<compile_context>
chip_gen: v7x
topology: tpu7x:2x2x1
jax: 0.10.0
libtpu: 0.0.40
codegen_flags: <defaults>
</compile_context>

<pallas_src>
import functools

import jax
import jax.numpy as jnp
from jax import lax
from jax.experimental import pallas as pl
from jax.experimental.pallas import tpu as pltpu


def _elu(z):
    # ELU(alpha=1): z if z > 0 else exp(z) - 1   (clamp arg to avoid overflow)
    return jnp.where(z > 0, z, jnp.exp(jnp.minimum(z, 0.0)) - 1.0)


def aspp_kernel(x_ref, w1_ref, w2_ref, w3_ref, w4_ref, wg_ref, wp_ref, b_ref,
                o_ref, xpad_ref, *, dilations, pad, height, width):
    """One batch element per grid step.

    x_ref  : (1, H, W, Cin)        unpadded NHWC input tile
    w1_ref : (Cin, Cpad)           1x1 conv weight (branch 1, BN scale folded)
    w2..w4 : (9*Cin, Cpad)         dilated 3x3 conv weights, taps flattened
    wg_ref : (Cin, Cpad)           1x1 conv weight of global-pool branch
    wp_ref : (5*Cpad, Cpad)        final projection, per-branch row blocks
    b_ref  : (6, Cpad)             BN biases (branches 1-5 + final)
    o_ref  : (1, H*W, Cpad)        lane-dense output (Cpad multiple of 128)
    xpad_ref: (H+2P, W+2P, Cin)    VMEM scratch holding the zero-padded image
    """
    H, W, P = height, width, pad
    Cin = x_ref.shape[-1]
    Cpad = o_ref.shape[-1]

    # Build the zero halo in VMEM. Re-zeroed every step so the kernel stays
    # correct even if the (parallel) batch axis is sharded across TensorCores.
    xpad_ref[...] = jnp.zeros_like(xpad_ref)
    xpad_ref[P:P + H, P:P + W, :] = x_ref[0]

    # Memoize tap windows so each (oy, ox) window is materialized at most once
    # (the center tap is shared by the 1x1 branch and all dilated branches).
    tap_cache = {}

    def tap(oy, ox):
        if (oy, ox) not in tap_cache:
            tap_cache[(oy, ox)] = (
                xpad_ref[oy:oy + H, ox:ox + W, :].reshape(H * W, Cin))
        return tap_cache[(oy, ox)]

    xf = tap(P, P)                                        # (H*W, Cin)

    # ---- branch 1: 1x1 conv (BN scale pre-folded) + bias + ELU ----
    y1 = _elu(jnp.dot(xf, w1_ref[...], preferred_element_type=jnp.float32)
              + b_ref[0, :])
    # projection contribution of branch 1 (split-wp accumulation, no concat)
    acc = jnp.dot(y1, wp_ref[0:Cpad, :], preferred_element_type=jnp.float32)

    # ---- branches 2-4: dilated 3x3 conv as ONE deep-K matmul per branch ----
    def dilated(w_ref, d, idx):
        slab = jnp.concatenate(
            [tap(P + (ky - 1) * d, P + (kx - 1) * d)
             for ky in range(3) for kx in range(3)], axis=-1)  # (H*W, 9*Cin)
        y = jnp.dot(slab, w_ref[...], preferred_element_type=jnp.float32)
        return _elu(y + b_ref[idx, :])

    for idx, (w_ref, d) in enumerate(
            [(w2_ref, dilations[1]), (w3_ref, dilations[2]),
             (w4_ref, dilations[3])], start=1):
        yb = dilated(w_ref, d, idx)
        acc = acc + jnp.dot(yb, wp_ref[idx * Cpad:(idx + 1) * Cpad, :],
                            preferred_element_type=jnp.float32)

    # ---- branch 5: global avg pool -> 1x1 conv -> bias -> ELU ----
    # (bilinear upsample from 1x1 with align_corners=True == broadcast, so it
    #  contributes a single (1, Cpad) row through the projection)
    xm = jnp.mean(xf, axis=0, keepdims=True)                      # (1, Cin)
    g = _elu(jnp.dot(xm, wg_ref[...], preferred_element_type=jnp.float32)
             + b_ref[4, :])
    pool_row = jnp.dot(g, wp_ref[4 * Cpad:5 * Cpad, :],
                       preferred_element_type=jnp.float32)        # (1, Cpad)

    # ---- final bias + ELU -> (dropout = identity in eval mode) ----
    out = _elu(acc + pool_row + b_ref[5, :])                      # (H*W, Cpad)
    o_ref[0] = out.astype(o_ref.dtype)


def aspp_forward(x_nchw, params, dilations):
    """x_nchw: (N, Cin, H, W) float32 -> (N, planes, H, W) float32."""
    N, Cin, H, W = x_nchw.shape
    Cp = params["w1"].shape[-1]
    Cpad = ((Cp + 127) // 128) * 128        # lane-dense out-channel width
    P = max(dilations[1:])                  # one shared halo for all dilations
    Hp, Wp = H + 2 * P, W + 2 * P

    sb = params["sb"]
    scale, bias = sb[:, 0, :], sb[:, 1, :]  # (6, Cp) each

    def pad_c(w):   # zero-pad the out-channel (last) dim to Cpad
        pads = [(0, 0)] * (w.ndim - 1) + [(0, Cpad - Cp)]
        return jnp.pad(w, pads)

    # Fold eval-mode BN scale into conv weights; flatten 3x3 taps; pad channels.
    w1s = pad_c(params["w1"] * scale[0])                          # (Cin, Cpad)
    w2s = pad_c((params["w2"] * scale[1]).reshape(9 * Cin, Cp))   # (9Cin, Cpad)
    w3s = pad_c((params["w3"] * scale[2]).reshape(9 * Cin, Cp))
    w4s = pad_c((params["w4"] * scale[3]).reshape(9 * Cin, Cp))
    wgs = pad_c(params["wg"] * scale[4])                          # (Cin, Cpad)

    # Final projection, laid out as five per-branch (Cpad, Cpad) row blocks.
    wp_scaled = params["wp"] * scale[5]                           # (5*Cp, Cp)
    wps = jnp.zeros((5 * Cpad, Cpad), jnp.float32)
    for i in range(5):
        wps = wps.at[i * Cpad:i * Cpad + Cp, :Cp].set(
            wp_scaled[i * Cp:(i + 1) * Cp])

    biases = pad_c(bias)                                          # (6, Cpad)

    x_nhwc = jnp.transpose(x_nchw, (0, 2, 3, 1))                  # (N,H,W,Cin)

    kernel = functools.partial(aspp_kernel, dilations=tuple(dilations),
                               pad=P, height=H, width=W)

    out = pl.pallas_call(
        kernel,
        out_shape=jax.ShapeDtypeStruct((N, H * W, Cpad), jnp.float32),
        grid_spec=pltpu.PrefetchScalarGridSpec(
            num_scalar_prefetch=0,
            grid=(N,),
            in_specs=[
                pl.BlockSpec((1, H, W, Cin), lambda n: (n, 0, 0, 0)),
                pl.BlockSpec((Cin, Cpad), lambda n: (0, 0)),
                pl.BlockSpec((9 * Cin, Cpad), lambda n: (0, 0)),
                pl.BlockSpec((9 * Cin, Cpad), lambda n: (0, 0)),
                pl.BlockSpec((9 * Cin, Cpad), lambda n: (0, 0)),
                pl.BlockSpec((Cin, Cpad), lambda n: (0, 0)),
                pl.BlockSpec((5 * Cpad, Cpad), lambda n: (0, 0)),
                pl.BlockSpec((6, Cpad), lambda n: (0, 0)),
            ],
            out_specs=pl.BlockSpec((1, H * W, Cpad), lambda n: (n, 0, 0)),
            scratch_shapes=[pltpu.VMEM((Hp, Wp, Cin), jnp.float32)],
        ),
        compiler_params=pltpu.CompilerParams(
            dimension_semantics=("parallel",)),
    )(x_nhwc, w1s, w2s, w3s, w4s, wgs, wps, biases)

    out = out[:, :, :Cp].reshape(N, H, W, Cp)
    return jnp.transpose(out, (0, 3, 1, 2))   # back to NCHW


def init_params(key, inplanes, planes, eps=1e-5):
    """Deterministic synthetic weights + folded eval-mode BatchNorm params."""
    keys = jax.random.split(key, 7)
    w1 = 0.3 * jax.random.normal(keys[0], (inplanes, planes), jnp.float32)
    w2 = 0.3 * jax.random.normal(keys[1], (3, 3, inplanes, planes), jnp.float32)
    w3 = 0.3 * jax.random.normal(keys[2], (3, 3, inplanes, planes), jnp.float32)
    w4 = 0.3 * jax.random.normal(keys[3], (3, 3, inplanes, planes), jnp.float32)
    wg = 0.3 * jax.random.normal(keys[4], (inplanes, planes), jnp.float32)
    wp = 0.3 * jax.random.normal(keys[5], (5 * planes, planes), jnp.float32)

    sb = []
    for k in jax.random.split(keys[6], 6):
        k1, k2, k3, k4 = jax.random.split(k, 4)
        gamma = 1.0 + 0.1 * jax.random.normal(k1, (planes,), jnp.float32)
        beta = 0.1 * jax.random.normal(k2, (planes,), jnp.float32)
        mean = 0.1 * jax.random.normal(k3, (planes,), jnp.float32)
        var = 0.5 + jax.random.uniform(k4, (planes,), jnp.float32)
        scale = gamma / jnp.sqrt(var + eps)
        bias = beta - mean * scale
        sb.append(jnp.stack([scale, bias], axis=0))
    sb = jnp.stack(sb, axis=0)   # (6, 2, planes)
    return dict(w1=w1, w2=w2, w3=w3, w4=w4, wg=wg, wp=wp, sb=sb)


def aspp_reference(x_nchw, params, dilations):
    """Pure-JAX reference of the same forward pass (for validation)."""
    x = jnp.transpose(x_nchw, (0, 2, 3, 1))
    sb = params["sb"]
    dn = ("NHWC", "HWIO", "NHWC")

    def bn_elu(y, i):
        return _elu(y * sb[i, 0] + sb[i, 1])

    y1 = bn_elu(jnp.einsum("nhwc,cd->nhwd", x, params["w1"]), 0)

    def dil(w, d, i):
        y = lax.conv_general_dilated(x, w, window_strides=(1, 1),
                                     padding=[(d, d), (d, d)],
                                     rhs_dilation=(d, d),
                                     dimension_numbers=dn)
        return bn_elu(y, i)

    y2 = dil(params["w2"], dilations[1], 1)
    y3 = dil(params["w3"], dilations[2], 2)
    y4 = dil(params["w4"], dilations[3], 3)

    g = jnp.mean(x, axis=(1, 2), keepdims=True)
    g = bn_elu(jnp.einsum("nhwc,cd->nhwd", g, params["wg"]), 4)
    y5 = jnp.broadcast_to(g, y4.shape)

    cat = jnp.concatenate([y1, y2, y3, y4, y5], axis=-1)
    out = bn_elu(jnp.einsum("nhwc,cd->nhwd", cat, params["wp"]), 5)
    return jnp.transpose(out, (0, 3, 1, 2))


if __name__ == "__main__":
    key = jax.random.PRNGKey(0)
    kx, kp = jax.random.split(key)

    N, Cin, H, W = 2, 4, 16, 16
    planes = 8
    dilations = (1, 2, 3, 4)   # small dilations consistent with 16x16 spatial

    x = jax.random.normal(kx, (N, Cin, H, W), jnp.float32)
    params = init_params(kp, Cin, planes)

    out = jax.block_until_ready(aspp_forward(x, params, dilations))
    assert out.shape == (N, planes, H, W)

    ref = aspp_reference(x, params, dilations)
    max_err = float(jnp.max(jnp.abs(out - ref)))
    scale = float(jnp.max(jnp.abs(ref))) + 1e-6
    assert max_err / scale < 1e-2, f"mismatch vs reference: {max_err}"

    print("KERNEL_OK")
</pallas_src>

<mosaic_0001>
module attributes {stable_mosaic.version = 11 : i64} {
  func.func @aspp_kernel(%arg0: i32, %arg1: memref<1x16x16x4xf32, #tpu.memory_space<vmem>>, %arg2: memref<4x128xf32, #tpu.memory_space<vmem>>, %arg3: memref<36x128xf32, #tpu.memory_space<vmem>>, %arg4: memref<36x128xf32, #tpu.memory_space<vmem>>, %arg5: memref<36x128xf32, #tpu.memory_space<vmem>>, %arg6: memref<4x128xf32, #tpu.memory_space<vmem>>, %arg7: memref<640x128xf32, #tpu.memory_space<vmem>>, %arg8: memref<6x128xf32, #tpu.memory_space<vmem>>, %arg9: memref<1x256x128xf32, #tpu.memory_space<vmem>>, %arg10: memref<24x24x4xf32, #tpu.memory_space<vmem>>) attributes {dimension_semantics = [#tpu.dimension_semantics<parallel>], iteration_bounds = array<i64: 2>, scalar_prefetch = 0 : i64, scratch_operands = 1 : i64, tpu.core_type = #tpu.core_type<tc>, window_params = [{transform_indices = @transform_0, window_bounds = array<i64: 1, 16, 16, 4>}, {pipeline_mode = #tpu.pipeline_mode<synchronous>, transform_indices = @transform_1, window_bounds = array<i64: 4, 128>}, {pipeline_mode = #tpu.pipeline_mode<synchronous>, transform_indices = @transform_2, window_bounds = array<i64: 36, 128>}, {pipeline_mode = #tpu.pipeline_mode<synchronous>, transform_indices = @transform_3, window_bounds = array<i64: 36, 128>}, {pipeline_mode = #tpu.pipeline_mode<synchronous>, transform_indices = @transform_4, window_bounds = array<i64: 36, 128>}, {pipeline_mode = #tpu.pipeline_mode<synchronous>, transform_indices = @transform_5, window_bounds = array<i64: 4, 128>}, {pipeline_mode = #tpu.pipeline_mode<synchronous>, transform_indices = @transform_6, window_bounds = array<i64: 640, 128>}, {pipeline_mode = #tpu.pipeline_mode<synchronous>, transform_indices = @transform_7, window_bounds = array<i64: 6, 128>}, {transform_indices = @transform_8, window_bounds = array<i64: 1, 256, 128>}]} {
    %cst = arith.constant 0.000000e+00 : f32
    %0 = vector.broadcast %cst : f32 to vector<24x24x4xf32>
    %c0 = arith.constant 0 : index
    %c0_0 = arith.constant 0 : index
    %c0_1 = arith.constant 0 : index
    %1 = vector.load %arg10[%c0, %c0_0, %c0_1] : memref<24x24x4xf32, #tpu.memory_space<vmem>>, vector<24x24x4xf32>
    tpu.vector_store %arg10[%c0, %c0_0, %c0_1], %0 {strides = array<i32>} : memref<24x24x4xf32, #tpu.memory_space<vmem>>, vector<24x24x4xf32>,
    %c0_2 = arith.constant 0 : index
    %c0_3 = arith.constant 0 : index
    %c0_4 = arith.constant 0 : index
    %c0_5 = arith.constant 0 : index
    %2 = vector.load %arg1[%c0_2, %c0_3, %c0_4, %c0_5] : memref<1x16x16x4xf32, #tpu.memory_space<vmem>>, vector<1x16x16x4xf32>
    %3 = vector.shape_cast %2 : vector<1x16x16x4xf32> to vector<16x16x4xf32>
    %c4 = arith.constant 4 : index
    %c4_6 = arith.constant 4 : index
    %c0_7 = arith.constant 0 : index
    %4 = vector.load %arg10[%c4, %c4_6, %c0_7] : memref<24x24x4xf32, #tpu.memory_space<vmem>>, vector<16x16x4xf32>
    tpu.vector_store %arg10[%c4, %c4_6, %c0_7], %3 {strides = array<i32>} : memref<24x24x4xf32, #tpu.memory_space<vmem>>, vector<16x16x4xf32>,
    %c4_8 = arith.constant 4 : index
    %c4_9 = arith.constant 4 : index
    %c0_10 = arith.constant 0 : index
    %5 = vector.load %arg10[%c4_8, %c4_9, %c0_10] : memref<24x24x4xf32, #tpu.memory_space<vmem>>, vector<16x16x4xf32>
    %6 = vector.shape_cast %5 : vector<16x16x4xf32> to vector<256x4xf32>
    %c0_11 = arith.constant 0 : index
    %c0_12 = arith.constant 0 : index
    %7 = vector.load %arg2[%c0_11, %c0_12] : memref<4x128xf32, #tpu.memory_space<vmem>>, vector<4x128xf32>
    %cst_13 = arith.constant dense<0.000000e+00> : vector<256x128xf32>
    %8 = tpu.matmul %6, %7, %cst_13 {dimension_numbers = #tpu.dot_dimension_numbers<[1], [0], [0], [1], [0, 0, 1, 1], [], []>} : vector<256x4xf32>, vector<4x128xf32>, vector<256x128xf32> -> vector<256x128xf32>
    %c0_14 = arith.constant 0 : index
    %c0_15 = arith.constant 0 : index
    %9 = vector.load %arg8[%c0_14, %c0_15] : memref<6x128xf32, #tpu.memory_space<vmem>>, vector<1x128xf32>
    %10 = vector.shape_cast %9 : vector<1x128xf32> to vector<128xf32>
    %11 = vector.shape_cast %10 : vector<128xf32> to vector<1x128xf32>
    %12 = vector.broadcast %11 : vector<1x128xf32> to vector<256x128xf32>
    %13 = arith.addf %8, %12 : vector<256x128xf32>
    %cst_16 = arith.constant 0.000000e+00 : f32
    %14 = vector.broadcast %cst_16 : f32 to vector<256x128xf32>
    %15 = arith.cmpf ogt, %13, %14 : vector<256x128xf32>
    %cst_17 = arith.constant 0.000000e+00 : f32
    %16 = vector.broadcast %cst_17 : f32 to vector<256x128xf32>
    %17 = arith.minimumf %13, %16 : vector<256x128xf32>
    %18 = math.exp %17 : vector<256x128xf32>
    %cst_18 = arith.constant 1.000000e+00 : f32
    %19 = vector.broadcast %cst_18 : f32 to vector<256x128xf32>
    %20 = arith.subf %18, %19 : vector<256x128xf32>
    %21 = arith.select %15, %13, %20 : vector<256x128xi1>, vector<256x128xf32>
    %c0_19 = arith.constant 0 : index
    %c0_20 = arith.constant 0 : index
    %22 = vector.load %arg7[%c0_19, %c0_20] : memref<640x128xf32, #tpu.memory_space<vmem>>, vector<128x128xf32>
    %cst_21 = arith.constant dense<0.000000e+00> : vector<256x128xf32>
    %23 = tpu.matmul %21, %22, %cst_21 {dimension_numbers = #tpu.dot_dimension_numbers<[1], [0], [0], [1], [0, 0, 1, 1], [], []>} : vector<256x128xf32>, vector<128x128xf32>, vector<256x128xf32> -> vector<256x128xf32>
    %c2 = arith.constant 2 : index
    %c2_22 = arith.constant 2 : index
    %c0_23 = arith.constant 0 : index
    %24 = vector.load %arg10[%c2, %c2_22, %c0_23] : memref<24x24x4xf32, #tpu.memory_space<vmem>>, vector<16x16x4xf32>
    %25 = vector.shape_cast %24 : vector<16x16x4xf32> to vector<256x4xf32>
    %c2_24 = arith.constant 2 : index
    %c4_25 = arith.constant 4 : index
    %c0_26 = arith.constant 0 : index
    %26 = vector.load %arg10[%c2_24, %c4_25, %c0_26] : memref<24x24x4xf32, #tpu.memory_space<vmem>>, vector<16x16x4xf32>
    %27 = vector.shape_cast %26 : vector<16x16x4xf32> to vector<256x4xf32>
    %c2_27 = arith.constant 2 : index
    %c6 = arith.constant 6 : index
    %c0_28 = arith.constant 0 : index
    %28 = vector.load %arg10[%c2_27, %c6, %c0_28] : memref<24x24x4xf32, #tpu.memory_space<vmem>>, vector<16x16x4xf32>
    %29 = vector.shape_cast %28 : vector<16x16x4xf32> to vector<256x4xf32>
    %c4_29 = arith.constant 4 : index
    %c2_30 = arith.constant 2 : index
    %c0_31 = arith.constant 0 : index
    %30 = vector.load %arg10[%c4_29, %c2_30, %c0_31] : memref<24x24x4xf32, #tpu.memory_space<vmem>>, vector<16x16x4xf32>
    %31 = vector.shape_cast %30 : vector<16x16x4xf32> to vector<256x4xf32>
    %c4_32 = arith.constant 4 : index
    %c6_33 = arith.constant 6 : index
    %c0_34 = arith.constant 0 : index
    %32 = vector.load %arg10[%c4_32, %c6_33, %c0_34] : memref<24x24x4xf32, #tpu.memory_space<vmem>>, vector<16x16x4xf32>
    %33 = vector.shape_cast %32 : vector<16x16x4xf32> to vector<256x4xf32>
    %c6_35 = arith.constant 6 : index
    %c2_36 = arith.constant 2 : index
    %c0_37 = arith.constant 0 : index
    %34 = vector.load %arg10[%c6_35, %c2_36, %c0_37] : memref<24x24x4xf32, #tpu.memory_space<vmem>>, vector<16x16x4xf32>
    %35 = vector.shape_cast %34 : vector<16x16x4xf32> to vector<256x4xf32>
    %c6_38 = arith.constant 6 : index
    %c4_39 = arith.constant 4 : index
    %c0_40 = arith.constant 0 : index
    %36 = vector.load %arg10[%c6_38, %c4_39, %c0_40] : memref<24x24x4xf32, #tpu.memory_space<vmem>>, vector<16x16x4xf32>
    %37 = vector.shape_cast %36 : vector<16x16x4xf32> to vector<256x4xf32>
    %c6_41 = arith.constant 6 : index
    %c6_42 = arith.constant 6 : index
    %c0_43 = arith.constant 0 : index
    %38 = vector.load %arg10[%c6_41, %c6_42, %c0_43] : memref<24x24x4xf32, #tpu.memory_space<vmem>>, vector<16x16x4xf32>
    %39 = vector.shape_cast %38 : vector<16x16x4xf32> to vector<256x4xf32>
    %40 = tpu.concatenate %25, %27, %29, %31, %6, %33, %35, %37, %39 in 1 : vector<256x4xf32>, vector<256x4xf32>, vector<256x4xf32>, vector<256x4xf32>, vector<256x4xf32>, vector<256x4xf32>, vector<256x4xf32>, vector<256x4xf32>, vector<256x4xf32> -> vector<256x36xf32>
    %c0_44 = arith.constant 0 : index
    %c0_45 = arith.constant 0 : index
    %41 = vector.load %arg3[%c0_44, %c0_45] : memref<36x128xf32, #tpu.memory_space<vmem>>, vector<36x128xf32>
    %cst_46 = arith.constant dense<0.000000e+00> : vector<256x128xf32>
    %42 = tpu.matmul %40, %41, %cst_46 {dimension_numbers = #tpu.dot_dimension_numbers<[1], [0], [0], [1], [0, 0, 1, 1], [], []>} : vector<256x36xf32>, vector<36x128xf32>, vector<256x128xf32> -> vector<256x128xf32>
    %c1 = arith.constant 1 : index
    %c0_47 = arith.constant 0 : index
    %43 = vector.load %arg8[%c1, %c0_47] : memref<6x128xf32, #tpu.memory_space<vmem>>, vector<1x128xf32>
    %44 = vector.shape_cast %43 : vector<1x128xf32> to vector<128xf32>
    %45 = vector.shape_cast %44 : vector<128xf32> to vector<1x128xf32>
    %46 = vector.broadcast %45 : vector<1x128xf32> to vector<256x128xf32>
    %47 = arith.addf %42, %46 : vector<256x128xf32>
    %cst_48 = arith.constant 0.000000e+00 : f32
    %48 = vector.broadcast %cst_48 : f32 to vector<256x128xf32>
    %49 = arith.cmpf ogt, %47, %48 : vector<256x128xf32>
    %cst_49 = arith.constant 0.000000e+00 : f32
    %50 = vector.broadcast %cst_49 : f32 to vector<256x128xf32>
    %51 = arith.minimumf %47, %50 : vector<256x128xf32>
    %52 = math.exp %51 : vector<256x128xf32>
    %cst_50 = arith.constant 1.000000e+00 : f32
    %53 = vector.broadcast %cst_50 : f32 to vector<256x128xf32>
    %54 = arith.subf %52, %53 : vector<256x128xf32>
    %55 = arith.select %49, %47, %54 : vector<256x128xi1>, vector<256x128xf32>
    %c128 = arith.constant 128 : index
    %c0_51 = arith.constant 0 : index
    %56 = vector.load %arg7[%c128, %c0_51] : memref<640x128xf32, #tpu.memory_space<vmem>>, vector<128x128xf32>
    %cst_52 = arith.constant dense<0.000000e+00> : vector<256x128xf32>
    %57 = tpu.matmul %55, %56, %cst_52 {dimension_numbers = #tpu.dot_dimension_numbers<[1], [0], [0], [1], [0, 0, 1, 1], [], []>} : vector<256x128xf32>, vector<128x128xf32>, vector<256x128xf32> -> vector<256x128xf32>
    %58 = arith.addf %23, %57 : vector<256x128xf32>
    %c1_53 = arith.constant 1 : index
    %c1_54 = arith.constant 1 : index
    %c0_55 = arith.constant 0 : index
    %59 = vector.load %arg10[%c1_53, %c1_54, %c0_55] : memref<24x24x4xf32, #tpu.memory_space<vmem>>, vector<16x16x4xf32>
    %60 = vector.shape_cast %59 : vector<16x16x4xf32> to vector<256x4xf32>
    %c1_56 = arith.constant 1 : index
    %c4_57 = arith.constant 4 : index
    %c0_58 = arith.constant 0 : index
    %61 = vector.load %arg10[%c1_56, %c4_57, %c0_58] : memref<24x24x4xf32, #tpu.memory_space<vmem>>, vector<16x16x4xf32>
    %62 = vector.shape_cast %61 : vector<16x16x4xf32> to vector<256x4xf32>
    %c1_59 = arith.constant 1 : index
    %c7 = arith.constant 7 : index
    %c0_60 = arith.constant 0 : index
    %63 = vector.load %arg10[%c1_59, %c7, %c0_60] : memref<24x24x4xf32, #tpu.memory_space<vmem>>, vector<16x16x4xf32>
    %64 = vector.shape_cast %63 : vector<16x16x4xf32> to vector<256x4xf32>
    %c4_61 = arith.constant 4 : index
    %c1_62 = arith.constant 1 : index
    %c0_63 = arith.constant 0 : index
    %65 = vector.load %arg10[%c4_61, %c1_62, %c0_63] : memref<24x24x4xf32, #tpu.memory_space<vmem>>, vector<16x16x4xf32>
    %66 = vector.shape_cast %65 : vector<16x16x4xf32> to vector<256x4xf32>
    %c4_64 = arith.constant 4 : index
    %c7_65 = arith.constant 7 : index
    %c0_66 = arith.constant 0 : index
    %67 = vector.load %arg10[%c4_64, %c7_65, %c0_66] : memref<24x24x4xf32, #tpu.memory_space<vmem>>, vector<16x16x4xf32>
    %68 = vector.shape_cast %67 : vector<16x16x4xf32> to vector<256x4xf32>
    %c7_67 = arith.constant 7 : index
    %c1_68 = arith.constant 1 : index
    %c0_69 = arith.constant 0 : index
    %69 = vector.load %arg10[%c7_67, %c1_68, %c0_69] : memref<24x24x4xf32, #tpu.memory_space<vmem>>, vector<16x16x4xf32>
    %70 = vector.shape_cast %69 : vector<16x16x4xf32> to vector<256x4xf32>
    %c7_70 = arith.constant 7 : index
    %c4_71 = arith.constant 4 : index
    %c0_72 = arith.constant 0 : index
    %71 = vector.load %arg10[%c7_70, %c4_71, %c0_72] : memref<24x24x4xf32, #tpu.memory_space<vmem>>, vector<16x16x4xf32>
    %72 = vector.shape_cast %71 : vector<16x16x4xf32> to vector<256x4xf32>
    %c7_73 = arith.constant 7 : index
    %c7_74 = arith.constant 7 : index
    %c0_75 = arith.constant 0 : index
    %73 = vector.load %arg10[%c7_73, %c7_74, %c0_75] : memref<24x24x4xf32, #tpu.memory_space<vmem>>, vector<16x16x4xf32>
    %74 = vector.shape_cast %73 : vector<16x16x4xf32> to vector<256x4xf32>
    %75 = tpu.concatenate %60, %62, %64, %66, %6, %68, %70, %72, %74 in 1 : vector<256x4xf32>, vector<256x4xf32>, vector<256x4xf32>, vector<256x4xf32>, vector<256x4xf32>, vector<256x4xf32>, vector<256x4xf32>, vector<256x4xf32>, vector<256x4xf32> -> vector<256x36xf32>
    %c0_76 = arith.constant 0 : index
    %c0_77 = arith.constant 0 : index
    %76 = vector.load %arg4[%c0_76, %c0_77] : memref<36x128xf32, #tpu.memory_space<vmem>>, vector<36x128xf32>
    %cst_78 = arith.constant dense<0.000000e+00> : vector<256x128xf32>
    %77 = tpu.matmul %75, %76, %cst_78 {dimension_numbers = #tpu.dot_dimension_numbers<[1], [0], [0], [1], [0, 0, 1, 1], [], []>} : vector<256x36xf32>, vector<36x128xf32>, vector<256x128xf32> -> vector<256x128xf32>
    %c2_79 = arith.constant 2 : index
    %c0_80 = arith.constant 0 : index
    %78 = vector.load %arg8[%c2_79, %c0_80] : memref<6x128xf32, #tpu.memory_space<vmem>>, vector<1x128xf32>
    %79 = vector.shape_cast %78 : vector<1x128xf32> to vector<128xf32>
    %80 = vector.shape_cast %79 : vector<128xf32> to vector<1x128xf32>
    %81 = vector.broadcast %80 : vector<1x128xf32> to vector<256x128xf32>
    %82 = arith.addf %77, %81 : vector<256x128xf32>
    %cst_81 = arith.constant 0.000000e+00 : f32
    %83 = vector.broadcast %cst_81 : f32 to vector<256x128xf32>
    %84 = arith.cmpf ogt, %82, %83 : vector<256x128xf32>
    %cst_82 = arith.constant 0.000000e+00 : f32
    %85 = vector.broadcast %cst_82 : f32 to vector<256x128xf32>
    %86 = arith.minimumf %82, %85 : vector<256x128xf32>
    %87 = math.exp %86 : vector<256x128xf32>
    %cst_83 = arith.constant 1.000000e+00 : f32
    %88 = vector.broadcast %cst_83 : f32 to vector<256x128xf32>
    %89 = arith.subf %87, %88 : vector<256x128xf32>
    %90 = arith.select %84, %82, %89 : vector<256x128xi1>, vector<256x128xf32>
    %c256 = arith.constant 256 : index
    %c0_84 = arith.constant 0 : index
    %91 = vector.load %arg7[%c256, %c0_84] : memref<640x128xf32, #tpu.memory_space<vmem>>, vector<128x128xf32>
    %cst_85 = arith.constant dense<0.000000e+00> : vector<256x128xf32>
    %92 = tpu.matmul %90, %91, %cst_85 {dimension_numbers = #tpu.dot_dimension_numbers<[1], [0], [0], [1], [0, 0, 1, 1], [], []>} : vector<256x128xf32>, vector<128x128xf32>, vector<256x128xf32> -> vector<256x128xf32>
    %93 = arith.addf %58, %92 : vector<256x128xf32>
    %c0_86 = arith.constant 0 : index
    %c0_87 = arith.constant 0 : index
    %c0_88 = arith.constant 0 : index
    %94 = vector.load %arg10[%c0_86, %c0_87, %c0_88] : memref<24x24x4xf32, #tpu.memory_space<vmem>>, vector<16x16x4xf32>
    %95 = vector.shape_cast %94 : vector<16x16x4xf32> to vector<256x4xf32>
    %c0_89 = arith.constant 0 : index
    %c4_90 = arith.constant 4 : index
    %c0_91 = arith.constant 0 : index
    %96 = vector.load %arg10[%c0_89, %c4_90, %c0_91] : memref<24x24x4xf32, #tpu.memory_space<vmem>>, vector<16x16x4xf32>
    %97 = vector.shape_cast %96 : vector<16x16x4xf32> to vector<256x4xf32>
    %c0_92 = arith.constant 0 : index
    %c8 = arith.constant 8 : index
    %c0_93 = arith.constant 0 : index
    %98 = vector.load %arg10[%c0_92, %c8, %c0_93] : memref<24x24x4xf32, #tpu.memory_space<vmem>>, vector<16x16x4xf32>
    %99 = vector.shape_cast %98 : vector<16x16x4xf32> to vector<256x4xf32>
    %c4_94 = arith.constant 4 : index
    %c0_95 = arith.constant 0 : index
    %c0_96 = arith.constant 0 : index
    %100 = vector.load %arg10[%c4_94, %c0_95, %c0_96] : memref<24x24x4xf32, #tpu.memory_space<vmem>>, vector<16x16x4xf32>
    %101 = vector.shape_cast %100 : vector<16x16x4xf32> to vector<256x4xf32>
    %c4_97 = arith.constant 4 : index
    %c8_98 = arith.constant 8 : index
    %c0_99 = arith.constant 0 : index
    %102 = vector.load %arg10[%c4_97, %c8_98, %c0_99] : memref<24x24x4xf32, #tpu.memory_space<vmem>>, vector<16x16x4xf32>
    %103 = vector.shape_cast %102 : vector<16x16x4xf32> to vector<256x4xf32>
    %c8_100 = arith.constant 8 : index
    %c0_101 = arith.constant 0 : index
    %c0_102 = arith.constant 0 : index
    %104 = vector.load %arg10[%c8_100, %c0_101, %c0_102] : memref<24x24x4xf32, #tpu.memory_space<vmem>>, vector<16x16x4xf32>
    %105 = vector.shape_cast %104 : vector<16x16x4xf32> to vector<256x4xf32>
    %c8_103 = arith.constant 8 : index
    %c4_104 = arith.constant 4 : index
    %c0_105 = arith.constant 0 : index
    %106 = vector.load %arg10[%c8_103, %c4_104, %c0_105] : memref<24x24x4xf32, #tpu.memory_space<vmem>>, vector<16x16x4xf32>
    %107 = vector.shape_cast %106 : vector<16x16x4xf32> to vector<256x4xf32>
    %c8_106 = arith.constant 8 : index
    %c8_107 = arith.constant 8 : index
    %c0_108 = arith.constant 0 : index
    %108 = vector.load %arg10[%c8_106, %c8_107, %c0_108] : memref<24x24x4xf32, #tpu.memory_space<vmem>>, vector<16x16x4xf32>
    %109 = vector.shape_cast %108 : vector<16x16x4xf32> to vector<256x4xf32>
    %110 = tpu.concatenate %95, %97, %99, %101, %6, %103, %105, %107, %109 in 1 : vector<256x4xf32>, vector<256x4xf32>, vector<256x4xf32>, vector<256x4xf32>, vector<256x4xf32>, vector<256x4xf32>, vector<256x4xf32>, vector<256x4xf32>, vector<256x4xf32> -> vector<256x36xf32>
    %c0_109 = arith.constant 0 : index
    %c0_110 = arith.constant 0 : index
    %111 = vector.load %arg5[%c0_109, %c0_110] : memref<36x128xf32, #tpu.memory_space<vmem>>, vector<36x128xf32>
    %cst_111 = arith.constant dense<0.000000e+00> : vector<256x128xf32>
    %112 = tpu.matmul %110, %111, %cst_111 {dimension_numbers = #tpu.dot_dimension_numbers<[1], [0], [0], [1], [0, 0, 1, 1], [], []>} : vector<256x36xf32>, vector<36x128xf32>, vector<256x128xf32> -> vector<256x128xf32>
    %c3 = arith.constant 3 : index
    %c0_112 = arith.constant 0 : index
    %113 = vector.load %arg8[%c3, %c0_112] : memref<6x128xf32, #tpu.memory_space<vmem>>, vector<1x128xf32>
    %114 = vector.shape_cast %113 : vector<1x128xf32> to vector<128xf32>
    %115 = vector.shape_cast %114 : vector<128xf32> to vector<1x128xf32>
    %116 = vector.broadcast %115 : vector<1x128xf32> to vector<256x128xf32>
    %117 = arith.addf %112, %116 : vector<256x128xf32>
    %cst_113 = arith.constant 0.000000e+00 : f32
    %118 = vector.broadcast %cst_113 : f32 to vector<256x128xf32>
    %119 = arith.cmpf ogt, %117, %118 : vector<256x128xf32>
    %cst_114 = arith.constant 0.000000e+00 : f32
    %120 = vector.broadcast %cst_114 : f32 to vector<256x128xf32>
    %121 = arith.minimumf %117, %120 : vector<256x128xf32>
    %122 = math.exp %121 : vector<256x128xf32>
    %cst_115 = arith.constant 1.000000e+00 : f32
    %123 = vector.broadcast %cst_115 : f32 to vector<256x128xf32>
    %124 = arith.subf %122, %123 : vector<256x128xf32>
    %125 = arith.select %119, %117, %124 : vector<256x128xi1>, vector<256x128xf32>
    %c384 = arith.constant 384 : index
    %c0_116 = arith.constant 0 : index
    %126 = vector.load %arg7[%c384, %c0_116] : memref<640x128xf32, #tpu.memory_space<vmem>>, vector<128x128xf32>
    %cst_117 = arith.constant dense<0.000000e+00> : vector<256x128xf32>
    %127 = tpu.matmul %125, %126, %cst_117 {dimension_numbers = #tpu.dot_dimension_numbers<[1], [0], [0], [1], [0, 0, 1, 1], [], []>} : vector<256x128xf32>, vector<128x128xf32>, vector<256x128xf32> -> vector<256x128xf32>
    %128 = arith.addf %93, %127 : vector<256x128xf32>
    %cst_118 = arith.constant dense<0.000000e+00> : vector<4xf32>
    %129 = vector.multi_reduction <add>, %6, %cst_118 [0] : vector<256x4xf32> to vector<4xf32>
    %130 = vector.shape_cast %129 : vector<4xf32> to vector<1x4xf32>
    %cst_119 = arith.constant 2.560000e+02 : f32
    %131 = vector.broadcast %cst_119 : f32 to vector<1x4xf32>
    %132 = arith.divf %130, %131 : vector<1x4xf32>
    %c0_120 = arith.constant 0 : index
    %c0_121 = arith.constant 0 : index
    %133 = vector.load %arg6[%c0_120, %c0_121] : memref<4x128xf32, #tpu.memory_space<vmem>>, vector<4x128xf32>
    %cst_122 = arith.constant dense<0.000000e+00> : vector<1x128xf32>
    %134 = tpu.matmul %132, %133, %cst_122 {dimension_numbers = #tpu.dot_dimension_numbers<[1], [0], [0], [1], [0, 0, 1, 1], [], []>} : vector<1x4xf32>, vector<4x128xf32>, vector<1x128xf32> -> vector<1x128xf32>
    %c4_123 = arith.constant 4 : index
    %c0_124 = arith.constant 0 : index
    %135 = vector.load %arg8[%c4_123, %c0_124] : memref<6x128xf32, #tpu.memory_space<vmem>>, vector<1x128xf32>
    %136 = vector.shape_cast %135 : vector<1x128xf32> to vector<128xf32>
    %137 = vector.shape_cast %136 : vector<128xf32> to vector<1x128xf32>
    %138 = arith.addf %134, %137 : vector<1x128xf32>
    %cst_125 = arith.constant 0.000000e+00 : f32
    %139 = vector.broadcast %cst_125 : f32 to vector<1x128xf32>
    %140 = arith.cmpf ogt, %138, %139 : vector<1x128xf32>
    %cst_126 = arith.constant 0.000000e+00 : f32
    %141 = vector.broadcast %cst_126 : f32 to vector<1x128xf32>
    %142 = arith.minimumf %138, %141 : vector<1x128xf32>
    %143 = math.exp %142 : vector<1x128xf32>
    %cst_127 = arith.constant 1.000000e+00 : f32
    %144 = vector.broadcast %cst_127 : f32 to vector<1x128xf32>
    %145 = arith.subf %143, %144 : vector<1x128xf32>
    %146 = arith.select %140, %138, %145 : vector<1x128xi1>, vector<1x128xf32>
    %c512 = arith.constant 512 : index
    %c0_128 = arith.constant 0 : index
    %147 = vector.load %arg7[%c512, %c0_128] : memref<640x128xf32, #tpu.memory_space<vmem>>, vector<128x128xf32>
    %cst_129 = arith.constant dense<0.000000e+00> : vector<1x128xf32>
    %148 = tpu.matmul %146, %147, %cst_129 {dimension_numbers = #tpu.dot_dimension_numbers<[1], [0], [0], [1], [0, 0, 1, 1], [], []>} : vector<1x128xf32>, vector<128x128xf32>, vector<1x128xf32> -> vector<1x128xf32>
    %149 = vector.broadcast %148 : vector<1x128xf32> to vector<256x128xf32>
    %150 = arith.addf %128, %149 : vector<256x128xf32>
    %c5 = arith.constant 5 : index
    %c0_130 = arith.constant 0 : index
    %151 = vector.load %arg8[%c5, %c0_130] : memref<6x128xf32, #tpu.memory_space<vmem>>, vector<1x128xf32>
    %152 = vector.shape_cast %151 : vector<1x128xf32> to vector<128xf32>
    %153 = vector.shape_cast %152 : vector<128xf32> to vector<1x128xf32>
    %154 = vector.broadcast %153 : vector<1x128xf32> to vector<256x128xf32>
    %155 = arith.addf %150, %154 : vector<256x128xf32>
    %cst_131 = arith.constant 0.000000e+00 : f32
    %156 = vector.broadcast %cst_131 : f32 to vector<256x128xf32>
    %157 = arith.cmpf ogt, %155, %156 : vector<256x128xf32>
    %cst_132 = arith.constant 0.000000e+00 : f32
    %158 = vector.broadcast %cst_132 : f32 to vector<256x128xf32>
    %159 = arith.minimumf %155, %158 : vector<256x128xf32>
    %160 = math.exp %159 : vector<256x128xf32>
    %cst_133 = arith.constant 1.000000e+00 : f32
    %161 = vector.broadcast %cst_133 : f32 to vector<256x128xf32>
    %162 = arith.subf %160, %161 : vector<256x128xf32>
    %163 = arith.select %157, %155, %162 : vector<256x128xi1>, vector<256x128xf32>
    %c0_134 = arith.constant 0 : index
    %c0_135 = arith.constant 0 : index
    %c0_136 = arith.constant 0 : index
    %164 = vector.load %arg9[%c0_134, %c0_135, %c0_136] : memref<1x256x128xf32, #tpu.memory_space<vmem>>, vector<1x256x128xf32>
    %165 = vector.shape_cast %164 : vector<1x256x128xf32> to vector<256x128xf32>
    %166 = vector.shape_cast %163 : vector<256x128xf32> to vector<1x256x128xf32>
    tpu.vector_store %arg9[%c0_134, %c0_135, %c0_136], %166 {strides = array<i32>} : memref<1x256x128xf32, #tpu.memory_space<vmem>>, vector<1x256x128xf32>,
    return
  }
  func.func @transform_0(%arg0: i32) -> (i32, i32, i32, i32) {
    %c0_i32 = arith.constant 0 : i32
    %c0_i32_0 = arith.constant 0 : i32
    %c0_i32_1 = arith.constant 0 : i32
    %c0_i32_2 = arith.constant 0 : i32
    return %arg0, %c0_i32, %c0_i32_0, %c0_i32_1 : i32, i32, i32, i32
  }
  func.func @transform_1(%arg0: i32) -> (i32, i32) {
    %c0_i32 = arith.constant 0 : i32
    %c0_i32_0 = arith.constant 0 : i32
    %c0_i32_1 = arith.constant 0 : i32
    return %c0_i32, %c0_i32_0 : i32, i32
  }
  func.func @transform_2(%arg0: i32) -> (i32, i32) {
    %c0_i32 = arith.constant 0 : i32
    %c0_i32_0 = arith.constant 0 : i32
    %c0_i32_1 = arith.constant 0 : i32
    return %c0_i32, %c0_i32_0 : i32, i32
  }
  func.func @transform_3(%arg0: i32) -> (i32, i32) {
    %c0_i32 = arith.constant 0 : i32
    %c0_i32_0 = arith.constant 0 : i32
    %c0_i32_1 = arith.constant 0 : i32
    return %c0_i32, %c0_i32_0 : i32, i32
  }
  func.func @transform_4(%arg0: i32) -> (i32, i32) {
    %c0_i32 = arith.constant 0 : i32
    %c0_i32_0 = arith.constant 0 : i32
    %c0_i32_1 = arith.constant 0 : i32
    return %c0_i32, %c0_i32_0 : i32, i32
  }
  func.func @transform_5(%arg0: i32) -> (i32, i32) {
    %c0_i32 = arith.constant 0 : i32
    %c0_i32_0 = arith.constant 0 : i32
    %c0_i32_1 = arith.constant 0 : i32
    return %c0_i32, %c0_i32_0 : i32, i32
  }
  func.func @transform_6(%arg0: i32) -> (i32, i32) {
    %c0_i32 = arith.constant 0 : i32
    %c0_i32_0 = arith.constant 0 : i32
    %c0_i32_1 = arith.constant 0 : i32
    return %c0_i32, %c0_i32_0 : i32, i32
  }
  func.func @transform_7(%arg0: i32) -> (i32, i32) {
    %c0_i32 = arith.constant 0 : i32
    %c0_i32_0 = arith.constant 0 : i32
    %c0_i32_1 = arith.constant 0 : i32
    return %c0_i32, %c0_i32_0 : i32, i32
  }
  func.func @transform_8(%arg0: i32) -> (i32, i32, i32) {
    %c0_i32 = arith.constant 0 : i32
    %c0_i32_0 = arith.constant 0 : i32
    %c0_i32_1 = arith.constant 0 : i32
    return %arg0, %c0_i32, %c0_i32_0 : i32, i32, i32
  }
}

</mosaic_0001>

<bundles_post_ra>
// kernel: tpu_custom_call.1
= control target key start
LH: loop header
LB: loop body
LE: loop exit
PB: predicated region body
PF: predicated region fallthrough
CT: control target
= control target key end

     0   :  { %13 = vsyncpa [#allocation4], 0  ;;  %s16746_s0 = inlined_call_operand.vmem [shape: f32[2,16,16,4], index: 0, kind: input, shape index: {}]   ;;  %s16747_s1 = inlined_call_operand.vmem [shape: f32[4,128], index: 1, kind: input, shape index: {}]   ;;  %s16748_s2 = inlined_call_operand.hbm [shape: f32[36,128], index: 2, kind: input, shape index: {}]   ;;  %s16749_s3 = inlined_call_operand.hbm [shape: f32[36,128], index: 3, kind: input, shape index: {}]   ;;  %s16750_s4 = inlined_call_operand.hbm [shape: f32[36,128], index: 4, kind: input, shape index: {}]   ;;  %s16751_s5 = inlined_call_operand.vmem [shape: f32[4,128], index: 5, kind: input, shape index: {}]   ;;  %s16752_s6 = inlined_call_operand.vmem [shape: f32[640,128], index: 6, kind: input, shape index: {}]   ;;  %s16753_s7 = inlined_call_operand.vmem [shape: f32[6,128], index: 7, kind: input, shape index: {}]   ;;  %s16754_s8 = inlined_call_operand.hbm [shape: f32[2,256,128], index: 8, kind: output, shape index: {}]  }
   0x1   :  { %14 = vsyncpa [#allocation7], 0 }
   0x2   :  { %15 = vsyncpa [#allocation5], 0 }
   0x3   :  { %17 = vsyncpa [#allocation5 + $0x1], 0  ;;  %s10840_s27 = smov 0   ;;  %s10842_s28 = smov 0  }
   0x4   :  { %s10844_s29 = smov 0   ;;  %s10846_s30 = smov 0  }
   0x5 LB: > { %16843 = sst [smem:[#allocation13_spill]] %s10771_s29  ;;  %s10861_s9 = sadd.s32 4294967295, %s10775_s30   ;;  %s10775_s30 = sphi %s10846_s30, %s17444_s30   ;;  %s10771_s29 = sphi %s10844_s29, %s17446_s29   ;;  %s10767_s28 = sphi %s10842_s28, %s17448_s28   ;;  %s10763_s27 = sphi %s10840_s27, %s17447_s27  }
   0x6   : > { %s8545_s10 = sadd.s32 4294967294, %s10775_s30   ;;  %s10865_s11 = sadd.s32 1, %s10775_s30  }
   0x7   : > { %16844 = sst [smem:[#allocation14_spill]] %s10865_s11  ;;  %s203_s12 = sadd.s32 1, %s10771_s29 }
   0x8   : > { %s200_s13 = ssub.s32 %s10775_s30, %s10865_s11  ;;  %p213_p0 = scmp.ne.s32.totalorder %s10771_s29, %s10767_s28 }
   0x9   : > { %p201_p1 = scmp.eq.s32.totalorder %s200_s13, 0  ;;  %p214_p2 = scmp.eq.s32.totalorder %s10861_s9, 1 }
   0xa   : > { %p219_p3 = scmp.ne.s32.totalorder %s10767_s28, %s10763_s27  ;;  %p220_p4 = scmp.eq.s32.totalorder %s8545_s10, 1 }
   0xb   : > { %s10876_s14 = scalar_select %p201_p1, %s10771_s29, %s203_s12  }
   0xc   : > { %p10878_p5 = por %p214_p2, %p213_p0  ;;  %p10882_p6 = por %p220_p4, %p219_p3 }
   0xd   : > { %16845 = sst [smem:[#allocation15_spill]] %s10876_s14  ;;  %p8546_p7 = scmp.ge.s32.totalorder %s10775_s30, 1 }
   0xe   : > { %s16846_s15 = scalar_select %p10878_p5, 1, 0 }
   0xf   : > { %s16847_s16 = scalar_select %p10882_p6, 1, 0 }
  0x10   : > { %p227_p8 = scmp.lt.s32.totalorder %s10775_s30, 3  ;;  %p16755_p9 = scmp.eq.s32.totalorder %s10861_s9, 0 }
  0x11   : > { %16848 = sst [smem:[#allocation16_spill]] %s16847_s16  ;;  %s10777_s18 = smov [#allocation6]  }
  0x12   : > { %p10889_p10 = pnand %p8546_p7, %p227_p8  ;;  %s255_s19 = sshll.u32 %s10777_s18, 4  ;;  %s10895_s19 = int_to_ptr.vmem [resolvable:$true] %s255_s19 }
  0x13   : > { %s10778_s21 = smov [#allocation3]   ;;  %s10779_s23 = smov [#allocation8]  }
  0x14   : > { %s16849_s17 = scalar_select %p10889_p10, 1, 0 }
  0x15   : > { %p10106_p11 = pneg %p10889_p10  ;;  %s242_s22 = sshll.u32 %s10778_s21, 4  ;;  %s10903_s22 = int_to_ptr.vmem [resolvable:$true] %s242_s22 }
  0x16   : > { %s10905_s24 = sshll.u32 %s10779_s23, 4  ;;  %s10621_s10 = scalar_lea.hbm %s16749_s3, 640  ;;  %s269_s24 = int_to_ptr.vmem [resolvable:$true] %s10905_s24 }
  0x17   : > { %p10899_p12 = pnand %p16755_p9, %p10106_p11  ;;  %p10622_p13 = scmp.ne.s32.totalorder %s16749_s3, %s10621_s10 }
  0x18   : > { %p10628_p3 = scmp.lt.u32.totalorder %s10621_s10, %s16749_s3 }
  0x19   : > { %p10915_p0 = pneg %p10899_p12 }
  0x1b   : > { %p10624_p1 = pnand %p10915_p0, %p10622_p13 }
  0x1d   : > { %p10625_p2 = pneg %p10624_p1 }
  0x1f   : > { %p10630_p4 = pnand %p10628_p3, %p10625_p2 }
  0x21   : > { %10633 = shalt.err (!%p10630_p4)
}
  0x22   : > { %s10634_s25 = scalar_lea.vmem %s10895_s19, 640  ;;  %p10642_p9 = scmp.lt.s32.totalorder %s10895_s19, %s10895_s19 }
  0x23   : > { %p10635_p7 = scmp.ne.s32.totalorder %s10895_s19, %s10634_s25  ;;  %p10643_p6 = scmp.lt.s32.totalorder %s10634_s25, %s10634_s25 }
  0x25   : > { %p10637_p8 = pnand %p10635_p7, %p10915_p0  ;;  %p10644_p13 = por %p10643_p6, %p10642_p9 }
  0x27   : > { %p10638_p11 = pneg %p10637_p8 }
  0x29   : > { %p10645_p1 = pnand %p10644_p13, %p10638_p11 }
  0x2b   : > { %10648 = shalt.err (!%p10645_p1)
}
  0x2c   : > { %s10780_s26 = smov 128   ;;  %s10781_s10 = smov 8  }
  0x2d   : > { %10112 = dma.hbm_to_vmem [thread:$0]  (!%p10899_p12), %s16749_s3, 640, %s10895_s19, [#allocation7], %s10780_s26, %s10780_s26, %s10781_s10  }
  0x2e   : > { %s10649_s25 = scalar_lea.hbm %s16748_s2, 640 }
  0x2f   : > { %p10650_p6 = scmp.ne.s32.totalorder %s16748_s2, %s10649_s25  ;;  %p10656_p3 = scmp.lt.u32.totalorder %s10649_s25, %s16748_s2 }
  0x31   : > { %p10652_p9 = pnand %p10650_p6, %p10915_p0 }
  0x33   : > { %p10653_p2 = pneg %p10652_p9 }
  0x35   : > { %p10658_p4 = pnand %p10656_p3, %p10653_p2 }
  0x37   : > { %10661 = shalt.err (!%p10658_p4)
}
  0x38   : > { %s10662_s19 = scalar_lea.vmem %s10903_s22, 640  ;;  %p10670_p13 = scmp.lt.s32.totalorder %s10903_s22, %s10903_s22 }
  0x39   : > { %p10663_p7 = scmp.ne.s32.totalorder %s10903_s22, %s10662_s19  ;;  %p10671_p1 = scmp.lt.s32.totalorder %s10662_s19, %s10662_s19 }
  0x3b   : > { %p10665_p8 = pnand %p10663_p7, %p10915_p0  ;;  %p10672_p6 = por %p10671_p1, %p10670_p13 }
  0x3d   : > { %p10666_p11 = pneg %p10665_p8 }
  0x3f   : > { %p10673_p9 = pnand %p10672_p6, %p10666_p11 }
  0x41   : > { %10676 = shalt.err (!%p10673_p9)
}
  0x42   : > { %10109 = dma.hbm_to_vmem [thread:$0]  (!%p10899_p12), %s16748_s2, 640, %s10903_s22, [#allocation4], %s10780_s26, %s10780_s26, %s10781_s10  }
  0x43   : > { %s10677_s12 = scalar_lea.hbm %s16750_s4, 640 }
  0x44   : > { %p10678_p2 = scmp.ne.s32.totalorder %s16750_s4, %s10677_s12  ;;  %p10684_p7 = scmp.lt.u32.totalorder %s10677_s12, %s16750_s4 }
  0x46   : > { %p10680_p3 = pnand %p10678_p2, %p10915_p0 }
  0x48   : > { %p10681_p4 = pneg %p10680_p3 }
  0x4a   : > { %p10686_p8 = pnand %p10684_p7, %p10681_p4 }
  0x4c   : > { %10689 = shalt.err (!%p10686_p8)
}
  0x4d   : > { %s10690_s19 = scalar_lea.vmem %s269_s24, 640  ;;  %p10698_p6 = scmp.lt.s32.totalorder %s269_s24, %s269_s24 }
  0x4e   : > { %p10691_p11 = scmp.ne.s32.totalorder %s269_s24, %s10690_s19  ;;  %p10699_p9 = scmp.lt.s32.totalorder %s10690_s19, %s10690_s19 }
  0x50   : > { %p10693_p13 = pnand %p10691_p11, %p10915_p0  ;;  %p10700_p5 = por %p10699_p9, %p10698_p6 }
  0x52   : > { %p10694_p1 = pneg %p10693_p13 }
  0x54   : > { %p10701_p10 = pnand %p10700_p5, %p10694_p1 }
  0x56   : > { %10704 = shalt.err (!%p10701_p10)
}
  0x57   : > { %10115 = dma.hbm_to_vmem [thread:$0]  (!%p10899_p12), %s16750_s4, 640, %s269_s24, [#allocation7], %s10780_s26, %s10780_s26, %s10781_s10  }
  0x58   : > { %p16852_p2 = scmp.ne.s32.totalorder %s16849_s17, 0 }
  0x5a   : > { %301 = sbr.rel (%p16852_p2) target bundleno = 2450 (0x992), region = 52 }
  0x61   : > { %p16853_p0 = scmp.eq.s32.totalorder %s10861_s9, 0 }
  0x63   : > { %10750 = dma.done.wait (%p16853_p0), [#allocation4], 640   ;;  %p16854_p3 = pmov %p16853_p0 }
  0x64   : > { %p16855_p5 = pmov %p16853_p0 }
  0x65   : > { %10752 = vsyncadd (%p16854_p3), [#allocation4], 4294966656 }
  0x66   : > { %10754 = dma.done.wait (%p16855_p5), [#allocation7], 1280   ;;  %p16856_p10 = pmov %p16853_p0 }
  0x67   : > { %vm348_vm0 = vcmask 31744   ;;  %p343_p4 = scmp.lt.s32.totalorder %s10861_s9, 1  ;;  %v16762_v0 = vmov 0.0   ;;  %s10783_s10 = smov 4   ;;  %vm620_vm1 = vcmask 1043456   ;;  %vm2339_vm2 = vcmask 64512  }
  0x68   : > { %10756 = vsyncadd (%p16856_p10), [#allocation7], 4294966016  ;;  %358 = vst.msk [vmem:[#allocation2 + $0x48] sm:$0xff] %vm348_vm0, %v16762_v0  ;;  %s10784_s11 = smov 8   ;;  %s10785_s14 = smov 12   ;;  %vm2372_vm3 = vcmask 97280  }
  0x69   : > { %359 = vst.msk [vmem:[#allocation2 + $0x50] sm:$0xff] %vm348_vm0, %v16762_v0  ;;  %349 = vst.msk [vmem:[#allocation2] sm:$0xff] %vm348_vm0, %v16762_v0  ;;  %s344_s17 = scalar_select %p343_p4, %s10861_s9, 1  ;;  %vm2405_vm4 = vcmask 130048   ;;  %vm2438_vm5 = vcmask 162816   ;;  %vm2471_vm6 = vcmask 195584  }
  0x6a   : > { %350 = vst.msk [vmem:[#allocation2 + $0x8] sm:$0xff] %vm348_vm0, %v16762_v0  ;;  %351 = vst.msk [vmem:[#allocation2 + $0x10] sm:$0xff] %vm348_vm0, %v16762_v0  ;;  %s10786_s16 = smov 16   ;;  %s10787_s12 = smov 20   ;;  %vm2504_vm7 = vcmask 228352   ;;  %vm2537_vm8 = vcmask 261120  }
  0x6b   : > { %352 = vst.msk [vmem:[#allocation2 + $0x18] sm:$0xff] %vm348_vm0, %v16762_v0  ;;  %353 = vst.msk [vmem:[#allocation2 + $0x20] sm:$0xff] %vm348_vm0, %v16762_v0  ;;  %s8863_s20 = sshll.u32 %s344_s17, 8  ;;  %s10788_s13 = smov 24   ;;  %vm2580_vm9 = vcmask 293888  }
  0x6c   : > { %354 = vst.msk [vmem:[#allocation2 + $0x28] sm:$0xff] %vm348_vm0, %v16762_v0  ;;  %355 = vst.msk [vmem:[#allocation2 + $0x30] sm:$0xff] %vm348_vm0, %v16762_v0  ;;  %s11148_s26 = scalar_lea.vmem %s16746_s0, %s8863_s20  ;;  %s10789_s21 = smov 28  }
  0x6d   : > { %356 = vst.msk [vmem:[#allocation2 + $0x38] sm:$0xff] %vm348_vm0, %v16762_v0  ;;  %357 = vst.msk [vmem:[#allocation2 + $0x40] sm:$0xff] %vm348_vm0, %v16762_v0  ;;  %v422_v1 = vld [vmem:[%s11148_s26 + $0x8] sm:$0xff]  ;;  %v421_v2 = vld [vmem:[%s11148_s26] sm:$0xff]  ;;  %s10790_s23 = smov 32   ;;  %s340_s24 = sand.u32 1, %s10767_s28  }
  0x6e   : > { %360 = vst.msk [vmem:[#allocation2 + $0x58] sm:$0xff] %vm348_vm0, %v16762_v0  ;;  %361 = vst.msk [vmem:[#allocation2 + $0x60] sm:$0xff] %vm348_vm0, %v16762_v0  ;;  %v424_v3 = vld [vmem:[%s11148_s26 + $0x18] sm:$0xff]  ;;  %v423_v8 = vld [vmem:[%s11148_s26 + $0x10] sm:$0xff]  ;;  %s16534_s18 = sshll.u32 %s340_s24, 8  ;;  %s16704_s29 = scalar_lea.sflag [#allocation5], %s340_s24 }
  0x6f   : > { %362 = vst.msk [vmem:[#allocation2 + $0x68] sm:$0xff] %vm348_vm0, %v16762_v0  ;;  %363 = vst.msk [vmem:[#allocation2 + $0x70] sm:$0xff] %vm348_vm0, %v16762_v0  ;;  %v426_v9 = vld [vmem:[%s11148_s26 + $0x28] sm:$0xff]  ;;  %v425_v10 = vld [vmem:[%s11148_s26 + $0x20] sm:$0xff]  ;;  %p17441_p7 = scmp.ne.s32.totalorder %s16846_s15, 0 }
  0x70   : > { %364 = vst.msk [vmem:[#allocation2 + $0x78] sm:$0xff] %vm348_vm0, %v16762_v0  ;;  %365 = vst.msk [vmem:[#allocation2 + $0x80] sm:$0xff] %vm348_vm0, %v16762_v0  ;;  %v1092_v4 = vld [vmem:[#allocation2 + $0x4c] sm:$0xff]  ;;  %v428_v11 = vld [vmem:[%s11148_s26 + $0x38] sm:$0xff] }
  0x71   : > { %366 = vst.msk [vmem:[#allocation2 + $0x88] sm:$0xff] %vm348_vm0, %v16762_v0  ;;  %367 = vst.msk [vmem:[#allocation2 + $0x90] sm:$0xff] %vm348_vm0, %v16762_v0  ;;  %1351 = vrot.lane.b32.xlu1 %v1092_v4, %s10783_s10  ;;  %v427_v12 = vld [vmem:[%s11148_s26 + $0x30] sm:$0xff]  ;;  %v430_v13 = vld [vmem:[%s11148_s26 + $0x48] sm:$0xff] }
  0x72   : > { %368 = vst.msk [vmem:[#allocation2 + $0x98] sm:$0xff] %vm348_vm0, %v16762_v0  ;;  %369 = vst.msk [vmem:[#allocation2 + $0xa0] sm:$0xff] %vm348_vm0, %v16762_v0  ;;  %v429_v14 = vld [vmem:[%s11148_s26 + $0x40] sm:$0xff]  ;;  %v432_v15 = vld [vmem:[%s11148_s26 + $0x58] sm:$0xff] }
  0x73   : > { %370 = vst.msk [vmem:[#allocation2 + $0xa8] sm:$0xff] %vm348_vm0, %v16762_v0  ;;  %371 = vst.msk [vmem:[#allocation2 + $0xb0] sm:$0xff] %vm348_vm0, %v16762_v0  ;;  %v431_v16 = vld [vmem:[%s11148_s26 + $0x50] sm:$0xff]  ;;  %v434_v17 = vld [vmem:[%s11148_s26 + $0x68] sm:$0xff] }
  0x74   : > { %372 = vst.msk [vmem:[#allocation2 + $0xb8] sm:$0xff] %vm348_vm0, %v16762_v0  ;;  %373 = vst.msk [vmem:[#allocation2 + $0xc0] sm:$0xff] %vm348_vm0, %v16762_v0  ;;  %v1090_v5 = vld [vmem:[#allocation2 + $0x34] sm:$0xff]  ;;  %v1091_v7 = vld [vmem:[#allocation2 + $0x3c] sm:$0xff] }
  0x75   : > { %374 = vst.msk [vmem:[#allocation2 + $0xc8] sm:$0xff] %vm348_vm0, %v16762_v0  ;;  %375 = vst.msk [vmem:[#allocation2 + $0xd0] sm:$0xff] %vm348_vm0, %v16762_v0  ;;  %v1093_v6 = vld [vmem:[#allocation2 + $0x54] sm:$0xff]  ;;  %1347 = vrot.lane.b32.xlu0 %v1090_v5, %s10783_s10  ;;  %v433_v18 = vld [vmem:[%s11148_s26 + $0x60] sm:$0xff] }
  0x76   : > { %376 = vst.msk [vmem:[#allocation2 + $0xd8] sm:$0xff] %vm348_vm0, %v16762_v0  ;;  %377 = vst.msk [vmem:[#allocation2 + $0xe0] sm:$0xff] %vm348_vm0, %v16762_v0  ;;  %1353 = vrot.lane.b32.xlu1 %v1093_v6, %s10783_s10  ;;  %v436_v19 = vld [vmem:[%s11148_s26 + $0x78] sm:$0xff]  ;;  %v435_v20 = vld [vmem:[%s11148_s26 + $0x70] sm:$0xff] }
  0x77   : > { %378 = vst.msk [vmem:[#allocation2 + $0xe8] sm:$0xff] %vm348_vm0, %v16762_v0  ;;  %379 = vst.msk [vmem:[#allocation2 + $0xf0] sm:$0xff] %vm348_vm0, %v16762_v0  ;;  %v438_v21 = vld [vmem:[%s11148_s26 + $0x88] sm:$0xff]  ;;  %v437_v22 = vld [vmem:[%s11148_s26 + $0x80] sm:$0xff] }
  0x78   : > { %380 = vst.msk [vmem:[#allocation2 + $0xf8] sm:$0xff] %vm348_vm0, %v16762_v0  ;;  %381 = vst.msk [vmem:[#allocation2 + $0x100] sm:$0xff] %vm348_vm0, %v16762_v0  ;;  %v440_v23 = vld [vmem:[%s11148_s26 + $0x98] sm:$0xff]  ;;  %v439_v26 = vld [vmem:[%s11148_s26 + $0x90] sm:$0xff] }
  0x79   : > { %382 = vst.msk [vmem:[#allocation2 + $0x108] sm:$0xff] %vm348_vm0, %v16762_v0  ;;  %383 = vst.msk [vmem:[#allocation2 + $0x110] sm:$0xff] %vm348_vm0, %v16762_v0  ;;  %1349 = vrot.lane.b32.xlu0 %v1091_v7, %s10783_s10  ;;  %v442_v27 = vld [vmem:[%s11148_s26 + $0xa8] sm:$0xff]  ;;  %v441_v28 = vld [vmem:[%s11148_s26 + $0xa0] sm:$0xff] }
  0x7a   : > { %384 = vst.msk [vmem:[#allocation2 + $0x118] sm:$0xff] %vm348_vm0, %v16762_v0  ;;  %385 = vst.msk [vmem:[#allocation2 + $0x120] sm:$0xff] %vm348_vm0, %v16762_v0  ;;  %v444_v29 = vld [vmem:[%s11148_s26 + $0xb8] sm:$0xff]  ;;  %v443_v32 = vld [vmem:[%s11148_s26 + $0xb0] sm:$0xff] }
  0x7b   : > { %386 = vst.msk [vmem:[#allocation2 + $0x128] sm:$0xff] %vm348_vm0, %v16762_v0  ;;  %387 = vst.msk [vmem:[#allocation2 + $0x130] sm:$0xff] %vm348_vm0, %v16762_v0  ;;  %v446_v35 = vld [vmem:[%s11148_s26 + $0xc8] sm:$0xff]  ;;  %v445_v36 = vld [vmem:[%s11148_s26 + $0xc0] sm:$0xff] }
  0x7c   : > { %388 = vst.msk [vmem:[#allocation2 + $0x138] sm:$0xff] %vm348_vm0, %v16762_v0  ;;  %389 = vst.msk [vmem:[#allocation2 + $0x140] sm:$0xff] %vm348_vm0, %v16762_v0  ;;  %v448_v37 = vld [vmem:[%s11148_s26 + $0xd8] sm:$0xff]  ;;  %v447_v38 = vld [vmem:[%s11148_s26 + $0xd0] sm:$0xff] }
  0x7d   : > { %390 = vst.msk [vmem:[#allocation2 + $0x148] sm:$0xff] %vm348_vm0, %v16762_v0  ;;  %391 = vst.msk [vmem:[#allocation2 + $0x150] sm:$0xff] %vm348_vm0, %v16762_v0  ;;  %v449_v55 = vld [vmem:[%s11148_s26 + $0xe0] sm:$0xff]  ;;  %v450_v56 = vld [vmem:[%s11148_s26 + $0xe8] sm:$0xff] }
  0x7e   : > { %392 = vst.msk [vmem:[#allocation2 + $0x158] sm:$0xff] %vm348_vm0, %v16762_v0  ;;  %393 = vst.msk [vmem:[#allocation2 + $0x160] sm:$0xff] %vm348_vm0, %v16762_v0  ;;  %v451_v59 = vld [vmem:[%s11148_s26 + $0xf0] sm:$0xff]  ;;  %v452_v60 = vld [vmem:[%s11148_s26 + $0xf8] sm:$0xff]  ;;  %s16558_s26 = scalar_lea.vmem [#allocation9], %s16534_s18 }
  0x7f   : > { %394 = vst.msk [vmem:[#allocation2 + $0x168] sm:$0xff] %vm348_vm0, %v16762_v0  ;;  %395 = vst.msk [vmem:[#allocation2 + $0x170] sm:$0xff] %vm348_vm0, %v16762_v0  ;;  %v1125_v4 = vld [vmem:[#allocation2 + $0x56] sm:$0xff]  ;;  %v1124_v5 = vld [vmem:[#allocation2 + $0x4e] sm:$0xff]  ;;  %s8452_s25 = sshll.u32 %s16558_s26, 4  ;;  %s16697_s25 = int_to_ptr.vmem [resolvable:$true] %s8452_s25 }
  0x80   : > { %396 = vst.msk [vmem:[#allocation2 + $0x178] sm:$0xff] %vm348_vm0, %v16762_v0  ;;  %397 = vst.msk [vmem:[#allocation2 + $0x180] sm:$0xff] %vm348_vm0, %v16762_v0 }
  0x81   : > { %398 = vst.msk [vmem:[#allocation2 + $0x188] sm:$0xff] %vm348_vm0, %v16762_v0  ;;  %399 = vst.msk [vmem:[#allocation2 + $0x190] sm:$0xff] %vm348_vm0, %v16762_v0 }
  0x82   : > { %400 = vst.msk [vmem:[#allocation2 + $0x198] sm:$0xff] %vm348_vm0, %v16762_v0  ;;  %401 = vst.msk [vmem:[#allocation2 + $0x1a0] sm:$0xff] %vm348_vm0, %v16762_v0 }
  0x83   : > { %402 = vst.msk [vmem:[#allocation2 + $0x1a8] sm:$0xff] %vm348_vm0, %v16762_v0  ;;  %403 = vst.msk [vmem:[#allocation2 + $0x1b0] sm:$0xff] %vm348_vm0, %v16762_v0 }
  0x84   : > { %404 = vst.msk [vmem:[#allocation2 + $0x1b8] sm:$0xff] %vm348_vm0, %v16762_v0  ;;  %405 = vst.msk [vmem:[#allocation2 + $0x1c0] sm:$0xff] %vm348_vm0, %v16762_v0 }
  0x85   : > { %406 = vst.msk [vmem:[#allocation2 + $0x1c8] sm:$0xff] %vm348_vm0, %v16762_v0  ;;  %407 = vst.msk [vmem:[#allocation2 + $0x1d0] sm:$0xff] %vm348_vm0, %v16762_v0 }
  0x86   : > { %408 = vst.msk [vmem:[#allocation2 + $0x1d8] sm:$0xff] %vm348_vm0, %v16762_v0  ;;  %409 = vst.msk [vmem:[#allocation2 + $0x1e0] sm:$0xff] %vm348_vm0, %v16762_v0 }
  0x87   : > { %410 = vst.msk [vmem:[#allocation2 + $0x1e8] sm:$0xff] %vm348_vm0, %v16762_v0  ;;  %411 = vst.msk [vmem:[#allocation2 + $0x1f0] sm:$0xff] %vm348_vm0, %v16762_v0 }
  0x88   : > { %412 = vst.msk [vmem:[#allocation2 + $0x1f8] sm:$0xff] %vm348_vm0, %v16762_v0  ;;  %413 = vst.msk [vmem:[#allocation2 + $0x200] sm:$0xff] %vm348_vm0, %v16762_v0 }
  0x89   : > { %414 = vst.msk [vmem:[#allocation2 + $0x208] sm:$0xff] %vm348_vm0, %v16762_v0  ;;  %415 = vst.msk [vmem:[#allocation2 + $0x210] sm:$0xff] %vm348_vm0, %v16762_v0 }
  0x8a   : > { %416 = vst.msk [vmem:[#allocation2 + $0x218] sm:$0xff] %vm348_vm0, %v16762_v0  ;;  %417 = vst.msk [vmem:[#allocation2 + $0x220] sm:$0xff] %vm348_vm0, %v16762_v0 }
  0x8b   : > { %418 = vst.msk [vmem:[#allocation2 + $0x228] sm:$0xff] %vm348_vm0, %v16762_v0  ;;  %419 = vst.msk [vmem:[#allocation2 + $0x230] sm:$0xff] %vm348_vm0, %v16762_v0 }
  0x8c   : > { %420 = vst.msk [vmem:[#allocation2 + $0x238] sm:$0xff] %vm348_vm0, %v16762_v0  ;;  %455 = vst.msk [vmem:[#allocation2 + $0x6c] sm:$0xff] %vm348_vm0, %v422_v1 }
  0x8d   : > { %454 = vst.msk [vmem:[#allocation2 + $0x64] sm:$0xff] %vm348_vm0, %v421_v2  ;;  %457 = vst.msk [vmem:[#allocation2 + $0x84] sm:$0xff] %vm348_vm0, %v424_v3  ;;  %v1123_v2 = vld [vmem:[#allocation2 + $0x3e] sm:$0xff]  ;;  %v1122_v3 = vld [vmem:[#allocation2 + $0x36] sm:$0xff] }
  0x8e   : > { %456 = vst.msk [vmem:[#allocation2 + $0x7c] sm:$0xff] %vm348_vm0, %v423_v8  ;;  %459 = vst.msk [vmem:[#allocation2 + $0x9c] sm:$0xff] %vm348_vm0, %v426_v9 }
  0x8f   : > { %458 = vst.msk [vmem:[#allocation2 + $0x94] sm:$0xff] %vm348_vm0, %v425_v10  ;;  %461 = vst.msk [vmem:[#allocation2 + $0xb4] sm:$0xff] %vm348_vm0, %v428_v11 }
  0x90   : > { %460 = vst.msk [vmem:[#allocation2 + $0xac] sm:$0xff] %vm348_vm0, %v427_v12  ;;  %463 = vst.msk [vmem:[#allocation2 + $0xcc] sm:$0xff] %vm348_vm0, %v430_v13 }
  0x91   : > { %462 = vst.msk [vmem:[#allocation2 + $0xc4] sm:$0xff] %vm348_vm0, %v429_v14  ;;  %465 = vst.msk [vmem:[#allocation2 + $0xe4] sm:$0xff] %vm348_vm0, %v432_v15 }
  0x92   : > { %464 = vst.msk [vmem:[#allocation2 + $0xdc] sm:$0xff] %vm348_vm0, %v431_v16  ;;  %467 = vst.msk [vmem:[#allocation2 + $0xfc] sm:$0xff] %vm348_vm0, %v434_v17 }
  0x93   : > { %466 = vst.msk [vmem:[#allocation2 + $0xf4] sm:$0xff] %vm348_vm0, %v433_v18  ;;  %469 = vst.msk [vmem:[#allocation2 + $0x114] sm:$0xff] %vm348_vm0, %v436_v19  ;;  %v11189_v24 = vld [vmem:[#allocation2 + $0x6c] sm:$0xff] }
  0x94   : > { %468 = vst.msk [vmem:[#allocation2 + $0x10c] sm:$0xff] %vm348_vm0, %v435_v20  ;;  %v11191_v25 = vld [vmem:[#allocation2 + $0x64] sm:$0xff]  ;;  %471 = vst.msk [vmem:[#allocation2 + $0x12c] sm:$0xff] %vm348_vm0, %v438_v21  ;;  %1357 = vrot.lane.b32.xlu1 %v11189_v24, %s10783_s10  ;;  %v11336_v6 = vld [vmem:[#allocation2 + $0x6e] sm:$0xff] }
  0x95   : > { %470 = vst.msk [vmem:[#allocation2 + $0x124] sm:$0xff] %vm348_vm0, %v437_v22  ;;  %473 = vst.msk [vmem:[#allocation2 + $0x144] sm:$0xff] %vm348_vm0, %v440_v23  ;;  %9222 = vmatprep.mubr.msk.f32.mxu0 %vm348_vm0, %v11191_v25  ;;  %1355 = vrot.lane.b32.xlu0 %v11191_v25, %s10783_s10  ;;  %v11209_v30 = vld [vmem:[#allocation2 + $0x84] sm:$0xff]  ;;  %v11211_v31 = vld [vmem:[#allocation2 + $0x7c] sm:$0xff] }
  0x96   : > { %472 = vst.msk [vmem:[#allocation2 + $0x13c] sm:$0xff] %vm348_vm0, %v439_v26  ;;  %475 = vst.msk [vmem:[#allocation2 + $0x15c] sm:$0xff] %vm348_vm0, %v442_v27  ;;  %v11219_v33 = vld [vmem:[#allocation2 + $0x9c] sm:$0xff]  ;;  %v11221_v34 = vld [vmem:[#allocation2 + $0x94] sm:$0xff] }
  0x97   : > { %474 = vst.msk [vmem:[#allocation2 + $0x154] sm:$0xff] %vm348_vm0, %v441_v28  ;;  %477 = vst.msk [vmem:[#allocation2 + $0x174] sm:$0xff] %vm348_vm0, %v444_v29  ;;  %v11235_v39 = vld [vmem:[#allocation2 + $0xb4] sm:$0xff]  ;;  %v11237_v40 = vld [vmem:[#allocation2 + $0xac] sm:$0xff] }
  0x98   : > { %1361 = vrot.lane.b32.xlu1 %v11209_v30, %s10783_s10  ;;  %476 = vst.msk [vmem:[#allocation2 + $0x16c] sm:$0xff] %vm348_vm0, %v443_v32  ;;  %479 = vst.msk [vmem:[#allocation2 + $0x18c] sm:$0xff] %vm348_vm0, %v446_v35  ;;  %v11244_v41 = vld [vmem:[#allocation2 + $0xcc] sm:$0xff]  ;;  %v11246_v42 = vld [vmem:[#allocation2 + $0xc4] sm:$0xff] }
  0x99   : > { %1359 = vrot.lane.b32.xlu0 %v11211_v31, %s10783_s10  ;;  %478 = vst.msk [vmem:[#allocation2 + $0x184] sm:$0xff] %vm348_vm0, %v445_v36  ;;  %481 = vst.msk [vmem:[#allocation2 + $0x1a4] sm:$0xff] %vm348_vm0, %v448_v37  ;;  %v11252_v43 = vld [vmem:[#allocation2 + $0xe4] sm:$0xff]  ;;  %v11254_v44 = vld [vmem:[#allocation2 + $0xdc] sm:$0xff] }
  0x9a   : > { %480 = vst.msk [vmem:[#allocation2 + $0x19c] sm:$0xff] %vm348_vm0, %v447_v38  ;;  %v11260_v45 = vld [vmem:[#allocation2 + $0xfc] sm:$0xff]  ;;  %v11262_v46 = vld [vmem:[#allocation2 + $0xf4] sm:$0xff]  ;;  %482 = vst.msk [vmem:[#allocation2 + $0x1b4] sm:$0xff] %vm348_vm0, %v449_v55 }
  0x9b   : > { %v11268_v47 = vld [vmem:[#allocation2 + $0x114] sm:$0xff]  ;;  %v11270_v48 = vld [vmem:[#allocation2 + $0x10c] sm:$0xff]  ;;  %483 = vst.msk [vmem:[#allocation2 + $0x1bc] sm:$0xff] %vm348_vm0, %v450_v56  ;;  %484 = vst.msk [vmem:[#allocation2 + $0x1cc] sm:$0xff] %vm348_vm0, %v451_v59 }
  0x9c   : > { %1365 = vrot.lane.b32.xlu1 %v11219_v33, %s10783_s10  ;;  %v11276_v49 = vld [vmem:[#allocation2 + $0x12c] sm:$0xff]  ;;  %v11278_v50 = vld [vmem:[#allocation2 + $0x124] sm:$0xff]  ;;  %485 = vst.msk [vmem:[#allocation2 + $0x1d4] sm:$0xff] %vm348_vm0, %v452_v60  ;;  %v11354_v11 = vld [vmem:[#allocation2 + $0x96] sm:$0xff] }
  0x9d   : > { %1363 = vrot.lane.b32.xlu0 %v11221_v34, %s10783_s10  ;;  %v11284_v51 = vld [vmem:[#allocation2 + $0x144] sm:$0xff]  ;;  %v11286_v52 = vld [vmem:[#allocation2 + $0x13c] sm:$0xff]  ;;  %v11362_v13 = vld [vmem:[#allocation2 + $0xae] sm:$0xff] }
  0x9e   : > { %v11292_v53 = vld [vmem:[#allocation2 + $0x15c] sm:$0xff]  ;;  %v11294_v54 = vld [vmem:[#allocation2 + $0x154] sm:$0xff]  ;;  %v11338_v7 = vld [vmem:[#allocation2 + $0x66] sm:$0xff] }
  0x9f   : > { %v11304_v57 = vld [vmem:[#allocation2 + $0x174] sm:$0xff]  ;;  %v11306_v58 = vld [vmem:[#allocation2 + $0x16c] sm:$0xff]  ;;  %v11346_v9 = vld [vmem:[#allocation2 + $0x7e] sm:$0xff] }
  0xa0   : > { %1369 = vrot.lane.b32.xlu1 %v11235_v39, %s10783_s10  ;;  %v11316_v61 = vld [vmem:[#allocation2 + $0x18c] sm:$0xff]  ;;  %v11318_v62 = vld [vmem:[#allocation2 + $0x184] sm:$0xff]  ;;  %v11360_v12 = vld [vmem:[#allocation2 + $0xb6] sm:$0xff] }
  0xa1   : > { %1367 = vrot.lane.b32.xlu0 %v11237_v40, %s10783_s10  ;;  %v11324_v63 = vld [vmem:[#allocation2 + $0x1a4] sm:$0xff]  ;;  %v11326_v1 = vld [vmem:[#allocation2 + $0x19c] sm:$0xff]  ;;  %v11368_v14 = vld [vmem:[#allocation2 + $0xce] sm:$0xff] }
  0xa2   : > { %v11344_v8 = vld [vmem:[#allocation2 + $0x86] sm:$0xff]  ;;  %v11352_v10 = vld [vmem:[#allocation2 + $0x9e] sm:$0xff]  ;;  %v11386_v19 = vld [vmem:[#allocation2 + $0xf6] sm:$0xff] }
  0xa3   : > { %v11370_v15 = vld [vmem:[#allocation2 + $0xc6] sm:$0xff]  ;;  %v11378_v17 = vld [vmem:[#allocation2 + $0xde] sm:$0xff]  ;;  %v11392_v20 = vld [vmem:[#allocation2 + $0x116] sm:$0xff] }
  0xa4   : > { %1373 = vrot.lane.b32.xlu1 %v11244_v41, %s10783_s10  ;;  %v11376_v16 = vld [vmem:[#allocation2 + $0xe6] sm:$0xff]  ;;  %v11384_v18 = vld [vmem:[#allocation2 + $0xfe] sm:$0xff]  ;;  %v11394_v21 = vld [vmem:[#allocation2 + $0x10e] sm:$0xff] }
  0xa5   : > { %1371 = vrot.lane.b32.xlu0 %v11246_v42, %s10783_s10  ;;  %v11400_v22 = vld [vmem:[#allocation2 + $0x12e] sm:$0xff]  ;;  %v11402_v23 = vld [vmem:[#allocation2 + $0x126] sm:$0xff]  ;;  %v11410_v27 = vld [vmem:[#allocation2 + $0x13e] sm:$0xff] }
  0xa6   : > { %v11408_v26 = vld [vmem:[#allocation2 + $0x146] sm:$0xff]  ;;  %v11416_v28 = vld [vmem:[#allocation2 + $0x15e] sm:$0xff]  ;;  %v11418_v29 = vld [vmem:[#allocation2 + $0x156] sm:$0xff] }
  0xa7   : > { %v11424_v32 = vld [vmem:[#allocation2 + $0x176] sm:$0xff]  ;;  %v11426_v35 = vld [vmem:[#allocation2 + $0x16e] sm:$0xff]  ;;  %v11438_v55 = vld [vmem:[#allocation2 + $0x186] sm:$0xff] }
  0xa8   : > { %1377 = vrot.lane.b32.xlu1 %v11252_v43, %s10783_s10  ;;  %v11436_v38 = vld [vmem:[#allocation2 + $0x18e] sm:$0xff]  ;;  %v11448_v60 = vld [vmem:[#allocation2 + $0x1a6] sm:$0xff] }
  0xa9   : > { %1375 = vrot.lane.b32.xlu0 %v11254_v44, %s10783_s10  ;;  %16861 = vst [vmem:[#allocation21_spill] sm:$0xff] %v11448_v60 }
  0xac   : > { %1381 = vrot.lane.b32.xlu1 %v11260_v45, %s10783_s10 }
  0xad   : > { %1379 = vrot.lane.b32.xlu0 %v11262_v46, %s10783_s10 }
  0xb0   : > { %1385 = vrot.lane.b32.xlu1 %v11268_v47, %s10783_s10 }
  0xb1   : > { %1383 = vrot.lane.b32.xlu0 %v11270_v48, %s10783_s10 }
  0xb4   : > { %1389 = vrot.lane.b32.xlu1 %v11276_v49, %s10783_s10 }
  0xb5   : > { %1387 = vrot.lane.b32.xlu0 %v11278_v50, %s10783_s10 }
  0xb8   : > { %1393 = vrot.lane.b32.xlu1 %v11284_v51, %s10783_s10 }
  0xb9   : > { %1391 = vrot.lane.b32.xlu0 %v11286_v52, %s10783_s10 }
  0xbc   : > { %1397 = vrot.lane.b32.xlu1 %v11292_v53, %s10783_s10 }
  0xbd   : > { %1395 = vrot.lane.b32.xlu0 %v11294_v54, %s10783_s10 }
  0xc0   : > { %1401 = vrot.lane.b32.xlu1 %v11304_v57, %s10783_s10 }
  0xc1   : > { %1399 = vrot.lane.b32.xlu0 %v11306_v58, %s10783_s10 }
  0xc4   : > { %1405 = vrot.lane.b32.xlu1 %v11316_v61, %s10783_s10 }
  0xc5   : > { %1403 = vrot.lane.b32.xlu0 %v11318_v62, %s10783_s10 }
  0xc8   : > { %1409 = vrot.lane.b32.xlu1 %v11324_v63, %s10783_s10 }
  0xc9   : > { %1407 = vrot.lane.b32.xlu0 %v11326_v1, %s10783_s10 }
  0xcc   : > { %1477 = vrot.lane.b32.xlu1 %v1123_v2, %s10784_s11  ;;  %v11450_v2 = vld [vmem:[#allocation2 + $0x19e] sm:$0xff] }
  0xcd   : > { %1475 = vrot.lane.b32.xlu0 %v1122_v3, %s10784_s11  ;;  %16862 = vst [vmem:[#allocation22_spill] sm:$0xff] %v11450_v2 }
  0xd0   : > { %1481 = vrot.lane.b32.xlu1 %v1125_v4, %s10784_s11 }
  0xd1   : > { %1479 = vrot.lane.b32.xlu0 %v1124_v5, %s10784_s11 }
  0xd4   : > { %1485 = vrot.lane.b32.xlu1 %v11336_v6, %s10784_s11 }
  0xd5   : > { %1483 = vrot.lane.b32.xlu0 %v11338_v7, %s10784_s11 }
  0xd8   : > { %1489 = vrot.lane.b32.xlu1 %v11344_v8, %s10784_s11 }
  0xd9   : > { %1487 = vrot.lane.b32.xlu0 %v11346_v9, %s10784_s11 }
  0xdc   : > { %1493 = vrot.lane.b32.xlu1 %v11352_v10, %s10784_s11 }
  0xdd   : > { %1491 = vrot.lane.b32.xlu0 %v11354_v11, %s10784_s11 }
  0xe0   : > { %1497 = vrot.lane.b32.xlu1 %v11360_v12, %s10784_s11 }
  0xe1   : > { %1495 = vrot.lane.b32.xlu0 %v11362_v13, %s10784_s11 }
  0xe3   : > { %v11428_v36 = vpop.permute.xlu1 %1351 }
  0xe4   : > { %1501 = vrot.lane.b32.xlu1 %v11368_v14, %s10784_s11  ;;  %16857 = vst [vmem:[#allocation17_spill] sm:$0xff] %v11428_v36  ;;  %v1064_v36 = vld [vmem:[#allocation2 + $0x7a] sm:$0xff] }
  0xe5   : > { %1499 = vrot.lane.b32.xlu0 %v11370_v15, %s10784_s11 }
  0xe7   : > { %v11430_v37 = vpop.permute.xlu0 %1347 }
  0xe8   : > { %1505 = vrot.lane.b32.xlu1 %v11376_v16, %s10784_s11  ;;  %16858 = vst [vmem:[#allocation18_spill] sm:$0xff] %v11430_v37  ;;  %v11440_v56 = vpop.permute.xlu1 %1353  ;;  %v1065_v37 = vld [vmem:[#allocation2 + $0x82] sm:$0xff] }
  0xe9   : > { %1503 = vrot.lane.b32.xlu0 %v11378_v17, %s10784_s11  ;;  %16859 = vst [vmem:[#allocation19_spill] sm:$0xff] %v11440_v56  ;;  %v1062_v56 = vld [vmem:[#allocation2 + $0x62] sm:$0xff] }
  0xeb   : > { %v11442_v59 = vpop.permute.xlu0 %1349 }
  0xec   : > { %1509 = vrot.lane.b32.xlu1 %v11384_v18, %s10784_s11  ;;  %16860 = vst [vmem:[#allocation20_spill] sm:$0xff] %v11442_v59  ;;  %v1063_v59 = vld [vmem:[#allocation2 + $0x6a] sm:$0xff] }
  0xed   : > { %1507 = vrot.lane.b32.xlu0 %v11386_v19, %s10784_s11 }
  0xf0   : > { %1513 = vrot.lane.b32.xlu1 %v11392_v20, %s10784_s11 }
  0xf1   : > { %1511 = vrot.lane.b32.xlu0 %v11394_v21, %s10784_s11 }
  0xf4   : > { %1517 = vrot.lane.b32.xlu1 %v11400_v22, %s10784_s11 }
  0xf5   : > { %1515 = vrot.lane.b32.xlu0 %v11402_v23, %s10784_s11 }
  0xf8   : > { %1521 = vrot.lane.b32.xlu1 %v11408_v26, %s10784_s11 }
  0xf9   : > { %1519 = vrot.lane.b32.xlu0 %v11410_v27, %s10784_s11 }
  0xfc   : > { %1525 = vrot.lane.b32.xlu1 %v11416_v28, %s10784_s11 }
  0xfd   : > { %1523 = vrot.lane.b32.xlu0 %v11418_v29, %s10784_s11 }
 0x100   : > { %1529 = vrot.lane.b32.xlu1 %v11424_v32, %s10784_s11 }
 0x101   : > { %1527 = vrot.lane.b32.xlu0 %v11426_v35, %s10784_s11 }
 0x104   : > { %1533 = vrot.lane.b32.xlu1 %v11436_v38, %s10784_s11 }
 0x105   : > { %1531 = vrot.lane.b32.xlu0 %v11438_v55, %s10784_s11 }
 0x106   : > { %v11452_v3 = vpop.permute.xlu1 %1357 }
 0x107   : > { %16863 = vst [vmem:[#allocation23_spill] sm:$0xff] %v11452_v3  ;;  %v11454_v4 = vpop.permute.xlu0 %1355 }
 0x108   : > { %16864 = vst [vmem:[#allocation24_spill] sm:$0xff] %v11454_v4  ;;  %1537 = vrot.lane.b32.xlu1 %v11448_v60, %s10784_s11  ;;  %v11478_v60 = vld [vmem:[#allocation2 + $0x92] sm:$0xff] }
 0x109   : > { %1535 = vrot.lane.b32.xlu0 %v11450_v2, %s10784_s11  ;;  %v11476_v2 = vld [vmem:[#allocation2 + $0x9a] sm:$0xff] }
 0x10a   : > { %v11460_v5 = vpop.permute.xlu1 %1361 }
 0x10b   : > { %16865 = vst [vmem:[#allocation25_spill] sm:$0xff] %v11460_v5  ;;  %v11462_v0 = vpop.permute.xlu0 %1359 }
 0x10c   : > { %16866 = vst [vmem:[#allocation26_spill] sm:$0xff] %v11462_v0  ;;  %1605 = vrot.lane.b32.xlu1 %v1063_v59, %s10785_s14 }
 0x10d   : > { %1603 = vrot.lane.b32.xlu0 %v1062_v56, %s10785_s14 }
 0x10e   : > { %v11466_v3 = vpop.permute.xlu1 %1365 }
 0x10f   : > { %16867 = vst [vmem:[#allocation27_spill] sm:$0xff] %v11466_v3  ;;  %v11468_v4 = vpop.permute.xlu0 %1363  ;;  %v11502_v3 = vld [vmem:[#allocation2 + $0xc2] sm:$0xff] }
 0x110   : > { %16868 = vst [vmem:[#allocation28_spill] sm:$0xff] %v11468_v4  ;;  %1609 = vrot.lane.b32.xlu1 %v1065_v37, %s10785_s14  ;;  %v11488_v37 = vld [vmem:[#allocation2 + $0xb2] sm:$0xff]  ;;  %v11500_v4 = vld [vmem:[#allocation2 + $0xca] sm:$0xff]  ;;  %16878 = vst [vmem:[#allocation38_spill] sm:$0xff] %v11502_v3 }
 0x111   : > { %1607 = vrot.lane.b32.xlu0 %v1064_v36, %s10785_s14  ;;  %16873 = vst [vmem:[#allocation33_spill] sm:$0xff] %v11488_v37  ;;  %v11490_v36 = vld [vmem:[#allocation2 + $0xaa] sm:$0xff]  ;;  %16877 = vst [vmem:[#allocation37_spill] sm:$0xff] %v11500_v4 }
 0x112   : > { %v11472_v5 = vpop.permute.xlu1 %1369  ;;  %16874 = vst [vmem:[#allocation34_spill] sm:$0xff] %v11490_v36 }
 0x113   : > { %16869 = vst [vmem:[#allocation29_spill] sm:$0xff] %v11472_v5  ;;  %v11474_v0 = vpop.permute.xlu0 %1367 }
 0x114   : > { %16870 = vst [vmem:[#allocation30_spill] sm:$0xff] %v11474_v0  ;;  %1613 = vrot.lane.b32.xlu1 %v11476_v2, %s10785_s14 }
 0x115   : > { %1611 = vrot.lane.b32.xlu0 %v11478_v60, %s10785_s14 }
 0x116   : > { %v11484_v56 = vpop.permute.xlu1 %1373 }
 0x117   : > { %16871 = vst [vmem:[#allocation31_spill] sm:$0xff] %v11484_v56  ;;  %v11486_v59 = vpop.permute.xlu0 %1371 }
 0x118   : > { %16872 = vst [vmem:[#allocation32_spill] sm:$0xff] %v11486_v59  ;;  %1617 = vrot.lane.b32.xlu1 %v11488_v37, %s10785_s14  ;;  %v11512_v37 = vld [vmem:[#allocation2 + $0xe2] sm:$0xff] }
 0x119   : > { %1615 = vrot.lane.b32.xlu0 %v11490_v36, %s10785_s14  ;;  %16881 = vst [vmem:[#allocation41_spill] sm:$0xff] %v11512_v37  ;;  %v11514_v36 = vld [vmem:[#allocation2 + $0xda] sm:$0xff] }
 0x11a   : > { %v11496_v0 = vpop.permute.xlu1 %1377  ;;  %16882 = vst [vmem:[#allocation42_spill] sm:$0xff] %v11514_v36 }
 0x11b   : > { %16875 = vst [vmem:[#allocation35_spill] sm:$0xff] %v11496_v0  ;;  %v11498_v5 = vpop.permute.xlu0 %1375 }
 0x11c   : > { %16876 = vst [vmem:[#allocation36_spill] sm:$0xff] %v11498_v5  ;;  %1621 = vrot.lane.b32.xlu1 %v11500_v4, %s10785_s14  ;;  %v11524_v4 = vld [vmem:[#allocation2 + $0xfa] sm:$0xff] }
 0x11d   : > { %1619 = vrot.lane.b32.xlu0 %v11502_v3, %s10785_s14  ;;  %16885 = vst [vmem:[#allocation45_spill] sm:$0xff] %v11524_v4  ;;  %v11526_v3 = vld [vmem:[#allocation2 + $0xf2] sm:$0xff] }
 0x11e   : > { %v11508_v59 = vpop.permute.xlu1 %1381  ;;  %16886 = vst [vmem:[#allocation46_spill] sm:$0xff] %v11526_v3 }
 0x11f   : > { %16879 = vst [vmem:[#allocation39_spill] sm:$0xff] %v11508_v59  ;;  %v11510_v56 = vpop.permute.xlu0 %1379 }
 0x120   : > { %16880 = vst [vmem:[#allocation40_spill] sm:$0xff] %v11510_v56  ;;  %1625 = vrot.lane.b32.xlu1 %v11512_v37, %s10785_s14  ;;  %v11536_v37 = vld [vmem:[#allocation2 + $0x112] sm:$0xff] }
 0x121   : > { %1623 = vrot.lane.b32.xlu0 %v11514_v36, %s10785_s14  ;;  %16889 = vst [vmem:[#allocation49_spill] sm:$0xff] %v11536_v37  ;;  %v11538_v36 = vld [vmem:[#allocation2 + $0x10a] sm:$0xff] }
 0x122   : > { %v11520_v5 = vpop.permute.xlu1 %1385  ;;  %16890 = vst [vmem:[#allocation50_spill] sm:$0xff] %v11538_v36 }
 0x123   : > { %16883 = vst [vmem:[#allocation43_spill] sm:$0xff] %v11520_v5  ;;  %v11522_v0 = vpop.permute.xlu0 %1383 }
 0x124   : > { %16884 = vst [vmem:[#allocation44_spill] sm:$0xff] %v11522_v0  ;;  %1629 = vrot.lane.b32.xlu1 %v11524_v4, %s10785_s14  ;;  %v11548_v4 = vld [vmem:[#allocation2 + $0x12a] sm:$0xff] }
 0x125   : > { %1627 = vrot.lane.b32.xlu0 %v11526_v3, %s10785_s14  ;;  %16893 = vst [vmem:[#allocation53_spill] sm:$0xff] %v11548_v4  ;;  %v11550_v3 = vld [vmem:[#allocation2 + $0x122] sm:$0xff] }
 0x126   : > { %v11532_v56 = vpop.permute.xlu1 %1389  ;;  %16894 = vst [vmem:[#allocation54_spill] sm:$0xff] %v11550_v3 }
 0x127   : > { %16887 = vst [vmem:[#allocation47_spill] sm:$0xff] %v11532_v56  ;;  %v11534_v59 = vpop.permute.xlu0 %1387 }
 0x128   : > { %16888 = vst [vmem:[#allocation48_spill] sm:$0xff] %v11534_v59  ;;  %1633 = vrot.lane.b32.xlu1 %v11536_v37, %s10785_s14  ;;  %v11560_v37 = vld [vmem:[#allocation2 + $0x142] sm:$0xff] }
 0x129   : > { %1631 = vrot.lane.b32.xlu0 %v11538_v36, %s10785_s14  ;;  %16897 = vst [vmem:[#allocation57_spill] sm:$0xff] %v11560_v37  ;;  %v11562_v36 = vld [vmem:[#allocation2 + $0x13a] sm:$0xff] }
 0x12a   : > { %v11544_v0 = vpop.permute.xlu1 %1393  ;;  %16898 = vst [vmem:[#allocation58_spill] sm:$0xff] %v11562_v36 }
 0x12b   : > { %16891 = vst [vmem:[#allocation51_spill] sm:$0xff] %v11544_v0  ;;  %v11546_v5 = vpop.permute.xlu0 %1391 }
 0x12c   : > { %16892 = vst [vmem:[#allocation52_spill] sm:$0xff] %v11546_v5  ;;  %1637 = vrot.lane.b32.xlu1 %v11548_v4, %s10785_s14  ;;  %v11572_v4 = vld [vmem:[#allocation2 + $0x15a] sm:$0xff] }
 0x12d   : > { %1635 = vrot.lane.b32.xlu0 %v11550_v3, %s10785_s14  ;;  %16901 = vst [vmem:[#allocation61_spill] sm:$0xff] %v11572_v4  ;;  %v11574_v3 = vld [vmem:[#allocation2 + $0x152] sm:$0xff] }
 0x12e   : > { %v11556_v59 = vpop.permute.xlu1 %1397  ;;  %16902 = vst [vmem:[#allocation62_spill] sm:$0xff] %v11574_v3 }
 0x12f   : > { %16895 = vst [vmem:[#allocation55_spill] sm:$0xff] %v11556_v59  ;;  %v11558_v56 = vpop.permute.xlu0 %1395 }
 0x130   : > { %16896 = vst [vmem:[#allocation56_spill] sm:$0xff] %v11558_v56  ;;  %1641 = vrot.lane.b32.xlu1 %v11560_v37, %s10785_s14  ;;  %v11584_v37 = vld [vmem:[#allocation2 + $0x172] sm:$0xff] }
 0x131   : > { %1639 = vrot.lane.b32.xlu0 %v11562_v36, %s10785_s14  ;;  %16905 = vst [vmem:[#allocation65_spill] sm:$0xff] %v11584_v37  ;;  %v11586_v36 = vld [vmem:[#allocation2 + $0x16a] sm:$0xff] }
 0x132   : > { %v11568_v5 = vpop.permute.xlu1 %1401  ;;  %16906 = vst [vmem:[#allocation66_spill] sm:$0xff] %v11586_v36 }
 0x133   : > { %16899 = vst [vmem:[#allocation59_spill] sm:$0xff] %v11568_v5  ;;  %v11570_v0 = vpop.permute.xlu0 %1399 }
 0x134   : > { %16900 = vst [vmem:[#allocation60_spill] sm:$0xff] %v11570_v0  ;;  %1645 = vrot.lane.b32.xlu1 %v11572_v4, %s10785_s14  ;;  %v11596_v4 = vld [vmem:[#allocation2 + $0x18a] sm:$0xff] }
 0x135   : > { %1643 = vrot.lane.b32.xlu0 %v11574_v3, %s10785_s14  ;;  %16909 = vst [vmem:[#allocation69_spill] sm:$0xff] %v11596_v4  ;;  %v11598_v3 = vld [vmem:[#allocation2 + $0x182] sm:$0xff] }
 0x136   : > { %v11580_v56 = vpop.permute.xlu1 %1405  ;;  %16910 = vst [vmem:[#allocation70_spill] sm:$0xff] %v11598_v3 }
 0x137   : > { %16903 = vst [vmem:[#allocation63_spill] sm:$0xff] %v11580_v56  ;;  %v11582_v59 = vpop.permute.xlu0 %1403 }
 0x138   : > { %16904 = vst [vmem:[#allocation64_spill] sm:$0xff] %v11582_v59  ;;  %1649 = vrot.lane.b32.xlu1 %v11584_v37, %s10785_s14  ;;  %v11608_v37 = vld [vmem:[#allocation2 + $0x1a2] sm:$0xff] }
 0x139   : > { %1647 = vrot.lane.b32.xlu0 %v11586_v36, %s10785_s14  ;;  %16913 = vst [vmem:[#allocation73_spill] sm:$0xff] %v11608_v37  ;;  %v11610_v36 = vld [vmem:[#allocation2 + $0x19a] sm:$0xff] }
 0x13a   : > { %v11592_v0 = vpop.permute.xlu1 %1409  ;;  %16914 = vst [vmem:[#allocation74_spill] sm:$0xff] %v11610_v36 }
 0x13b   : > { %16907 = vst [vmem:[#allocation67_spill] sm:$0xff] %v11592_v0  ;;  %v11594_v5 = vpop.permute.xlu0 %1407  ;;  %v11616_v0 = vld [vmem:[#allocation2 + $0x1ba] sm:$0xff] }
 0x13c   : > { %16908 = vst [vmem:[#allocation68_spill] sm:$0xff] %v11594_v5  ;;  %1653 = vrot.lane.b32.xlu1 %v11596_v4, %s10785_s14  ;;  %v11618_v5 = vld [vmem:[#allocation2 + $0x1b2] sm:$0xff] }
 0x13d   : > { %1651 = vrot.lane.b32.xlu0 %v11598_v3, %s10785_s14 }
 0x13e   : > { %v11604_v59 = vpop.permute.xlu1 %1477 }
 0x13f   : > { %16911 = vst [vmem:[#allocation71_spill] sm:$0xff] %v11604_v59  ;;  %v11606_v56 = vpop.permute.xlu0 %1475  ;;  %v11630_v59 = vld [vmem:[#allocation2 + $0x1ca] sm:$0xff] }
 0x140   : > { %16912 = vst [vmem:[#allocation72_spill] sm:$0xff] %v11606_v56  ;;  %1657 = vrot.lane.b32.xlu1 %v11608_v37, %s10785_s14  ;;  %v11628_v56 = vld [vmem:[#allocation2 + $0x1d2] sm:$0xff] }
 0x141   : > { %1655 = vrot.lane.b32.xlu0 %v11610_v36, %s10785_s14 }
 0x142   : > { %v11620_v4 = vpop.permute.xlu1 %1481 }
 0x143   : > { %16915 = vst [vmem:[#allocation75_spill] sm:$0xff] %v11620_v4  ;;  %v11622_v3 = vpop.permute.xlu0 %1479 }
 0x144   : > { %16916 = vst [vmem:[#allocation76_spill] sm:$0xff] %v11622_v3  ;;  %1661 = vrot.lane.b32.xlu1 %v11616_v0, %s10785_s14 }
 0x145   : > { %1659 = vrot.lane.b32.xlu0 %v11618_v5, %s10785_s14 }
 0x146   : > { %v11632_v37 = vpop.permute.xlu1 %1485 }
 0x147   : > { %16917 = vst [vmem:[#allocation77_spill] sm:$0xff] %v11632_v37  ;;  %v11634_v36 = vpop.permute.xlu0 %1483 }
 0x148   : > { %16918 = vst [vmem:[#allocation78_spill] sm:$0xff] %v11634_v36  ;;  %1665 = vrot.lane.b32.xlu1 %v11628_v56, %s10785_s14 }
 0x149   : > { %1663 = vrot.lane.b32.xlu0 %v11630_v59, %s10785_s14 }
 0x14a   : > { %v11640_v3 = vpop.permute.xlu1 %1489 }
 0x14b   : > { %16919 = vst [vmem:[#allocation79_spill] sm:$0xff] %v11640_v3  ;;  %v11642_v4 = vpop.permute.xlu0 %1487 }
 0x14c   : > { %16920 = vst [vmem:[#allocation80_spill] sm:$0xff] %v11642_v4  ;;  %1701 = vrot.lane.b32.xlu1 %v11189_v24, %s10786_s16 }
 0x14d   : > { %1699 = vrot.lane.b32.xlu0 %v11191_v25, %s10786_s16 }
 0x14e   : > { %v11648_v37 = vpop.permute.xlu1 %1493 }
 0x14f   : > { %v11650_v36 = vpop.permute.xlu0 %1491 }
 0x150   : > { %1705 = vrot.lane.b32.xlu1 %v11209_v30, %s10786_s16 }
 0x151   : > { %1703 = vrot.lane.b32.xlu0 %v11211_v31, %s10786_s16 }
 0x152   : > { %v11656_v3 = vpop.permute.xlu1 %1497 }
 0x153   : > { %16921 = vst [vmem:[#allocation81_spill] sm:$0xff] %v11656_v3  ;;  %v11658_v4 = vpop.permute.xlu0 %1495  ;;  %v17103_v3 = vld [vmem:[#allocation19_spill] sm:$0xff] }
 0x154   : > { %16922 = vst [vmem:[#allocation82_spill] sm:$0xff] %v11658_v4  ;;  %1709 = vrot.lane.b32.xlu1 %v11219_v33, %s10786_s16 }
 0x155   : > { %1707 = vrot.lane.b32.xlu0 %v11221_v34, %s10786_s16 }
 0x156   : > { %v11664_v24 = vpop.permute.xlu1 %1501 }
 0x157   : > { %16923 = vst [vmem:[#allocation83_spill] sm:$0xff] %v11664_v24  ;;  %v11666_v25 = vpop.permute.xlu0 %1499 }
 0x158   : > { %16924 = vst [vmem:[#allocation84_spill] sm:$0xff] %v11666_v25  ;;  %1713 = vrot.lane.b32.xlu1 %v11235_v39, %s10786_s16 }
 0x159   : > { %1711 = vrot.lane.b32.xlu0 %v11237_v40, %s10786_s16 }
 0x15a   : > { %v11672_v30 = vpop.permute.xlu1 %1505 }
 0x15b   : > { %16925 = vst [vmem:[#allocation85_spill] sm:$0xff] %v11672_v30  ;;  %v11674_v31 = vpop.permute.xlu0 %1503  ;;  %v1259_v30 = vld [vmem:[#allocation2 + $0xf4] sm:$0xff] }
 0x15c   : > { %16926 = vst [vmem:[#allocation86_spill] sm:$0xff] %v11674_v31  ;;  %1717 = vrot.lane.b32.xlu1 %v11244_v41, %s10786_s16  ;;  %v1260_v31 = vld [vmem:[#allocation2 + $0xfc] sm:$0xff] }
 0x15d   : > { %1715 = vrot.lane.b32.xlu0 %v11246_v42, %s10786_s16 }
 0x15e   : > { %v11680_v33 = vpop.permute.xlu1 %1509 }
 0x15f   : > { %16927 = vst [vmem:[#allocation87_spill] sm:$0xff] %v11680_v33  ;;  %v11682_v34 = vpop.permute.xlu0 %1507  ;;  %v12056_v33 = vld [vmem:[#allocation2 + $0xc4] sm:$0xff] }
 0x160   : > { %16928 = vst [vmem:[#allocation88_spill] sm:$0xff] %v11682_v34  ;;  %1721 = vrot.lane.b32.xlu1 %v11252_v43, %s10786_s16 }
 0x161   : > { %1719 = vrot.lane.b32.xlu0 %v11254_v44, %s10786_s16 }
 0x162   : > { %v11688_v39 = vpop.permute.xlu1 %1513 }
 0x163   : > { %16929 = vst [vmem:[#allocation89_spill] sm:$0xff] %v11688_v39  ;;  %v11690_v40 = vpop.permute.xlu0 %1511 }
 0x164   : > { %16930 = vst [vmem:[#allocation90_spill] sm:$0xff] %v11690_v40  ;;  %1725 = vrot.lane.b32.xlu1 %v11260_v45, %s10786_s16  ;;  %v16995_v40 = vld [vmem:[#allocation49_spill] sm:$0xff] }
 0x165   : > { %1723 = vrot.lane.b32.xlu0 %v11262_v46, %s10786_s16 }
 0x166   : > { %v11696_v41 = vpop.permute.xlu1 %1517 }
 0x167   : > { %16931 = vst [vmem:[#allocation91_spill] sm:$0xff] %v11696_v41  ;;  %v11698_v42 = vpop.permute.xlu0 %1515 }
 0x168   : > { %16932 = vst [vmem:[#allocation92_spill] sm:$0xff] %v11698_v42  ;;  %1729 = vrot.lane.b32.xlu1 %v11268_v47, %s10786_s16  ;;  %v16987_v42 = vld [vmem:[#allocation41_spill] sm:$0xff] }
 0x169   : > { %1727 = vrot.lane.b32.xlu0 %v11270_v48, %s10786_s16 }
 0x16a   : > { %v11704_v43 = vpop.permute.xlu1 %1521 }
 0x16b   : > { %16933 = vst [vmem:[#allocation93_spill] sm:$0xff] %v11704_v43  ;;  %v11706_v44 = vpop.permute.xlu0 %1519 }
 0x16c   : > { %16934 = vst [vmem:[#allocation94_spill] sm:$0xff] %v11706_v44  ;;  %1733 = vrot.lane.b32.xlu1 %v11276_v49, %s10786_s16 }
 0x16d   : > { %1731 = vrot.lane.b32.xlu0 %v11278_v50, %s10786_s16 }
 0x16e   : > { %v11712_v45 = vpop.permute.xlu1 %1525 }
 0x16f   : > { %16935 = vst [vmem:[#allocation95_spill] sm:$0xff] %v11712_v45  ;;  %v11714_v46 = vpop.permute.xlu0 %1523 }
 0x170   : > { %16936 = vst [vmem:[#allocation96_spill] sm:$0xff] %v11714_v46  ;;  %1737 = vrot.lane.b32.xlu1 %v11284_v51, %s10786_s16 }
 0x171   : > { %1735 = vrot.lane.b32.xlu0 %v11286_v52, %s10786_s16 }
 0x172   : > { %v11720_v47 = vpop.permute.xlu1 %1529 }
 0x173   : > { %16937 = vst [vmem:[#allocation97_spill] sm:$0xff] %v11720_v47  ;;  %v11722_v48 = vpop.permute.xlu0 %1527 }
 0x174   : > { %16938 = vst [vmem:[#allocation98_spill] sm:$0xff] %v11722_v48  ;;  %1741 = vrot.lane.b32.xlu1 %v11292_v53, %s10786_s16 }
 0x175   : > { %1739 = vrot.lane.b32.xlu0 %v11294_v54, %s10786_s16 }
 0x176   : > { %v11728_v49 = vpop.permute.xlu1 %1533 }
 0x177   : > { %16939 = vst [vmem:[#allocation99_spill] sm:$0xff] %v11728_v49  ;;  %v11730_v50 = vpop.permute.xlu0 %1531 }
 0x178   : > { %16940 = vst [vmem:[#allocation100_spill] sm:$0xff] %v11730_v50  ;;  %1745 = vrot.lane.b32.xlu1 %v11304_v57, %s10786_s16  ;;  %v11752_v57 = vld [vmem:[#allocation2 + $0x1bc] sm:$0xff] }
 0x179   : > { %1743 = vrot.lane.b32.xlu0 %v11306_v58, %s10786_s16  ;;  %v11754_v58 = vld [vmem:[#allocation2 + $0x1b4] sm:$0xff] }
 0x17a   : > { %v11736_v51 = vpop.permute.xlu1 %1537 }
 0x17b   : > { %16941 = vst [vmem:[#allocation101_spill] sm:$0xff] %v11736_v51  ;;  %v11738_v52 = vpop.permute.xlu0 %1535 }
 0x17c   : > { %16942 = vst [vmem:[#allocation102_spill] sm:$0xff] %v11738_v52  ;;  %1749 = vrot.lane.b32.xlu1 %v11316_v61, %s10786_s16 }
 0x17d   : > { %1747 = vrot.lane.b32.xlu0 %v11318_v62, %s10786_s16  ;;  %v11764_v62 = vld [vmem:[#allocation2 + $0x1d4] sm:$0xff] }
 0x17e   : > { %v11744_v53 = vpop.permute.xlu1 %1605 }
 0x17f   : > { %v11746_v54 = vpop.permute.xlu0 %1603 }
 0x180   : > { %1753 = vrot.lane.b32.xlu1 %v11324_v63, %s10786_s16  ;;  %v11766_v63 = vld [vmem:[#allocation2 + $0x1cc] sm:$0xff] }
 0x181   : > { %1751 = vrot.lane.b32.xlu0 %v11326_v1, %s10786_s16 }
 0x182   : > { %v11756_v51 = vpop.permute.xlu1 %1609 }
 0x183   : > { %v11758_v61 = vpop.permute.xlu0 %1607 }
 0x184   : > { %1757 = vrot.lane.b32.xlu1 %v11752_v57, %s10786_s16 }
 0x185   : > { %1755 = vrot.lane.b32.xlu0 %v11754_v58, %s10786_s16 }
 0x186   : > { %v11768_v52 = vpop.permute.xlu1 %1613 }
 0x187   : > { %v11770_v1 = vpop.permute.xlu0 %1611 }
 0x188   : > { %1761 = vrot.lane.b32.xlu1 %v11764_v62, %s10786_s16 }
 0x189   : > { %1759 = vrot.lane.b32.xlu0 %v11766_v63, %s10786_s16  ;;  %s8864_s16 = sshll.u32 %s10861_s9, 12 }
 0x18a   : > { %v11776_v50 = vpop.permute.xlu1 %1617  ;;  %s16692_s22 = scalar_lea.hbm %s16754_s8, %s8864_s16 }
 0x18b   : > { %v11778_v49 = vpop.permute.xlu0 %1615 }
 0x18c   : > { %1829 = vrot.lane.b32.xlu1 %v11336_v6, %s10787_s12 }
 0x18d   : > { %1827 = vrot.lane.b32.xlu0 %v11338_v7, %s10787_s12 }
 0x18e   : > { %v11784_v48 = vpop.permute.xlu1 %1621 }
 0x18f   : > { %16943 = vst [vmem:[#allocation103_spill] sm:$0xff] %v11784_v48  ;;  %v11786_v47 = vpop.permute.xlu0 %1619  ;;  %v10526_v48 = vld [vmem:[#allocation2 + $0xca] sm:$0xff] }
 0x190   : > { %16944 = vst [vmem:[#allocation104_spill] sm:$0xff] %v11786_v47  ;;  %1833 = vrot.lane.b32.xlu1 %v11344_v8, %s10787_s12  ;;  %v10523_v47 = vld [vmem:[#allocation2 + $0xb2] sm:$0xff] }
 0x191   : > { %1831 = vrot.lane.b32.xlu0 %v11346_v9, %s10787_s12 }
 0x192   : > { %v11792_v46 = vpop.permute.xlu1 %1625 }
 0x193   : > { %16945 = vst [vmem:[#allocation105_spill] sm:$0xff] %v11792_v46  ;;  %v11794_v45 = vpop.permute.xlu0 %1623 }
 0x194   : > { %16946 = vst [vmem:[#allocation106_spill] sm:$0xff] %v11794_v45  ;;  %1837 = vrot.lane.b32.xlu1 %v11352_v10, %s10787_s12 }
 0x195   : > { %1835 = vrot.lane.b32.xlu0 %v11354_v11, %s10787_s12 }
 0x196   : > { %v11800_v6 = vpop.permute.xlu1 %1629 }
 0x197   : > { %16947 = vst [vmem:[#allocation107_spill] sm:$0xff] %v11800_v6  ;;  %v11802_v7 = vpop.permute.xlu0 %1627  ;;  %v1261_v6 = vld [vmem:[#allocation2 + $0x10c] sm:$0xff] }
 0x198   : > { %16948 = vst [vmem:[#allocation108_spill] sm:$0xff] %v11802_v7  ;;  %1841 = vrot.lane.b32.xlu1 %v11360_v12, %s10787_s12  ;;  %v1262_v7 = vld [vmem:[#allocation2 + $0x114] sm:$0xff] }
 0x199   : > { %1839 = vrot.lane.b32.xlu0 %v11362_v13, %s10787_s12 }
 0x19a   : > { %v11808_v8 = vpop.permute.xlu1 %1633 }
 0x19b   : > { %16949 = vst [vmem:[#allocation109_spill] sm:$0xff] %v11808_v8  ;;  %v11810_v9 = vpop.permute.xlu0 %1631 }
 0x19c   : > { %16950 = vst [vmem:[#allocation110_spill] sm:$0xff] %v11810_v9  ;;  %1845 = vrot.lane.b32.xlu1 %v11368_v14, %s10787_s12 }
 0x19d   : > { %1843 = vrot.lane.b32.xlu0 %v11370_v15, %s10787_s12 }
 0x19e   : > { %v11816_v10 = vpop.permute.xlu1 %1637 }
 0x19f   : > { %16951 = vst [vmem:[#allocation111_spill] sm:$0xff] %v11816_v10  ;;  %v11818_v11 = vpop.permute.xlu0 %1635 }
 0x1a0   : > { %16952 = vst [vmem:[#allocation112_spill] sm:$0xff] %v11818_v11  ;;  %1849 = vrot.lane.b32.xlu1 %v11376_v16, %s10787_s12  ;;  %v16999_v11 = vld [vmem:[#allocation53_spill] sm:$0xff] }
 0x1a1   : > { %1847 = vrot.lane.b32.xlu0 %v11378_v17, %s10787_s12 }
 0x1a2   : > { %v11824_v12 = vpop.permute.xlu1 %1641 }
 0x1a3   : > { %16953 = vst [vmem:[#allocation113_spill] sm:$0xff] %v11824_v12  ;;  %v11826_v13 = vpop.permute.xlu0 %1639 }
 0x1a4   : > { %16954 = vst [vmem:[#allocation114_spill] sm:$0xff] %v11826_v13  ;;  %1853 = vrot.lane.b32.xlu1 %v11384_v18, %s10787_s12  ;;  %v16991_v13 = vld [vmem:[#allocation45_spill] sm:$0xff] }
 0x1a5   : > { %1851 = vrot.lane.b32.xlu0 %v11386_v19, %s10787_s12 }
 0x1a6   : > { %v11832_v14 = vpop.permute.xlu1 %1645 }
 0x1a7   : > { %16955 = vst [vmem:[#allocation115_spill] sm:$0xff] %v11832_v14  ;;  %v11834_v15 = vpop.permute.xlu0 %1643 }
 0x1a8   : > { %16956 = vst [vmem:[#allocation116_spill] sm:$0xff] %v11834_v15  ;;  %1857 = vrot.lane.b32.xlu1 %v11392_v20, %s10787_s12  ;;  %v16983_v15 = vld [vmem:[#allocation37_spill] sm:$0xff] }
 0x1a9   : > { %1855 = vrot.lane.b32.xlu0 %v11394_v21, %s10787_s12 }
 0x1aa   : > { %v11840_v16 = vpop.permute.xlu1 %1649 }
 0x1ab   : > { %16957 = vst [vmem:[#allocation117_spill] sm:$0xff] %v11840_v16  ;;  %v11842_v17 = vpop.permute.xlu0 %1647  ;;  %v16980_v16 = vld [vmem:[#allocation34_spill] sm:$0xff] }
 0x1ac   : > { %16958 = vst [vmem:[#allocation118_spill] sm:$0xff] %v11842_v17  ;;  %1861 = vrot.lane.b32.xlu1 %v11400_v22, %s10787_s12  ;;  %v16979_v17 = vld [vmem:[#allocation33_spill] sm:$0xff] }
 0x1ad   : > { %1859 = vrot.lane.b32.xlu0 %v11402_v23, %s10787_s12 }
 0x1ae   : > { %v11848_v18 = vpop.permute.xlu1 %1653 }
 0x1af   : > { %16959 = vst [vmem:[#allocation119_spill] sm:$0xff] %v11848_v18  ;;  %v11850_v19 = vpop.permute.xlu0 %1651 }
 0x1b0   : > { %16960 = vst [vmem:[#allocation120_spill] sm:$0xff] %v11850_v19  ;;  %1865 = vrot.lane.b32.xlu1 %v11408_v26, %s10787_s12 }
 0x1b1   : > { %1863 = vrot.lane.b32.xlu0 %v11410_v27, %s10787_s12 }
 0x1b2   : > { %v11856_v20 = vpop.permute.xlu1 %1657 }
 0x1b3   : > { %16961 = vst [vmem:[#allocation121_spill] sm:$0xff] %v11856_v20  ;;  %v11858_v21 = vpop.permute.xlu0 %1655 }
 0x1b4   : > { %16962 = vst [vmem:[#allocation122_spill] sm:$0xff] %v11858_v21  ;;  %1869 = vrot.lane.b32.xlu1 %v11416_v28, %s10787_s12 }
 0x1b5   : > { %1867 = vrot.lane.b32.xlu0 %v11418_v29, %s10787_s12 }
 0x1b6   : > { %v11864_v22 = vpop.permute.xlu1 %1661 }
 0x1b7   : > { %16963 = vst [vmem:[#allocation123_spill] sm:$0xff] %v11864_v22  ;;  %v11866_v23 = vpop.permute.xlu0 %1659 }
 0x1b8   : > { %16964 = vst [vmem:[#allocation124_spill] sm:$0xff] %v11866_v23  ;;  %1873 = vrot.lane.b32.xlu1 %v11424_v32, %s10787_s12  ;;  %v16969_v23 = vld [vmem:[#allocation21_spill] sm:$0xff]  ;;  %v16970_v32 = vld [vmem:[#allocation22_spill] sm:$0xff] }
 0x1b9   : > { %1871 = vrot.lane.b32.xlu0 %v11426_v35, %s10787_s12  ;;  %v11888_v35 = vld [vmem:[#allocation2 + $0x1be] sm:$0xff] }
 0x1ba   : > { %v11872_v26 = vpop.permute.xlu1 %1665 }
 0x1bb   : > { %16965 = vst [vmem:[#allocation125_spill] sm:$0xff] %v11872_v26  ;;  %v11874_v27 = vpop.permute.xlu0 %1663  ;;  %v11890_v26 = vld [vmem:[#allocation2 + $0x1b6] sm:$0xff] }
 0x1bc   : > { %16966 = vst [vmem:[#allocation126_spill] sm:$0xff] %v11874_v27  ;;  %1877 = vrot.lane.b32.xlu1 %v11436_v38, %s10787_s12 }
 0x1bd   : > { %1875 = vrot.lane.b32.xlu0 %v11438_v55, %s10787_s12  ;;  %v11900_v55 = vld [vmem:[#allocation2 + $0x1d6] sm:$0xff] }
 0x1be   : > { %v11880_v28 = vpop.permute.xlu1 %1701 }
 0x1bf   : > { %16967 = vst [vmem:[#allocation127_spill] sm:$0xff] %v11880_v28  ;;  %v11882_v29 = vpop.permute.xlu0 %1699 }
 0x1c0   : > { %16968 = vst [vmem:[#allocation128_spill] sm:$0xff] %v11882_v29  ;;  %1881 = vrot.lane.b32.xlu1 %v16969_v23, %s10787_s12  ;;  %v11902_v23 = vld [vmem:[#allocation2 + $0x1ce] sm:$0xff] }
 0x1c1   : > { %1879 = vrot.lane.b32.xlu0 %v16970_v32, %s10787_s12 }
 0x1c2   : > { %v11892_v27 = vpop.permute.xlu1 %1705 }
 0x1c3   : > { %16971 = vst [vmem:[#allocation21_spill] sm:$0xff] %v11892_v27  ;;  %v11894_v38 = vpop.permute.xlu0 %1703 }
 0x1c4   : > { %16972 = vst [vmem:[#allocation22_spill] sm:$0xff] %v11894_v38  ;;  %1885 = vrot.lane.b32.xlu1 %v11888_v35, %s10787_s12 }
 0x1c5   : > { %1883 = vrot.lane.b32.xlu0 %v11890_v26, %s10787_s12 }
 0x1c6   : > { %v11904_v22 = vpop.permute.xlu1 %1709 }
 0x1c7   : > { %16973 = vst [vmem:[#allocation129_spill] sm:$0xff] %v11904_v22  ;;  %v11906_v32 = vpop.permute.xlu0 %1707 }
 0x1c8   : > { %16974 = vst [vmem:[#allocation130_spill] sm:$0xff] %v11906_v32  ;;  %1889 = vrot.lane.b32.xlu1 %v11900_v55, %s10787_s12 }
 0x1c9   : > { %1887 = vrot.lane.b32.xlu0 %v11902_v23, %s10787_s12 }
 0x1ca   : > { %v11912_v21 = vpop.permute.xlu1 %1713 }
 0x1cb   : > { %16975 = vst [vmem:[#allocation131_spill] sm:$0xff] %v11912_v21  ;;  %v11914_v20 = vpop.permute.xlu0 %1711 }
 0x1cc   : > { %16976 = vst [vmem:[#allocation132_spill] sm:$0xff] %v11914_v20  ;;  %1957 = vrot.lane.b32.xlu1 %v11476_v2, %s10788_s13  ;;  %v16984_v2 = vld [vmem:[#allocation38_spill] sm:$0xff] }
 0x1cd   : > { %1955 = vrot.lane.b32.xlu0 %v11478_v60, %s10788_s13 }
 0x1ce   : > { %v11920_v19 = vpop.permute.xlu1 %1717 }
 0x1cf   : > { %16977 = vst [vmem:[#allocation133_spill] sm:$0xff] %v11920_v19  ;;  %v11922_v18 = vpop.permute.xlu0 %1715  ;;  %v12383_v19 = vld [vmem:[#allocation2 + $0xb7] sm:$0xff] }
 0x1d0   : > { %16978 = vst [vmem:[#allocation134_spill] sm:$0xff] %v11922_v18  ;;  %1961 = vrot.lane.b32.xlu1 %v16979_v17, %s10788_s13  ;;  %v16988_v17 = vld [vmem:[#allocation42_spill] sm:$0xff] }
 0x1d1   : > { %1959 = vrot.lane.b32.xlu0 %v16980_v16, %s10788_s13 }
 0x1d2   : > { %v11928_v44 = vpop.permute.xlu1 %1721 }
 0x1d3   : > { %16981 = vst [vmem:[#allocation33_spill] sm:$0xff] %v11928_v44  ;;  %v11930_v43 = vpop.permute.xlu0 %1719 }
 0x1d4   : > { %16982 = vst [vmem:[#allocation34_spill] sm:$0xff] %v11930_v43  ;;  %1965 = vrot.lane.b32.xlu1 %v16983_v15, %s10788_s13  ;;  %v16992_v15 = vld [vmem:[#allocation46_spill] sm:$0xff] }
 0x1d5   : > { %1963 = vrot.lane.b32.xlu0 %v16984_v2, %s10788_s13 }
 0x1d6   : > { %v11936_v60 = vpop.permute.xlu1 %1725 }
 0x1d7   : > { %16985 = vst [vmem:[#allocation37_spill] sm:$0xff] %v11936_v60  ;;  %v11938_v14 = vpop.permute.xlu0 %1723 }
 0x1d8   : > { %16986 = vst [vmem:[#allocation38_spill] sm:$0xff] %v11938_v14  ;;  %1969 = vrot.lane.b32.xlu1 %v16987_v42, %s10788_s13  ;;  %v16996_v42 = vld [vmem:[#allocation50_spill] sm:$0xff] }
 0x1d9   : > { %1967 = vrot.lane.b32.xlu0 %v16988_v17, %s10788_s13 }
 0x1da   : > { %v11944_v16 = vpop.permute.xlu1 %1729 }
 0x1db   : > { %16989 = vst [vmem:[#allocation41_spill] sm:$0xff] %v11944_v16  ;;  %v11946_v41 = vpop.permute.xlu0 %1727  ;;  %v1257_v16 = vld [vmem:[#allocation2 + $0xdc] sm:$0xff] }
 0x1dc   : > { %16990 = vst [vmem:[#allocation42_spill] sm:$0xff] %v11946_v41  ;;  %1973 = vrot.lane.b32.xlu1 %v16991_v13, %s10788_s13  ;;  %v17000_v13 = vld [vmem:[#allocation54_spill] sm:$0xff] }
 0x1dd   : > { %1971 = vrot.lane.b32.xlu0 %v16992_v15, %s10788_s13  ;;  %v1258_v41 = vld [vmem:[#allocation2 + $0xe4] sm:$0xff] }
 0x1de   : > { %v11952_v2 = vpop.permute.xlu1 %1733 }
 0x1df   : > { %16993 = vst [vmem:[#allocation45_spill] sm:$0xff] %v11952_v2  ;;  %v11954_v12 = vpop.permute.xlu0 %1731 }
 0x1e0   : > { %16994 = vst [vmem:[#allocation46_spill] sm:$0xff] %v11954_v12  ;;  %1977 = vrot.lane.b32.xlu1 %v16995_v40, %s10788_s13  ;;  %v17003_v12 = vld [vmem:[#allocation57_spill] sm:$0xff]  ;;  %v17004_v40 = vld [vmem:[#allocation58_spill] sm:$0xff] }
 0x1e1   : > { %1975 = vrot.lane.b32.xlu0 %v16996_v42, %s10788_s13 }
 0x1e2   : > { %v11960_v17 = vpop.permute.xlu1 %1737 }
 0x1e3   : > { %16997 = vst [vmem:[#allocation49_spill] sm:$0xff] %v11960_v17  ;;  %v11962_v39 = vpop.permute.xlu0 %1735 }
 0x1e4   : > { %16998 = vst [vmem:[#allocation50_spill] sm:$0xff] %v11962_v39  ;;  %1981 = vrot.lane.b32.xlu1 %v16999_v11, %s10788_s13  ;;  %v17007_v39 = vld [vmem:[#allocation61_spill] sm:$0xff]  ;;  %v17008_v11 = vld [vmem:[#allocation62_spill] sm:$0xff] }
 0x1e5   : > { %1979 = vrot.lane.b32.xlu0 %v17000_v13, %s10788_s13 }
 0x1e6   : > { %v11968_v15 = vpop.permute.xlu1 %1741 }
 0x1e7   : > { %17001 = vst [vmem:[#allocation53_spill] sm:$0xff] %v11968_v15  ;;  %v11970_v2 = vpop.permute.xlu0 %1739 }
 0x1e8   : > { %17002 = vst [vmem:[#allocation54_spill] sm:$0xff] %v11970_v2  ;;  %1985 = vrot.lane.b32.xlu1 %v17003_v12, %s10788_s13  ;;  %v17011_v2 = vld [vmem:[#allocation65_spill] sm:$0xff]  ;;  %v17012_v12 = vld [vmem:[#allocation66_spill] sm:$0xff] }
 0x1e9   : > { %1983 = vrot.lane.b32.xlu0 %v17004_v40, %s10788_s13 }
 0x1ea   : > { %v11976_v42 = vpop.permute.xlu1 %1745 }
 0x1eb   : > { %17005 = vst [vmem:[#allocation57_spill] sm:$0xff] %v11976_v42  ;;  %v11978_v17 = vpop.permute.xlu0 %1743 }
 0x1ec   : > { %17006 = vst [vmem:[#allocation58_spill] sm:$0xff] %v11978_v17  ;;  %1989 = vrot.lane.b32.xlu1 %v17007_v39, %s10788_s13  ;;  %v17015_v17 = vld [vmem:[#allocation69_spill] sm:$0xff]  ;;  %v17016_v39 = vld [vmem:[#allocation70_spill] sm:$0xff] }
 0x1ed   : > { %1987 = vrot.lane.b32.xlu0 %v17008_v11, %s10788_s13 }
 0x1ee   : > { %v11984_v13 = vpop.permute.xlu1 %1749 }
 0x1ef   : > { %17009 = vst [vmem:[#allocation61_spill] sm:$0xff] %v11984_v13  ;;  %v11986_v15 = vpop.permute.xlu0 %1747 }
 0x1f0   : > { %17010 = vst [vmem:[#allocation62_spill] sm:$0xff] %v11986_v15  ;;  %1993 = vrot.lane.b32.xlu1 %v17011_v2, %s10788_s13  ;;  %v17019_v15 = vld [vmem:[#allocation73_spill] sm:$0xff]  ;;  %v17020_v2 = vld [vmem:[#allocation74_spill] sm:$0xff] }
 0x1f1   : > { %1991 = vrot.lane.b32.xlu0 %v17012_v12, %s10788_s13 }
 0x1f2   : > { %v11992_v40 = vpop.permute.xlu1 %1753 }
 0x1f3   : > { %17013 = vst [vmem:[#allocation65_spill] sm:$0xff] %v11992_v40  ;;  %v11994_v42 = vpop.permute.xlu0 %1751 }
 0x1f4   : > { %17014 = vst [vmem:[#allocation66_spill] sm:$0xff] %v11994_v42  ;;  %1997 = vrot.lane.b32.xlu1 %v17015_v17, %s10788_s13 }
 0x1f5   : > { %1995 = vrot.lane.b32.xlu0 %v17016_v39, %s10788_s13 }
 0x1f6   : > { %v12000_v11 = vpop.permute.xlu1 %1757 }
 0x1f7   : > { %17017 = vst [vmem:[#allocation69_spill] sm:$0xff] %v12000_v11  ;;  %v12002_v13 = vpop.permute.xlu0 %1755 }
 0x1f8   : > { %17018 = vst [vmem:[#allocation70_spill] sm:$0xff] %v12002_v13  ;;  %2001 = vrot.lane.b32.xlu1 %v17019_v15, %s10788_s13  ;;  %v1248_v15 = vld [vmem:[#allocation2 + $0x1ea] sm:$0xff] }
 0x1f9   : > { %1999 = vrot.lane.b32.xlu0 %v17020_v2, %s10788_s13  ;;  %v1247_v2 = vld [vmem:[#allocation2 + $0x1e2] sm:$0xff] }
 0x1fa   : > { %v12008_v12 = vpop.permute.xlu1 %1761 }
 0x1fb   : > { %17021 = vst [vmem:[#allocation73_spill] sm:$0xff] %v12008_v12  ;;  %v12010_v40 = vpop.permute.xlu0 %1759 }
 0x1fc   : > { %17022 = vst [vmem:[#allocation74_spill] sm:$0xff] %v12010_v40  ;;  %2005 = vrot.lane.b32.xlu1 %v11616_v0, %s10788_s13  ;;  %v1250_v0 = vld [vmem:[#allocation2 + $0x202] sm:$0xff] }
 0x1fd   : > { %2003 = vrot.lane.b32.xlu0 %v11618_v5, %s10788_s13  ;;  %v1249_v5 = vld [vmem:[#allocation2 + $0x1fa] sm:$0xff] }
 0x1fe   : > { %v12016_v17 = vpop.permute.xlu1 %1829 }
 0x1ff   : > { %v12018_v39 = vpop.permute.xlu0 %1827 }
 0x200   : > { %2009 = vrot.lane.b32.xlu1 %v11628_v56, %s10788_s13  ;;  %v1252_v56 = vld [vmem:[#allocation2 + $0x9c] sm:$0xff] }
 0x201   : > { %2007 = vrot.lane.b32.xlu0 %v11630_v59, %s10788_s13  ;;  %v1251_v59 = vld [vmem:[#allocation2 + $0x94] sm:$0xff] }
 0x202   : > { %v12024_v12 = vpop.permute.xlu1 %1833 }
 0x203   : > { %v12026_v40 = vpop.permute.xlu0 %1831 }
 0x204   : > { %2013 = vrot.lane.b32.xlu1 %v1248_v15, %s10788_s13  ;;  %v12042_v15 = vld [vmem:[#allocation2 + $0xb4] sm:$0xff] }
 0x205   : > { %2011 = vrot.lane.b32.xlu0 %v1247_v2, %s10788_s13  ;;  %v12044_v2 = vld [vmem:[#allocation2 + $0xac] sm:$0xff] }
 0x206   : > { %v12030_v13 = vpop.permute.xlu1 %1837 }
 0x207   : > { %v12032_v11 = vpop.permute.xlu0 %1835 }
 0x208   : > { %2017 = vrot.lane.b32.xlu1 %v1250_v0, %s10788_s13 }
 0x209   : > { %2015 = vrot.lane.b32.xlu0 %v1249_v5, %s10788_s13  ;;  %v12054_v5 = vld [vmem:[#allocation2 + $0xcc] sm:$0xff] }
 0x20a   : > { %v12036_v42 = vpop.permute.xlu1 %1841  ;;  %17027 = vst [vmem:[#allocation139_spill] sm:$0xff] %v12054_v5 }
 0x20b   : > { %17023 = vst [vmem:[#allocation135_spill] sm:$0xff] %v12036_v42  ;;  %v12038_v10 = vpop.permute.xlu0 %1839  ;;  %v17125_v42 = vld [vmem:[#allocation36_spill] sm:$0xff] }
 0x20c   : > { %17024 = vst [vmem:[#allocation136_spill] sm:$0xff] %v12038_v10  ;;  %2085 = vrot.lane.b32.xlu1 %v1252_v56, %s10789_s21  ;;  %v10527_v10 = vld [vmem:[#allocation2 + $0xc2] sm:$0xff] }
 0x20d   : > { %2083 = vrot.lane.b32.xlu0 %v1251_v59, %s10789_s21 }
 0x20e   : > { %v12046_v34 = vpop.permute.xlu1 %1845 }
 0x20f   : > { %17025 = vst [vmem:[#allocation137_spill] sm:$0xff] %v12046_v34  ;;  %v12048_v0 = vpop.permute.xlu0 %1843 }
 0x210   : > { %17026 = vst [vmem:[#allocation138_spill] sm:$0xff] %v12048_v0  ;;  %2089 = vrot.lane.b32.xlu1 %v12042_v15, %s10789_s21  ;;  %v17101_v0 = vld [vmem:[#allocation17_spill] sm:$0xff] }
 0x211   : > { %2087 = vrot.lane.b32.xlu0 %v12044_v2, %s10789_s21 }
 0x212   : > { %v12058_v56 = vpop.permute.xlu1 %1849 }
 0x213   : > { %17028 = vst [vmem:[#allocation140_spill] sm:$0xff] %v12058_v56  ;;  %v12060_v59 = vpop.permute.xlu0 %1847 }
 0x214   : > { %17029 = vst [vmem:[#allocation141_spill] sm:$0xff] %v12060_v59  ;;  %2093 = vrot.lane.b32.xlu1 %v12054_v5, %s10789_s21  ;;  %v17113_v5 = vld [vmem:[#allocation29_spill] sm:$0xff] }
 0x215   : > { %2091 = vrot.lane.b32.xlu0 %v12056_v33, %s10789_s21 }
 0x216   : > { %v12066_v9 = vpop.permute.xlu1 %1853 }
 0x217   : > { %17030 = vst [vmem:[#allocation142_spill] sm:$0xff] %v12066_v9  ;;  %v12068_v8 = vpop.permute.xlu0 %1851 }
 0x218   : > { %17031 = vst [vmem:[#allocation143_spill] sm:$0xff] %v12068_v8  ;;  %2097 = vrot.lane.b32.xlu1 %v1258_v41, %s10789_s21  ;;  %v1264_v41 = vld [vmem:[#allocation2 + $0x12c] sm:$0xff] }
 0x219   : > { %2095 = vrot.lane.b32.xlu0 %v1257_v16, %s10789_s21  ;;  %v1263_v16 = vld [vmem:[#allocation2 + $0x124] sm:$0xff] }
 0x21a   : > { %v12072_v14 = vpop.permute.xlu1 %1857 }
 0x21b   : > { %17032 = vst [vmem:[#allocation144_spill] sm:$0xff] %v12072_v14  ;;  %v12074_v60 = vpop.permute.xlu0 %1855 }
 0x21c   : > { %17033 = vst [vmem:[#allocation145_spill] sm:$0xff] %v12074_v60  ;;  %2101 = vrot.lane.b32.xlu1 %v1260_v31, %s10789_s21  ;;  %v1265_v31 = vld [vmem:[#allocation2 + $0x13c] sm:$0xff] }
 0x21d   : > { %2099 = vrot.lane.b32.xlu0 %v1259_v30, %s10789_s21  ;;  %v1266_v30 = vld [vmem:[#allocation2 + $0x144] sm:$0xff] }
 0x21e   : > { %v12078_v25 = vpop.permute.xlu1 %1861 }
 0x21f   : > { %17034 = vst [vmem:[#allocation146_spill] sm:$0xff] %v12078_v25  ;;  %v12080_v9 = vpop.permute.xlu0 %1859 }
 0x220   : > { %17035 = vst [vmem:[#allocation147_spill] sm:$0xff] %v12080_v9  ;;  %2105 = vrot.lane.b32.xlu1 %v1262_v7, %s10789_s21  ;;  %v1267_v7 = vld [vmem:[#allocation2 + $0x154] sm:$0xff] }
 0x221   : > { %2103 = vrot.lane.b32.xlu0 %v1261_v6, %s10789_s21  ;;  %v1268_v6 = vld [vmem:[#allocation2 + $0x15c] sm:$0xff] }
 0x222   : > { %v12084_v8 = vpop.permute.xlu1 %1865 }
 0x223   : > { %17036 = vst [vmem:[#allocation148_spill] sm:$0xff] %v12084_v8  ;;  %v12086_v14 = vpop.permute.xlu0 %1863 }
 0x224   : > { %17037 = vst [vmem:[#allocation149_spill] sm:$0xff] %v12086_v14  ;;  %2109 = vrot.lane.b32.xlu1 %v1264_v41, %s10789_s21  ;;  %v1270_v41 = vld [vmem:[#allocation2 + $0x174] sm:$0xff] }
 0x225   : > { %2107 = vrot.lane.b32.xlu0 %v1263_v16, %s10789_s21  ;;  %v1269_v16 = vld [vmem:[#allocation2 + $0x16c] sm:$0xff] }
 0x226   : > { %v12090_v60 = vpop.permute.xlu1 %1869 }
 0x227   : > { %17038 = vst [vmem:[#allocation150_spill] sm:$0xff] %v12090_v60  ;;  %v12092_v25 = vpop.permute.xlu0 %1867 }
 0x228   : > { %17039 = vst [vmem:[#allocation151_spill] sm:$0xff] %v12092_v25  ;;  %2113 = vrot.lane.b32.xlu1 %v1266_v30, %s10789_s21  ;;  %v1272_v30 = vld [vmem:[#allocation2 + $0x18c] sm:$0xff] }
 0x229   : > { %2111 = vrot.lane.b32.xlu0 %v1265_v31, %s10789_s21  ;;  %v1271_v31 = vld [vmem:[#allocation2 + $0x184] sm:$0xff] }
 0x22a   : > { %v12096_v9 = vpop.permute.xlu1 %1873 }
 0x22b   : > { %17040 = vst [vmem:[#allocation152_spill] sm:$0xff] %v12096_v9  ;;  %v12098_v8 = vpop.permute.xlu0 %1871 }
 0x22c   : > { %17041 = vst [vmem:[#allocation153_spill] sm:$0xff] %v12098_v8  ;;  %2117 = vrot.lane.b32.xlu1 %v1268_v6, %s10789_s21  ;;  %v2570_v6 = vld [vmem:[#allocation3] sm:$0xff] }
 0x22d   : > { %2115 = vrot.lane.b32.xlu0 %v1267_v7, %s10789_s21  ;;  %v2571_v7 = vld [vmem:[#allocation3 + $0x8] sm:$0xff] }
 0x22e   : > { %v12102_v14 = vpop.permute.xlu1 %1877  ;;  %v1274_v8 = vld [vmem:[#allocation2 + $0x1a4] sm:$0xff]  ;;  %v9804_v59 = vpack.c.bf16 %v2571_v7, %v2570_v6 }
 0x22f   : > { %17042 = vst [vmem:[#allocation154_spill] sm:$0xff] %v12102_v14  ;;  %v12104_v60 = vpop.permute.xlu0 %1875  ;;  %v1273_v14 = vld [vmem:[#allocation2 + $0x19c] sm:$0xff]  ;;  %v1282_v7 = vld [vmem:[#allocation2 + $0x204] sm:$0xff] }
 0x230   : > { %17043 = vst [vmem:[#allocation155_spill] sm:$0xff] %v12104_v60  ;;  %2121 = vrot.lane.b32.xlu1 %v1270_v41, %s10789_s21  ;;  %9805 = vmatprep.subr.bf16.mxu1 %v9804_v59 }
 0x231   : > { %2119 = vrot.lane.b32.xlu0 %v1269_v16, %s10789_s21  ;;  %v2572_v16 = vld [vmem:[#allocation3 + $0x10] sm:$0xff]  ;;  %9807 = vmatpush3.bf16.msra.mxu1 %v9804_v59 }
 0x232   : > { %v12108_v25 = vpop.permute.xlu1 %1881 }
 0x233   : > { %17044 = vst [vmem:[#allocation156_spill] sm:$0xff] %v12108_v25  ;;  %v12110_v9 = vpop.permute.xlu0 %1879 }
 0x234   : > { %17045 = vst [vmem:[#allocation157_spill] sm:$0xff] %v12110_v9  ;;  %2125 = vrot.lane.b32.xlu1 %v1272_v30, %s10789_s21  ;;  %v2573_v9 = vld [vmem:[#allocation3 + $0x18] sm:$0xff] }
 0x235   : > { %2123 = vrot.lane.b32.xlu0 %v1271_v31, %s10789_s21  ;;  %v9808_v30 = vpack.c.bf16 %v2573_v9, %v2572_v16  ;;  %v1280_v9 = vld [vmem:[#allocation2 + $0x1ec] sm:$0xff]  ;;  %v1281_v16 = vld [vmem:[#allocation2 + $0x1fc] sm:$0xff] }
 0x236   : > { %v12114_v60 = vpop.permute.xlu1 %1885 }
 0x237   : > { %17046 = vst [vmem:[#allocation158_spill] sm:$0xff] %v12114_v60  ;;  %v12116_v41 = vpop.permute.xlu0 %1883  ;;  %9809 = vmatprep.subr.bf16.mxu1 %v9808_v30 }
 0x238   : > { %17047 = vst [vmem:[#allocation159_spill] sm:$0xff] %v12116_v41  ;;  %2129 = vrot.lane.b32.xlu1 %v1274_v8, %s10789_s21  ;;  %9811 = vmatpush3.bf16.msra.mxu1 %v9808_v30 }
 0x239   : > { %2127 = vrot.lane.b32.xlu0 %v1273_v14, %s10789_s21  ;;  %v2574_v14 = vld [vmem:[#allocation3 + $0x20] sm:$0xf] }
 0x23a   : > { %v12120_v25 = vpop.permute.xlu1 %1889  ;;  %9278 = vmatprep.subr.msk.mxu1 %vm620_vm1, %v2574_v14 }
 0x23b   : > { %17048 = vst [vmem:[#allocation160_spill] sm:$0xff] %v12120_v25  ;;  %v12122_v31 = vpop.permute.xlu0 %1887 }
 0x23c   : > { %17049 = vst [vmem:[#allocation161_spill] sm:$0xff] %v12122_v31  ;;  %2133 = vrot.lane.b32.xlu1 %v11752_v57, %s10789_s21  ;;  %v1279_v57 = vld [vmem:[#allocation2 + $0x1e4] sm:$0xff]  ;;  %9279 = vmatpush3.msk.msra.mxu1 %vm620_vm1, %v2574_v14  ;;  %v1283_v14 = vld [vmem:[#allocation2 + $0x96] sm:$0xff] }
 0x23d   : > { %2131 = vrot.lane.b32.xlu0 %v11754_v58, %s10789_s21 }
 0x23e   : > { %v12128_v6 = vpop.permute.xlu1 %1957 }
 0x23f   : > { %v12130_v8 = vpop.permute.xlu0 %1955 }
 0x240   : > { %2137 = vrot.lane.b32.xlu1 %v11764_v62, %s10789_s21 }
 0x241   : > { %2135 = vrot.lane.b32.xlu0 %v11766_v63, %s10789_s21  ;;  %v1284_v63 = vld [vmem:[#allocation2 + $0x9e] sm:$0xff] }
 0x242   : > { %v12138_v58 = vpop.permute.xlu1 %1961 }
 0x243   : > { %v12140_v59 = vpop.permute.xlu0 %1959 }
 0x244   : > { %2141 = vrot.lane.b32.xlu1 %v1280_v9, %s10789_s21  ;;  %v1286_v9 = vld [vmem:[#allocation2 + $0xb6] sm:$0xff] }
 0x245   : > { %2139 = vrot.lane.b32.xlu0 %v1279_v57, %s10789_s21  ;;  %v1285_v57 = vld [vmem:[#allocation2 + $0xae] sm:$0xff] }
 0x246   : > { %v12144_v30 = vpop.permute.xlu1 %1965 }
 0x247   : > { %v12146_v62 = vpop.permute.xlu0 %1963 }
 0x248   : > { %2145 = vrot.lane.b32.xlu1 %v1282_v7, %s10789_s21  ;;  %v1288_v7 = vld [vmem:[#allocation2 + $0xce] sm:$0xff] }
 0x249   : > { %2143 = vrot.lane.b32.xlu0 %v1281_v16, %s10789_s21  ;;  %v1287_v16 = vld [vmem:[#allocation2 + $0xc6] sm:$0xff] }
 0x24a   : > { %v12150_v25 = vpop.permute.xlu1 %1969 }
 0x24b   : > { %17050 = vst [vmem:[#allocation162_spill] sm:$0xff] %v12150_v25  ;;  %v12152_v31 = vpop.permute.xlu0 %1967 }
 0x24c   : > { %17051 = vst [vmem:[#allocation163_spill] sm:$0xff] %v12152_v31  ;;  %2213 = vrot.lane.b32.xlu1 %v1284_v63, %s10790_s23  ;;  %v1290_v63 = vld [vmem:[#allocation2 + $0xe6] sm:$0xff]  ;;  %v12400_v31 = vsel %vm348_vm0, %v10523_v47, %v17113_v5  ;;  %v17121_v47 = vld [vmem:[#allocation32_spill] sm:$0xff] }
 0x24d   : > { %2211 = vrot.lane.b32.xlu0 %v1283_v14, %s10790_s23  ;;  %v1289_v14 = vld [vmem:[#allocation2 + $0xde] sm:$0xff]  ;;  %17114 = vst [vmem:[#allocation19_spill] sm:$0xff] %v12400_v31  ;;  %v12417_v5 = vsel %vm348_vm0, %v10527_v10, %v17121_v47  ;;  %v10533_v47 = vld [vmem:[#allocation2 + $0x10a] sm:$0xff] }
 0x24e   : > { %v12156_v41 = vpop.permute.xlu1 %1973 }
 0x24f   : > { %17052 = vst [vmem:[#allocation164_spill] sm:$0xff] %v12156_v41  ;;  %v12158_v60 = vpop.permute.xlu0 %1971  ;;  %v10500_v41 = vld [vmem:[#allocation2 + $0x84] sm:$0xff] }
 0x250   : > { %17053 = vst [vmem:[#allocation165_spill] sm:$0xff] %v12158_v60  ;;  %2217 = vrot.lane.b32.xlu1 %v1286_v9, %s10790_s23  ;;  %v1292_v9 = vld [vmem:[#allocation2 + $0xfe] sm:$0xff] }
 0x251   : > { %2215 = vrot.lane.b32.xlu0 %v1285_v57, %s10790_s23  ;;  %v1291_v57 = vld [vmem:[#allocation2 + $0xf6] sm:$0xff] }
 0x252   : > { %v12162_v56 = vpop.permute.xlu1 %1977  ;;  %v10499_v60 = vld [vmem:[#allocation2 + $0x7c] sm:$0xff] }
 0x253   : > { %17054 = vst [vmem:[#allocation166_spill] sm:$0xff] %v12162_v56  ;;  %v12164_v24 = vpop.permute.xlu0 %1975 }
 0x254   : > { %17055 = vst [vmem:[#allocation167_spill] sm:$0xff] %v12164_v24  ;;  %2221 = vrot.lane.b32.xlu1 %v1288_v7, %s10790_s23  ;;  %v1294_v7 = vld [vmem:[#allocation2 + $0x116] sm:$0xff] }
 0x255   : > { %2219 = vrot.lane.b32.xlu0 %v1287_v16, %s10790_s23  ;;  %v1293_v16 = vld [vmem:[#allocation2 + $0x10e] sm:$0xff] }
 0x256   : > { %v12168_v43 = vpop.permute.xlu1 %1981 }
 0x257   : > { %17056 = vst [vmem:[#allocation168_spill] sm:$0xff] %v12168_v43  ;;  %v12170_v44 = vpop.permute.xlu0 %1979 }
 0x258   : > { %17057 = vst [vmem:[#allocation169_spill] sm:$0xff] %v12170_v44  ;;  %2225 = vrot.lane.b32.xlu1 %v1290_v63, %s10790_s23  ;;  %v1296_v63 = vld [vmem:[#allocation2 + $0x12e] sm:$0xff] }
 0x259   : > { %2223 = vrot.lane.b32.xlu0 %v1289_v14, %s10790_s23  ;;  %v1295_v14 = vld [vmem:[#allocation2 + $0x126] sm:$0xff] }
 0x25a   : > { %v12174_v45 = vpop.permute.xlu1 %1985 }
 0x25b   : > { %17058 = vst [vmem:[#allocation170_spill] sm:$0xff] %v12174_v45  ;;  %v12176_v56 = vpop.permute.xlu0 %1983 }
 0x25c   : > { %17059 = vst [vmem:[#allocation171_spill] sm:$0xff] %v12176_v56  ;;  %2229 = vrot.lane.b32.xlu1 %v1292_v9, %s10790_s23  ;;  %v1298_v9 = vld [vmem:[#allocation2 + $0x146] sm:$0xff] }
 0x25d   : > { %2227 = vrot.lane.b32.xlu0 %v1291_v57, %s10790_s23  ;;  %v1297_v57 = vld [vmem:[#allocation2 + $0x13e] sm:$0xff] }
 0x25e   : > { %v12180_v24 = vpop.permute.xlu1 %1989 }
 0x25f   : > { %17060 = vst [vmem:[#allocation172_spill] sm:$0xff] %v12180_v24  ;;  %v12182_v43 = vpop.permute.xlu0 %1987 }
 0x260   : > { %17061 = vst [vmem:[#allocation173_spill] sm:$0xff] %v12182_v43  ;;  %2233 = vrot.lane.b32.xlu1 %v1294_v7, %s10790_s23  ;;  %v1300_v7 = vld [vmem:[#allocation2 + $0x15e] sm:$0xff] }
 0x261   : > { %2231 = vrot.lane.b32.xlu0 %v1293_v16, %s10790_s23  ;;  %v1299_v16 = vld [vmem:[#allocation2 + $0x156] sm:$0xff] }
 0x262   : > { %v12186_v44 = vpop.permute.xlu1 %1993 }
 0x263   : > { %17062 = vst [vmem:[#allocation174_spill] sm:$0xff] %v12186_v44  ;;  %v12188_v45 = vpop.permute.xlu0 %1991 }
 0x264   : > { %17063 = vst [vmem:[#allocation175_spill] sm:$0xff] %v12188_v45  ;;  %2237 = vrot.lane.b32.xlu1 %v1296_v63, %s10790_s23  ;;  %v1302_v63 = vld [vmem:[#allocation2 + $0x176] sm:$0xff] }
 0x265   : > { %2235 = vrot.lane.b32.xlu0 %v1295_v14, %s10790_s23  ;;  %v1301_v14 = vld [vmem:[#allocation2 + $0x16e] sm:$0xff] }
 0x266   : > { %v12192_v56 = vpop.permute.xlu1 %1997 }
 0x267   : > { %17064 = vst [vmem:[#allocation176_spill] sm:$0xff] %v12192_v56  ;;  %v12194_v24 = vpop.permute.xlu0 %1995 }
 0x268   : > { %17065 = vst [vmem:[#allocation177_spill] sm:$0xff] %v12194_v24  ;;  %2241 = vrot.lane.b32.xlu1 %v1298_v9, %s10790_s23  ;;  %v1304_v9 = vld [vmem:[#allocation2 + $0x18e] sm:$0xff] }
 0x269   : > { %2239 = vrot.lane.b32.xlu0 %v1297_v57, %s10790_s23  ;;  %v1303_v57 = vld [vmem:[#allocation2 + $0x186] sm:$0xff] }
 0x26a   : > { %v12198_v43 = vpop.permute.xlu1 %2001 }
 0x26b   : > { %17066 = vst [vmem:[#allocation178_spill] sm:$0xff] %v12198_v43  ;;  %v12200_v44 = vpop.permute.xlu0 %1999 }
 0x26c   : > { %17067 = vst [vmem:[#allocation179_spill] sm:$0xff] %v12200_v44  ;;  %2245 = vrot.lane.b32.xlu1 %v1300_v7, %s10790_s23  ;;  %v1306_v7 = vld [vmem:[#allocation2 + $0x1a6] sm:$0xff] }
 0x26d   : > { %2243 = vrot.lane.b32.xlu0 %v1299_v16, %s10790_s23  ;;  %v1305_v16 = vld [vmem:[#allocation2 + $0x19e] sm:$0xff] }
 0x26e   : > { %v12204_v45 = vpop.permute.xlu1 %2005 }
 0x26f   : > { %17068 = vst [vmem:[#allocation180_spill] sm:$0xff] %v12204_v45  ;;  %v12206_v56 = vpop.permute.xlu0 %2003 }
 0x270   : > { %17069 = vst [vmem:[#allocation181_spill] sm:$0xff] %v12206_v56  ;;  %2249 = vrot.lane.b32.xlu1 %v1302_v63, %s10790_s23 }
 0x271   : > { %2247 = vrot.lane.b32.xlu0 %v1301_v14, %s10790_s23 }
 0x272   : > { %v12210_v24 = vpop.permute.xlu1 %2009 }
 0x273   : > { %17070 = vst [vmem:[#allocation182_spill] sm:$0xff] %v12210_v24  ;;  %v12212_v43 = vpop.permute.xlu0 %2007 }
 0x274   : > { %17071 = vst [vmem:[#allocation183_spill] sm:$0xff] %v12212_v43  ;;  %2253 = vrot.lane.b32.xlu1 %v1304_v9, %s10790_s23  ;;  %v518_v43 = vld [vmem:[%s16747_s1] sm:$0xf] }
 0x275   : > { %2251 = vrot.lane.b32.xlu0 %v1303_v57, %s10790_s23  ;;  %9220 = vmatprep.subr.msk.mxu0 %vm620_vm1, %v518_v43 }
 0x276   : > { %v12216_v44 = vpop.permute.xlu1 %2013  ;;  %9221 = vmatpush3.msk.msra.mxu0 %vm620_vm1, %v518_v43  ;;  %v3661_v43 = vld [vmem:[#allocation2 + $0x69] sm:$0xff] }
 0x277   : > { %17072 = vst [vmem:[#allocation184_spill] sm:$0xff] %v12216_v44  ;;  %v12218_v45 = vpop.permute.xlu0 %2011 }
 0x278   : > { %17073 = vst [vmem:[#allocation185_spill] sm:$0xff] %v12218_v45  ;;  %2257 = vrot.lane.b32.xlu1 %v1306_v7, %s10790_s23  ;;  %v1312_v7 = vld [vmem:[#allocation2 + $0x1ee] sm:$0xff] }
 0x279   : > { %2255 = vrot.lane.b32.xlu0 %v1305_v16, %s10790_s23  ;;  %v1311_v16 = vld [vmem:[#allocation2 + $0x1e6] sm:$0xff] }
 0x27a   : > { %v12222_v63 = vpop.permute.xlu1 %2017 }
 0x27b   : > { %17074 = vst [vmem:[#allocation186_spill] sm:$0xff] %v12222_v63  ;;  %v12224_v14 = vpop.permute.xlu0 %2015 }
 0x27c   : > { %17075 = vst [vmem:[#allocation187_spill] sm:$0xff] %v12224_v14  ;;  %2261 = vrot.lane.b32.xlu1 %v11888_v35, %s10790_s23  ;;  %v3596_v35 = vld [vmem:[#allocation2 + $0x1c] sm:$0xff] }
 0x27d   : > { %2259 = vrot.lane.b32.xlu0 %v11890_v26, %s10790_s23  ;;  %v1313_v26 = vld [vmem:[#allocation2 + $0x1fe] sm:$0xff] }
 0x27e   : > { %v12230_v9 = vpop.permute.xlu1 %2085 }
 0x27f   : > { %v12232_v57 = vpop.permute.xlu0 %2083 }
 0x280   : > { %2265 = vrot.lane.b32.xlu1 %v11900_v55, %s10790_s23  ;;  %v3597_v55 = vld [vmem:[#allocation2 + $0x24] sm:$0xff] }
 0x281   : > { %2263 = vrot.lane.b32.xlu0 %v11902_v23, %s10790_s23  ;;  %v3628_v23 = vld [vmem:[#allocation2 + $0x1f] sm:$0xff] }
 0x282   : > { %v12238_v63 = vpop.permute.xlu1 %2089 }
 0x283   : > { %v12240_v14 = vpop.permute.xlu0 %2087 }
 0x284   : > { %2269 = vrot.lane.b32.xlu1 %v1312_v7, %s10790_s23 }
 0x285   : > { %2267 = vrot.lane.b32.xlu0 %v1311_v16, %s10790_s23  ;;  %v3629_v16 = vld [vmem:[#allocation2 + $0x27] sm:$0xff] }
 0x286   : > { %v12244_v45 = vpop.permute.xlu1 %2093 }
 0x287   : > { %v12246_v44 = vpop.permute.xlu0 %2091 }
 0x288   : > { %3853 = vrot.lane.b32.xlu1 %v3596_v35, %s10783_s10  ;;  %v10498_v35 = vld [vmem:[#allocation2 + $0x6c] sm:$0xff] }
 0x289   : > { %2271 = vrot.lane.b32.xlu0 %v1313_v26, %s10790_s23  ;;  %v3660_v26 = vld [vmem:[#allocation2 + $0x61] sm:$0xff]  ;;  %9223 = vmatmul.mubr.msk.f32.vlgmr.msra.gmra.mrb[0].mxu0 %vm348_vm0, %v10498_v35  ;;  %v10501_v35 = vld [vmem:[#allocation2 + $0x94] sm:$0xff] }
 0x28a   : > { %v12253_v24 = vpop.permute.xlu1 %2097  ;;  %9225 = vmatprep.mubr.msk.f32.mxu0 %vm348_vm0, %v10499_v60  ;;  %v3598_v60 = vld [vmem:[#allocation2 + $0x34] sm:$0xff] }
 0x28b   : > { %17076 = vst [vmem:[#allocation188_spill] sm:$0xff] %v12253_v24  ;;  %v12255_v7 = vpop.permute.xlu0 %2095  ;;  %v10522_v24 = vld [vmem:[#allocation2 + $0x92] sm:$0xff] }
 0x28c   : > { %17077 = vst [vmem:[#allocation189_spill] sm:$0xff] %v12255_v7  ;;  %3981 = vrot.lane.b32.xlu1 %v3628_v23, %s10784_s11  ;;  %v10521_v7 = vld [vmem:[#allocation2 + $0x9a] sm:$0xff] }
 0x28d   : > { %3855 = vrot.lane.b32.xlu0 %v3597_v55, %s10783_s10  ;;  %v1314_v55 = vld [vmem:[#allocation2 + $0x206] sm:$0xff]  ;;  %9226 = vmatmul.mubr.msk.f32.gmra.mrb[2].mxu0 %vm348_vm0, %v10500_v41 }
 0x28e   : > { %v12262_v56 = vpop.permute.xlu1 %2101  ;;  %9228 = vmatprep.mubr.msk.f32.mxu0 %vm348_vm0, %v10501_v35  ;;  %v10504_v35 = vld [vmem:[#allocation2 + $0xb4] sm:$0xff] }
 0x28f   : > { %17078 = vst [vmem:[#allocation190_spill] sm:$0xff] %v12262_v56  ;;  %v12264_v46 = vpop.permute.xlu0 %2099  ;;  %v10506_v56 = vld [vmem:[#allocation2 + $0xcc] sm:$0xff] }
 0x290   : > { %17079 = vst [vmem:[#allocation191_spill] sm:$0xff] %v12264_v46  ;;  %4109 = vrot.lane.b32.xlu1 %v3660_v26, %s10785_s14  ;;  %v10502_v26 = vld [vmem:[#allocation2 + $0x9c] sm:$0xff] }
 0x291   : > { %3983 = vrot.lane.b32.xlu0 %v3629_v16, %s10784_s11  ;;  %v12277_v16 = vld [vmem:[#allocation2 + $0x67] sm:$0xff]  ;;  %9229 = vmatmul.mubr.msk.f32.gmra.mrb[4].mxu0 %vm348_vm0, %v10502_v26 }
 0x292   : > { %v12270_v23 = vpop.permute.xlu1 %2105  ;;  %17082 = vst [vmem:[#allocation194_spill] sm:$0xff] %v12277_v16 }
 0x293   : > { %17080 = vst [vmem:[#allocation192_spill] sm:$0xff] %v12270_v23  ;;  %v12272_v4 = vpop.permute.xlu0 %2103  ;;  %v10503_v23 = vld [vmem:[#allocation2 + $0xac] sm:$0xff] }
 0x294   : > { %17081 = vst [vmem:[#allocation193_spill] sm:$0xff] %v12272_v4  ;;  %2273 = vrot.lane.b32.xlu1 %v1314_v55, %s10790_s23  ;;  %9231 = vmatprep.mubr.msk.f32.mxu0 %vm348_vm0, %v10503_v23  ;;  %v3630_v55 = vld [vmem:[#allocation2 + $0x37] sm:$0xff]  ;;  %v4973_v23 = vld [vmem:[#allocation6] sm:$0xff] }
 0x295   : > { %4111 = vrot.lane.b32.xlu0 %v3661_v43, %s10785_s14  ;;  %v3599_v43 = vld [vmem:[#allocation2 + $0x3c] sm:$0xff]  ;;  %9232 = vmatmul.mubr.msk.f32.gmra.mrb[6].mxu0 %vm348_vm0, %v10504_v35 }
 0x296   : > { %v12280_v46 = vpop.permute.xlu1 %2109 }
 0x297   : > { %17083 = vst [vmem:[#allocation195_spill] sm:$0xff] %v12280_v46  ;;  %v12282_v41 = vpop.permute.xlu0 %2107  ;;  %v10505_v46 = vld [vmem:[#allocation2 + $0xc4] sm:$0xff] }
 0x298   : > { %17084 = vst [vmem:[#allocation196_spill] sm:$0xff] %v12282_v41  ;;  %4237 = vrot.lane.b32.xlu1 %v12277_v16, %s10787_s12  ;;  %9234 = vmatprep.mubr.msk.f32.mxu0 %vm348_vm0, %v10505_v46  ;;  %v12296_v41 = vld [vmem:[#allocation2 + $0x6f] sm:$0xff]  ;;  %v10507_v46 = vld [vmem:[#allocation2 + $0xdc] sm:$0xff] }
 0x299   : > { %3857 = vrot.lane.b32.xlu0 %v3598_v60, %s10783_s10  ;;  %v4974_v60 = vld [vmem:[#allocation6 + $0x8] sm:$0xff]  ;;  %17087 = vst [vmem:[#allocation199_spill] sm:$0xff] %v12296_v41  ;;  %9235 = vmatmul.mubr.msk.f32.gmra.mrb[8].mxu0 %vm348_vm0, %v10506_v56  ;;  %v10508_v56 = vld [vmem:[#allocation2 + $0xe4] sm:$0xff] }
 0x29a   : > { %v12289_v4 = vpop.permute.xlu1 %2113  ;;  %v12298_v16 = vld [vmem:[#allocation2 + $0xa9] sm:$0xff]  ;;  %v12301_v35 = vpack.c.bf16 %v4974_v60, %v4973_v23  ;;  %9237 = vmatprep.mubr.msk.f32.mxu0 %vm348_vm0, %v10507_v46  ;;  %v12321_v46 = vld [vmem:[#allocation2 + $0xb1] sm:$0xff] }
 0x29b   : > { %17085 = vst [vmem:[#allocation197_spill] sm:$0xff] %v12289_v4  ;;  %v12291_v26 = vpop.permute.xlu0 %2111  ;;  %17088 = vst [vmem:[#allocation200_spill] sm:$0xff] %v12298_v16 }
 0x29c   : > { %17086 = vst [vmem:[#allocation198_spill] sm:$0xff] %v12291_v26  ;;  %3985 = vrot.lane.b32.xlu1 %v3630_v55, %s10784_s11  ;;  %9877 = vmatprep.subr.bf16.mxu1 %v12301_v35  ;;  %v3662_v55 = vld [vmem:[#allocation2 + $0x79] sm:$0xff]  ;;  %17093 = vst [vmem:[#allocation205_spill] sm:$0xff] %v12321_v46 }
 0x29d   : > { %3859 = vrot.lane.b32.xlu0 %v3599_v43, %s10783_s10  ;;  %v3631_v43 = vld [vmem:[#allocation2 + $0x3f] sm:$0xff]  ;;  %9238 = vmatmul.mubr.msk.f32.gmra.mrb[10].mxu0 %vm348_vm0, %v10508_v56  ;;  %v10511_v56 = vld [vmem:[#allocation2 + $0x10c] sm:$0xff] }
 0x29e   : > { %v12303_v4 = vpop.permute.xlu1 %2117 }
 0x29f   : > { %17089 = vst [vmem:[#allocation201_spill] sm:$0xff] %v12303_v4  ;;  %v12305_v26 = vpop.permute.xlu0 %2115  ;;  %v10510_v4 = vld [vmem:[#allocation2 + $0xfc] sm:$0xff] }
 0x2a0   : > { %17090 = vst [vmem:[#allocation202_spill] sm:$0xff] %v12305_v26  ;;  %4365 = vrot.lane.b32.xlu1 %v12298_v16, %s10788_s13  ;;  %v10509_v26 = vld [vmem:[#allocation2 + $0xf4] sm:$0xff] }
 0x2a1   : > { %4239 = vrot.lane.b32.xlu0 %v12296_v41, %s10787_s12  ;;  %9240 = vmatprep.mubr.msk.f32.mxu0 %vm348_vm0, %v10509_v26  ;;  %v3663_v26 = vld [vmem:[#allocation2 + $0x81] sm:$0xff] }
 0x2a2   : > { %v12314_v23 = vpop.permute.xlu1 %2121  ;;  %9241 = vmatmul.mubr.msk.f32.gmra.mrb[12].mxu0 %vm348_vm0, %v10510_v4 }
 0x2a3   : > { %17091 = vst [vmem:[#allocation203_spill] sm:$0xff] %v12314_v23  ;;  %v12316_v60 = vpop.permute.xlu0 %2119  ;;  %9243 = vmatprep.mubr.msk.f32.mxu0 %vm348_vm0, %v10511_v56  ;;  %v1061_v56 = vld [vmem:[#allocation2 + $0x52] sm:$0xff] }
 0x2a4   : > { %17092 = vst [vmem:[#allocation204_spill] sm:$0xff] %v12316_v60  ;;  %4113 = vrot.lane.b32.xlu1 %v3662_v55, %s10785_s14  ;;  %v1058_v60 = vld [vmem:[#allocation2 + $0x32] sm:$0xff]  ;;  %v12360_v18 = vsel %vm348_vm0, %v1061_v56, %v17103_v3  ;;  %v10518_v56 = vld [vmem:[#allocation2 + $0x82] sm:$0xff] }
 0x2a5   : > { %3987 = vrot.lane.b32.xlu0 %v3631_v43, %s10784_s11  ;;  %v10512_v43 = vld [vmem:[#allocation2 + $0x114] sm:$0xff]  ;;  %v10514_v23 = vld [vmem:[#allocation2 + $0x12c] sm:$0xff] }
 0x2a6   : > { %v12324_v16 = vpop.permute.xlu1 %2125  ;;  %9244 = vmatmul.mubr.msk.f32.gmra.mrb[14].mxu0 %vm348_vm0, %v10512_v43  ;;  %v1059_v43 = vld [vmem:[#allocation2 + $0x3a] sm:$0xff] }
 0x2a7   : > { %17094 = vst [vmem:[#allocation206_spill] sm:$0xff] %v12324_v16  ;;  %v12326_v41 = vpop.permute.xlu0 %2123  ;;  %v10513_v16 = vld [vmem:[#allocation2 + $0x124] sm:$0xff] }
 0x2a8   : > { %17095 = vst [vmem:[#allocation207_spill] sm:$0xff] %v12326_v41  ;;  %4493 = vrot.lane.b32.xlu1 %v12044_v2, %s10789_s21  ;;  %9246 = vmatprep.mubr.msk.f32.mxu0 %vm348_vm0, %v10513_v16  ;;  %v1060_v41 = vld [vmem:[#allocation2 + $0x4a] sm:$0xff]  ;;  %v10515_v16 = vld [vmem:[#allocation2 + $0x13c] sm:$0xff] }
 0x2a9   : > { %4367 = vrot.lane.b32.xlu0 %v12321_v46, %s10788_s13  ;;  %v12342_v2 = vld [vmem:[#allocation2 + $0xaf] sm:$0xff] }
 0x2aa   : > { %v12334_v55 = vpop.permute.xlu1 %2129  ;;  %17098 = vst [vmem:[#allocation210_spill] sm:$0xff] %v12342_v2  ;;  %v3600_v46 = vld [vmem:[#allocation2 + $0x4c] sm:$0xff]  ;;  %9247 = vmatmul.mubr.msk.f32.gmra.mrb[16].mxu0 %vm348_vm0, %v10514_v23 }
 0x2ab   : > { %17096 = vst [vmem:[#allocation208_spill] sm:$0xff] %v12334_v55  ;;  %v12336_v4 = vpop.permute.xlu0 %2127  ;;  %9249 = vmatprep.mubr.msk.f32.mxu0 %vm348_vm0, %v10515_v16  ;;  %v17104_v23 = vld [vmem:[#allocation20_spill] sm:$0xff] }
 0x2ac   : > { %17097 = vst [vmem:[#allocation209_spill] sm:$0xff] %v12336_v4  ;;  %4495 = vrot.lane.b32.xlu1 %v12042_v15, %s10789_s21  ;;  %v17102_v15 = vld [vmem:[#allocation18_spill] sm:$0xff]  ;;  %v12367_v16 = vsel %vm348_vm0, %v1059_v43, %v17104_v23 }
 0x2ad   : > { %4115 = vrot.lane.b32.xlu0 %v3663_v26, %s10785_s14  ;;  %v12352_v26 = vsel %vm348_vm0, %v1060_v41, %v17101_v0  ;;  %v12356_v34 = vsel %vm348_vm0, %v1058_v60, %v17102_v15  ;;  %v10516_v0 = vld [vmem:[#allocation2 + $0x6a] sm:$0xff]  ;;  %v10517_v60 = vld [vmem:[#allocation2 + $0x62] sm:$0xff]  ;;  %17109 = vst [vmem:[#allocation18_spill] sm:$0xff] %v12383_v19  ;;  %v10520_v23 = vld [vmem:[#allocation2 + $0x7a] sm:$0xff] }
 0x2ae   : > { %v12345_v55 = vpop.permute.xlu1 %2133  ;;  %v17105_v41 = vld [vmem:[#allocation23_spill] sm:$0xff]  ;;  %v17106_v15 = vld [vmem:[#allocation24_spill] sm:$0xff] }
 0x2af   : > { %17099 = vst [vmem:[#allocation211_spill] sm:$0xff] %v12345_v55  ;;  %v12347_v4 = vpop.permute.xlu0 %2131  ;;  %v12375_v3 = vsel %vm348_vm0, %v10517_v60, %v17106_v15  ;;  %v17107_v55 = vld [vmem:[#allocation25_spill] sm:$0xff]  ;;  %v10519_v43 = vld [vmem:[#allocation2 + $0x144] sm:$0xff] }
 0x2b0   : > { %17100 = vst [vmem:[#allocation212_spill] sm:$0xff] %v12347_v4  ;;  %3861 = vrot.lane.b32.xlu1 %v3600_v46, %s10783_s10  ;;  %v12371_v4 = vsel %vm348_vm0, %v10516_v0, %v17105_v41  ;;  %v12381_v46 = vld [vmem:[#allocation2 + $0x7f] sm:$0xff]  ;;  %9250 = vmatmul.mubr.msk.f32.gmra.mrb[18].mxu0 %vm348_vm0, %v10519_v43  ;;  %v17111_v60 = vld [vmem:[#allocation27_spill] sm:$0xff] }
 0x2b1   : > { %4621 = vrot.lane.b32.xlu0 %v12342_v2, %s10790_s23  ;;  %v12379_v2 = vsel %vm348_vm0, %v10518_v56, %v17107_v55  ;;  %17108 = vst [vmem:[#allocation17_spill] sm:$0xff] %v12381_v46  ;;  %v17110_v0 = vld [vmem:[#allocation26_spill] sm:$0xff]  ;;  %v12392_v15 = vsel %vm348_vm0, %v10521_v7, %v17111_v60  ;;  %v17112_v55 = vld [vmem:[#allocation28_spill] sm:$0xff] }
 0x2b2   : > { %v12388_v41 = vsel %vm348_vm0, %v10520_v23, %v17110_v0  ;;  %v12396_v56 = vsel %vm348_vm0, %v10522_v24, %v17112_v55  ;;  %v12402_v43 = vpop.permute.xlu1 %2137  ;;  %v10524_v23 = vld [vmem:[#allocation2 + $0x154] sm:$0xff]  ;;  %v10525_v0 = vld [vmem:[#allocation2 + $0xaa] sm:$0xff]  ;;  %v17117_v7 = vld [vmem:[#allocation30_spill] sm:$0xff]  ;;  %17122 = vst [vmem:[#allocation26_spill] sm:$0xff] %v12417_v5 }
 0x2b3   : > { %17115 = vst [vmem:[#allocation20_spill] sm:$0xff] %v12402_v43  ;;  %v12404_v25 = vpop.permute.xlu0 %2135  ;;  %9252 = vmatprep.mubr.msk.f32.mxu0 %vm348_vm0, %v10524_v23  ;;  %v12409_v60 = vsel %vm348_vm0, %v10525_v0, %v17117_v7  ;;  %v17119_v24 = vld [vmem:[#allocation31_spill] sm:$0xff]  ;;  %v10529_v23 = vld [vmem:[#allocation2 + $0xda] sm:$0xff] }
 0x2b4   : > { %17116 = vst [vmem:[#allocation23_spill] sm:$0xff] %v12404_v25  ;;  %17118 = vst [vmem:[#allocation24_spill] sm:$0xff] %v12409_v60  ;;  %v12413_v55 = vsel %vm348_vm0, %v10526_v48, %v17119_v24  ;;  %v10528_v43 = vld [vmem:[#allocation2 + $0xe2] sm:$0xff]  ;;  %v12425_v0 = vsel %vm348_vm0, %v10529_v23, %v17125_v42  ;;  %v10530_v7 = vld [vmem:[#allocation2 + $0xfa] sm:$0xff]  ;;  %4623 = vrot.lane.b32.xlu1 %v12383_v19, %s10790_s23 }
 0x2b5   : > { %17120 = vst [vmem:[#allocation25_spill] sm:$0xff] %v12413_v55  ;;  %v17123_v25 = vld [vmem:[#allocation35_spill] sm:$0xff]  ;;  %17126 = vst [vmem:[#allocation28_spill] sm:$0xff] %v12425_v0  ;;  %v10531_v24 = vld [vmem:[#allocation2 + $0xf2] sm:$0xff]  ;;  %4241 = vrot.lane.b32.xlu0 %v12381_v46, %s10787_s12 }
 0x2b6   : > { %v12421_v31 = vsel %vm348_vm0, %v10528_v43, %v17123_v25  ;;  %v17127_v60 = vld [vmem:[#allocation39_spill] sm:$0xff]  ;;  %v17129_v55 = vld [vmem:[#allocation40_spill] sm:$0xff] }
 0x2b7   : > { %17124 = vst [vmem:[#allocation27_spill] sm:$0xff] %v12421_v31  ;;  %v12429_v48 = vsel %vm348_vm0, %v10530_v7, %v17127_v60  ;;  %v12433_v10 = vsel %vm348_vm0, %v10531_v24, %v17129_v55  ;;  %v10532_v25 = vld [vmem:[#allocation2 + $0x112] sm:$0xff]  ;;  %v17131_v42 = vld [vmem:[#allocation43_spill] sm:$0xff]  ;;  %v10536_v31 = vld [vmem:[#allocation2 + $0x15c] sm:$0xff]  ;;  %v12474_v5 = vpop.permute.xlu0 %2139 }
 0x2b8   : > { %17128 = vst [vmem:[#allocation29_spill] sm:$0xff] %v12429_v48  ;;  %17130 = vst [vmem:[#allocation30_spill] sm:$0xff] %v12433_v10  ;;  %v12441_v43 = vsel %vm348_vm0, %v10532_v25, %v17131_v42  ;;  %v17133_v60 = vld [vmem:[#allocation44_spill] sm:$0xff]  ;;  %v17135_v55 = vld [vmem:[#allocation47_spill] sm:$0xff]  ;;  %9253 = vmatmul.mubr.msk.f32.gmra.mrb[20].mxu0 %vm348_vm0, %v10536_v31  ;;  %v12472_v31 = vpop.permute.xlu1 %2141 }
 0x2b9   : > { %17132 = vst [vmem:[#allocation31_spill] sm:$0xff] %v12441_v43  ;;  %v12445_v23 = vsel %vm348_vm0, %v10533_v47, %v17133_v60  ;;  %v10534_v7 = vld [vmem:[#allocation2 + $0x12a] sm:$0xff]  ;;  %v10535_v10 = vld [vmem:[#allocation2 + $0x122] sm:$0xff]  ;;  %v3601_v19 = vld [vmem:[#allocation2 + $0x54] sm:$0xff] }
 0x2ba   : > { %17134 = vst [vmem:[#allocation32_spill] sm:$0xff] %v12445_v23  ;;  %v12449_v24 = vsel %vm348_vm0, %v10534_v7, %v17135_v55  ;;  %v17137_v46 = vld [vmem:[#allocation48_spill] sm:$0xff]  ;;  %v10537_v25 = vld [vmem:[#allocation2 + $0x142] sm:$0xff]  ;;  %v10538_v60 = vld [vmem:[#allocation2 + $0x13a] sm:$0xff]  ;;  %3863 = vrot.lane.b32.xlu0 %v3601_v19, %s10783_s10 }
 0x2bb   : > { %17136 = vst [vmem:[#allocation35_spill] sm:$0xff] %v12449_v24  ;;  %v12453_v48 = vsel %vm348_vm0, %v10535_v10, %v17137_v46  ;;  %v3632_v0 = vld [vmem:[#allocation2 + $0x4f] sm:$0xff]  ;;  %v10539_v55 = vld [vmem:[#allocation2 + $0x15a] sm:$0xff]  ;;  %17146 = vst [vmem:[#allocation44_spill] sm:$0xff] %v12472_v31 }
 0x2bc   : > { %17138 = vst [vmem:[#allocation36_spill] sm:$0xff] %v12453_v48  ;;  %v17139_v42 = vld [vmem:[#allocation51_spill] sm:$0xff]  ;;  %v17140_v23 = vld [vmem:[#allocation52_spill] sm:$0xff]  ;;  %17147 = vst [vmem:[#allocation47_spill] sm:$0xff] %v12474_v5  ;;  %3989 = vrot.lane.b32.xlu1 %v3632_v0, %s10784_s11 }
 0x2bd   : > { %v12458_v47 = vsel %vm348_vm0, %v10537_v25, %v17139_v42  ;;  %v12462_v7 = vsel %vm348_vm0, %v10538_v60, %v17140_v23  ;;  %v17142_v24 = vld [vmem:[#allocation55_spill] sm:$0xff]  ;;  %v10540_v10 = vld [vmem:[#allocation2 + $0x152] sm:$0xff] }
 0x2be   : > { %17141 = vst [vmem:[#allocation39_spill] sm:$0xff] %v12462_v7  ;;  %v12466_v46 = vsel %vm348_vm0, %v10539_v55, %v17142_v24  ;;  %v17144_v48 = vld [vmem:[#allocation56_spill] sm:$0xff]  ;;  %v17148_v23 = vld [vmem:[#allocation59_spill] sm:$0xff] }
 0x2bf   : > { %17143 = vst [vmem:[#allocation40_spill] sm:$0xff] %v12466_v46  ;;  %v12470_v43 = vsel %vm348_vm0, %v10540_v10, %v17144_v48  ;;  %v10541_v25 = vld [vmem:[#allocation2 + $0x16c] sm:$0xff]  ;;  %v10545_v31 = vld [vmem:[#allocation2 + $0x182] sm:$0xff]  ;;  %v10546_v19 = vld [vmem:[#allocation2 + $0x174] sm:$0xff] }
 0x2c0   : > { %17145 = vst [vmem:[#allocation43_spill] sm:$0xff] %v12470_v43  ;;  %9255 = vmatprep.mubr.msk.f32.mxu0 %vm348_vm0, %v10541_v25  ;;  %v10542_v42 = vld [vmem:[#allocation2 + $0x172] sm:$0xff]  ;;  %v10543_v7 = vld [vmem:[#allocation2 + $0x16a] sm:$0xff] }
 0x2c1   : > { %v12479_v60 = vsel %vm348_vm0, %v10542_v42, %v17148_v23  ;;  %v17150_v24 = vld [vmem:[#allocation60_spill] sm:$0xff]  ;;  %v17151_v48 = vld [vmem:[#allocation63_spill] sm:$0xff]  ;;  %9256 = vmatmul.mubr.msk.f32.gmra.mrb[22].mxu0 %vm348_vm0, %v10546_v19  ;;  %v4976_v19 = vld [vmem:[#allocation6 + $0x18] sm:$0xff] }
 0x2c2   : > { %17149 = vst [vmem:[#allocation48_spill] sm:$0xff] %v12479_v60  ;;  %v12483_v55 = vsel %vm348_vm0, %v10543_v7, %v17150_v24  ;;  %v10544_v46 = vld [vmem:[#allocation2 + $0x18a] sm:$0xff] }
 0x2c3   : > { %v12487_v10 = vsel %vm348_vm0, %v10544_v46, %v17151_v48  ;;  %v17152_v5 = vld [vmem:[#allocation64_spill] sm:$0xff]  ;;  %v17153_v25 = vld [vmem:[#allocation71_spill] sm:$0xff]  ;;  %v17158_v48 = vld [vmem:[#allocation78_spill] sm:$0xff] }
 0x2c4   : > { %v12491_v43 = vsel %vm348_vm0, %v10545_v31, %v17152_v5  ;;  %v2341_v42 = vsel %vm2339_vm2, %v12367_v16, %v17153_v25  ;;  %v17154_v23 = vld [vmem:[#allocation72_spill] sm:$0xff]  ;;  %v17155_v7 = vld [vmem:[#allocation75_spill] sm:$0xff]  ;;  %v17157_v31 = vld [vmem:[#allocation77_spill] sm:$0xff] }
 0x2c5   : > { %v2340_v60 = vsel %vm2339_vm2, %v12356_v34, %v17154_v23  ;;  %v2343_v24 = vsel %vm2339_vm2, %v12360_v18, %v17155_v7  ;;  %v17156_v46 = vld [vmem:[#allocation76_spill] sm:$0xff]  ;;  %v2345_v16 = vsel %vm2339_vm2, %v12371_v4, %v17157_v31  ;;  %v2344_v34 = vsel %vm2339_vm2, %v12375_v3, %v17158_v48  ;;  %v12513_v25 = vld [vmem:[#allocation2 + $0x87] sm:$0xff]  ;;  %v12527_v3 = vpop.permute.xlu1 %2145  ;;  %v12529_v7 = vpop.permute.xlu0 %2143 }
 0x2c6   : > { %v2342_v5 = vsel %vm2339_vm2, %v12352_v26, %v17156_v46  ;;  %v12515_v18 = vld [vmem:[#allocation2 + $0xc1] sm:$0xff]  ;;  %v2374_v4 = vsel %vm2372_vm3, %v2341_v42, %v11744_v53  ;;  %v2373_v23 = vsel %vm2372_vm3, %v2340_v60, %v11746_v54  ;;  %v17160_v31 = vld [vmem:[#allocation80_spill] sm:$0xff]  ;;  %v12544_v54 = vsel %vm2339_vm2, %v12392_v15, %v11648_v37  ;;  %4243 = vrot.lane.b32.xlu0 %v12513_v25, %s10787_s12 }
 0x2c7   : > { %v17159_v0 = vld [vmem:[#allocation79_spill] sm:$0xff]  ;;  %v12535_v48 = vsel %vm2339_vm2, %v12388_v41, %v17160_v31  ;;  %v2406_v53 = vsel %vm2405_vm4, %v2373_v23, %v11882_v29  ;;  %4369 = vrot.lane.b32.xlu1 %v12515_v18, %s10788_s13  ;;  %v4975_v41 = vld [vmem:[#allocation6 + $0x10] sm:$0xff] }
 0x2c8   : > { %v12521_v26 = vsel %vm2339_vm2, %v12379_v2, %v17159_v0  ;;  %v10547_v46 = vld [vmem:[#allocation2 + $0x184] sm:$0xff]  ;;  %v2407_v2 = vsel %vm2405_vm4, %v2374_v4, %v11880_v28  ;;  %v2439_v42 = vsel %vm2438_vm5, %v2406_v53, %v12018_v39  ;;  %v2376_v0 = vsel %vm2372_vm3, %v2343_v24, %v11756_v51  ;;  %v3633_v39 = vld [vmem:[#allocation2 + $0x57] sm:$0xff]  ;;  %v10548_v15 = vld [vmem:[#allocation2 + $0x18c] sm:$0xff] }
 0x2c9   : > { %9258 = vmatprep.mubr.msk.f32.mxu0 %vm348_vm0, %v10547_v46  ;;  %v2440_v60 = vsel %vm2438_vm5, %v2407_v2, %v12016_v17  ;;  %v2472_v17 = vsel %vm2471_vm6, %v2439_v42, %v12130_v8  ;;  %v2375_v4 = vsel %vm2372_vm3, %v2342_v5, %v11758_v61  ;;  %v2409_v23 = vsel %vm2405_vm4, %v2376_v0, %v11892_v27  ;;  %v2214_v24 = vpop.permute.xlu1 %2213  ;;  %v2212_v46 = vpop.permute.xlu0 %2211  ;;  %v3664_v8 = vld [vmem:[#allocation2 + $0x91] sm:$0xff]  ;;  %v10549_v31 = vld [vmem:[#allocation2 + $0x19c] sm:$0xff] }
 0x2ca   : > { %v2473_v37 = vsel %vm2471_vm6, %v2440_v60, %v12128_v6  ;;  %9259 = vmatmul.mubr.msk.f32.gmra.mrb[24].mxu0 %vm348_vm0, %v10548_v15  ;;  %v2505_v6 = vsel %vm2504_vm7, %v2472_v17, %v12232_v57  ;;  %v2408_v2 = vsel %vm2405_vm4, %v2375_v4, %v11894_v38  ;;  %v9880_v53 = vpack.c.bf16 %v4976_v19, %v4975_v41  ;;  %v10551_v17 = vld [vmem:[#allocation2 + $0x1b4] sm:$0xff] }
 0x2cb   : > { %v2506_v51 = vsel %vm2504_vm7, %v2473_v37, %v12230_v9  ;;  %9261 = vmatprep.mubr.msk.f32.mxu0 %vm348_vm0, %v10549_v31  ;;  %v2538_v5 = vsel %vm2537_vm8, %v2505_v6, %v2212_v46  ;;  %v2378_v9 = vsel %vm2372_vm3, %v2345_v16, %v11768_v52  ;;  %v2442_v57 = vsel %vm2438_vm5, %v2409_v23, %v12024_v12  ;;  %v12590_v52 = vld [vmem:[#allocation2 + $0xc9] sm:$0xff]  ;;  %v10552_v23 = vld [vmem:[#allocation2 + $0x1bc] sm:$0xff] }
 0x2cc   : > { %v2539_v61 = vsel %vm2537_vm8, %v2506_v51, %v2214_v24  ;;  %v2441_v60 = vsel %vm2438_vm5, %v2408_v2, %v12026_v40  ;;  %9280 = vmatprep.mubr.msk.f32.mxu1 %vm2580_vm9, %v2538_v5  ;;  %3991 = vrot.lane.b32.xlu0 %v3633_v39, %s10784_s11  ;;  %v2377_v42 = vsel %vm2372_vm3, %v2344_v34, %v11770_v1  ;;  %v4977_v39 = vld [vmem:[#allocation6 + $0x20] sm:$0xf]  ;;  %v10553_v6 = vld [vmem:[#allocation2 + $0x1cc] sm:$0xff] }
 0x2cd   : > { %v2475_v0 = vsel %vm2471_vm6, %v2442_v57, %v12138_v58  ;;  %v2474_v41 = vsel %vm2471_vm6, %v2441_v60, %v12140_v59  ;;  %4117 = vrot.lane.b32.xlu1 %v3664_v8, %s10785_s14  ;;  %9281 = vmatmul.mubr.msk.f32.vlgmr.msra.gmra.mrb[0].mxu1 %vm2580_vm9, %v2539_v61  ;;  %v2411_v40 = vsel %vm2405_vm4, %v2378_v9, %v11904_v22  ;;  %v2218_v16 = vpop.permute.xlu1 %2217  ;;  %v2216_v58 = vpop.permute.xlu0 %2215  ;;  %v10550_v59 = vld [vmem:[#allocation2 + $0x1a4] sm:$0xff]  ;;  %v17162_v46 = vld [vmem:[#allocation136_spill] sm:$0xff] }
 0x2ce   : > { %v2508_v12 = vsel %vm2504_vm7, %v2475_v0, %v12238_v63  ;;  %v2507_v1 = vsel %vm2504_vm7, %v2474_v41, %v12240_v14  ;;  %9879 = vmatpush3.bf16.msra.mxu1 %v12301_v35  ;;  %9262 = vmatmul.mubr.msk.f32.gmra.mrb[26].mxu0 %vm348_vm0, %v10550_v59  ;;  %v2410_v34 = vsel %vm2405_vm4, %v2377_v42, %v11906_v32  ;;  %v17163_v31 = vld [vmem:[#allocation103_spill] sm:$0xff]  ;;  %v17164_v61 = vld [vmem:[#allocation162_spill] sm:$0xff]  ;;  %v17167_v57 = vld [vmem:[#allocation104_spill] sm:$0xff] }
 0x2cf   : > { %v2541_v19 = vsel %vm2537_vm8, %v2508_v12, %v2218_v16  ;;  %v2540_v37 = vsel %vm2537_vm8, %v2507_v1, %v2216_v58  ;;  %9881 = vmatprep.subr.bf16.mxu1 %v9880_v53  ;;  %9264 = vmatprep.mubr.msk.f32.mxu0 %vm348_vm0, %v10551_v17  ;;  %v2380_v63 = vsel %vm2372_vm3, %v12521_v26, %v11776_v50  ;;  %v12657_v9 = vld [vmem:[#allocation2 + $0xc7] sm:$0xff]  ;;  %v17168_v42 = vld [vmem:[#allocation188_spill] sm:$0xff]  ;;  %v17170_v58 = vld [vmem:[#allocation133_spill] sm:$0xff] }
 0x2d0   : > { %v2444_v14 = vsel %vm2438_vm5, %v2411_v40, %v12030_v13  ;;  %v2443_v35 = vsel %vm2438_vm5, %v2410_v34, %v12032_v11  ;;  %9283 = vmatprep.mubr.msk.f32.mxu1 %vm2580_vm9, %v2540_v37  ;;  %4371 = vrot.lane.b32.xlu0 %v12590_v52, %s10788_s13  ;;  %v2379_v15 = vsel %vm2372_vm3, %v12535_v48, %v11778_v49  ;;  %v3665_v13 = vld [vmem:[#allocation2 + $0x99] sm:$0xff]  ;;  %v3602_v1 = vld [vmem:[#allocation2 + $0x64] sm:$0xff] }
 0x2d1   : > { %v2477_v4 = vsel %vm2471_vm6, %v2444_v14, %v12144_v30  ;;  %v2476_v50 = vsel %vm2471_vm6, %v2443_v35, %v12146_v62  ;;  %4497 = vrot.lane.b32.xlu1 %v12056_v33, %s10789_s21  ;;  %9284 = vmatmul.mubr.msk.f32.gmra.mrb[2].mxu1 %vm2580_vm9, %v2541_v19  ;;  %v2413_v11 = vsel %vm2405_vm4, %v2380_v63, %v11912_v21  ;;  %v2222_v48 = vpop.permute.xlu1 %2221  ;;  %v2220_v30 = vpop.permute.xlu0 %2219  ;;  %v10554_v16 = vld [vmem:[#allocation2 + $0x1d4] sm:$0xff]  ;;  %v17171_v34 = vld [vmem:[#allocation134_spill] sm:$0xff]  ;;  %v17173_v14 = vld [vmem:[#allocation19_spill] sm:$0xff] }
 0x2d2   : > { %v2510_v26 = vsel %vm2504_vm7, %v2477_v4, %v12244_v45  ;;  %v2509_v49 = vsel %vm2504_vm7, %v2476_v50, %v12246_v44  ;;  %9883 = vmatpush3.bf16.msra.mxu1 %v9880_v53  ;;  %9265 = vmatmul.mubr.msk.f32.gmra.mrb[28].mxu0 %vm348_vm0, %v10552_v23  ;;  %v2412_v33 = vsel %vm2405_vm4, %v2379_v15, %v11914_v20  ;;  %v17161_v45 = vld [vmem:[#allocation135_spill] sm:$0xff]  ;;  %v17172_v63 = vld [vmem:[#allocation81_spill] sm:$0xff]  ;;  %v17175_v4 = vld [vmem:[#allocation138_spill] sm:$0xff] }
 0x2d3   : > { %v2543_v62 = vsel %vm2537_vm8, %v2510_v26, %v2222_v48  ;;  %v2542_v51 = vsel %vm2537_vm8, %v2509_v49, %v2220_v30  ;;  %9496 = vmatprep.subr.msk.mxu1 %vm620_vm1, %v4977_v39  ;;  %9267 = vmatprep.mubr.msk.f32.mxu0 %vm348_vm0, %v10553_v6  ;;  %v2348_v44 = vsel %vm2339_vm2, %v12396_v56, %v11650_v36  ;;  %v17165_v53 = vld [vmem:[#allocation163_spill] sm:$0xff]  ;;  %v17174_v15 = vld [vmem:[#allocation137_spill] sm:$0xff]  ;;  %v17178_v49 = vld [vmem:[#allocation164_spill] sm:$0xff] }
 0x2d4   : > { %v2446_v24 = vsel %vm2438_vm5, %v2413_v11, %v17161_v45  ;;  %v2445_v8 = vsel %vm2438_vm5, %v2412_v33, %v17162_v46  ;;  %9286 = vmatprep.mubr.msk.f32.mxu1 %vm2580_vm9, %v2542_v51  ;;  %4119 = vrot.lane.b32.xlu0 %v3665_v13, %s10785_s14  ;;  %v2382_v2 = vsel %vm2372_vm3, %v12544_v54, %v17163_v31  ;;  %v17166_v56 = vld [vmem:[#allocation139_spill] sm:$0xff]  ;;  %v17169_v54 = vld [vmem:[#allocation189_spill] sm:$0xff]  ;;  %v17176_v13 = vld [vmem:[#allocation82_spill] sm:$0xff] }
 0x2d5   : > { %v2479_v5 = vsel %vm2471_vm6, %v2446_v24, %v17164_v61  ;;  %v2478_v36 = vsel %vm2471_vm6, %v2445_v8, %v17165_v53  ;;  %4499 = vrot.lane.b32.xlu1 %v17166_v56, %s10789_s21  ;;  %9287 = vmatmul.mubr.msk.f32.gmra.mrb[4].mxu1 %vm2580_vm9, %v2543_v62  ;;  %v2381_v60 = vsel %vm2372_vm3, %v2348_v44, %v17167_v57  ;;  %v2226_v40 = vpop.permute.xlu1 %2225  ;;  %v2224_v12 = vpop.permute.xlu0 %2223  ;;  %v17177_v11 = vld [vmem:[#allocation24_spill] sm:$0xff]  ;;  %v17179_v30 = vld [vmem:[#allocation165_spill] sm:$0xff]  ;;  %v17181_v6 = vld [vmem:[#allocation106_spill] sm:$0xff] }
 0x2d6   : > { %v2512_v0 = vsel %vm2504_vm7, %v2479_v5, %v17168_v42  ;;  %v2511_v41 = vsel %vm2504_vm7, %v2478_v36, %v17169_v54  ;;  %9497 = vmatpush3.msk.msra.mxu1 %vm620_vm1, %v4977_v39  ;;  %9268 = vmatmul.mubr.msk.f32.gmra.mrb[30].mxu0 %vm348_vm0, %v10554_v16  ;;  %v2415_v59 = vsel %vm2405_vm4, %v2382_v2, %v17170_v58  ;;  %v12692_v33 = vld [vmem:[#allocation2 + $0x97] sm:$0xff]  ;;  %v17182_v45 = vld [vmem:[#allocation190_spill] sm:$0xff]  ;;  %v17183_v46 = vld [vmem:[#allocation191_spill] sm:$0xff] }
 0x2d7   : > { %v2414_v19 = vsel %vm2405_vm4, %v2381_v60, %v17171_v34  ;;  %v2545_v37 = vsel %vm2537_vm8, %v2512_v0, %v2226_v40  ;;  %v2544_v17 = vsel %vm2537_vm8, %v2511_v41, %v2224_v12  ;;  %v2351_v35 = vsel %vm2339_vm2, %v17173_v14, %v17172_v63  ;;  %v17180_v62 = vld [vmem:[#allocation105_spill] sm:$0xff]  ;;  %v12702_v61 = vld [vmem:[#allocation2 + $0xcf] sm:$0xff]  ;;  %v17185_v36 = vld [vmem:[#allocation34_spill] sm:$0xff] }
 0x2d8   : > { %v2448_v39 = vsel %vm2438_vm5, %v2415_v59, %v17174_v15  ;;  %v2447_v50 = vsel %vm2438_vm5, %v2414_v19, %v17175_v4  ;;  %9289 = vmatprep.mubr.msk.f32.mxu1 %vm2580_vm9, %v2544_v17  ;;  %4625 = vrot.lane.b32.xlu0 %v12657_v9, %s10790_s23  ;;  %v2350_v26 = vsel %vm2339_vm2, %v17177_v11, %v17176_v13  ;;  %v17184_v5 = vld [vmem:[#allocation33_spill] sm:$0xff]  ;;  %v17186_v42 = vld [vmem:[#allocation83_spill] sm:$0xff]  ;;  %v17188_v41 = vld [vmem:[#allocation140_spill] sm:$0xff] }
 0x2d9   : > { %v2481_v48 = vsel %vm2471_vm6, %v2448_v39, %v17178_v49  ;;  %v2480_v23 = vsel %vm2471_vm6, %v2447_v50, %v17179_v30  ;;  %3865 = vrot.lane.b32.xlu1 %v3602_v1, %s10783_s10  ;;  %9290 = vmatmul.mubr.msk.f32.gmra.mrb[6].mxu1 %vm2580_vm9, %v2545_v37  ;;  %v2384_v51 = vsel %vm2372_vm3, %v2351_v35, %v17180_v62  ;;  %v2230_v31 = vpop.permute.xlu1 %2229  ;;  %v2228_v2 = vpop.permute.xlu0 %2227  ;;  %v17187_v0 = vld [vmem:[#allocation25_spill] sm:$0xff]  ;;  %v17190_v16 = vld [vmem:[#allocation84_spill] sm:$0xff]  ;;  %v17191_v59 = vld [vmem:[#allocation26_spill] sm:$0xff] }
 0x2da   : > { %v2383_v44 = vsel %vm2372_vm3, %v2350_v26, %v17181_v6  ;;  %v2514_v24 = vsel %vm2504_vm7, %v2481_v48, %v17182_v45  ;;  %v2513_v8 = vsel %vm2504_vm7, %v2480_v23, %v17183_v46  ;;  %v2417_v53 = vsel %vm2405_vm4, %v2384_v51, %v17184_v5  ;;  %v17189_v12 = vld [vmem:[#allocation141_spill] sm:$0xff]  ;;  %v17192_v37 = vld [vmem:[#allocation166_spill] sm:$0xff]  ;;  %v17193_v63 = vld [vmem:[#allocation167_spill] sm:$0xff] }
 0x2db   : > { %v2416_v56 = vsel %vm2405_vm4, %v2383_v44, %v17185_v36  ;;  %v2547_v57 = vsel %vm2537_vm8, %v2514_v24, %v2230_v31  ;;  %v2546_v60 = vsel %vm2537_vm8, %v2513_v8, %v2228_v2  ;;  %v2353_v54 = vsel %vm2339_vm2, %v17187_v0, %v17186_v42  ;;  %v3603_v35 = vld [vmem:[#allocation2 + $0x6c] sm:$0xff]  ;;  %v17197_v26 = vld [vmem:[#allocation193_spill] sm:$0xff]  ;;  %v17199_v51 = vld [vmem:[#allocation38_spill] sm:$0xff] }
 0x2dc   : > { %v2450_v40 = vsel %vm2438_vm5, %v2417_v53, %v17188_v41  ;;  %v2449_v1 = vsel %vm2438_vm5, %v2416_v56, %v17189_v12  ;;  %9292 = vmatprep.mubr.msk.f32.mxu1 %vm2580_vm9, %v2546_v60  ;;  %4245 = vrot.lane.b32.xlu0 %v12692_v33, %s10787_s12  ;;  %v2352_v19 = vsel %vm2339_vm2, %v17191_v59, %v17190_v16  ;;  %v17194_v15 = vld [vmem:[#allocation107_spill] sm:$0xff]  ;;  %v17195_v4 = vld [vmem:[#allocation108_spill] sm:$0xff]  ;;  %v17198_v23 = vld [vmem:[#allocation37_spill] sm:$0xff] }
 0x2dd   : > { %v2483_v17 = vsel %vm2471_vm6, %v2450_v40, %v17192_v37  ;;  %v2482_v14 = vsel %vm2471_vm6, %v2449_v1, %v17193_v63  ;;  %4627 = vrot.lane.b32.xlu1 %v12702_v61, %s10790_s23  ;;  %9293 = vmatmul.mubr.msk.f32.gmra.mrb[8].mxu1 %vm2580_vm9, %v2547_v57  ;;  %v2386_v39 = vsel %vm2372_vm3, %v2353_v54, %v17194_v15  ;;  %v17196_v13 = vld [vmem:[#allocation192_spill] sm:$0xff]  ;;  %v2234_v48 = vpop.permute.xlu1 %2233  ;;  %v2232_v30 = vpop.permute.xlu0 %2231  ;;  %v17200_v24 = vld [vmem:[#allocation85_spill] sm:$0xff]  ;;  %v17201_v46 = vld [vmem:[#allocation27_spill] sm:$0xff] }
 0x2de   : > { %v2385_v50 = vsel %vm2372_vm3, %v2352_v19, %v17195_v4  ;;  %v2516_v11 = vsel %vm2504_vm7, %v2483_v17, %v17196_v13  ;;  %v2515_v49 = vsel %vm2504_vm7, %v2482_v14, %v17197_v26  ;;  %v2419_v62 = vsel %vm2405_vm4, %v2386_v39, %v17198_v23  ;;  %v17202_v31 = vld [vmem:[#allocation142_spill] sm:$0xff]  ;;  %v17203_v53 = vld [vmem:[#allocation143_spill] sm:$0xff]  ;;  %v17205_v60 = vld [vmem:[#allocation28_spill] sm:$0xff] }
 0x2df   : > { %v2418_v6 = vsel %vm2405_vm4, %v2385_v50, %v17199_v51  ;;  %v2549_v44 = vsel %vm2537_vm8, %v2516_v11, %v2234_v48  ;;  %v2548_v45 = vsel %vm2537_vm8, %v2515_v49, %v2232_v30  ;;  %v2355_v8 = vsel %vm2339_vm2, %v17201_v46, %v17200_v24  ;;  %v17204_v57 = vld [vmem:[#allocation86_spill] sm:$0xff]  ;;  %v17206_v0 = vld [vmem:[#allocation168_spill] sm:$0xff]  ;;  %v17207_v41 = vld [vmem:[#allocation169_spill] sm:$0xff] }
 0x2e0   : > { %v2452_v2 = vsel %vm2438_vm5, %v2419_v62, %v17202_v31  ;;  %v2451_v56 = vsel %vm2438_vm5, %v2418_v6, %v17203_v53  ;;  %9295 = vmatprep.mubr.msk.f32.mxu1 %vm2580_vm9, %v2548_v45  ;;  %3867 = vrot.lane.b32.xlu0 %v3603_v35, %s10783_s10  ;;  %v2354_v42 = vsel %vm2339_vm2, %v17205_v60, %v17204_v57  ;;  %v17208_v12 = vld [vmem:[#allocation194_spill] sm:$0xff]  ;;  %v17209_v16 = vld [vmem:[#allocation109_spill] sm:$0xff]  ;;  %v17211_v17 = vld [vmem:[#allocation195_spill] sm:$0xff] }
 0x2e1   : > { %v2485_v54 = vsel %vm2471_vm6, %v2452_v2, %v17206_v0  ;;  %v2484_v40 = vsel %vm2471_vm6, %v2451_v56, %v17207_v41  ;;  %3993 = vrot.lane.b32.xlu1 %v17208_v12, %s10784_s11  ;;  %9296 = vmatmul.mubr.msk.f32.gmra.mrb[10].mxu1 %vm2580_vm9, %v2549_v44  ;;  %v12763_v1 = vld [vmem:[#allocation2 + $0x9f] sm:$0xff]  ;;  %v2388_v59 = vsel %vm2372_vm3, %v2355_v8, %v17209_v16  ;;  %v17212_v14 = vld [vmem:[#allocation196_spill] sm:$0xff]  ;;  %v2238_v15 = vpop.permute.xlu1 %2237  ;;  %v2236_v39 = vpop.permute.xlu0 %2235  ;;  %v17215_v30 = vld [vmem:[#allocation87_spill] sm:$0xff] }
 0x2e2   : > { %v17210_v19 = vld [vmem:[#allocation110_spill] sm:$0xff]  ;;  %v2518_v63 = vsel %vm2504_vm7, %v2485_v54, %v17211_v17  ;;  %v2517_v35 = vsel %vm2504_vm7, %v2484_v40, %v17212_v14  ;;  %v17213_v50 = vld [vmem:[#allocation41_spill] sm:$0xff]  ;;  %v17217_v44 = vld [vmem:[#allocation144_spill] sm:$0xff] }
 0x2e3   : > { %v2387_v37 = vsel %vm2372_vm3, %v2354_v42, %v17210_v19  ;;  %v12773_v4 = vld [vmem:[#allocation2 + $0xd9] sm:$0xff]  ;;  %v2421_v13 = vsel %vm2405_vm4, %v2388_v59, %v17213_v50  ;;  %v2551_v49 = vsel %vm2537_vm8, %v2518_v63, %v2238_v15  ;;  %v2550_v48 = vsel %vm2537_vm8, %v2517_v35, %v2236_v39  ;;  %v17219_v8 = vld [vmem:[#allocation88_spill] sm:$0xff]  ;;  %v17222_v57 = vld [vmem:[#allocation171_spill] sm:$0xff] }
 0x2e4   : > { %v17214_v11 = vld [vmem:[#allocation42_spill] sm:$0xff]  ;;  %v17216_v62 = vld [vmem:[#allocation29_spill] sm:$0xff]  ;;  %v2454_v45 = vsel %vm2438_vm5, %v2421_v13, %v17217_v44  ;;  %9298 = vmatprep.mubr.msk.f32.mxu1 %vm2580_vm9, %v2550_v48  ;;  %4247 = vrot.lane.b32.xlu0 %v12763_v1, %s10787_s12  ;;  %v17223_v42 = vld [vmem:[#allocation111_spill] sm:$0xff] }
 0x2e5   : > { %v2420_v26 = vsel %vm2405_vm4, %v2387_v37, %v17214_v11  ;;  %v2357_v6 = vsel %vm2339_vm2, %v17216_v62, %v17215_v30  ;;  %v17218_v24 = vld [vmem:[#allocation145_spill] sm:$0xff]  ;;  %v17220_v31 = vld [vmem:[#allocation30_spill] sm:$0xff]  ;;  %4373 = vrot.lane.b32.xlu1 %v12773_v4, %s10788_s13  ;;  %9299 = vmatmul.mubr.msk.f32.gmra.mrb[12].mxu1 %vm2580_vm9, %v2551_v49  ;;  %v17224_v54 = vld [vmem:[#allocation112_spill] sm:$0xff]  ;;  %v2242_v19 = vpop.permute.xlu1 %2241  ;;  %v2240_v37 = vpop.permute.xlu0 %2239 }
 0x2e6   : > { %v2453_v46 = vsel %vm2438_vm5, %v2420_v26, %v17218_v24  ;;  %v2356_v2 = vsel %vm2339_vm2, %v17220_v31, %v17219_v8  ;;  %v17221_v53 = vld [vmem:[#allocation170_spill] sm:$0xff]  ;;  %v2390_v0 = vsel %vm2372_vm3, %v2357_v6, %v17223_v42  ;;  %v17225_v40 = vld [vmem:[#allocation197_spill] sm:$0xff]  ;;  %v17230_v26 = vld [vmem:[#allocation31_spill] sm:$0xff] }
 0x2e7   : > { %v2487_v56 = vsel %vm2471_vm6, %v2454_v45, %v17221_v53  ;;  %v2486_v60 = vsel %vm2471_vm6, %v2453_v46, %v17222_v57  ;;  %v2389_v41 = vsel %vm2372_vm3, %v2356_v2, %v17224_v54  ;;  %v17226_v16 = vld [vmem:[#allocation198_spill] sm:$0xff]  ;;  %v17227_v17 = vld [vmem:[#allocation45_spill] sm:$0xff]  ;;  %v17232_v62 = vld [vmem:[#allocation147_spill] sm:$0xff] }
 0x2e8   : > { %v2520_v12 = vsel %vm2504_vm7, %v2487_v56, %v17225_v40  ;;  %v2519_v59 = vsel %vm2504_vm7, %v2486_v60, %v17226_v16  ;;  %v2423_v63 = vsel %vm2405_vm4, %v2390_v0, %v17227_v17  ;;  %v17228_v14 = vld [vmem:[#allocation46_spill] sm:$0xff]  ;;  %v17229_v13 = vld [vmem:[#allocation89_spill] sm:$0xff]  ;;  %v17233_v44 = vld [vmem:[#allocation199_spill] sm:$0xff] }
 0x2e9   : > { %v2422_v35 = vsel %vm2405_vm4, %v2389_v41, %v17228_v14  ;;  %v2553_v15 = vsel %vm2537_vm8, %v2520_v12, %v2242_v19  ;;  %v2552_v39 = vsel %vm2537_vm8, %v2519_v59, %v2240_v37  ;;  %v2359_v49 = vsel %vm2339_vm2, %v17230_v26, %v17229_v13  ;;  %v17231_v48 = vld [vmem:[#allocation146_spill] sm:$0xff]  ;;  %3995 = vrot.lane.b32.xlu0 %v17233_v44, %s10784_s11  ;;  %v17235_v24 = vld [vmem:[#allocation32_spill] sm:$0xff]  ;;  %v17237_v2 = vld [vmem:[#allocation173_spill] sm:$0xff]  ;;  %v2246_v59 = vpop.permute.xlu1 %2245  ;;  %v2244_v19 = vpop.permute.xlu0 %2243 }
 0x2ea   : > { %v2456_v30 = vsel %vm2438_vm5, %v2423_v63, %v17231_v48  ;;  %v2455_v6 = vsel %vm2438_vm5, %v2422_v35, %v17232_v62  ;;  %9301 = vmatprep.mubr.msk.f32.mxu1 %vm2580_vm9, %v2552_v39  ;;  %v17234_v45 = vld [vmem:[#allocation90_spill] sm:$0xff]  ;;  %v17236_v8 = vld [vmem:[#allocation172_spill] sm:$0xff]  ;;  %v17239_v60 = vld [vmem:[#allocation113_spill] sm:$0xff] }
 0x2eb   : > { %v2358_v46 = vsel %vm2339_vm2, %v17235_v24, %v17234_v45  ;;  %v2489_v31 = vsel %vm2471_vm6, %v2456_v30, %v17236_v8  ;;  %v2488_v53 = vsel %vm2471_vm6, %v2455_v6, %v17237_v2  ;;  %v17238_v56 = vld [vmem:[#allocation200_spill] sm:$0xff]  ;;  %9302 = vmatmul.mubr.msk.f32.gmra.mrb[14].mxu1 %vm2580_vm9, %v2553_v15  ;;  %v12835_v57 = vld [vmem:[#allocation2 + $0xe1] sm:$0xff]  ;;  %v2392_v42 = vsel %vm2372_vm3, %v2359_v49, %v17239_v60  ;;  %v17241_v41 = vld [vmem:[#allocation201_spill] sm:$0xff] }
 0x2ec   : > { %4121 = vrot.lane.b32.xlu1 %v17238_v56, %s10785_s14  ;;  %v17240_v0 = vld [vmem:[#allocation114_spill] sm:$0xff]  ;;  %v2522_v40 = vsel %vm2504_vm7, %v2489_v31, %v17241_v41  ;;  %v17243_v37 = vld [vmem:[#allocation49_spill] sm:$0xff]  ;;  %v17245_v26 = vld [vmem:[#allocation91_spill] sm:$0xff] }
 0x2ed   : > { %v2391_v54 = vsel %vm2372_vm3, %v2358_v46, %v17240_v0  ;;  %v17242_v12 = vld [vmem:[#allocation202_spill] sm:$0xff]  ;;  %v2425_v63 = vsel %vm2405_vm4, %v2392_v42, %v17243_v37  ;;  %v2555_v39 = vsel %vm2537_vm8, %v2522_v40, %v2246_v59  ;;  %v17246_v49 = vld [vmem:[#allocation35_spill] sm:$0xff]  ;;  %v17247_v30 = vld [vmem:[#allocation148_spill] sm:$0xff]  ;;  %4375 = vrot.lane.b32.xlu0 %v12835_v57, %s10788_s13  ;;  %v2250_v59 = vpop.permute.xlu1 %2249 }
 0x2ee   : > { %v2521_v16 = vsel %vm2504_vm7, %v2488_v53, %v17242_v12  ;;  %v17244_v35 = vld [vmem:[#allocation50_spill] sm:$0xff]  ;;  %v2361_v48 = vsel %vm2339_vm2, %v17246_v49, %v17245_v26  ;;  %v2458_v62 = vsel %vm2438_vm5, %v2425_v63, %v17247_v30  ;;  %v17248_v6 = vld [vmem:[#allocation149_spill] sm:$0xff]  ;;  %v17249_v45 = vld [vmem:[#allocation92_spill] sm:$0xff] }
 0x2ef   : > { %v2424_v15 = vsel %vm2405_vm4, %v2391_v54, %v17244_v35  ;;  %v2554_v13 = vsel %vm2537_vm8, %v2521_v16, %v2244_v19  ;;  %v17250_v24 = vld [vmem:[#allocation36_spill] sm:$0xff]  ;;  %v17251_v8 = vld [vmem:[#allocation174_spill] sm:$0xff]  ;;  %v17252_v2 = vld [vmem:[#allocation175_spill] sm:$0xff]  ;;  %v2248_v19 = vpop.permute.xlu0 %2247 }
 0x2f0   : > { %v2457_v44 = vsel %vm2438_vm5, %v2424_v15, %v17248_v6  ;;  %9304 = vmatprep.mubr.msk.f32.mxu1 %vm2580_vm9, %v2554_v13  ;;  %v2360_v46 = vsel %vm2339_vm2, %v17250_v24, %v17249_v45  ;;  %v2491_v31 = vsel %vm2471_vm6, %v2458_v62, %v17251_v8  ;;  %v10555_v56 = vld [vmem:[#allocation2 + $0xdc] sm:$0xff]  ;;  %v17253_v60 = vld [vmem:[#allocation115_spill] sm:$0xff]  ;;  %v17254_v0 = vld [vmem:[#allocation116_spill] sm:$0xff] }
 0x2f1   : > { %v2490_v53 = vsel %vm2471_vm6, %v2457_v44, %v17252_v2  ;;  %4501 = vrot.lane.b32.xlu1 %v10555_v56, %s10789_s21  ;;  %9305 = vmatmul.mubr.msk.f32.gmra.mrb[16].mxu1 %vm2580_vm9, %v2555_v39  ;;  %v2394_v42 = vsel %vm2372_vm3, %v2361_v48, %v17253_v60  ;;  %v2393_v54 = vsel %vm2372_vm3, %v2360_v46, %v17254_v0  ;;  %v17255_v41 = vld [vmem:[#allocation203_spill] sm:$0xff]  ;;  %v17256_v12 = vld [vmem:[#allocation204_spill] sm:$0xff]  ;;  %v17257_v63 = vld [vmem:[#allocation53_spill] sm:$0xff] }
 0x2f2   : > { %v2524_v40 = vsel %vm2504_vm7, %v2491_v31, %v17255_v41  ;;  %v2523_v16 = vsel %vm2504_vm7, %v2490_v53, %v17256_v12  ;;  %v2427_v15 = vsel %vm2405_vm4, %v2394_v42, %v17257_v63  ;;  %v17258_v13 = vld [vmem:[#allocation54_spill] sm:$0xff]  ;;  %v17259_v48 = vld [vmem:[#allocation93_spill] sm:$0xff]  ;;  %v17261_v44 = vld [vmem:[#allocation151_spill] sm:$0xff] }
 0x2f3   : > { %v2426_v39 = vsel %vm2405_vm4, %v2393_v54, %v17258_v13  ;;  %v2557_v26 = vsel %vm2537_vm8, %v2524_v40, %v2250_v59  ;;  %v2556_v49 = vsel %vm2537_vm8, %v2523_v16, %v2248_v19  ;;  %v2363_v30 = vsel %vm2339_vm2, %v12458_v47, %v17259_v48  ;;  %v17260_v62 = vld [vmem:[#allocation150_spill] sm:$0xff]  ;;  %v17262_v24 = vld [vmem:[#allocation205_spill] sm:$0xff]  ;;  %v17264_v8 = vld [vmem:[#allocation39_spill] sm:$0xff] }
 0x2f4   : > { %v2460_v6 = vsel %vm2438_vm5, %v2427_v15, %v17260_v62  ;;  %v2459_v45 = vsel %vm2438_vm5, %v2426_v39, %v17261_v44  ;;  %9307 = vmatprep.mubr.msk.f32.mxu1 %vm2580_vm9, %v2556_v49  ;;  %4123 = vrot.lane.b32.xlu0 %v17262_v24, %s10785_s14  ;;  %v17263_v46 = vld [vmem:[#allocation94_spill] sm:$0xff]  ;;  %v17265_v2 = vld [vmem:[#allocation176_spill] sm:$0xff]  ;;  %v17266_v56 = vld [vmem:[#allocation177_spill] sm:$0xff]  ;;  %v2254_v15 = vpop.permute.xlu1 %2253  ;;  %v2252_v39 = vpop.permute.xlu0 %2251 }
 0x2f5   : > { %v2362_v31 = vsel %vm2339_vm2, %v17264_v8, %v17263_v46  ;;  %v2493_v53 = vsel %vm2471_vm6, %v2460_v6, %v17265_v2  ;;  %v2492_v47 = vsel %vm2471_vm6, %v2459_v45, %v17266_v56  ;;  %v10556_v60 = vld [vmem:[#allocation2 + $0xe4] sm:$0xff]  ;;  %9308 = vmatmul.mubr.msk.f32.gmra.mrb[18].mxu1 %vm2580_vm9, %v2557_v26  ;;  %v17267_v0 = vld [vmem:[#allocation117_spill] sm:$0xff]  ;;  %v17274_v24 = vld [vmem:[#allocation40_spill] sm:$0xff] }
 0x2f6   : > { %4503 = vrot.lane.b32.xlu1 %v10556_v60, %s10789_s21  ;;  %v12903_v42 = vld [vmem:[#allocation2 + $0xdf] sm:$0xff]  ;;  %v2396_v54 = vsel %vm2372_vm3, %v2363_v30, %v17267_v0  ;;  %v17270_v59 = vld [vmem:[#allocation207_spill] sm:$0xff]  ;;  %v17275_v8 = vld [vmem:[#allocation152_spill] sm:$0xff] }
 0x2f7   : > { %v17268_v41 = vld [vmem:[#allocation118_spill] sm:$0xff]  ;;  %v2525_v19 = vsel %vm2504_vm7, %v2492_v47, %v17270_v59  ;;  %v17271_v48 = vld [vmem:[#allocation57_spill] sm:$0xff]  ;;  %v17273_v45 = vld [vmem:[#allocation95_spill] sm:$0xff] }
 0x2f8   : > { %v2395_v40 = vsel %vm2372_vm3, %v2362_v31, %v17268_v41  ;;  %v17269_v12 = vld [vmem:[#allocation206_spill] sm:$0xff]  ;;  %v2429_v26 = vsel %vm2405_vm4, %v2396_v54, %v17271_v48  ;;  %v2558_v44 = vsel %vm2537_vm8, %v2525_v19, %v2252_v39  ;;  %v2365_v46 = vsel %vm2339_vm2, %v17274_v24, %v17273_v45  ;;  %v17276_v2 = vld [vmem:[#allocation153_spill] sm:$0xff]  ;;  %4629 = vrot.lane.b32.xlu0 %v12903_v42, %s10790_s23  ;;  %v17277_v56 = vld [vmem:[#allocation96_spill] sm:$0xff]  ;;  %v2256_v45 = vpop.permute.xlu0 %2255 }
 0x2f9   : > { %v2526_v16 = vsel %vm2504_vm7, %v2493_v53, %v17269_v12  ;;  %v3604_v49 = vld [vmem:[#allocation2 + $0x7c] sm:$0xff]  ;;  %v2462_v31 = vsel %vm2438_vm5, %v2429_v26, %v17275_v8  ;;  %9310 = vmatprep.mubr.msk.f32.mxu1 %vm2580_vm9, %v2558_v44  ;;  %v17278_v47 = vld [vmem:[#allocation43_spill] sm:$0xff]  ;;  %v17282_v59 = vld [vmem:[#allocation120_spill] sm:$0xff]  ;;  %v2258_v44 = vpop.permute.xlu1 %2257 }
 0x2fa   : > { %v17272_v62 = vld [vmem:[#allocation58_spill] sm:$0xff]  ;;  %v2559_v30 = vsel %vm2537_vm8, %v2526_v16, %v2254_v15  ;;  %v2364_v60 = vsel %vm2339_vm2, %v17278_v47, %v17277_v56  ;;  %v17280_v41 = vld [vmem:[#allocation179_spill] sm:$0xff]  ;;  %3869 = vrot.lane.b32.xlu1 %v3604_v49, %s10783_s10  ;;  %v17283_v15 = vld [vmem:[#allocation208_spill] sm:$0xff] }
 0x2fb   : > { %v2428_v6 = vsel %vm2405_vm4, %v2395_v40, %v17272_v62  ;;  %v17279_v0 = vld [vmem:[#allocation178_spill] sm:$0xff]  ;;  %9311 = vmatmul.mubr.msk.f32.gmra.mrb[20].mxu1 %vm2580_vm9, %v2559_v30  ;;  %v17281_v12 = vld [vmem:[#allocation119_spill] sm:$0xff]  ;;  %v2397_v19 = vsel %vm2372_vm3, %v2364_v60, %v17282_v59  ;;  %v17284_v26 = vld [vmem:[#allocation209_spill] sm:$0xff] }
 0x2fc   : > { %v2461_v53 = vsel %vm2438_vm5, %v2428_v6, %v17276_v2  ;;  %v2495_v54 = vsel %vm2471_vm6, %v2462_v31, %v17279_v0  ;;  %v2398_v16 = vsel %vm2372_vm3, %v2365_v46, %v17281_v12  ;;  %v12946_v24 = vld [vmem:[#allocation2 + $0xe7] sm:$0xff]  ;;  %v17285_v8 = vld [vmem:[#allocation61_spill] sm:$0xff]  ;;  %v17288_v56 = vld [vmem:[#allocation48_spill] sm:$0xff] }
 0x2fd   : > { %v2494_v40 = vsel %vm2471_vm6, %v2461_v53, %v17280_v41  ;;  %v2528_v39 = vsel %vm2504_vm7, %v2495_v54, %v17283_v15  ;;  %v2431_v49 = vsel %vm2405_vm4, %v2398_v16, %v17285_v8  ;;  %v17286_v30 = vld [vmem:[#allocation62_spill] sm:$0xff]  ;;  %v17287_v53 = vld [vmem:[#allocation97_spill] sm:$0xff]  ;;  %v17290_v54 = vld [vmem:[#allocation155_spill] sm:$0xff] }
 0x2fe   : > { %v2527_v6 = vsel %vm2504_vm7, %v2494_v40, %v17284_v26  ;;  %v2430_v31 = vsel %vm2405_vm4, %v2397_v19, %v17286_v30  ;;  %v2561_v46 = vsel %vm2537_vm8, %v2528_v39, %v2258_v44  ;;  %v2367_v47 = vsel %vm2339_vm2, %v17288_v56, %v17287_v53  ;;  %v17289_v60 = vld [vmem:[#allocation154_spill] sm:$0xff]  ;;  %v17293_v59 = vld [vmem:[#allocation180_spill] sm:$0xff]  ;;  %v17294_v15 = vld [vmem:[#allocation181_spill] sm:$0xff]  ;;  %4631 = vrot.lane.b32.xlu1 %v12946_v24, %s10790_s23  ;;  %v2262_v56 = vpop.permute.xlu1 %2261 }
 0x2ff   : > { %v2560_v2 = vsel %vm2537_vm8, %v2527_v6, %v2256_v45  ;;  %v2464_v0 = vsel %vm2438_vm5, %v2431_v49, %v17289_v60  ;;  %v2463_v41 = vsel %vm2438_vm5, %v2430_v31, %v17290_v54  ;;  %v17291_v40 = vld [vmem:[#allocation210_spill] sm:$0xff]  ;;  %v17295_v6 = vld [vmem:[#allocation121_spill] sm:$0xff]  ;;  %v17297_v31 = vld [vmem:[#allocation211_spill] sm:$0xff]  ;;  %v2260_v60 = vpop.permute.xlu0 %2259 }
 0x300   : > { %9313 = vmatprep.mubr.msk.f32.mxu1 %vm2580_vm9, %v2560_v2  ;;  %4249 = vrot.lane.b32.xlu0 %v17291_v40, %s10787_s12  ;;  %v17292_v12 = vld [vmem:[#allocation98_spill] sm:$0xff]  ;;  %v2497_v19 = vsel %vm2471_vm6, %v2464_v0, %v17293_v59  ;;  %v2496_v39 = vsel %vm2471_vm6, %v2463_v41, %v17294_v15  ;;  %v2400_v44 = vsel %vm2372_vm3, %v2367_v47, %v17295_v6  ;;  %v17298_v2 = vld [vmem:[#allocation212_spill] sm:$0xff]  ;;  %v17299_v0 = vld [vmem:[#allocation65_spill] sm:$0xff] }
 0x301   : > { %v2366_v16 = vsel %vm2339_vm2, %v12483_v55, %v17292_v12  ;;  %9314 = vmatmul.mubr.msk.f32.gmra.mrb[22].mxu1 %vm2580_vm9, %v2561_v46  ;;  %v3605_v26 = vld [vmem:[#allocation2 + $0x84] sm:$0xff]  ;;  %v2530_v55 = vsel %vm2504_vm7, %v2497_v19, %v17297_v31  ;;  %v2529_v53 = vsel %vm2504_vm7, %v2496_v39, %v17298_v2  ;;  %v2433_v54 = vsel %vm2405_vm4, %v2400_v44, %v17299_v0  ;;  %v17302_v59 = vld [vmem:[#allocation156_spill] sm:$0xff]  ;;  %v17303_v15 = vld [vmem:[#allocation157_spill] sm:$0xff] }
 0x302   : > { %v17296_v45 = vld [vmem:[#allocation122_spill] sm:$0xff]  ;;  %v2563_v40 = vsel %vm2537_vm8, %v2530_v55, %v2262_v56  ;;  %v2562_v47 = vsel %vm2537_vm8, %v2529_v53, %v2260_v60  ;;  %v17301_v12 = vld [vmem:[#allocation99_spill] sm:$0xff]  ;;  %v2466_v19 = vsel %vm2438_vm5, %v2433_v54, %v17302_v59  ;;  %v17304_v6 = vld [vmem:[#allocation100_spill] sm:$0xff] }
 0x303   : > { %v2399_v49 = vsel %vm2372_vm3, %v2366_v16, %v17296_v45  ;;  %v17300_v41 = vld [vmem:[#allocation66_spill] sm:$0xff]  ;;  %v2369_v16 = vsel %vm2339_vm2, %v12487_v10, %v17301_v12  ;;  %9316 = vmatprep.mubr.msk.f32.mxu1 %vm2580_vm9, %v2562_v47  ;;  %v2368_v44 = vsel %vm2339_vm2, %v12491_v43, %v17304_v6  ;;  %v17306_v31 = vld [vmem:[#allocation183_spill] sm:$0xff]  ;;  %v17307_v55 = vld [vmem:[#allocation17_spill] sm:$0xff]  ;;  %v2266_v47 = vpop.permute.xlu1 %2265  ;;  %v2264_v12 = vpop.permute.xlu0 %2263 }
 0x304   : > { %v2432_v46 = vsel %vm2405_vm4, %v2399_v49, %v17300_v41  ;;  %3871 = vrot.lane.b32.xlu0 %v3605_v26, %s10783_s10  ;;  %v17305_v45 = vld [vmem:[#allocation182_spill] sm:$0xff]  ;;  %3997 = vrot.lane.b32.xlu1 %v17307_v55, %s10784_s11  ;;  %v17308_v2 = vld [vmem:[#allocation123_spill] sm:$0xff]  ;;  %v17309_v56 = vld [vmem:[#allocation124_spill] sm:$0xff] }
 0x305   : > { %v2465_v39 = vsel %vm2438_vm5, %v2432_v46, %v17303_v15  ;;  %v2499_v49 = vsel %vm2471_vm6, %v2466_v19, %v17305_v45  ;;  %9317 = vmatmul.mubr.msk.f32.gmra.mrb[24].mxu1 %vm2580_vm9, %v2563_v40  ;;  %v2402_v53 = vsel %vm2372_vm3, %v2369_v16, %v17308_v2  ;;  %v2401_v26 = vsel %vm2372_vm3, %v2368_v44, %v17309_v56  ;;  %v17310_v60 = vld [vmem:[#allocation20_spill] sm:$0xff]  ;;  %v17311_v54 = vld [vmem:[#allocation23_spill] sm:$0xff]  ;;  %v17312_v19 = vld [vmem:[#allocation69_spill] sm:$0xff] }
 0x306   : > { %v2498_v10 = vsel %vm2471_vm6, %v2465_v39, %v17306_v31  ;;  %v2532_v43 = vsel %vm2504_vm7, %v2499_v49, %v17310_v60  ;;  %v13015_v59 = vld [vmem:[#allocation2 + $0xf1] sm:$0xff]  ;;  %v2435_v15 = vsel %vm2405_vm4, %v2402_v53, %v17312_v19  ;;  %v17313_v40 = vld [vmem:[#allocation70_spill] sm:$0xff]  ;;  %v17316_v55 = vld [vmem:[#allocation159_spill] sm:$0xff] }
 0x307   : > { %v2531_v46 = vsel %vm2504_vm7, %v2498_v10, %v17311_v54  ;;  %v2434_v39 = vsel %vm2405_vm4, %v2401_v26, %v17313_v40  ;;  %v2565_v16 = vsel %vm2537_vm8, %v2532_v43, %v2266_v47  ;;  %v10557_v44 = vld [vmem:[#allocation2 + $0x19a] sm:$0xff]  ;;  %v17314_v45 = vld [vmem:[#allocation68_spill] sm:$0xff] }
 0x308   : > { %v2564_v6 = vsel %vm2537_vm8, %v2531_v46, %v2264_v12  ;;  %v2337_v49 = vsel %vm348_vm0, %v10557_v44, %v17314_v45  ;;  %v17315_v31 = vld [vmem:[#allocation158_spill] sm:$0xff]  ;;  %v2467_v2 = vsel %vm2438_vm5, %v2434_v39, %v17316_v55  ;;  %v17319_v60 = vld [vmem:[#allocation184_spill] sm:$0xff]  ;;  %v17320_v54 = vld [vmem:[#allocation185_spill] sm:$0xff]  ;;  %4377 = vrot.lane.b32.xlu1 %v13015_v59, %s10788_s13  ;;  %v2270_v45 = vpop.permute.xlu1 %2269 }
 0x309   : > { %v2468_v10 = vsel %vm2438_vm5, %v2435_v15, %v17315_v31  ;;  %9319 = vmatprep.mubr.msk.f32.mxu1 %vm2580_vm9, %v2564_v6  ;;  %v17317_v53 = vld [vmem:[#allocation18_spill] sm:$0xff]  ;;  %v2500_v46 = vsel %vm2471_vm6, %v2467_v2, %v17320_v54  ;;  %v17322_v15 = vld [vmem:[#allocation44_spill] sm:$0xff]  ;;  %v17323_v6 = vld [vmem:[#allocation47_spill] sm:$0xff] }
 0x30a   : > { %4251 = vrot.lane.b32.xlu0 %v17317_v53, %s10787_s12  ;;  %v17318_v56 = vld [vmem:[#allocation102_spill] sm:$0xff]  ;;  %v2501_v43 = vsel %vm2471_vm6, %v2468_v10, %v17319_v60  ;;  %9320 = vmatmul.mubr.msk.f32.gmra.mrb[26].mxu1 %vm2580_vm9, %v2565_v16  ;;  %v2533_v44 = vsel %vm2504_vm7, %v2500_v46, %v17323_v6  ;;  %v17325_v53 = vld [vmem:[#allocation161_spill] sm:$0xff] }
 0x30b   : > { %v2370_v26 = vsel %vm2339_vm2, %v2337_v49, %v17318_v56  ;;  %v17321_v47 = vld [vmem:[#allocation126_spill] sm:$0xff]  ;;  %v2534_v39 = vsel %vm2504_vm7, %v2501_v43, %v17322_v15  ;;  %v2268_v49 = vpop.permute.xlu0 %2267  ;;  %v17326_v56 = vld [vmem:[#allocation187_spill] sm:$0xff]  ;;  %v13183_v40 = vld [vmem:[#allocation2 + $0x114] sm:$0xff] }
 0x30c   : > { %v2403_v12 = vsel %vm2372_vm3, %v2370_v26, %v17321_v47  ;;  %v17324_v31 = vld [vmem:[#allocation74_spill] sm:$0xff]  ;;  %v2567_v55 = vsel %vm2537_vm8, %v2534_v39, %v2270_v45  ;;  %v2566_v2 = vsel %vm2537_vm8, %v2533_v44, %v2268_v49  ;;  %4125 = vrot.lane.b32.xlu1 %v12515_v18, %s10785_s14  ;;  %v13065_v46 = vpop.permute.xlu1 %3853  ;;  %v13067_v47 = vld [vmem:[#allocation2 + $0xf4] sm:$0xff]  ;;  %v17327_v39 = vld [vmem:[#allocation67_spill] sm:$0xff] }
 0x30d   : > { %v2436_v10 = vsel %vm2405_vm4, %v2403_v12, %v17324_v31  ;;  %9322 = vmatprep.mubr.msk.f32.mxu1 %vm2580_vm9, %v2566_v2  ;;  %v13061_v60 = vld [vmem:[#allocation2 + $0xf9] sm:$0xff]  ;;  %v10558_v15 = vld [vmem:[#allocation2 + $0x1a2] sm:$0xff] }
 0x30e   : > { %v2469_v16 = vsel %vm2438_vm5, %v2436_v10, %v17325_v53  ;;  %3999 = vrot.lane.b32.xlu0 %v12513_v25, %s10784_s11  ;;  %9323 = vmatmul.mubr.msk.f32.gmra.mrb[28].mxu1 %vm2580_vm9, %v2567_v55  ;;  %v2338_v6 = vsel %vm348_vm0, %v10558_v15, %v17327_v39  ;;  %v17328_v44 = vld [vmem:[#allocation101_spill] sm:$0xff]  ;;  %v3565_v41 = vld [vmem:[#allocation2 + $0x21] sm:$0xff] }
 0x30f   : > { %v2502_v26 = vsel %vm2471_vm6, %v2469_v16, %v17326_v56  ;;  %v2272_v54 = vpop.permute.xlu0 %2271  ;;  %v2371_v45 = vsel %vm2339_vm2, %v2338_v6, %v17328_v44  ;;  %v13089_v49 = vld [vmem:[#allocation2 + $0xf7] sm:$0xff]  ;;  %v13110_v44 = vld [vmem:[#allocation2 + $0xff] sm:$0xff] }
 0x310   : > { %v2535_v43 = vsel %vm2504_vm7, %v2502_v26, %v12529_v7  ;;  %4505 = vrot.lane.b32.xlu1 %v13067_v47, %s10789_s21  ;;  %v13077_v12 = vpop.permute.xlu1 %3981  ;;  %v13079_v7 = vld [vmem:[#allocation2 + $0xfc] sm:$0xff]  ;;  %v3606_v16 = vld [vmem:[#allocation2 + $0x94] sm:$0xff] }
 0x311   : > { %v2568_v25 = vsel %vm2537_vm8, %v2535_v43, %v2272_v54  ;;  %v17329_v10 = vld [vmem:[#allocation125_spill] sm:$0xff]  ;;  %v17332_v54 = vld [vmem:[#allocation186_spill] sm:$0xff] }
 0x312   : > { %9325 = vmatprep.mubr.msk.f32.mxu1 %vm2580_vm9, %v2568_v25  ;;  %4379 = vrot.lane.b32.xlu0 %v13061_v60, %s10788_s13  ;;  %v2404_v55 = vsel %vm2372_vm3, %v2371_v45, %v17329_v10  ;;  %v17330_v56 = vld [vmem:[#allocation73_spill] sm:$0xff] }
 0x313   : > { %v13075_v18 = vpop.permute.xlu0 %3855  ;;  %v2437_v26 = vsel %vm2405_vm4, %v2404_v55, %v17330_v56  ;;  %v3607_v10 = vld [vmem:[#allocation2 + $0x9c] sm:$0xff]  ;;  %v3098_v55 = vld [vmem:[%s16752_s6 + $0x88] sm:$0xff] }
 0x314   : > { %4507 = vrot.lane.b32.xlu1 %v13079_v7, %s10789_s21  ;;  %v13095_v53 = vpop.permute.xlu1 %4109  ;;  %v3564_v31 = vld [vmem:[#allocation2 + $0x19] sm:$0xff] }
 0x316   : > { %4127 = vrot.lane.b32.xlu0 %v12590_v52, %s10785_s14  ;;  %v17331_v52 = vld [vmem:[#allocation160_spill] sm:$0xff] }
 0x317   : > { %v13093_v2 = vpop.permute.xlu0 %3983  ;;  %v2470_v43 = vsel %vm2438_vm5, %v2437_v26, %v17331_v52 }
 0x318   : > { %v2503_v25 = vsel %vm2471_vm6, %v2470_v43, %v17332_v54  ;;  %3873 = vrot.lane.b32.xlu1 %v3606_v16, %s10783_s10  ;;  %v2274_v6 = vpop.permute.xlu1 %2273  ;;  %v3099_v43 = vld [vmem:[%s16752_s6 + $0x90] sm:$0xff]  ;;  %v3100_v54 = vld [vmem:[%s16752_s6 + $0x98] sm:$0xff] }
 0x319   : > { %v2536_v15 = vsel %vm2504_vm7, %v2503_v25, %v12527_v3  ;;  %v3097_v3 = vld [vmem:[%s16752_s6 + $0x80] sm:$0xff] }
 0x31a   : > { %4633 = vrot.lane.b32.xlu0 %v13089_v49, %s10790_s23  ;;  %v2569_v45 = vsel %vm2537_vm8, %v2536_v15, %v2274_v6  ;;  %v9812_v52 = vpack.c.bf16 %v3098_v55, %v3097_v3  ;;  %v13141_v6 = vld [vmem:[#allocation2 + $0x109] sm:$0xff] }
 0x31b   : > { %v13108_v39 = vpop.permute.xlu0 %4111  ;;  %9326 = vmatmul.mubr.msk.f32.gmra.mrb[30].mxu1 %vm2580_vm9, %v2569_v45  ;;  %v9816_v45 = vpack.c.bf16 %v3100_v54, %v3099_v43  ;;  %v13157_v43 = vld [vmem:[#allocation2 + $0x111] sm:$0xff] }
 0x31c   : > { %4635 = vrot.lane.b32.xlu1 %v13110_v44, %s10790_s23  ;;  %v13126_v26 = vpop.permute.xlu1 %4237  ;;  %9813 = vmatprep.subr.bf16.mxu0 %v9812_v52  ;;  %v3103_v54 = vld [vmem:[%s16752_s6 + $0xb0] sm:$0xff] }
 0x31d   : > { %9815 = vmatpush3.bf16.msra.mxu0 %v9812_v52 }
 0x31e   : > { %4253 = vrot.lane.b32.xlu0 %v12657_v9, %s10787_s12  ;;  %9817 = vmatprep.subr.bf16.mxu0 %v9816_v45 }
 0x31f   : > { %v13124_v16 = vpop.permute.xlu0 %3857 }
 0x320   : > { %4001 = vrot.lane.b32.xlu1 %v12692_v33, %s10784_s11  ;;  %v13139_v15 = vpop.permute.xlu1 %3985  ;;  %v3101_v33 = vld [vmem:[%s16752_s6 + $0xa0] sm:$0xff] }
 0x321   : > { %9819 = vmatpush3.bf16.msra.mxu0 %v9816_v45  ;;  %v3104_v45 = vld [vmem:[%s16752_s6 + $0xb8] sm:$0xff] }
 0x322   : > { %3875 = vrot.lane.b32.xlu0 %v3607_v10, %s10783_s10  ;;  %v3102_v10 = vld [vmem:[%s16752_s6 + $0xa8] sm:$0xff] }
 0x323   : > { %v13137_v25 = vpop.permute.xlu0 %3859  ;;  %v9820_v52 = vpack.c.bf16 %v3102_v10, %v3101_v33  ;;  %v9824_v10 = vpack.c.bf16 %v3104_v45, %v3103_v54  ;;  %v4717_v54 = vsel %vm348_vm0, %v3564_v31, %v13065_v46  ;;  %v13193_v31 = vld [vmem:[#allocation2 + $0x10f] sm:$0xff] }
 0x324   : > { %4381 = vrot.lane.b32.xlu1 %v13141_v6, %s10788_s13  ;;  %v4366_v55 = vpop.permute.xlu1 %4365  ;;  %v3107_v46 = vld [vmem:[%s16752_s6 + $0xd0] sm:$0xff] }
 0x325   : > { %9821 = vmatprep.subr.bf16.mxu0 %v9820_v52 }
 0x326   : > { %4255 = vrot.lane.b32.xlu0 %v12702_v61, %s10787_s12  ;;  %9823 = vmatpush3.bf16.msra.mxu0 %v9820_v52  ;;  %v3106_v52 = vld [vmem:[%s16752_s6 + $0xc8] sm:$0xff] }
 0x327   : > { %v4240_v3 = vpop.permute.xlu0 %4239  ;;  %9825 = vmatprep.subr.bf16.mxu0 %v9824_v10 }
 0x328   : > { %4129 = vrot.lane.b32.xlu1 %v12773_v4, %s10785_s14  ;;  %v13167_v33 = vpop.permute.xlu1 %4113  ;;  %v3105_v4 = vld [vmem:[%s16752_s6 + $0xc0] sm:$0xff] }
 0x329   : > { %v9828_v0 = vpack.c.bf16 %v3106_v52, %v3105_v4  ;;  %v3608_v52 = vld [vmem:[#allocation2 + $0xac] sm:$0xff] }
 0x32a   : > { %4003 = vrot.lane.b32.xlu0 %v12763_v1, %s10784_s11  ;;  %v13169_v1 = vld [vmem:[#allocation2 + $0x10c] sm:$0xff]  ;;  %9827 = vmatpush3.bf16.msra.mxu0 %v9824_v10  ;;  %v4749_v10 = vsel %vm2339_vm2, %v4717_v54, %v13077_v12  ;;  %v3108_v12 = vld [vmem:[%s16752_s6 + $0xd8] sm:$0xff] }
 0x32b   : > { %v13165_v56 = vpop.permute.xlu0 %3987  ;;  %v4781_v8 = vsel %vm2372_vm3, %v4749_v10, %v13095_v53  ;;  %9829 = vmatprep.subr.bf16.mxu0 %v9828_v0  ;;  %v4718_v53 = vsel %vm348_vm0, %v3565_v41, %v13075_v18  ;;  %v9832_v54 = vpack.c.bf16 %v3108_v12, %v3107_v46  ;;  %v3109_v18 = vld [vmem:[%s16752_s6 + $0xe0] sm:$0xff]  ;;  %v13226_v46 = vld [vmem:[#allocation2 + $0x117] sm:$0xff] }
 0x32c   : > { %4509 = vrot.lane.b32.xlu1 %v13169_v1, %s10789_s21  ;;  %v4494_v19 = vpop.permute.xlu1 %4493  ;;  %v4750_v10 = vsel %vm2339_vm2, %v4718_v53, %v13093_v2 }
 0x32d   : > { %v4782_v30 = vsel %vm2372_vm3, %v4750_v10, %v13108_v39 }
 0x32e   : > { %4383 = vrot.lane.b32.xlu0 %v13157_v43, %s10788_s13  ;;  %9831 = vmatpush3.bf16.msra.mxu0 %v9828_v0  ;;  %v4813_v0 = vsel %vm2405_vm4, %v4781_v8, %v11882_v29  ;;  %v3110_v8 = vld [vmem:[%s16752_s6 + $0xe8] sm:$0xff] }
 0x32f   : > { %v4368_v45 = vpop.permute.xlu0 %4367  ;;  %v4845_v48 = vsel %vm2438_vm5, %v4813_v0, %v13126_v26  ;;  %9833 = vmatprep.subr.bf16.mxu0 %v9832_v54  ;;  %v9836_v12 = vpack.c.bf16 %v3110_v8, %v3109_v18  ;;  %v10559_v18 = vld [vmem:[#allocation2 + $0xaf] sm:$0xff] }
 0x330   : > { %4511 = vrot.lane.b32.xlu1 %v13183_v40, %s10789_s21  ;;  %v4877_v41 = vsel %vm2471_vm6, %v4845_v48, %v4366_v55  ;;  %v4814_v48 = vsel %vm2405_vm4, %v4782_v30, %v11880_v28  ;;  %v3111_v30 = vld [vmem:[%s16752_s6 + $0xf0] sm:$0xff] }
 0x331   : > { %v4909_v2 = vsel %vm2504_vm7, %v4877_v41, %v4494_v19  ;;  %v4846_v53 = vsel %vm2438_vm5, %v4814_v48, %v4240_v3  ;;  %v3112_v3 = vld [vmem:[%s16752_s6 + $0xf8] sm:$0xff] }
 0x332   : > { %4131 = vrot.lane.b32.xlu0 %v12835_v57, %s10785_s14  ;;  %v4496_v57 = vpop.permute.xlu1 %4495  ;;  %9835 = vmatpush3.bf16.msra.mxu0 %v9832_v54  ;;  %v4878_v19 = vsel %vm2471_vm6, %v4846_v53, %v4368_v45  ;;  %v9840_v41 = vpack.c.bf16 %v3112_v3, %v3111_v30  ;;  %v10560_v48 = vld [vmem:[#allocation2 + $0xb7] sm:$0xff] }
 0x333   : > { %v13203_v4 = vpop.permute.xlu0 %4115  ;;  %9837 = vmatprep.subr.bf16.mxu0 %v9836_v12  ;;  %v4910_v54 = vsel %vm2504_vm7, %v4878_v19, %v4496_v57  ;;  %v13266_v19 = vld [vmem:[#allocation2 + $0x124] sm:$0xff] }
 0x334   : > { %3877 = vrot.lane.b32.xlu1 %v3608_v52, %s10783_s10  ;;  %v3609_v52 = vld [vmem:[#allocation2 + $0xb4] sm:$0xff] }
 0x336   : > { %4637 = vrot.lane.b32.xlu0 %v13193_v31, %s10790_s23  ;;  %v13224_v26 = vpop.permute.xlu1 %3861  ;;  %9839 = vmatpush3.bf16.msra.mxu0 %v9836_v12 }
 0x337   : > { %v4622_v39 = vpop.permute.xlu0 %4621  ;;  %9841 = vmatprep.subr.bf16.mxu0 %v9840_v41 }
 0x338   : > { %v4941_v55 = vsel %vm2537_vm8, %v4909_v2, %v4622_v39  ;;  %4639 = vrot.lane.b32.xlu1 %v13226_v46, %s10790_s23  ;;  %v13253_v39 = vld [vmem:[#allocation2 + $0x121] sm:$0xff] }
 0x339   : > { %9498 = vmatprep.mubr.msk.f32.mxu1 %vm2580_vm9, %v4941_v55  ;;  %v13262_v55 = vld [vmem:[#allocation2 + $0x129] sm:$0xff] }
 0x33a   : > { %4257 = vrot.lane.b32.xlu0 %v12903_v42, %s10787_s12  ;;  %v4624_v0 = vpop.permute.xlu1 %4623  ;;  %9843 = vmatpush3.bf16.msra.mxu0 %v9840_v41 }
 0x33b   : > { %v4242_v10 = vpop.permute.xlu0 %4241  ;;  %v4942_v45 = vsel %vm2537_vm8, %v4910_v54, %v4624_v0 }
 0x33c   : > { %9499 = vmatmul.mubr.msk.f32.vlgmr.msra.gmra.mrb[32].mxu1 %vm2580_vm9, %v4942_v45  ;;  %4005 = vrot.lane.b32.xlu1 %v10559_v18, %s10784_s11  ;;  %v3567_v45 = vld [vmem:[#allocation2 + $0x39] sm:$0xff] }
 0x33d   : > { %v4720_v28 = vsel %vm348_vm0, %v3567_v45, %v13137_v25 }
 0x33e   : > { %3879 = vrot.lane.b32.xlu0 %v3609_v52, %s10783_s10  ;;  %v13251_v2 = vpop.permute.xlu1 %3989  ;;  %v3566_v52 = vld [vmem:[#allocation2 + $0x31] sm:$0xff] }
 0x33f   : > { %v13249_v8 = vpop.permute.xlu0 %3863  ;;  %v4719_v3 = vsel %vm348_vm0, %v3566_v52, %v13124_v16  ;;  %v3610_v52 = vld [vmem:[#allocation2 + $0xc4] sm:$0xff] }
 0x340   : > { %4385 = vrot.lane.b32.xlu1 %v13253_v39, %s10788_s13  ;;  %v4751_v0 = vsel %vm2339_vm2, %v4719_v3, %v13139_v15 }
 0x341   : > { %v4783_v18 = vsel %vm2372_vm3, %v4751_v0, %v13167_v33  ;;  %v4752_v33 = vsel %vm2339_vm2, %v4720_v28, %v13165_v56 }
 0x342   : > { %4259 = vrot.lane.b32.xlu0 %v12946_v24, %s10787_s12  ;;  %v4370_v12 = vpop.permute.xlu1 %4369  ;;  %v4815_v15 = vsel %vm2405_vm4, %v4783_v18, %v11894_v38  ;;  %v4784_v0 = vsel %vm2372_vm3, %v4752_v33, %v13203_v4  ;;  %v13304_v18 = vld [vmem:[#allocation2 + $0x12f] sm:$0xff] }
 0x343   : > { %v4244_v57 = vpop.permute.xlu0 %4243  ;;  %v4816_v56 = vsel %vm2405_vm4, %v4784_v0, %v11892_v27  ;;  %v3769_v0 = vld [vmem:[#allocation2 + $0x13c] sm:$0xff] }
 0x344   : > { %4133 = vrot.lane.b32.xlu1 %v13015_v59, %s10785_s14  ;;  %v13276_v59 = vld [vmem:[#allocation2 + $0x12c] sm:$0xff]  ;;  %v4848_v4 = vsel %vm2438_vm5, %v4816_v56, %v4244_v57  ;;  %v13326_v57 = vld [vmem:[#allocation2 + $0x139] sm:$0xff] }
 0x346   : > { %4007 = vrot.lane.b32.xlu0 %v10560_v48, %s10784_s11  ;;  %v13268_v30 = vpop.permute.xlu1 %4117  ;;  %v13286_v48 = vld [vmem:[#allocation2 + $0x127] sm:$0xff] }
 0x347   : > { %v13264_v53 = vpop.permute.xlu0 %3991 }
 0x348   : > { %4513 = vrot.lane.b32.xlu1 %v13266_v19, %s10789_s21 }
 0x34a   : > { %4387 = vrot.lane.b32.xlu0 %v13262_v55, %s10788_s13  ;;  %v4498_v41 = vpop.permute.xlu1 %4497 }
 0x34b   : > { %v4372_v54 = vpop.permute.xlu0 %4371 }
 0x34c   : > { %4515 = vrot.lane.b32.xlu1 %v13276_v59, %s10789_s21 }
 0x34e   : > { %4135 = vrot.lane.b32.xlu0 %v13061_v60, %s10785_s14  ;;  %v4500_v3 = vpop.permute.xlu1 %4499  ;;  %v4847_v60 = vsel %vm2438_vm5, %v4815_v15, %v4242_v10  ;;  %v4880_v10 = vsel %vm2471_vm6, %v4848_v4, %v4372_v54  ;;  %v3770_v4 = vld [vmem:[#allocation2 + $0x144] sm:$0xff] }
 0x34f   : > { %v13288_v16 = vpop.permute.xlu0 %4119  ;;  %v4879_v29 = vsel %vm2471_vm6, %v4847_v60, %v4370_v12 }
 0x350   : > { %3881 = vrot.lane.b32.xlu1 %v3610_v52, %s10783_s10  ;;  %v4911_v25 = vsel %vm2504_vm7, %v4879_v29, %v4498_v41  ;;  %v3611_v29 = vld [vmem:[#allocation2 + $0xcc] sm:$0xff]  ;;  %v4912_v41 = vsel %vm2504_vm7, %v4880_v10, %v4500_v3 }
 0x351   : > { %v3569_v10 = vld [vmem:[#allocation2 + $0x51] sm:$0xff] }
 0x352   : > { %4641 = vrot.lane.b32.xlu0 %v13286_v48, %s10790_s23  ;;  %v13307_v28 = vpop.permute.xlu1 %3865 }
 0x353   : > { %v4626_v45 = vpop.permute.xlu0 %4625 }
 0x354   : > { %v4943_v38 = vsel %vm2537_vm8, %v4911_v25, %v4626_v45  ;;  %4643 = vrot.lane.b32.xlu1 %v13304_v18, %s10790_s23  ;;  %v3568_v25 = vld [vmem:[#allocation2 + $0x49] sm:$0xff] }
 0x355   : > { %9501 = vmatprep.mubr.msk.f32.mxu1 %vm2580_vm9, %v4943_v38  ;;  %v4721_v56 = vsel %vm348_vm0, %v3568_v25, %v13224_v26  ;;  %v3612_v26 = vld [vmem:[#allocation2 + $0xdc] sm:$0xff] }
 0x356   : > { %4261 = vrot.lane.b32.xlu0 %v13089_v49, %s10787_s12  ;;  %v4628_v52 = vpop.permute.xlu1 %4627 }
 0x357   : > { %v4246_v12 = vpop.permute.xlu0 %4245  ;;  %v4944_v15 = vsel %vm2537_vm8, %v4912_v41, %v4628_v52  ;;  %v13356_v52 = vld [vmem:[#allocation2 + $0x13f] sm:$0xff] }
 0x358   : > { %4009 = vrot.lane.b32.xlu1 %v12657_v9, %s10784_s11  ;;  %9502 = vmatmul.mubr.msk.f32.gmra.mrb[34].mxu1 %vm2580_vm9, %v4944_v15  ;;  %v13338_v9 = vld [vmem:[#allocation2 + $0x141] sm:$0xff] }
 0x35a   : > { %3883 = vrot.lane.b32.xlu0 %v3611_v29, %s10783_s10  ;;  %v13328_v33 = vpop.permute.xlu1 %3993 }
 0x35b   : > { %v13324_v38 = vpop.permute.xlu0 %3867 }
 0x35c   : > { %4389 = vrot.lane.b32.xlu1 %v13326_v57, %s10788_s13 }
 0x35e   : > { %4263 = vrot.lane.b32.xlu0 %v13110_v44, %s10787_s12  ;;  %v4374_v3 = vpop.permute.xlu1 %4373 }
 0x35f   : > { %v4248_v54 = vpop.permute.xlu0 %4247 }
 0x360   : > { %4137 = vrot.lane.b32.xlu1 %v13141_v6, %s10785_s14  ;;  %v4753_v6 = vsel %vm2339_vm2, %v4721_v56, %v13251_v2  ;;  %v1042_v2 = vld [vmem:[%s16752_s6 + $0x8] sm:$0xff] }
 0x361   : > { %v4785_v41 = vsel %vm2372_vm3, %v4753_v6, %v13268_v30  ;;  %v4722_v30 = vsel %vm348_vm0, %v3569_v10, %v13249_v8 }
 0x362   : > { %4011 = vrot.lane.b32.xlu0 %v12702_v61, %s10784_s11  ;;  %v13342_v45 = vpop.permute.xlu1 %4121 }
 0x363   : > { %v13340_v60 = vpop.permute.xlu0 %3995 }
 0x364   : > { %4517 = vrot.lane.b32.xlu1 %v3769_v0, %s10789_s21  ;;  %v1041_v0 = vld [vmem:[%s16752_s6] sm:$0xff] }
 0x365   : > { %v13370_v56 = vpack.c.bf16 %v1042_v2, %v1041_v0 }
 0x366   : > { %4391 = vrot.lane.b32.xlu0 %v13338_v9, %s10788_s13  ;;  %v4502_v29 = vpop.permute.xlu1 %4501 }
 0x367   : > { %v4376_v61 = vpop.permute.xlu0 %4375  ;;  %9845 = vmatprep.subr.bf16.mxu0 %v13370_v56 }
 0x368   : > { %4519 = vrot.lane.b32.xlu1 %v3770_v4, %s10789_s21  ;;  %v4754_v4 = vsel %vm2339_vm2, %v4722_v30, %v13264_v53 }
 0x369   : > { %v4786_v27 = vsel %vm2372_vm3, %v4754_v4, %v13288_v16 }
 0x36a   : > { %4139 = vrot.lane.b32.xlu0 %v13157_v43, %s10785_s14  ;;  %v4817_v43 = vsel %vm2405_vm4, %v4785_v41, %v11906_v32  ;;  %v4504_v25 = vpop.permute.xlu1 %4503  ;;  %v13383_v41 = vld [vmem:[#allocation2 + $0x147] sm:$0xff]  ;;  %v4818_v0 = vsel %vm2405_vm4, %v4786_v27, %v11904_v22  ;;  %v3772_v22 = vld [vmem:[#allocation2 + $0x15c] sm:$0xff] }
 0x36b   : > { %v13358_v15 = vpop.permute.xlu0 %4123  ;;  %v4849_v6 = vsel %vm2438_vm5, %v4817_v43, %v4246_v12  ;;  %v4850_v16 = vsel %vm2438_vm5, %v4818_v0, %v4248_v54  ;;  %v13405_v54 = vld [vmem:[#allocation2 + $0x151] sm:$0xff] }
 0x36c   : > { %v4881_v62 = vsel %vm2471_vm6, %v4849_v6, %v4374_v3  ;;  %3885 = vrot.lane.b32.xlu1 %v3612_v26, %s10783_s10  ;;  %v4882_v3 = vsel %vm2471_vm6, %v4850_v16, %v4376_v61  ;;  %v13409_v61 = vpop.f32.mrb[0].mxu0 }
 0x36d   : > { %v4913_v8 = vsel %vm2504_vm7, %v4881_v62, %v4502_v29  ;;  %v3613_v62 = vld [vmem:[#allocation2 + $0xe4] sm:$0xff]  ;;  %v4914_v26 = vsel %vm2504_vm7, %v4882_v3, %v4504_v25  ;;  %v13413_v25 = vpop.f32.mrb[1].mxu0 }
 0x36e   : > { %4645 = vrot.lane.b32.xlu0 %v13356_v52, %s10790_s23  ;;  %v13386_v12 = vpop.permute.xlu1 %3869  ;;  %v13417_v4 = vpop.f32.mrb[2].mxu0 }
 0x36f   : > { %v4630_v10 = vpop.permute.xlu0 %4629  ;;  %v13419_v6 = vpop.f32.mrb[3].mxu0 }
 0x370   : > { %v4945_v53 = vsel %vm2537_vm8, %v4913_v8, %v4630_v10  ;;  %4647 = vrot.lane.b32.xlu1 %v13383_v41, %s10790_s23  ;;  %v13423_v10 = vpop.f32.mrb[4].mxu0 }
 0x371   : > { %9504 = vmatprep.mubr.msk.f32.mxu1 %vm2580_vm9, %v4945_v53  ;;  %v13427_v53 = vld [vmem:[#allocation2 + $0x159] sm:$0xff]  ;;  %v13429_v0 = vpop.f32.mrb[5].mxu0 }
 0x372   : > { %4265 = vrot.lane.b32.xlu0 %v13193_v31, %s10787_s12  ;;  %v4632_v2 = vpop.permute.xlu1 %4631 }
 0x373   : > { %v4250_v29 = vpop.permute.xlu0 %4249  ;;  %v4946_v30 = vsel %vm2537_vm8, %v4914_v26, %v4632_v2  ;;  %v13437_v26 = vpop.f32.mrb[6].mxu0  ;;  %v10561_v2 = vld [vmem:[#allocation2 + $0x61] sm:$0xff] }
 0x374   : > { %4013 = vrot.lane.b32.xlu1 %v12903_v42, %s10784_s11  ;;  %9505 = vmatmul.mubr.msk.f32.gmra.mrb[36].mxu1 %vm2580_vm9, %v4946_v30  ;;  %17333 = vst [vmem:[#allocation51_spill] sm:$0xff] %v13437_v26 }
 0x376   : > { %3887 = vrot.lane.b32.xlu0 %v3613_v62, %s10783_s10  ;;  %v13407_v43 = vpop.permute.xlu1 %3997  ;;  %v3771_v62 = vld [vmem:[#allocation2 + $0x154] sm:$0xff] }
 0x377   : > { %v13403_v27 = vpop.permute.xlu0 %3871 }
 0x378   : > { %4393 = vrot.lane.b32.xlu1 %v13405_v54, %s10788_s13 }
 0x37a   : > { %4267 = vrot.lane.b32.xlu0 %v13226_v46, %s10787_s12  ;;  %v4378_v8 = vpop.permute.xlu1 %4377 }
 0x37c   : > { %v4252_v42 = vpop.permute.xlu0 %4251  ;;  %4141 = vrot.lane.b32.xlu1 %v13253_v39, %s10785_s14  ;;  %v4723_v39 = vsel %vm348_vm0, %v10561_v2, %v13307_v28  ;;  %v10562_v2 = vld [vmem:[#allocation2 + $0x69] sm:$0xff] }
 0x37d   : > { %v4755_v32 = vsel %vm2339_vm2, %v4723_v39, %v13328_v33  ;;  %v4724_v33 = vsel %vm348_vm0, %v10562_v2, %v13324_v38  ;;  %v13478_v2 = vld [vmem:[#allocation2 + $0x15f] sm:$0xff] }
 0x37e   : > { %4015 = vrot.lane.b32.xlu0 %v12946_v24, %s10784_s11  ;;  %v13433_v3 = vpop.permute.xlu1 %4125  ;;  %v13440_v24 = vpop.f32.mrb[7].mxu0  ;;  %v4787_v13 = vsel %vm2372_vm3, %v4755_v32, %v13342_v45 }
 0x37f   : > { %17334 = vst [vmem:[#allocation52_spill] sm:$0xff] %v13440_v24  ;;  %v13450_v37 = vpop.f32.mrb[8].mxu0  ;;  %v4819_v32 = vsel %vm2405_vm4, %v4787_v13, %v11914_v20 }
 0x380   : > { %v13431_v16 = vpop.permute.xlu0 %3999  ;;  %4521 = vrot.lane.b32.xlu1 %v3771_v62, %s10789_s21  ;;  %17335 = vst [vmem:[#allocation55_spill] sm:$0xff] %v13450_v37  ;;  %v13453_v62 = vld [vmem:[#allocation2 + $0x157] sm:$0xff]  ;;  %v13455_v35 = vpop.f32.mrb[9].mxu0  ;;  %v4851_v39 = vsel %vm2438_vm5, %v4819_v32, %v4250_v29 }
 0x381   : > { %17336 = vst [vmem:[#allocation56_spill] sm:$0xff] %v13455_v35  ;;  %v4883_v14 = vsel %vm2471_vm6, %v4851_v39, %v4378_v8  ;;  %v1052_v37 = vld [vmem:[%s16752_s6 + $0x58] sm:$0xff] }
 0x382   : > { %4395 = vrot.lane.b32.xlu0 %v13427_v53, %s10788_s13  ;;  %v4506_v63 = vpop.permute.xlu1 %4505 }
 0x383   : > { %v4915_v38 = vsel %vm2504_vm7, %v4883_v14, %v4506_v63 }
 0x384   : > { %v4380_v30 = vpop.permute.xlu0 %4379  ;;  %4523 = vrot.lane.b32.xlu1 %v3772_v22, %s10789_s21  ;;  %v13468_v22 = vpop.f32.mrb[10].mxu0 }
 0x385   : > { %17337 = vst [vmem:[#allocation59_spill] sm:$0xff] %v13468_v22  ;;  %v13475_v13 = vpop.f32.mrb[11].mxu0 }
 0x386   : > { %4143 = vrot.lane.b32.xlu0 %v13262_v55, %s10785_s14  ;;  %v4508_v45 = vpop.permute.xlu1 %4507  ;;  %v4756_v55 = vsel %vm2339_vm2, %v4724_v33, %v13340_v60  ;;  %17338 = vst [vmem:[#allocation60_spill] sm:$0xff] %v13475_v13 }
 0x387   : > { %v4788_v17 = vsel %vm2372_vm3, %v4756_v55, %v13358_v15 }
 0x388   : > { %v13457_v28 = vpop.permute.xlu0 %4127  ;;  %3889 = vrot.lane.b32.xlu1 %v13067_v47, %s10783_s10  ;;  %v4820_v32 = vsel %vm2405_vm4, %v4788_v17, %v11912_v21  ;;  %v13488_v47 = vpop.f32.mrb[12].mxu0 }
 0x389   : > { %17339 = vst [vmem:[#allocation63_spill] sm:$0xff] %v13488_v47  ;;  %v4852_v15 = vsel %vm2438_vm5, %v4820_v32, %v4252_v42  ;;  %v13493_v14 = vpop.f32.mrb[13].mxu0  ;;  %v3773_v32 = vld [vmem:[#allocation2 + $0x16c] sm:$0xff] }
 0x38a   : > { %4649 = vrot.lane.b32.xlu0 %v13453_v62, %s10790_s23  ;;  %v13481_v33 = vpop.permute.xlu1 %3873  ;;  %17340 = vst [vmem:[#allocation64_spill] sm:$0xff] %v13493_v14  ;;  %v4884_v63 = vsel %vm2471_vm6, %v4852_v15, %v4380_v30 }
 0x38b   : > { %v4916_v55 = vsel %vm2504_vm7, %v4884_v63, %v4508_v45 }
 0x38c   : > { %v4634_v60 = vpop.permute.xlu0 %4633  ;;  %4651 = vrot.lane.b32.xlu1 %v13478_v2, %s10790_s23 }
 0x38d   : > { %v4947_v29 = vsel %vm2537_vm8, %v4915_v38, %v4634_v60  ;;  %v13500_v38 = vpop.f32.mrb[14].mxu0  ;;  %v13507_v60 = vld [vmem:[#allocation2 + $0x169] sm:$0xff] }
 0x38e   : > { %4269 = vrot.lane.b32.xlu0 %v13286_v48, %s10787_s12  ;;  %9507 = vmatprep.mubr.msk.f32.mxu1 %vm2580_vm9, %v4947_v29  ;;  %v4636_v17 = vpop.permute.xlu1 %4635  ;;  %17341 = vst [vmem:[#allocation71_spill] sm:$0xff] %v13500_v38  ;;  %v13523_v15 = vpop.f32.mrb[15].mxu0 }
 0x38f   : > { %v4948_v39 = vsel %vm2537_vm8, %v4916_v55, %v4636_v17  ;;  %17342 = vst [vmem:[#allocation72_spill] sm:$0xff] %v13523_v15  ;;  %v13530_v55 = vpop.f32.mrb[16].mxu0 }
 0x390   : > { %v4254_v8 = vpop.permute.xlu0 %4253  ;;  %4017 = vrot.lane.b32.xlu1 %v13089_v49, %s10784_s11  ;;  %9508 = vmatmul.mubr.msk.f32.gmra.mrb[38].mxu1 %vm2580_vm9, %v4948_v39  ;;  %v13519_v49 = vld [vmem:[#allocation2 + $0x171] sm:$0xff]  ;;  %17343 = vst [vmem:[#allocation75_spill] sm:$0xff] %v13530_v55  ;;  %v13534_v21 = vpop.f32.mrb[17].mxu0 }
 0x391   : > { %v3774_v39 = vld [vmem:[#allocation2 + $0x174] sm:$0xff]  ;;  %17344 = vst [vmem:[#allocation76_spill] sm:$0xff] %v13534_v21  ;;  %v13545_v55 = vpop.f32.mrb[18].mxu0  ;;  %v10564_v21 = vld [vmem:[#allocation2 + $0x81] sm:$0xff] }
 0x392   : > { %3891 = vrot.lane.b32.xlu0 %v13079_v7, %s10783_s10  ;;  %v13509_v30 = vpop.permute.xlu1 %4001  ;;  %17345 = vst [vmem:[#allocation77_spill] sm:$0xff] %v13545_v55 }
 0x394   : > { %v13505_v42 = vpop.permute.xlu0 %3875  ;;  %4397 = vrot.lane.b32.xlu1 %v13507_v60, %s10788_s13 }
 0x396   : > { %4271 = vrot.lane.b32.xlu0 %v13304_v18, %s10787_s12  ;;  %v4382_v45 = vpop.permute.xlu1 %4381 }
 0x398   : > { %v4256_v7 = vpop.permute.xlu0 %4255  ;;  %4145 = vrot.lane.b32.xlu1 %v13326_v57, %s10785_s14 }
 0x39a   : > { %4019 = vrot.lane.b32.xlu0 %v13110_v44, %s10784_s11  ;;  %v13525_v63 = vpop.permute.xlu1 %4129  ;;  %v10563_v44 = vld [vmem:[#allocation2 + $0x79] sm:$0xff] }
 0x39b   : > { %v4725_v57 = vsel %vm348_vm0, %v10563_v44, %v13386_v12  ;;  %v13549_v44 = vpop.f32.mrb[19].mxu0 }
 0x39c   : > { %v13521_v29 = vpop.permute.xlu0 %4003  ;;  %4525 = vrot.lane.b32.xlu1 %v3773_v32, %s10789_s21  ;;  %v4757_v20 = vsel %vm2339_vm2, %v4725_v57, %v13407_v43  ;;  %v13543_v32 = vld [vmem:[#allocation2 + $0x16f] sm:$0xff]  ;;  %17346 = vst [vmem:[#allocation78_spill] sm:$0xff] %v13549_v44  ;;  %v4726_v43 = vsel %vm348_vm0, %v10564_v21, %v13403_v27  ;;  %v13555_v57 = vpop.f32.mrb[20].mxu0 }
 0x39d   : > { %v4789_v38 = vsel %vm2372_vm3, %v4757_v20, %v13433_v3  ;;  %17347 = vst [vmem:[#allocation79_spill] sm:$0xff] %v13555_v57  ;;  %v13562_v55 = vpop.f32.mrb[21].mxu0 }
 0x39e   : > { %4399 = vrot.lane.b32.xlu0 %v13519_v49, %s10788_s13  ;;  %v4510_v15 = vpop.permute.xlu1 %4509  ;;  %v4821_v20 = vsel %vm2405_vm4, %v4789_v38, %v17171_v34  ;;  %17348 = vst [vmem:[#allocation80_spill] sm:$0xff] %v13562_v55  ;;  %v13569_v27 = vpop.f32.mrb[22].mxu0 }
 0x39f   : > { %17349 = vst [vmem:[#allocation135_spill] sm:$0xff] %v13569_v27 }
 0x3a0   : > { %v4384_v17 = vpop.permute.xlu0 %4383  ;;  %4527 = vrot.lane.b32.xlu1 %v3774_v39, %s10789_s21  ;;  %v4853_v39 = vsel %vm2438_vm5, %v4821_v20, %v4254_v8  ;;  %v13575_v8 = vld [vmem:[%s16753_s7 + $0x1] ss:$0 sm:$0xff]  ;;  %v13579_v20 = vpop.f32.mrb[23].mxu0 }
 0x3a1   : > { %v4885_v21 = vsel %vm2471_vm6, %v4853_v39, %v4382_v45  ;;  %17350 = vst [vmem:[#allocation136_spill] sm:$0xff] %v13579_v20 }
 0x3a2   : > { %4147 = vrot.lane.b32.xlu0 %v13338_v9, %s10785_s14  ;;  %v4512_v3 = vpop.permute.xlu1 %4511  ;;  %v4758_v9 = vsel %vm2339_vm2, %v4726_v43, %v13431_v16  ;;  %v4917_v38 = vsel %vm2504_vm7, %v4885_v21, %v4510_v15  ;;  %v13577_v43 = vld [vmem:[#allocation2 + $0x177] sm:$0xff]  ;;  %v9282_v15 = vpop.f32.mrb[0].mxu1 }
 0x3a3   : > { %v4790_v44 = vsel %vm2372_vm3, %v4758_v9, %v13457_v28  ;;  %v13584_v9 = vpop.f32.mrb[24].mxu0  ;;  %v13595_v34 = vadd.f32 %v9282_v15, %v13575_v8 }
 0x3a4   : > { %v13547_v12 = vpop.permute.xlu0 %4131  ;;  %3893 = vrot.lane.b32.xlu1 %v13169_v1, %s10783_s10  ;;  %17351 = vst [vmem:[#allocation103_spill] sm:$0xff] %v13584_v9  ;;  %v4822_v1 = vsel %vm2405_vm4, %v4790_v44, %v17170_v58  ;;  %v13591_v39 = vpop.f32.mrb[25].mxu0  ;;  %v13614_v9 = vld [vmem:[%s16753_s7] ss:$0 sm:$0xff] }
 0x3a5   : > { %17352 = vst [vmem:[#allocation162_spill] sm:$0xff] %v13591_v39  ;;  %v4854_v21 = vsel %vm2438_vm5, %v4822_v1, %v4256_v7  ;;  %v2938_v1 = vmin.f32 %v13595_v34, 0.0  ;;  %v13653_v20 = vadd.f32 %v13614_v9, %v13413_v25  ;;  %vm2906_vm10 = vcmp.gt.f32.partialorder %v13595_v34, 0.0 }
 0x3a6   : > { %4653 = vrot.lane.b32.xlu0 %v13543_v32, %s10790_s23  ;;  %v13582_v45 = vpop.permute.xlu1 %3877  ;;  %v4886_v44 = vsel %vm2471_vm6, %v4854_v21, %v4384_v17 }
 0x3a7   : > { %v4918_v7 = vsel %vm2504_vm7, %v4886_v44, %v4512_v3  ;;  %v1043_v3 = vld [vmem:[%s16752_s6 + $0x10] sm:$0xff]  ;;  %v2971_v44 = vmul.f32 1.442695, %v2938_v1  ;;  %17358 = vst [vmem:[#allocation81_spill] sm:$0xff] %v13653_v20 }
 0x3a8   : > { %v4638_v16 = vpop.permute.xlu0 %4637  ;;  %4655 = vrot.lane.b32.xlu1 %v13577_v43, %s10790_s23 }
 0x3a9   : > { %v4949_v28 = vsel %vm2537_vm8, %v4917_v38, %v4638_v16  ;;  %v2746_v38 = vpop.f32.mrb[1].mxu1  ;;  %v13599_v16 = vpop.f32.mrb[26].mxu0  ;;  %10176 = vpow2.f32 %v2971_v44 }
 0x3aa   : > { %4273 = vrot.lane.b32.xlu0 %v13356_v52, %s10787_s12  ;;  %9510 = vmatprep.mubr.msk.f32.mxu1 %vm2580_vm9, %v4949_v28  ;;  %17353 = vst [vmem:[#allocation163_spill] sm:$0xff] %v13599_v16  ;;  %v13603_v58 = vadd.f32 %v13575_v8, %v2746_v38  ;;  %v13607_v28 = vpop.f32.mrb[27].mxu0  ;;  %v4640_v15 = vpop.permute.xlu1 %4639  ;;  %v1044_v38 = vld [vmem:[%s16752_s6 + $0x18] sm:$0xff] }
 0x3ab   : > { %17354 = vst [vmem:[#allocation139_spill] sm:$0xff] %v13607_v28  ;;  %v4950_v17 = vsel %vm2537_vm8, %v4918_v7, %v4640_v15  ;;  %v9285_v21 = vpop.f32.mrb[2].mxu1  ;;  %v1046_v15 = vld [vmem:[%s16752_s6 + $0x28] sm:$0xff]  ;;  %v13638_v39 = vpop.f32.mrb[28].mxu0  ;;  %v13667_v25 = vpack.c.bf16 %v1044_v38, %v1043_v3 }
 0x3ac   : > { %v13605_v52 = vpop.permute.xlu0 %4257  ;;  %v2937_v16 = vmin.f32 %v13603_v58, 0.0  ;;  %v13627_v28 = vadd.f32 %v9285_v21, %v13575_v8  ;;  %4021 = vrot.lane.b32.xlu1 %v13193_v31, %s10784_s11  ;;  %9511 = vmatmul.mubr.msk.f32.gmra.mrb[40].mxu1 %vm2580_vm9, %v4950_v17  ;;  %v2756_v7 = vpop.f32.mrb[3].mxu1  ;;  %17355 = vst [vmem:[#allocation104_spill] sm:$0xff] %v13638_v39  ;;  %v13645_v31 = vld [vmem:[#allocation2 + $0x181] sm:$0xff]  ;;  %v13649_v17 = vadd.f32 %v13409_v61, %v13614_v9  ;;  %v1047_v39 = vld [vmem:[%s16752_s6 + $0x30] sm:$0xff]  ;;  %vm2905_vm11 = vcmp.gt.f32.partialorder %v13603_v58, 0.0 }
 0x3ad   : > { %v13641_v21 = vadd.f32 %v13575_v8, %v2756_v7  ;;  %17356 = vst [vmem:[#allocation188_spill] sm:$0xff] %v13645_v31  ;;  %v9288_v57 = vpop.f32.mrb[4].mxu1 }
 0x3ae   : > { %3895 = vrot.lane.b32.xlu0 %v13183_v40, %s10783_s10  ;;  %v1045_v40 = vld [vmem:[%s16752_s6 + $0x20] sm:$0xff]  ;;  %v2969_v1 = vmul.f32 1.442695, %v2937_v16  ;;  %17357 = vst [vmem:[#allocation189_spill] sm:$0xff] %v13649_v17  ;;  %v1048_v16 = vld [vmem:[%s16752_s6 + $0x38] sm:$0xff]  ;;  %v2940_v7 = vmin.f32 %v13627_v28, 0.0  ;;  %v13662_v55 = vpop.permute.xlu1 %4005  ;;  %v13672_v47 = vadd.f32 %v9288_v57, %v13575_v8 }
 0x3af   : > { %v2939_v61 = vmin.f32 %v13641_v21, 0.0  ;;  %v13669_v14 = vpack.c.bf16 %v1046_v15, %v1045_v40  ;;  %v2766_v44 = vpop.f32.mrb[5].mxu1  ;;  %v13676_v22 = vpack.c.bf16 %v1048_v16, %v1047_v39  ;;  %v10565_v40 = vld [vmem:[#allocation2 + $0x91] sm:$0xff]  ;;  %vm2908_vm12 = vcmp.gt.f32.partialorder %v13627_v28, 0.0 }
 0x3b0   : > { %v13643_v27 = vpop.permute.xlu0 %3879  ;;  %10178 = vpow2.f32 %v2969_v1  ;;  %v2975_v50 = vmul.f32 1.442695, %v2940_v7  ;;  %4401 = vrot.lane.b32.xlu1 %v13645_v31, %s10788_s13  ;;  %v13680_v1 = vadd.f32 %v13417_v4, %v13614_v9  ;;  %v4727_v15 = vsel %vm348_vm0, %v10565_v40, %v13481_v33  ;;  %v13694_v4 = vld [vmem:[#allocation2 + $0x189] sm:$0xff]  ;;  %v13709_v33 = vpop.f32.mrb[29].mxu0  ;;  %v10566_v40 = vld [vmem:[#allocation2 + $0x99] sm:$0xff] }
 0x3b1   : > { %v2973_v11 = vmul.f32 1.442695, %v2939_v61  ;;  %v2942_v39 = vmin.f32 %v13672_v47, 0.0  ;;  %17359 = vst [vmem:[#allocation19_spill] sm:$0xff] %v13694_v4  ;;  %v13698_v7 = vadd.f32 %v13614_v9, %v13419_v6  ;;  %v1049_v61 = vld [vmem:[%s16752_s6 + $0x40] sm:$0xff]  ;;  %17360 = vst [vmem:[#allocation137_spill] sm:$0xff] %v13709_v33  ;;  %v4728_v57 = vsel %vm348_vm0, %v10566_v40, %v13505_v42 }
 0x3b2   : > { %4275 = vrot.lane.b32.xlu0 %v13383_v41, %s10787_s12  ;;  %v13683_v41 = vadd.f32 %v13575_v8, %v2766_v44  ;;  %10180 = vpow2.f32 %v2975_v50  ;;  %v13692_v16 = vpop.permute.xlu1 %4385  ;;  %v1050_v44 = vld [vmem:[%s16752_s6 + $0x48] sm:$0xff]  ;;  %v1051_v50 = vld [vmem:[%s16752_s6 + $0x50] sm:$0xff]  ;;  %v4759_v6 = vsel %vm2339_vm2, %v4727_v15, %v13509_v30  ;;  %v9291_v13 = vpop.f32.mrb[6].mxu1  ;;  %v1053_v33 = vld [vmem:[%s16752_s6 + $0x60] sm:$0xff]  ;;  %vm2907_vm13 = vcmp.gt.f32.partialorder %v13641_v21, 0.0 }
 0x3b3   : > { %10182 = vpow2.f32 %v2973_v11  ;;  %v1054_v42 = vld [vmem:[%s16752_s6 + $0x68] sm:$0xff]  ;;  %v13727_v30 = vpop.f32.mrb[30].mxu0  ;;  %v4760_v11 = vsel %vm2339_vm2, %v4728_v57, %v13521_v29  ;;  %v2979_v15 = vmul.f32 1.442695, %v2942_v39  ;;  %v13734_v40 = vadd.f32 %v9291_v13, %v13575_v8  ;;  %v2776_v35 = vpop.f32.mrb[7].mxu1  ;;  %v1055_v31 = vld [vmem:[%s16752_s6 + $0x70] sm:$0xff] }
 0x3b4   : > { %v13685_v3 = vpop.permute.xlu0 %4259  ;;  %v2941_v38 = vmin.f32 %v13683_v41, 0.0  ;;  %17361 = vst [vmem:[#allocation138_spill] sm:$0xff] %v13727_v30  ;;  %4149 = vrot.lane.b32.xlu1 %v13405_v54, %s10785_s14  ;;  %v1056_v30 = vld [vmem:[%s16752_s6 + $0x78] sm:$0xff]  ;;  %v13744_v29 = vpop.f32.mrb[31].mxu0  ;;  %v3576_v57 = vld [vmem:[#allocation2 + $0xa9] sm:$0xff]  ;;  %v13749_v39 = vadd.f32 %v13575_v8, %v2776_v35  ;;  %v13753_v24 = vpack.c.bf16 %v1050_v44, %v1049_v61  ;;  %v13758_v17 = vpack.c.bf16 %v1052_v37, %v1051_v50 }
 0x3b5   : > { %17362 = vst [vmem:[#allocation82_spill] sm:$0xff] %v13744_v29  ;;  %10184 = vpow2.f32 %v2979_v15  ;;  %v2944_v26 = vmin.f32 %v13734_v40, 0.0  ;;  %v13760_v29 = vpack.c.bf16 %v1054_v42, %v1053_v33  ;;  %v13767_v61 = vpack.c.bf16 %v1056_v30, %v1055_v31  ;;  %v10177_v44 = vpop.eup %10176  ;;  %v3577_v37 = vld [vmem:[#allocation2 + $0xb1] sm:$0xff] }
 0x3b6   : > { %4023 = vrot.lane.b32.xlu0 %v13226_v46, %s10784_s11  ;;  %v4791_v46 = vsel %vm2372_vm3, %v4759_v6, %v13525_v63  ;;  %v4792_v63 = vsel %vm2372_vm3, %v4760_v11, %v13547_v12  ;;  %v2977_v13 = vmul.f32 1.442695, %v2941_v38  ;;  %v3775_v6 = vld [vmem:[#allocation2 + $0x184] sm:$0xff]  ;;  %v13756_v20 = vpop.permute.xlu1 %4133  ;;  %v2943_v35 = vmin.f32 %v13749_v39, 0.0  ;;  %v9294_v38 = vpop.f32.mrb[8].mxu1 }
 0x3b7   : > { %v4823_v12 = vsel %vm2405_vm4, %v4791_v46, %v17185_v36  ;;  %v13771_v11 = vsel %vm348_vm0, %v3576_v57, %v13582_v45  ;;  %v4824_v50 = vsel %vm2405_vm4, %v4792_v63, %v17184_v5  ;;  %v2983_v33 = vmul.f32 1.442695, %v2944_v26  ;;  %v2786_v46 = vpop.f32.mrb[9].mxu1  ;;  %v3776_v57 = vld [vmem:[#allocation2 + $0x18c] sm:$0xff] }
 0x3b8   : > { %v13751_v54 = vpop.permute.xlu0 %4007  ;;  %10186 = vpow2.f32 %v2977_v13  ;;  %v13776_v42 = vadd.f32 %v9294_v38, %v13575_v8  ;;  %4529 = vrot.lane.b32.xlu1 %v3775_v6, %s10789_s21  ;;  %v8659_v31 = vadd.f32 -1.0, %v10177_v44  ;;  %v2981_v30 = vmul.f32 1.442695, %v2943_v35  ;;  %v9297_v44 = vpop.f32.mrb[10].mxu1 }
 0x3b9   : > { %v13781_v13 = vadd.f32 %v13575_v8, %v2786_v46  ;;  %v4855_v26 = vsel %vm2438_vm5, %v4823_v12, %v13605_v52  ;;  %10188 = vpow2.f32 %v2983_v33  ;;  %v13790_v5 = vsel %vm348_vm0, %v3577_v37, %v13643_v27  ;;  %v2796_v33 = vpop.f32.mrb[11].mxu1  ;;  %v13801_v37 = vld [vmem:[#allocation2 + $0x187] sm:$0xff] }
 0x3ba   : > { %4403 = vrot.lane.b32.xlu0 %v13694_v4, %s10788_s13  ;;  %v10179_v15 = vpop.eup %10178  ;;  %v2946_v63 = vmin.f32 %v13776_v42, 0.0  ;;  %v4514_v38 = vpop.permute.xlu1 %4513  ;;  %10190 = vpow2.f32 %v2981_v30  ;;  %v13797_v12 = vadd.f32 %v9297_v44, %v13575_v8  ;;  %v4856_v4 = vsel %vm2438_vm5, %v4824_v50, %v13685_v3 }
 0x3bb   : > { %v8658_v6 = vadd.f32 -1.0, %v10179_v15  ;;  %v2945_v35 = vmin.f32 %v13781_v13, 0.0  ;;  %vm2909_vm14 = vcmp.gt.f32.partialorder %v13683_v41, 0.0  ;;  %vm2910_vm15 = vcmp.gt.f32.partialorder %v13672_v47, 0.0 }
 0x3bc   : > { %v13783_v45 = vpop.permute.xlu0 %4387  ;;  %v10181_v46 = vpop.eup %10180  ;;  %v2987_v52 = vmul.f32 1.442695, %v2946_v63  ;;  %4531 = vrot.lane.b32.xlu1 %v3776_v57, %s10789_s21  ;;  %v13808_v63 = vadd.f32 %v13575_v8, %v2796_v33 }
 0x3bd   : > { %v3065_v27 = vsel %vm2905_vm11, %v13603_v58, %v8658_v6  ;;  %v10183_v15 = vpop.eup %10182  ;;  %v2985_v30 = vmul.f32 1.442695, %v2945_v35  ;;  %v8661_v57 = vadd.f32 -1.0, %v10181_v46  ;;  %v2948_v58 = vmin.f32 %v13797_v12, 0.0  ;;  %v9300_v35 = vpop.f32.mrb[12].mxu1 }
 0x3be   : > { %4151 = vrot.lane.b32.xlu0 %v13427_v53, %s10785_s14  ;;  %v3066_v53 = vsel %vm2906_vm10, %v13595_v34, %v8659_v31  ;;  %9360 = vmatprep.mubr.f32.mxu0 %v3065_v27  ;;  %10192 = vpow2.f32 %v2987_v52  ;;  %v4516_v6 = vpop.permute.xlu1 %4515  ;;  %v8660_v36 = vadd.f32 -1.0, %v10183_v15  ;;  %v4887_v34 = vsel %vm2471_vm6, %v4855_v26, %v13692_v16  ;;  %v2806_v3 = vpop.f32.mrb[13].mxu1 }
 0x3bf   : > { %9361 = vmatmul.mubr.f32.vlgmr.msra.gmra.mrb[32].mxu0 %v3066_v53  ;;  %10194 = vpow2.f32 %v2985_v30  ;;  %v2947_v31 = vmin.f32 %v13808_v63, 0.0  ;;  %v10185_v46 = vpop.eup %10184  ;;  %v4919_v52 = vsel %vm2504_vm7, %v4887_v34, %v4514_v38  ;;  %v2991_v33 = vmul.f32 1.442695, %v2948_v58  ;;  %v13836_v53 = vld [vmem:[#allocation2 + $0x18f] sm:$0xff] }
 0x3c0   : > { %v13810_v44 = vpop.permute.xlu0 %4135  ;;  %9847 = vmatpush3.bf16.msra.mxu0 %v13370_v56  ;;  %v13824_v27 = vadd.f32 %v9300_v35, %v13575_v8  ;;  %3897 = vrot.lane.b32.xlu1 %v13266_v19, %s10783_s10  ;;  %v3067_v16 = vsel %vm2907_vm13, %v13641_v21, %v8660_v36  ;;  %v13831_v15 = vadd.f32 %v13575_v8, %v2806_v3  ;;  %v8663_v30 = vadd.f32 -1.0, %v10185_v46 }
 0x3c1   : > { %9849 = vmatprep.subr.bf16.mxu0 %v13667_v25  ;;  %v2989_v26 = vmul.f32 1.442695, %v2947_v31  ;;  %9363 = vmatprep.mubr.f32.mxu0 %v3067_v16  ;;  %v3068_v38 = vsel %vm2908_vm12, %v13627_v28, %v8661_v57  ;;  %10196 = vpow2.f32 %v2991_v33  ;;  %v9303_v31 = vpop.f32.mrb[14].mxu1  ;;  %v4888_v57 = vsel %vm2471_vm6, %v4856_v4, %v13783_v45 }
 0x3c2   : > { %4657 = vrot.lane.b32.xlu0 %v13801_v37, %s10790_s23  ;;  %v10187_v50 = vpop.eup %10186  ;;  %v2950_v19 = vmin.f32 %v13824_v27, 0.0  ;;  %v13840_v21 = vpop.permute.xlu1 %3881  ;;  %v2949_v34 = vmin.f32 %v13831_v15, 0.0  ;;  %v13851_v46 = vadd.f32 %v9303_v31, %v13575_v8  ;;  %v3070_v4 = vsel %vm2910_vm15, %v13672_v47, %v8663_v30 }
 0x3c3   : > { %9364 = vmatmul.mubr.f32.gmra.mrb[34].mxu0 %v3068_v38  ;;  %v8662_v58 = vadd.f32 -1.0, %v10187_v50  ;;  %10198 = vpow2.f32 %v2989_v26  ;;  %v10189_v28 = vpop.eup %10188  ;;  %v4920_v26 = vsel %vm2504_vm7, %v4888_v57, %v4516_v6  ;;  %vm2911_vm10 = vcmp.gt.f32.partialorder %v13749_v39, 0.0 }
 0x3c4   : > { %v4642_v56 = vpop.permute.xlu0 %4641  ;;  %v2995_v35 = vmul.f32 1.442695, %v2950_v19  ;;  %4659 = vrot.lane.b32.xlu1 %v13836_v53, %s10790_s23  ;;  %9851 = vmatpush3.bf16.msra.mxu0 %v13667_v25  ;;  %v10191_v33 = vpop.eup %10190  ;;  %v2993_v3 = vmul.f32 1.442695, %v2949_v34  ;;  %v8665_v45 = vadd.f32 -1.0, %v10189_v28  ;;  %vm2912_vm11 = vcmp.gt.f32.partialorder %v13734_v40, 0.0 }
 0x3c5   : > { %v4951_v36 = vsel %vm2537_vm8, %v4919_v52, %v4642_v56  ;;  %v2816_v52 = vpop.f32.mrb[15].mxu1  ;;  %9853 = vmatprep.subr.bf16.mxu0 %v13669_v14  ;;  %v8664_v25 = vadd.f32 -1.0, %v10191_v33  ;;  %vm2913_vm12 = vcmp.gt.f32.partialorder %v13781_v13, 0.0  ;;  %vm2914_vm13 = vcmp.gt.f32.partialorder %v13776_v42, 0.0 }
 0x3c6   : > { %4277 = vrot.lane.b32.xlu0 %v13453_v62, %s10787_s12  ;;  %9513 = vmatprep.mubr.msk.f32.mxu1 %vm2580_vm9, %v4951_v36  ;;  %v3069_v62 = vsel %vm2909_vm14, %v13683_v41, %v8662_v58  ;;  %v13858_v16 = vadd.f32 %v13575_v8, %v2816_v52  ;;  %10200 = vpow2.f32 %v2995_v35  ;;  %v2952_v41 = vmin.f32 %v13851_v46, 0.0  ;;  %v4644_v56 = vpop.permute.xlu1 %4643  ;;  %v9306_v36 = vpop.f32.mrb[16].mxu1  ;;  %v13885_v52 = vld [vmem:[#allocation2 + $0x199] sm:$0xff] }
 0x3c7   : > { %9366 = vmatprep.mubr.f32.mxu0 %v3069_v62  ;;  %10202 = vpow2.f32 %v2993_v3  ;;  %v4952_v19 = vsel %vm2537_vm8, %v4920_v26, %v4644_v56  ;;  %v13872_v6 = vadd.f32 %v9306_v36, %v13575_v8  ;;  %v2826_v58 = vpop.f32.mrb[17].mxu1  ;;  %v3071_v34 = vsel %vm2911_vm10, %v13749_v39, %v8664_v25 }
 0x3c8   : > { %v13860_v50 = vpop.permute.xlu0 %4261  ;;  %9367 = vmatmul.mubr.f32.gmra.mrb[36].mxu0 %v3070_v4  ;;  %v2951_v38 = vmin.f32 %v13858_v16, 0.0  ;;  %v10193_v47 = vpop.eup %10192  ;;  %v2999_v30 = vmul.f32 1.442695, %v2952_v41  ;;  %4025 = vrot.lane.b32.xlu1 %v13286_v48, %s10784_s11  ;;  %v3072_v35 = vsel %vm2912_vm11, %v13734_v40, %v8665_v45  ;;  %v4761_v39 = vsel %vm2339_vm2, %v13771_v11, %v13662_v55 }
 0x3c9   : > { %9514 = vmatmul.mubr.msk.f32.gmra.mrb[42].mxu1 %vm2580_vm9, %v4952_v19  ;;  %v10195_v31 = vpop.eup %10194  ;;  %9369 = vmatprep.mubr.f32.mxu0 %v3071_v34  ;;  %v8667_v48 = vadd.f32 -1.0, %v10193_v47  ;;  %v2954_v62 = vmin.f32 %v13872_v6, 0.0  ;;  %v4762_v40 = vsel %vm2339_vm2, %v13790_v5, %v13751_v54  ;;  %v9309_v4 = vpop.f32.mrb[18].mxu1  ;;  %v4793_v19 = vsel %vm2372_vm3, %v4761_v39, %v13756_v20 }
 0x3ca   : > { %3899 = vrot.lane.b32.xlu0 %v13276_v59, %s10783_s10  ;;  %v2997_v28 = vmul.f32 1.442695, %v2951_v38  ;;  %v13880_v59 = vadd.f32 %v13575_v8, %v2826_v58  ;;  %9855 = vmatpush3.bf16.msra.mxu0 %v13669_v14  ;;  %10204 = vpow2.f32 %v2999_v30  ;;  %v13892_v33 = vpop.permute.xlu1 %4009  ;;  %v8666_v3 = vadd.f32 -1.0, %v10195_v31  ;;  %v2836_v26 = vpop.f32.mrb[19].mxu1 }
 0x3cb   : > { %9857 = vmatprep.subr.bf16.mxu0 %v13676_v22  ;;  %v10197_v55 = vpop.eup %10196  ;;  %v3003_v11 = vmul.f32 1.442695, %v2954_v62  ;;  %v13903_v45 = vadd.f32 %v9309_v4, %v13575_v8  ;;  %v13910_v56 = vadd.f32 %v13575_v8, %v2836_v26  ;;  %v3074_v25 = vsel %vm2914_vm13, %v13776_v42, %v8667_v48 }
 0x3cc   : > { %v13882_v57 = vpop.permute.xlu0 %3883  ;;  %9370 = vmatmul.mubr.f32.gmra.mrb[38].mxu0 %v3072_v35  ;;  %10206 = vpow2.f32 %v2997_v28  ;;  %v2953_v14 = vmin.f32 %v13880_v59, 0.0  ;;  %4405 = vrot.lane.b32.xlu1 %v13885_v52, %s10788_s13  ;;  %v3073_v5 = vsel %vm2913_vm12, %v13781_v13, %v8666_v3  ;;  %v8669_v38 = vadd.f32 -1.0, %v10197_v55  ;;  %v13935_v28 = vld [vmem:[#allocation2 + $0x1a1] sm:$0xff] }
 0x3cd   : > { %v10199_v54 = vpop.eup %10198  ;;  %9372 = vmatprep.mubr.f32.mxu0 %v3073_v5  ;;  %10208 = vpow2.f32 %v3003_v11  ;;  %v2956_v13 = vmin.f32 %v13903_v45, 0.0  ;;  %v4794_v30 = vsel %vm2372_vm3, %v4762_v40, %v13810_v44  ;;  %v2955_v42 = vmin.f32 %v13910_v56, 0.0  ;;  %v3777_v3 = vld [vmem:[#allocation2 + $0x19c] sm:$0xff] }
 0x3ce   : > { %4279 = vrot.lane.b32.xlu0 %v13478_v2, %s10787_s12  ;;  %v3001_v41 = vmul.f32 1.442695, %v2953_v14  ;;  %9859 = vmatpush3.bf16.msra.mxu0 %v13676_v22  ;;  %v13919_v36 = vpop.permute.xlu1 %4389  ;;  %v8668_v47 = vadd.f32 -1.0, %v10199_v54  ;;  %v9312_v58 = vpop.f32.mrb[20].mxu1  ;;  %vm2915_vm14 = vcmp.gt.f32.partialorder %v13808_v63, 0.0  ;;  %vm2916_vm15 = vcmp.gt.f32.partialorder %v13797_v12, 0.0 }
 0x3cf   : > { %9861 = vmatprep.subr.bf16.mxu0 %v13753_v24  ;;  %v3007_v20 = vmul.f32 1.442695, %v2956_v13  ;;  %v13929_v34 = vadd.f32 %v9312_v58, %v13575_v8  ;;  %v2846_v31 = vpop.f32.mrb[21].mxu1  ;;  %v3005_v48 = vmul.f32 1.442695, %v2955_v42  ;;  %v3076_v62 = vsel %vm2916_vm15, %v13797_v12, %v8669_v38 }
 0x3d0   : > { %v13912_v2 = vpop.permute.xlu0 %4263  ;;  %9373 = vmatmul.mubr.f32.gmra.mrb[40].mxu0 %v3074_v25  ;;  %10210 = vpow2.f32 %v3001_v41  ;;  %v10201_v22 = vpop.eup %10200  ;;  %4153 = vrot.lane.b32.xlu1 %v13507_v60, %s10785_s14  ;;  %v3075_v44 = vsel %vm2915_vm14, %v13808_v63, %v8668_v47  ;;  %v4825_v60 = vsel %vm2405_vm4, %v4793_v19, %v17199_v51  ;;  %v4826_v12 = vsel %vm2405_vm4, %v4794_v30, %v17198_v23  ;;  %v3778_v30 = vld [vmem:[#allocation2 + $0x1a4] sm:$0xff] }
 0x3d1   : > { %v10203_v35 = vpop.eup %10202  ;;  %9375 = vmatprep.mubr.f32.mxu0 %v3075_v44  ;;  %v8671_v40 = vadd.f32 -1.0, %v10201_v22  ;;  %10212 = vpow2.f32 %v3007_v20  ;;  %v2958_v63 = vmin.f32 %v13929_v34, 0.0  ;;  %vm2917_vm10 = vcmp.gt.f32.partialorder %v13831_v15, 0.0 }
 0x3d2   : > { %4027 = vrot.lane.b32.xlu0 %v13304_v18, %s10784_s11  ;;  %v13938_v18 = vadd.f32 %v13575_v8, %v2846_v31  ;;  %9863 = vmatpush3.bf16.msra.mxu0 %v13753_v24  ;;  %v13947_v14 = vpop.permute.xlu1 %4137  ;;  %v8670_v4 = vadd.f32 -1.0, %v10203_v35  ;;  %10214 = vpow2.f32 %v3005_v48  ;;  %vm2918_vm11 = vcmp.gt.f32.partialorder %v13824_v27, 0.0 }
 0x3d3   : > { %9865 = vmatprep.subr.bf16.mxu0 %v13758_v17  ;;  %v3011_v26 = vmul.f32 1.442695, %v2958_v63  ;;  %v3078_v47 = vsel %vm2918_vm11, %v13824_v27, %v8671_v40  ;;  %v4857_v58 = vsel %vm2438_vm5, %v4825_v60, %v13860_v50  ;;  %vm2919_vm12 = vcmp.gt.f32.partialorder %v13858_v16, 0.0 }
 0x3d4   : > { %v13940_v39 = vpop.permute.xlu0 %4011  ;;  %9376 = vmatmul.mubr.f32.gmra.mrb[42].mxu0 %v3076_v62  ;;  %v2957_v55 = vmin.f32 %v13938_v18, 0.0  ;;  %v9315_v11 = vpop.f32.mrb[22].mxu1  ;;  %4533 = vrot.lane.b32.xlu1 %v3777_v3, %s10789_s21  ;;  %v3077_v41 = vsel %vm2917_vm10, %v13831_v15, %v8670_v4  ;;  %vm2920_vm13 = vcmp.gt.f32.partialorder %v13851_v46, 0.0  ;;  %v13983_v62 = vld [vmem:[#allocation2 + $0x19f] sm:$0xff]  ;;  %vm2921_vm14 = vcmp.gt.f32.partialorder %v13880_v59, 0.0 }
 0x3d5   : > { %v10205_v24 = vpop.eup %10204  ;;  %v13957_v5 = vadd.f32 %v9315_v11, %v13575_v8  ;;  %v2856_v54 = vpop.f32.mrb[23].mxu1  ;;  %9378 = vmatprep.mubr.f32.mxu0 %v3077_v41  ;;  %10216 = vpow2.f32 %v3011_v26  ;;  %v4889_v26 = vsel %vm2471_vm6, %v4857_v58, %v13919_v36  ;;  %vm2922_vm15 = vcmp.gt.f32.partialorder %v13872_v6, 0.0 }
 0x3d6   : > { %4407 = vrot.lane.b32.xlu0 %v13935_v28, %s10788_s13  ;;  %v10207_v25 = vpop.eup %10206  ;;  %v3009_v38 = vmul.f32 1.442695, %v2957_v55  ;;  %v13963_v19 = vadd.f32 %v13575_v8, %v2856_v54  ;;  %v8673_v42 = vadd.f32 -1.0, %v10205_v24  ;;  %9867 = vmatpush3.bf16.msra.mxu0 %v13758_v17  ;;  %v4518_v22 = vpop.permute.xlu1 %4517  ;;  %vm2923_vm10 = vcmp.gt.f32.partialorder %v13910_v56, 0.0 }
 0x3d7   : > { %v2960_v15 = vmin.f32 %v13957_v5, 0.0  ;;  %v8672_v20 = vadd.f32 -1.0, %v10207_v25  ;;  %9869 = vmatprep.subr.bf16.mxu0 %v13760_v29  ;;  %v10209_v17 = vpop.eup %10208  ;;  %v10567_v25 = vld [vmem:[#allocation2 + $0x13c] sm:$0xff]  ;;  %vm2924_vm11 = vcmp.gt.f32.partialorder %v13903_v45, 0.0 }
 0x3d8   : > { %v13965_v13 = vpop.permute.xlu0 %4391  ;;  %9379 = vmatmul.mubr.f32.gmra.mrb[44].mxu0 %v3078_v47  ;;  %10218 = vpow2.f32 %v3009_v38  ;;  %v2959_v31 = vmin.f32 %v13963_v19, 0.0  ;;  %v9318_v44 = vpop.f32.mrb[24].mxu1  ;;  %4535 = vrot.lane.b32.xlu1 %v3778_v30, %s10789_s21  ;;  %v3080_v63 = vsel %vm2920_vm13, %v13851_v46, %v8673_v42  ;;  %v8675_v4 = vadd.f32 -1.0, %v10209_v17 }
 0x3d9   : > { %v3015_v27 = vmul.f32 1.442695, %v2960_v15  ;;  %v13979_v50 = vadd.f32 %v9318_v44, %v13575_v8  ;;  %v2866_v35 = vpop.f32.mrb[25].mxu1  ;;  %v3079_v48 = vsel %vm2919_vm12, %v13858_v16, %v8672_v20  ;;  %v4858_v16 = vsel %vm2438_vm5, %v4826_v12, %v13912_v2 }
 0x3da   : > { %4155 = vrot.lane.b32.xlu0 %v13519_v49, %s10785_s14  ;;  %v10211_v3 = vpop.eup %10210  ;;  %v3013_v49 = vmul.f32 1.442695, %v2959_v31  ;;  %v13987_v40 = vadd.f32 %v13575_v8, %v2866_v35  ;;  %9381 = vmatprep.mubr.f32.mxu0 %v3079_v48  ;;  %v4520_v11 = vpop.permute.xlu1 %4519  ;;  %v4921_v2 = vsel %vm2504_vm7, %v4889_v26, %v4518_v22  ;;  %v3082_v15 = vsel %vm2922_vm15, %v13872_v6, %v8675_v4  ;;  %v14015_v22 = vld [vmem:[#allocation2 + $0x1a7] sm:$0xff] }
 0x3db   : > { %9871 = vmatpush3.bf16.msra.mxu0 %v13760_v29  ;;  %10220 = vpow2.f32 %v3015_v27  ;;  %v2962_v55 = vmin.f32 %v13979_v50, 0.0  ;;  %v8674_v24 = vadd.f32 -1.0, %v10211_v3  ;;  %v10213_v29 = vpop.eup %10212  ;;  %v4890_v6 = vsel %vm2471_vm6, %v4858_v16, %v13965_v13  ;;  %v3652_v16 = vld [vmem:[#allocation2 + $0x13f] sm:$0xff] }
 0x3dc   : > { %v13989_v60 = vpop.permute.xlu0 %4139  ;;  %9382 = vmatmul.mubr.f32.gmra.mrb[46].mxu0 %v3080_v63  ;;  %9873 = vmatprep.subr.bf16.mxu0 %v13767_v61  ;;  %10222 = vpow2.f32 %v3013_v49  ;;  %v2961_v46 = vmin.f32 %v13987_v40, 0.0  ;;  %v10215_v47 = vpop.eup %10214  ;;  %v8677_v20 = vadd.f32 -1.0, %v10213_v29  ;;  %v3621_v63 = vld [vmem:[#allocation2 + $0x144] sm:$0xff]  ;;  %vm2925_vm12 = vcmp.gt.f32.partialorder %v13938_v18, 0.0 }
 0x3dd   : > { %v9321_v54 = vpop.f32.mrb[26].mxu1  ;;  %v3019_v12 = vmul.f32 1.442695, %v2962_v55  ;;  %3901 = vrot.lane.b32.xlu1 %v10567_v25, %s10783_s10  ;;  %v3081_v38 = vsel %vm2921_vm14, %v13880_v59, %v8674_v24  ;;  %v8676_v17 = vadd.f32 -1.0, %v10215_v47  ;;  %vm2926_vm13 = vcmp.gt.f32.partialorder %v13929_v34, 0.0 }
 0x3de   : > { %4661 = vrot.lane.b32.xlu0 %v13983_v62, %s10790_s23  ;;  %v14005_v41 = vadd.f32 %v9321_v54, %v13575_v8  ;;  %v2876_v36 = vpop.f32.mrb[27].mxu1  ;;  %v3017_v30 = vmul.f32 1.442695, %v2961_v46  ;;  %9384 = vmatprep.mubr.f32.mxu0 %v3081_v38  ;;  %v14020_v59 = vpop.permute.xlu1 %3885  ;;  %v3084_v13 = vsel %vm2924_vm11, %v13903_v45, %v8677_v20  ;;  %v4922_v54 = vsel %vm2504_vm7, %v4890_v6, %v4520_v11  ;;  %v14056_v20 = vld [vmem:[#allocation2 + $0x1b1] sm:$0xff] }
 0x3df   : > { %v14012_v42 = vadd.f32 %v13575_v8, %v2876_v36  ;;  %9875 = vmatpush3.bf16.msra.mxu0 %v13767_v61  ;;  %10224 = vpow2.f32 %v3019_v12  ;;  %v10217_v61 = vpop.eup %10216  ;;  %v884_v38 = vmin.f32 %v13680_v1, 0.0  ;;  %vm2927_vm14 = vcmp.gt.f32.partialorder %v13963_v19, 0.0 }
 0x3e0   : > { %v4646_v58 = vpop.permute.xlu0 %4645  ;;  %v2964_v31 = vmin.f32 %v14005_v41, 0.0  ;;  %9385 = vmatmul.mubr.f32.gmra.mrb[48].mxu0 %v3082_v15  ;;  %10226 = vpow2.f32 %v3017_v30  ;;  %v8679_v46 = vadd.f32 -1.0, %v10217_v61  ;;  %vm2928_vm15 = vcmp.gt.f32.partialorder %v13957_v5, 0.0 }
 0x3e1   : > { %v4953_v44 = vsel %vm2537_vm8, %v4921_v2, %v4646_v58  ;;  %v2963_v27 = vmin.f32 %v14012_v42, 0.0  ;;  %v9324_v35 = vpop.f32.mrb[28].mxu1  ;;  %4663 = vrot.lane.b32.xlu1 %v14015_v22, %s10790_s23  ;;  %vm2930_vm11 = vcmp.gt.f32.partialorder %v13979_v50, 0.0 }
 0x3e2   : > { %4281 = vrot.lane.b32.xlu0 %v13543_v32, %s10787_s12  ;;  %9516 = vmatprep.mubr.msk.f32.mxu1 %vm2580_vm9, %v4953_v44  ;;  %v3023_v48 = vmul.f32 1.442695, %v2964_v31  ;;  %v14031_v3 = vadd.f32 %v9324_v35, %v13575_v8  ;;  %v2886_v49 = vpop.f32.mrb[29].mxu1  ;;  %v3083_v32 = vsel %vm2923_vm10, %v13910_v56, %v8676_v17  ;;  %v10219_v4 = vpop.eup %10218  ;;  %v3086_v15 = vsel %vm2926_vm13, %v13929_v34, %v8679_v46  ;;  %v17363_v34 = vld [vmem:[#allocation189_spill] sm:$0xff] }
 0x3e3   : > { %v3021_v55 = vmul.f32 1.442695, %v2963_v27  ;;  %v14037_v24 = vadd.f32 %v13575_v8, %v2886_v49  ;;  %9387 = vmatprep.mubr.f32.mxu0 %v3083_v32  ;;  %v4648_v2 = vpop.permute.xlu1 %4647  ;;  %v8678_v56 = vadd.f32 -1.0, %v10219_v4  ;;  %v14060_v44 = vadd.f32 %v13423_v10, %v13614_v9  ;;  %v3653_v49 = vld [vmem:[#allocation2 + $0x147] sm:$0xff] }
 0x3e4   : > { %v14039_v26 = vpop.permute.xlu0 %4265  ;;  %10228 = vpow2.f32 %v3023_v48  ;;  %v2966_v29 = vmin.f32 %v14031_v3, 0.0  ;;  %9388 = vmatmul.mubr.f32.gmra.mrb[50].mxu0 %v3084_v13  ;;  %v4954_v25 = vsel %vm2537_vm8, %v4922_v54, %v4648_v2  ;;  %v883_v27 = vmin.f32 %v13698_v7, 0.0 }
 0x3e5   : > { %10230 = vpow2.f32 %v3021_v55  ;;  %v2965_v12 = vmin.f32 %v14037_v24, 0.0  ;;  %v10221_v45 = vpop.eup %10220  ;;  %4029 = vrot.lane.b32.xlu1 %v3652_v16, %s10784_s11  ;;  %9517 = vmatmul.mubr.msk.f32.gmra.mrb[44].mxu1 %vm2580_vm9, %v4954_v25  ;;  %v3085_v11 = vsel %vm2925_vm12, %v13938_v18, %v8678_v56  ;;  %v14067_v35 = vadd.f32 %v13614_v9, %v13429_v0  ;;  %v17365_v0 = vld [vmem:[#allocation81_spill] sm:$0xff]  ;;  %v17367_v56 = vld [vmem:[#allocation51_spill] sm:$0xff] }
 0x3e6   : > { %3903 = vrot.lane.b32.xlu0 %v3621_v63, %s10783_s10  ;;  %v3027_v36 = vmul.f32 1.442695, %v2966_v29  ;;  %v10223_v47 = vpop.eup %10222  ;;  %9390 = vmatprep.mubr.f32.mxu0 %v3085_v11  ;;  %v8681_v31 = vadd.f32 -1.0, %v10221_v45  ;;  %v17364_v10 = vmin.f32 %v17363_v34, 0.0  ;;  %v17366_v32 = vmin.f32 %v17365_v0, 0.0 }
 0x3e7   : > { %v3025_v30 = vmul.f32 1.442695, %v2965_v12  ;;  %v14062_v18 = vpop.permute.xlu1 %4013  ;;  %v8680_v17 = vadd.f32 -1.0, %v10223_v47  ;;  %v919_v16 = vmul.f32 1.442695, %v884_v38  ;;  %v885_v2 = vmin.f32 %v14067_v35, 0.0 }
 0x3e8   : > { %v14053_v58 = vpop.permute.xlu0 %3887  ;;  %10232 = vpow2.f32 %v3027_v36  ;;  %9391 = vmatmul.mubr.f32.gmra.mrb[52].mxu0 %v3086_v15  ;;  %v915_v61 = vmul.f32 1.442695, %v17364_v10  ;;  %v913_v63 = vmul.f32 1.442695, %v17366_v32  ;;  %v3088_v55 = vsel %vm2928_vm15, %v13957_v5, %v8681_v31  ;;  %v17368_v5 = vld [vmem:[#allocation52_spill] sm:$0xff]  ;;  %v14101_v38 = vld [vmem:[#allocation2 + $0x1b9] sm:$0xff] }
 0x3e9   : > { %10234 = vpow2.f32 %v3025_v30  ;;  %v10225_v6 = vpop.eup %10224  ;;  %4409 = vrot.lane.b32.xlu1 %v14056_v20, %s10788_s13  ;;  %v3087_v48 = vsel %vm2927_vm14, %v13963_v19, %v8680_v17  ;;  %v917_v29 = vmul.f32 1.442695, %v883_v27  ;;  %v886_v19 = vmin.f32 %v14060_v44, 0.0  ;;  %v17369_v36 = vld [vmem:[#allocation188_spill] sm:$0xff]  ;;  %v3578_v30 = vld [vmem:[#allocation2 + $0xc1] sm:$0xff] }
 0x3ea   : > { %4283 = vrot.lane.b32.xlu0 %v13577_v43, %s10787_s12  ;;  %v10227_v4 = vpop.eup %10226  ;;  %9393 = vmatprep.mubr.f32.mxu0 %v3087_v48  ;;  %v8683_v13 = vadd.f32 -1.0, %v10225_v6  ;;  %vm2929_vm10 = vcmp.gt.f32.partialorder %v13987_v40, 0.0  ;;  %10236 = vpow2.f32 %v915_v61  ;;  %v14091_v12 = vadd.f32 %v17367_v56, %v13614_v9  ;;  %v3779_v17 = vld [vmem:[#allocation2 + $0x1b4] sm:$0xff] }
 0x3eb   : > { %v14083_v46 = vpop.permute.xlu1 %4393  ;;  %v8682_v54 = vadd.f32 -1.0, %v10227_v4  ;;  %v14095_v25 = vadd.f32 %v13614_v9, %v17368_v5  ;;  %10238 = vpow2.f32 %v913_v63  ;;  %v923_v6 = vmul.f32 1.442695, %v886_v19  ;;  %v3780_v5 = vld [vmem:[#allocation2 + $0x1bc] sm:$0xff] }
 0x3ec   : > { %v14080_v43 = vpop.permute.xlu0 %4267  ;;  %9394 = vmatmul.mubr.f32.gmra.mrb[54].mxu0 %v3088_v55  ;;  %v3090_v31 = vsel %vm2930_vm11, %v13979_v50, %v8683_v13  ;;  %10240 = vpow2.f32 %v919_v16  ;;  %v14108_v48 = vmul.f32 1.442695, %v885_v2  ;;  %vm2931_vm12 = vcmp.gt.f32.partialorder %v14012_v42, 0.0  ;;  %v17370_v16 = vld [vmem:[#allocation56_spill] sm:$0xff] }
 0x3ed   : > { %4157 = vrot.lane.b32.xlu1 %v17369_v36, %s10785_s14  ;;  %v3089_v11 = vsel %vm2929_vm10, %v13987_v40, %v8682_v54  ;;  %10242 = vpow2.f32 %v917_v29  ;;  %v888_v50 = vmin.f32 %v14091_v12, 0.0  ;;  %v887_v63 = vmin.f32 %v14095_v25, 0.0 }
 0x3ee   : > { %4031 = vrot.lane.b32.xlu0 %v3653_v49, %s10784_s11  ;;  %v10229_v45 = vpop.eup %10228  ;;  %9396 = vmatprep.mubr.f32.mxu0 %v3089_v11  ;;  %v9327_v61 = vpop.f32.mrb[30].mxu1  ;;  %vm2932_vm13 = vcmp.gt.f32.partialorder %v14005_v41, 0.0  ;;  %v14126_v54 = vadd.f32 %v13614_v9, %v17370_v16  ;;  %v4731_v19 = vsel %vm348_vm0, %v3578_v30, %v13840_v21  ;;  %v5499_v30 = vld [vmem:[%s16752_s6 + $0x100] sm:$0xff]  ;;  %vm2933_vm14 = vcmp.gt.f32.partialorder %v14037_v24, 0.0 }
 0x3ef   : > { %v10231_v47 = vpop.eup %10230  ;;  %v8685_v27 = vadd.f32 -1.0, %v10229_v45  ;;  %v14106_v10 = vpop.permute.xlu1 %4141  ;;  %v14111_v49 = vadd.f32 %v9327_v61, %v13575_v8  ;;  %v17372_v61 = vld [vmem:[#allocation19_spill] sm:$0xff]  ;;  %vm2934_vm15 = vcmp.gt.f32.partialorder %v14031_v3, 0.0  ;;  %vm850_vm10 = vcmp.gt.f32.partialorder %v17363_v34, 0.0 }
 0x3f0   : > { %v14103_v15 = vpop.permute.xlu0 %4015  ;;  %9397 = vmatmul.mubr.f32.gmra.mrb[56].mxu0 %v3090_v31  ;;  %v8684_v40 = vadd.f32 -1.0, %v10231_v47  ;;  %v2896_v32 = vpop.f32.mrb[31].mxu1  ;;  %v17371_v31 = vld [vmem:[#allocation55_spill] sm:$0xff]  ;;  %vm849_vm11 = vcmp.gt.f32.partialorder %v17365_v0, 0.0 }
 0x3f1   : > { %v14119_v55 = vadd.f32 %v13575_v8, %v2896_v32  ;;  %4537 = vrot.lane.b32.xlu1 %v3779_v17, %s10789_s21  ;;  %v2968_v2 = vmin.f32 %v14111_v49, 0.0  ;;  %v3092_v8 = vsel %vm2932_vm13, %v14005_v41, %v8685_v27  ;;  %v14139_v21 = vadd.f32 %v17371_v31, %v13614_v9  ;;  %v5500_v41 = vld [vmem:[%s16752_s6 + $0x108] sm:$0xff] }
 0x3f2   : > { %4411 = vrot.lane.b32.xlu0 %v14101_v38, %s10788_s13  ;;  %v10233_v4 = vpop.eup %10232  ;;  %v3091_v13 = vsel %vm2931_vm12, %v14012_v42, %v8684_v40  ;;  %v4763_v42 = vsel %vm2339_vm2, %v4731_v19, %v13892_v33  ;;  %v3579_v17 = vld [vmem:[#allocation2 + $0xc9] sm:$0xff]  ;;  %v925_v9 = vmul.f32 1.442695, %v887_v63  ;;  %v3622_v19 = vld [vmem:[#allocation2 + $0x154] sm:$0xff]  ;;  %v14164_v63 = vld [vmem:[%s16753_s7] ss:$0 sm:$0xff] }
 0x3f3   : > { %v10235_v29 = vpop.eup %10234  ;;  %9399 = vmatprep.mubr.f32.mxu0 %v3091_v13  ;;  %v8687_v45 = vadd.f32 -1.0, %v10233_v4  ;;  %v2967_v36 = vmin.f32 %v14119_v55, 0.0  ;;  %v4522_v11 = vpop.permute.xlu1 %4521  ;;  %v4795_v33 = vsel %vm2372_vm3, %v4763_v42, %v13947_v14  ;;  %v3031_v27 = vmul.f32 1.442695, %v2968_v2  ;;  %v14155_v4 = vld [vmem:[#allocation2 + $0x1b7] sm:$0xff] }
 0x3f4   : > { %v14131_v56 = vpop.permute.xlu0 %4395  ;;  %9400 = vmatmul.mubr.f32.gmra.mrb[58].mxu0 %v3092_v8  ;;  %v8686_v47 = vadd.f32 -1.0, %v10235_v29  ;;  %v889_v13 = vmin.f32 %v14126_v54, 0.0  ;;  %v10237_v16 = vpop.eup %10236  ;;  %v14170_v8 = vpack.c.bf16 %v5500_v41, %v5499_v30  ;;  %v4732_v42 = vsel %vm348_vm0, %v3579_v17, %v13882_v57 }
 0x3f5   : > { %v3029_v40 = vmul.f32 1.442695, %v2967_v36  ;;  %4539 = vrot.lane.b32.xlu1 %v3780_v5, %s10789_s21  ;;  %10244 = vpow2.f32 %v3031_v27  ;;  %v3094_v29 = vsel %vm2934_vm15, %v14031_v3, %v8687_v45  ;;  %v10239_v5 = vpop.eup %10238  ;;  %v17374_v36 = vld [vmem:[#allocation42_spill] sm:$0xff]  ;;  %v17375_v45 = vld [vmem:[#allocation59_spill] sm:$0xff]  ;;  %v4764_v30 = vsel %vm2339_vm2, %v4732_v42, %v13940_v39 }
 0x3f6   : > { %4159 = vrot.lane.b32.xlu0 %v17372_v61, %s10785_s14  ;;  %v3093_v32 = vsel %vm2933_vm14, %v14037_v24, %v8686_v47  ;;  %v17373_v24 = vld [vmem:[#allocation60_spill] sm:$0xff]  ;;  %v4827_v47 = vsel %vm2405_vm4, %v4795_v33, %v17374_v36  ;;  %v14178_v31 = vadd.f32 %v14164_v63, %v17375_v45  ;;  %v14180_v27 = vpop.eup %10240  ;;  %v890_v57 = vmin.f32 %v14139_v21, 0.0  ;;  %9885 = vmatprep.subr.bf16.mxu0 %v14170_v8 }
 0x3f7   : > { %9402 = vmatprep.mubr.f32.mxu0 %v3093_v32  ;;  %v14168_v2 = vadd.f32 %v14164_v63, %v17373_v24  ;;  %10246 = vpow2.f32 %v3029_v40  ;;  %v4524_v3 = vpop.permute.xlu1 %4523  ;;  %v4859_v41 = vsel %vm2438_vm5, %v4827_v47, %v14039_v26  ;;  %v10243_v17 = vpop.eup %10242  ;;  %v4796_v33 = vsel %vm2372_vm3, %v4764_v30, %v13989_v60  ;;  %v14199_v40 = vld [vmem:[#allocation2 + $0x1bf] sm:$0xff]  ;;  %v17377_v24 = vld [vmem:[#allocation63_spill] sm:$0xff]  ;;  %v17379_v30 = vld [vmem:[#allocation64_spill] sm:$0xff] }
 0x3f8   : > { %v14158_v14 = vpop.permute.xlu0 %4143  ;;  %9403 = vmatmul.mubr.f32.gmra.mrb[60].mxu0 %v3094_v29  ;;  %10248 = vpow2.f32 %v923_v6  ;;  %v4891_v61 = vsel %vm2471_vm6, %v4859_v41, %v14083_v46  ;;  %v927_v39 = vmul.f32 1.442695, %v888_v50  ;;  %17376 = vst [vmem:[#allocation24_spill] sm:$0xff] %v14199_v40  ;;  %v929_v46 = vmul.f32 1.442695, %v889_v13  ;;  %v17378_v50 = vld [vmem:[#allocation41_spill] sm:$0xff] }
 0x3f9   : > { %3905 = vrot.lane.b32.xlu1 %v3622_v19, %s10783_s10  ;;  %10250 = vpow2.f32 %v14108_v48  ;;  %v4923_v26 = vsel %vm2504_vm7, %v4891_v61, %v4522_v11  ;;  %v891_v32 = vmin.f32 %v14168_v2, 0.0  ;;  %v892_v19 = vmin.f32 %v14178_v31, 0.0  ;;  %v3623_v47 = vld [vmem:[#allocation2 + $0x15c] sm:$0xff] }
 0x3fa   : > { %4665 = vrot.lane.b32.xlu0 %v14155_v4, %s10790_s23  ;;  %10252 = vpow2.f32 %v925_v9  ;;  %v14208_v48 = vadd.f32 %v14164_v63, %v17377_v24  ;;  %v4828_v11 = vsel %vm2405_vm4, %v4796_v33, %v17378_v50  ;;  %v8593_v42 = vadd.f32 -1.0, %v10237_v16  ;;  %v3654_v33 = vld [vmem:[#allocation2 + $0x157] sm:$0xff] }
 0x3fb   : > { %v14203_v29 = vpop.permute.xlu1 %3889  ;;  %v931_v9 = vmul.f32 1.442695, %v890_v57  ;;  %v4860_v13 = vsel %vm2438_vm5, %v4828_v11, %v14080_v43  ;;  %10254 = vpow2.f32 %v927_v39  ;;  %v8592_v45 = vadd.f32 -1.0, %v10239_v5  ;;  %v17380_v43 = vld [vmem:[#allocation71_spill] sm:$0xff]  ;;  %v17381_v11 = vld [vmem:[#allocation72_spill] sm:$0xff] }
 0x3fc   : > { %v4650_v6 = vpop.permute.xlu0 %4649  ;;  %v14222_v41 = vadd.f32 %v14164_v63, %v17379_v30  ;;  %v4892_v16 = vsel %vm2471_vm6, %v4860_v13, %v14131_v56  ;;  %v933_v57 = vmul.f32 1.442695, %v891_v32  ;;  %v14231_v61 = vadd.f32 %v14164_v63, %v17380_v43 }
 0x3fd   : > { %v4955_v60 = vsel %vm2537_vm8, %v4923_v26, %v4650_v6  ;;  %4667 = vrot.lane.b32.xlu1 %v14199_v40, %s10790_s23  ;;  %v4924_v39 = vsel %vm2504_vm7, %v4892_v16, %v4524_v3  ;;  %10256 = vpow2.f32 %v929_v46  ;;  %v935_v26 = vmul.f32 1.442695, %v892_v19 }
 0x3fe   : > { %4285 = vrot.lane.b32.xlu0 %v13801_v37, %s10787_s12  ;;  %9519 = vmatprep.mubr.msk.f32.mxu1 %vm2580_vm9, %v4955_v60  ;;  %v894_v6 = vmin.f32 %v14208_v48, 0.0  ;;  %v14238_v56 = vsel %vm850_vm10, %v17363_v34, %v8593_v42  ;;  %10258 = vpow2.f32 %v931_v9  ;;  %v1009_v46 = vsel %vm849_vm11, %v17365_v0, %v8592_v45  ;;  %v14254_v9 = vld [vmem:[#allocation2 + $0x1c9] sm:$0xff] }
 0x3ff   : > { %v4652_v5 = vpop.permute.xlu1 %4651  ;;  %v10245_v60 = vpop.eup %10244  ;;  %v893_v19 = vmin.f32 %v14222_v41, 0.0  ;;  %v14250_v34 = vadd.f32 %v14164_v63, %v17381_v11  ;;  %17382 = vst [vmem:[#allocation164_spill] sm:$0xff] %v14254_v9  ;;  %10260 = vpow2.f32 %v933_v57  ;;  %v8594_v30 = vadd.f32 -1.0, %v10243_v17 }
 0x400   : > { %v14226_v37 = vpop.permute.xlu0 %4269  ;;  %v4956_v32 = vsel %vm2537_vm8, %v4924_v39, %v4652_v5  ;;  %v8689_v3 = vadd.f32 -1.0, %v10245_v60  ;;  %v896_v16 = vmin.f32 %v14231_v61, 0.0  ;;  %vm2935_vm12 = vcmp.gt.f32.partialorder %v14119_v55, 0.0  ;;  %v3655_v5 = vld [vmem:[#allocation2 + $0x15f] sm:$0xff]  ;;  %v17383_v60 = vld [vmem:[#allocation76_spill] sm:$0xff] }
 0x401   : > { %v10247_v24 = vpop.eup %10246  ;;  %4033 = vrot.lane.b32.xlu1 %v3654_v33, %s10784_s11  ;;  %9520 = vmatmul.mubr.msk.f32.gmra.mrb[46].mxu1 %vm2580_vm9, %v4956_v32  ;;  %10262 = vpow2.f32 %v935_v26  ;;  %v939_v0 = vmul.f32 1.442695, %v894_v6  ;;  %vm851_vm13 = vcmp.gt.f32.partialorder %v13698_v7, 0.0  ;;  %vm2936_vm14 = vcmp.gt.f32.partialorder %v14111_v49, 0.0 }
 0x402   : > { %3907 = vrot.lane.b32.xlu0 %v3623_v47, %s10783_s10  ;;  %v10249_v42 = vpop.eup %10248  ;;  %v8688_v47 = vadd.f32 -1.0, %v10247_v24  ;;  %vm852_vm15 = vcmp.gt.f32.partialorder %v13680_v1, 0.0  ;;  %v8595_v17 = vadd.f32 -1.0, %v14180_v27  ;;  %v3096_v57 = vsel %vm2936_vm14, %v14111_v49, %v8689_v3  ;;  %v5502_v27 = vld [vmem:[%s16752_s6 + $0x118] sm:$0xff] }
 0x403   : > { %v10251_v33 = vpop.eup %10250  ;;  %v14257_v43 = vpop.permute.xlu1 %4017  ;;  %v937_v26 = vmul.f32 1.442695, %v893_v19  ;;  %v895_v6 = vmin.f32 %v14250_v34, 0.0  ;;  %v1011_v49 = vsel %vm851_vm13, %v13698_v7, %v8594_v30  ;;  %v943_v24 = vmul.f32 1.442695, %v896_v16  ;;  %v17384_v19 = vld [vmem:[#allocation75_spill] sm:$0xff] }
 0x404   : > { %v14252_v13 = vpop.permute.xlu0 %3891  ;;  %v10253_v45 = vpop.eup %10252  ;;  %v3095_v39 = vsel %vm2935_vm12, %v14119_v55, %v8688_v47  ;;  %v5501_v55 = vld [vmem:[%s16752_s6 + $0x110] sm:$0xff]  ;;  %v8596_v3 = vadd.f32 -1.0, %v10251_v33  ;;  %v14288_v11 = vadd.f32 %v14164_v63, %v17384_v19  ;;  %10264 = vpow2.f32 %v939_v0  ;;  %v17385_v7 = vld [vmem:[#allocation77_spill] sm:$0xff] }
 0x405   : > { %4413 = vrot.lane.b32.xlu1 %v14254_v9, %s10788_s13  ;;  %9405 = vmatprep.mubr.f32.mxu0 %v3095_v39  ;;  %v10255_v47 = vpop.eup %10254  ;;  %vm853_vm10 = vcmp.gt.f32.partialorder %v14067_v35, 0.0  ;;  %v8598_v50 = vadd.f32 -1.0, %v10253_v45  ;;  %vm854_vm11 = vcmp.gt.f32.partialorder %v14060_v44, 0.0  ;;  %vm855_vm12 = vcmp.gt.f32.partialorder %v14095_v25, 0.0  ;;  %v3580_v19 = vld [vmem:[#allocation2 + $0xd9] sm:$0xff] }
 0x406   : > { %4287 = vrot.lane.b32.xlu0 %v13836_v53, %s10787_s12  ;;  %v14273_v53 = vadd.f32 %v14164_v63, %v17383_v60  ;;  %9406 = vmatmul.mubr.f32.gmra.mrb[62].mxu0 %v3096_v57  ;;  %v8597_v60 = vadd.f32 -1.0, %v10249_v42  ;;  %v14298_v30 = vadd.f32 %v14164_v63, %v17385_v7  ;;  %v9888_v16 = vpack.c.bf16 %v5502_v27, %v5501_v55  ;;  %v5503_v57 = vld [vmem:[%s16752_s6 + $0x120] sm:$0xff] }
 0x407   : > { %v14290_v39 = vpop.permute.xlu1 %4397  ;;  %9440 = vmatprep.mubr.f32.mxu0 %v1009_v46  ;;  %v10257_v33 = vpop.eup %10256  ;;  %10266 = vpow2.f32 %v937_v26  ;;  %v14302_v46 = vld [vmem:[#allocation2 + $0x1d1] sm:$0xff]  ;;  %v1012_v42 = vsel %vm852_vm15, %v13680_v1, %v8595_v17  ;;  %v941_v0 = vmul.f32 1.442695, %v895_v6  ;;  %v1013_v1 = vsel %vm853_vm10, %v14067_v35, %v8596_v3  ;;  %v17387_v6 = vld [vmem:[#allocation78_spill] sm:$0xff]  ;;  %v17388_v35 = vld [vmem:[#allocation79_spill] sm:$0xff] }
 0x408   : > { %v14281_v32 = vpop.permute.xlu0 %4271  ;;  %17386 = vst [vmem:[#allocation165_spill] sm:$0xff] %v14302_v46  ;;  %v897_v45 = vmin.f32 %v14273_v53, 0.0  ;;  %v10259_v55 = vpop.eup %10258  ;;  %v3781_v26 = vld [vmem:[#allocation2 + $0x1cc] sm:$0xff]  ;;  %10268 = vpow2.f32 %v943_v24  ;;  %v898_v17 = vmin.f32 %v14288_v11, 0.0  ;;  %v14323_v27 = vadd.f32 %v14164_v63, %v17387_v6 }
 0x409   : > { %4161 = vrot.lane.b32.xlu1 %v13885_v52, %s10785_s14  ;;  %v1015_v24 = vsel %vm855_vm12, %v14095_v25, %v8598_v50  ;;  %v8599_v36 = vadd.f32 -1.0, %v10255_v47  ;;  %v14335_v3 = vadd.f32 %v14164_v63, %v17388_v35  ;;  %v10261_v6 = vpop.eup %10260  ;;  %vm856_vm13 = vcmp.gt.f32.partialorder %v14091_v12, 0.0  ;;  %v5505_v50 = vld [vmem:[%s16752_s6 + $0x130] sm:$0xff]  ;;  %v5506_v47 = vld [vmem:[%s16752_s6 + $0x138] sm:$0xff] }
 0x40a   : > { %4035 = vrot.lane.b32.xlu0 %v3655_v5, %s10784_s11  ;;  %v5504_v5 = vld [vmem:[%s16752_s6 + $0x128] sm:$0xff]  ;;  %9441 = vmatmul.mubr.f32.vlgmr.msra.gmra.mrb[32].mxu0 %v14238_v56  ;;  %v1014_v56 = vsel %vm854_vm11, %v14060_v44, %v8597_v60  ;;  %v8600_v44 = vadd.f32 -1.0, %v10257_v33  ;;  %10270 = vpow2.f32 %v941_v0  ;;  %v945_v25 = vmul.f32 1.442695, %v897_v45 }
 0x40b   : > { %v14325_v7 = vpop.permute.xlu1 %4145  ;;  %9443 = vmatprep.mubr.f32.mxu0 %v1011_v49  ;;  %9887 = vmatpush3.bf16.msra.mxu0 %v14170_v8  ;;  %v900_v49 = vmin.f32 %v14298_v30, 0.0  ;;  %v9892_v60 = vpack.c.bf16 %v5504_v5, %v5503_v57  ;;  %v14342_v23 = vpop.eup %10262  ;;  %vm857_vm14 = vcmp.gt.f32.partialorder %v14126_v54, 0.0  ;;  %v8601_v8 = vadd.f32 -1.0, %v10259_v55  ;;  %v3782_v5 = vld [vmem:[#allocation2 + $0x1d4] sm:$0xff] }
 0x40c   : > { %v14314_v52 = vpop.permute.xlu0 %4019  ;;  %9889 = vmatprep.subr.bf16.mxu0 %v9888_v16  ;;  %v4733_v33 = vsel %vm348_vm0, %v3580_v19, %v14020_v59  ;;  %v947_v0 = vmul.f32 1.442695, %v898_v17  ;;  %v899_v45 = vmin.f32 %v14323_v27, 0.0  ;;  %vm858_vm15 = vcmp.gt.f32.partialorder %v14139_v21, 0.0  ;;  %v3581_v17 = vld [vmem:[#allocation2 + $0xe1] sm:$0xff] }
 0x40d   : > { %4541 = vrot.lane.b32.xlu1 %v3781_v26, %s10789_s21  ;;  %v17389_v26 = vld [vmem:[#allocation80_spill] sm:$0xff]  ;;  %v4765_v35 = vsel %vm2339_vm2, %v4733_v33, %v14062_v18  ;;  %v902_v59 = vmin.f32 %v14335_v3, 0.0  ;;  %v951_v18 = vmul.f32 1.442695, %v900_v49  ;;  %vm859_vm10 = vcmp.gt.f32.partialorder %v14168_v2, 0.0 }
 0x40e   : > { %4415 = vrot.lane.b32.xlu0 %v14302_v46, %s10788_s13  ;;  %9444 = vmatmul.mubr.f32.gmra.mrb[34].mxu0 %v1012_v42  ;;  %v14359_v55 = vadd.f32 %v14164_v63, %v17389_v26  ;;  %v8602_v42 = vadd.f32 -1.0, %v10261_v6  ;;  %v4797_v19 = vsel %vm2372_vm3, %v4765_v35, %v14106_v10  ;;  %v14374_v33 = vpop.eup %10264  ;;  %10272 = vpow2.f32 %v945_v25  ;;  %v17390_v6 = vld [vmem:[#allocation136_spill] sm:$0xff] }
 0x40f   : > { %v4526_v51 = vpop.permute.xlu1 %4525  ;;  %v14363_v46 = vpop.f32.mrb[32].mxu1  ;;  %9446 = vmatprep.mubr.f32.mxu0 %v1013_v1  ;;  %9891 = vmatpush3.bf16.msra.mxu0 %v9888_v16  ;;  %v9896_v1 = vpack.c.bf16 %v5506_v47, %v5505_v50  ;;  %v14377_v16 = vld [vmem:[#allocation2 + $0x1cf] sm:$0xff]  ;;  %v1016_v10 = vsel %vm856_vm13, %v14091_v12, %v8599_v36  ;;  %v14387_v49 = vadd.f32 %v14164_v63, %v17390_v6  ;;  %10274 = vpow2.f32 %v947_v0  ;;  %v17391_v0 = vld [vmem:[#allocation46_spill] sm:$0xff] }
 0x410   : > { %v14354_v57 = vpop.permute.xlu0 %4399  ;;  %v14371_v26 = vpop.f32.mrb[33].mxu1  ;;  %9893 = vmatprep.subr.bf16.mxu0 %v9892_v60  ;;  %v3624_v47 = vld [vmem:[#allocation2 + $0x16c] sm:$0xff]  ;;  %v949_v25 = vmul.f32 1.442695, %v899_v45  ;;  %v901_v12 = vmin.f32 %v14359_v55, 0.0  ;;  %v4829_v45 = vsel %vm2405_vm4, %v4797_v19, %v17391_v0  ;;  %10276 = vpow2.f32 %v951_v18 }
 0x411   : > { %4543 = vrot.lane.b32.xlu1 %v3782_v5, %s10789_s21  ;;  %v1018_v5 = vsel %vm858_vm15, %v14139_v21, %v8601_v8  ;;  %v5508_v36 = vld [vmem:[%s16752_s6 + $0x148] sm:$0xff]  ;;  %v955_v21 = vmul.f32 1.442695, %v902_v59  ;;  %v1019_v8 = vsel %vm859_vm10, %v14168_v2, %v8602_v42  ;;  %v4861_v40 = vsel %vm2438_vm5, %v4829_v45, %v14226_v37  ;;  %v5509_v59 = vld [vmem:[%s16752_s6 + $0x150] sm:$0xff]  ;;  %v5510_v42 = vld [vmem:[%s16752_s6 + $0x158] sm:$0xff] }
 0x412   : > { %4163 = vrot.lane.b32.xlu0 %v13935_v28, %s10785_s14  ;;  %v1017_v28 = vsel %vm857_vm14, %v14126_v54, %v8600_v44  ;;  %9447 = vmatmul.mubr.f32.gmra.mrb[36].mxu0 %v1014_v56  ;;  %v5507_v54 = vld [vmem:[%s16752_s6 + $0x140] sm:$0xff]  ;;  %v10267_v44 = vpop.eup %10266  ;;  %v4734_v56 = vsel %vm348_vm0, %v3581_v17, %v14053_v58  ;;  %v17392_v58 = vld [vmem:[#allocation135_spill] sm:$0xff]  ;;  %10278 = vpow2.f32 %v949_v25  ;;  %vm860_vm11 = vcmp.gt.f32.partialorder %v14178_v31, 0.0 }
 0x413   : > { %v4528_v35 = vpop.permute.xlu1 %4527  ;;  %9449 = vmatprep.mubr.f32.mxu0 %v1015_v24  ;;  %9895 = vmatpush3.bf16.msra.mxu0 %v9892_v60  ;;  %v14408_v6 = vpop.eup %10268  ;;  %v4766_v9 = vsel %vm2339_vm2, %v4734_v56, %v14103_v15  ;;  %v14418_v24 = vadd.f32 %v14164_v63, %v17392_v58  ;;  %v4893_v60 = vsel %vm2471_vm6, %v4861_v40, %v14290_v39  ;;  %v903_v15 = vmin.f32 %v14387_v49, 0.0  ;;  %v17393_v40 = vld [vmem:[#allocation162_spill] sm:$0xff] }
 0x414   : > { %v14389_v50 = vpop.permute.xlu0 %4147  ;;  %9897 = vmatprep.subr.bf16.mxu0 %v9896_v1  ;;  %v4798_v2 = vsel %vm2372_vm3, %v4766_v9, %v14158_v14  ;;  %v9900_v37 = vpack.c.bf16 %v5508_v36, %v5507_v54  ;;  %v4925_v17 = vsel %vm2504_vm7, %v4893_v60, %v4526_v51  ;;  %v14433_v14 = vld [vmem:[#allocation2 + $0x1d7] sm:$0xff]  ;;  %v14438_v9 = vadd.f32 %v14164_v63, %v17393_v40  ;;  %v10271_v39 = vpop.eup %10270 }
 0x415   : > { %3909 = vrot.lane.b32.xlu1 %v3624_v47, %s10783_s10  ;;  %10280 = vpow2.f32 %v955_v21  ;;  %v953_v54 = vmul.f32 1.442695, %v901_v12  ;;  %v8603_v51 = vadd.f32 -1.0, %v14342_v23  ;;  %v904_v36 = vmin.f32 %v14418_v24, 0.0  ;;  %v3625_v23 = vld [vmem:[#allocation2 + $0x174] sm:$0xff]  ;;  %v17395_v12 = vld [vmem:[#allocation103_spill] sm:$0xff] }
 0x416   : > { %4669 = vrot.lane.b32.xlu0 %v14377_v16, %s10790_s23  ;;  %9450 = vmatmul.mubr.f32.gmra.mrb[38].mxu0 %v1016_v10  ;;  %v17394_v10 = vld [vmem:[#allocation45_spill] sm:$0xff]  ;;  %v8604_v56 = vadd.f32 -1.0, %v10267_v44  ;;  %v9904_v45 = vpack.c.bf16 %v5510_v42, %v5509_v59  ;;  %vm861_vm12 = vcmp.gt.f32.partialorder %v14222_v41, 0.0  ;;  %v14457_v21 = vadd.f32 %v14164_v63, %v17395_v12  ;;  %v17396_v59 = vld [vmem:[#allocation139_spill] sm:$0xff] }
 0x417   : > { %v14441_v47 = vpop.permute.xlu1 %3893  ;;  %9452 = vmatprep.mubr.f32.mxu0 %v1017_v28  ;;  %9899 = vmatpush3.bf16.msra.mxu0 %v9896_v1  ;;  %v4830_v25 = vsel %vm2405_vm4, %v4798_v2, %v17394_v10  ;;  %v957_v1 = vmul.f32 1.442695, %v903_v15  ;;  %v3656_v2 = vld [vmem:[#allocation2 + $0x16f] sm:$0xff]  ;;  %v8605_v60 = vadd.f32 -1.0, %v14374_v33  ;;  %v905_v15 = vmin.f32 %v14438_v9, 0.0 }
 0x418   : > { %v4654_v19 = vpop.permute.xlu0 %4653  ;;  %v4862_v28 = vsel %vm2438_vm5, %v4830_v25, %v14281_v32  ;;  %9901 = vmatprep.subr.bf16.mxu0 %v9900_v37  ;;  %v5512_v32 = vld [vmem:[%s16752_s6 + $0x168] sm:$0xff]  ;;  %v14473_v42 = vadd.f32 %v14164_v63, %v17396_v59  ;;  %10282 = vpow2.f32 %v953_v54  ;;  %vm862_vm13 = vcmp.gt.f32.partialorder %v14208_v48, 0.0 }
 0x419   : > { %v4957_v18 = vsel %vm2537_vm8, %v4925_v17, %v4654_v19  ;;  %4671 = vrot.lane.b32.xlu1 %v14433_v14, %s10790_s23  ;;  %v4894_v44 = vsel %vm2471_vm6, %v4862_v28, %v14354_v57  ;;  %v10273_v17 = vpop.eup %10272  ;;  %v1020_v57 = vsel %vm860_vm11, %v14178_v31, %v8603_v51  ;;  %v959_v31 = vmul.f32 1.442695, %v904_v36  ;;  %v3751_v25 = vld [vmem:[#allocation2 + $0x1e1] sm:$0xff] }
 0x41a   : > { %4289 = vrot.lane.b32.xlu0 %v13983_v62, %s10787_s12  ;;  %9522 = vmatprep.mubr.msk.f32.mxu1 %vm2580_vm9, %v4957_v18  ;;  %v5511_v62 = vld [vmem:[%s16752_s6 + $0x160] sm:$0xff]  ;;  %v4926_v19 = vsel %vm2504_vm7, %v4894_v44, %v4528_v35  ;;  %v10275_v33 = vpop.eup %10274  ;;  %v1021_v18 = vsel %vm861_vm12, %v14222_v41, %v8604_v56  ;;  %v8606_v35 = vadd.f32 -1.0, %v10271_v39  ;;  %10284 = vpow2.f32 %v957_v1  ;;  %v5514_v41 = vld [vmem:[%s16752_s6 + $0x178] sm:$0xff]  ;;  %v17397_v28 = vld [vmem:[#allocation163_spill] sm:$0xff] }
 0x41b   : > { %9453 = vmatmul.mubr.f32.gmra.mrb[40].mxu0 %v1018_v5  ;;  %v4656_v40 = vpop.permute.xlu1 %4655  ;;  %v9908_v54 = vpack.c.bf16 %v5512_v32, %v5511_v62  ;;  %vm863_vm14 = vcmp.gt.f32.partialorder %v14250_v34, 0.0  ;;  %v14495_v39 = vpop.eup %10276  ;;  %v1022_v36 = vsel %vm862_vm13, %v14208_v48, %v8605_v60  ;;  %v961_v56 = vmul.f32 1.442695, %v905_v15  ;;  %v17398_v44 = vld [vmem:[#allocation137_spill] sm:$0xff]  ;;  %v17399_v15 = vld [vmem:[#allocation104_spill] sm:$0xff] }
 0x41c   : > { %v14467_v58 = vpop.permute.xlu0 %4273  ;;  %9455 = vmatprep.mubr.f32.mxu0 %v1019_v8  ;;  %9903 = vmatpush3.bf16.msra.mxu0 %v9900_v37  ;;  %v4958_v5 = vsel %vm2537_vm8, %v4926_v19, %v4656_v40  ;;  %v906_v8 = vmin.f32 %v14457_v21, 0.0  ;;  %v5513_v37 = vld [vmem:[%s16752_s6 + $0x170] sm:$0xff]  ;;  %v907_v1 = vmin.f32 %v14473_v42, 0.0  ;;  %vm864_vm15 = vcmp.gt.f32.partialorder %v14231_v61, 0.0  ;;  %v10279_v48 = vpop.eup %10278  ;;  %v17400_v40 = vld [vmem:[#allocation82_spill] sm:$0xff] }
 0x41d   : > { %9905 = vmatprep.subr.bf16.mxu0 %v9904_v45  ;;  %4037 = vrot.lane.b32.xlu1 %v3656_v2, %s10784_s11  ;;  %v8607_v62 = vadd.f32 -1.0, %v14408_v6  ;;  %v8608_v32 = vadd.f32 -1.0, %v10273_v17  ;;  %v14513_v2 = vadd.f32 %v14164_v63, %v17398_v44  ;;  %v1023_v60 = vsel %vm863_vm14, %v14250_v34, %v8606_v35  ;;  %v3657_v19 = vld [vmem:[#allocation2 + $0x177] sm:$0xff] }
 0x41e   : > { %3911 = vrot.lane.b32.xlu0 %v3625_v23, %s10783_s10  ;;  %9523 = vmatmul.mubr.msk.f32.gmra.mrb[48].mxu1 %vm2580_vm9, %v4958_v5  ;;  %v14504_v23 = vadd.f32 %v14164_v63, %v17397_v28  ;;  %vm865_vm10 = vcmp.gt.f32.partialorder %v14273_v53, 0.0  ;;  %v14523_v59 = vadd.f32 %v14164_v63, %v17399_v15  ;;  %v9912_v6 = vpack.c.bf16 %v5514_v41, %v5513_v37 }
 0x41f   : > { %9456 = vmatmul.mubr.f32.gmra.mrb[42].mxu0 %v1020_v57  ;;  %v14507_v12 = vpop.permute.xlu1 %4021  ;;  %v10281_v17 = vpop.eup %10280  ;;  %10286 = vpow2.f32 %v959_v31  ;;  %v965_v5 = vmul.f32 1.442695, %v907_v1  ;;  %v1024_v35 = vsel %vm864_vm15, %v14231_v61, %v8607_v62  ;;  %v1025_v31 = vsel %vm865_vm10, %v14273_v53, %v8608_v32  ;;  %v3752_v53 = vld [vmem:[#allocation2 + $0x1e9] sm:$0xff]  ;;  %v3582_v32 = vld [vmem:[#allocation2 + $0xf1] sm:$0xff] }
 0x420   : > { %v14497_v51 = vpop.permute.xlu0 %3895  ;;  %9458 = vmatprep.mubr.f32.mxu0 %v1021_v18  ;;  %9907 = vmatpush3.bf16.msra.mxu0 %v9904_v45  ;;  %v963_v45 = vmul.f32 1.442695, %v906_v8  ;;  %10288 = vpow2.f32 %v961_v56  ;;  %v908_v34 = vmin.f32 %v14504_v23, 0.0  ;;  %v8609_v8 = vadd.f32 -1.0, %v10275_v33  ;;  %v3783_v1 = vld [vmem:[#allocation2 + $0x1e4] sm:$0xff] }
 0x421   : > { %9909 = vmatprep.subr.bf16.mxu0 %v9908_v54  ;;  %4417 = vrot.lane.b32.xlu1 %v3751_v25, %s10788_s13  ;;  %v909_v37 = vmin.f32 %v14513_v2, 0.0  ;;  %vm866_vm11 = vcmp.gt.f32.partialorder %v14288_v11, 0.0  ;;  %v910_v41 = vmin.f32 %v14523_v59, 0.0  ;;  %v8610_v25 = vadd.f32 -1.0, %v10279_v48 }
 0x422   : > { %4291 = vrot.lane.b32.xlu0 %v14015_v22, %s10787_s12  ;;  %v14528_v22 = vadd.f32 %v14164_v63, %v17400_v40  ;;  %v10283_v61 = vpop.eup %10282  ;;  %10290 = vpow2.f32 %v963_v45  ;;  %vm867_vm12 = vcmp.gt.f32.partialorder %v14323_v27, 0.0  ;;  %vm868_vm13 = vcmp.gt.f32.partialorder %v14298_v30, 0.0 }
 0x423   : > { %9459 = vmatmul.mubr.f32.gmra.mrb[44].mxu0 %v1022_v36  ;;  %v14533_v18 = vpop.permute.xlu1 %4401  ;;  %v17401_v36 = vld [vmem:[#allocation138_spill] sm:$0xff]  ;;  %10292 = vpow2.f32 %v965_v5  ;;  %v969_v48 = vmul.f32 1.442695, %v909_v37  ;;  %v971_v15 = vmul.f32 1.442695, %v910_v41  ;;  %v1027_v45 = vsel %vm867_vm12, %v14323_v27, %v8610_v25  ;;  %v3784_v27 = vld [vmem:[#allocation2 + $0x1ec] sm:$0xff] }
 0x424   : > { %v14530_v57 = vpop.permute.xlu0 %4275  ;;  %9461 = vmatprep.mubr.f32.mxu0 %v1023_v60  ;;  %9911 = vmatpush3.bf16.msra.mxu0 %v9908_v54  ;;  %v14547_v56 = vadd.f32 %v14164_v63, %v17401_v36  ;;  %v911_v33 = vmin.f32 %v14528_v22, 0.0  ;;  %v14556_v54 = vld [vmem:[%s16753_s7 + $0x2] ss:$0 sm:$0xff]  ;;  %v967_v63 = vmul.f32 1.442695, %v908_v34  ;;  %v10285_v62 = vpop.eup %10284  ;;  %v8611_v60 = vadd.f32 -1.0, %v14495_v39 }
 0x425   : > { %9913 = vmatprep.subr.bf16.mxu0 %v9912_v6  ;;  %4165 = vrot.lane.b32.xlu1 %v14056_v20, %s10785_s14  ;;  %v1026_v20 = vsel %vm866_vm11, %v14288_v11, %v8609_v8  ;;  %v8612_v40 = vadd.f32 -1.0, %v10283_v61  ;;  %v14574_v34 = vadd.f32 %v14556_v54, %v14371_v26  ;;  %vm869_vm14 = vcmp.gt.f32.partialorder %v14359_v55, 0.0  ;;  %v3583_v37 = vld [vmem:[#allocation2 + $0xf9] sm:$0xff] }
 0x426   : > { %4039 = vrot.lane.b32.xlu0 %v3657_v19, %s10784_s11  ;;  %v912_v19 = vmin.f32 %v14547_v56, 0.0  ;;  %v973_v11 = vmul.f32 1.442695, %v911_v33  ;;  %v8613_v39 = vadd.f32 -1.0, %v10281_v17  ;;  %10294 = vpow2.f32 %v967_v63  ;;  %v3626_v63 = vld [vmem:[#allocation2 + $0x184] sm:$0xff] }
 0x427   : > { %9462 = vmatmul.mubr.f32.gmra.mrb[46].mxu0 %v1024_v35  ;;  %v14560_v44 = vpop.permute.xlu1 %4149  ;;  %vm870_vm15 = vcmp.gt.f32.partialorder %v14335_v3, 0.0  ;;  %v8614_v35 = vadd.f32 -1.0, %v10285_v62  ;;  %10296 = vpow2.f32 %v969_v48  ;;  %v1028_v17 = vsel %vm868_vm13, %v14298_v30, %v8611_v60 }
 0x428   : > { %v14558_v28 = vpop.permute.xlu0 %4023  ;;  %9464 = vmatprep.mubr.f32.mxu0 %v1025_v31  ;;  %9915 = vmatpush3.bf16.msra.mxu0 %v9912_v6  ;;  %v4735_v6 = vsel %vm348_vm0, %v3582_v32, %v14203_v29  ;;  %vm871_vm10 = vcmp.gt.f32.partialorder %v14387_v49, 0.0  ;;  %v14593_v25 = vadd.f32 %v14363_v46, %v14556_v54  ;;  %10298 = vpow2.f32 %v971_v15 }
 0x429   : > { %4545 = vrot.lane.b32.xlu1 %v3783_v1, %s10789_s21  ;;  %v10287_v31 = vpop.eup %10286  ;;  %v4767_v26 = vsel %vm2339_vm2, %v4735_v6, %v14257_v43  ;;  %v1029_v30 = vsel %vm869_vm14, %v14359_v55, %v8612_v40  ;;  %v5339_v36 = vmin.f32 %v14574_v34, 0.0  ;;  %10300 = vpow2.f32 %v973_v11 }
 0x42a   : > { %4419 = vrot.lane.b32.xlu0 %v3752_v53, %s10788_s13  ;;  %v10289_v29 = vpop.eup %10288  ;;  %v4799_v41 = vsel %vm2372_vm3, %v4767_v26, %v14325_v7  ;;  %v975_v53 = vmul.f32 1.442695, %v912_v19  ;;  %v3815_v7 = vld [vmem:[#allocation2 + $0x1e7] sm:$0xff]  ;;  %v1030_v46 = vsel %vm870_vm15, %v14335_v3, %v8613_v39  ;;  %v1031_v55 = vsel %vm871_vm10, %v14387_v49, %v8614_v35 }
 0x42b   : > { %9465 = vmatmul.mubr.f32.gmra.mrb[48].mxu0 %v1026_v20  ;;  %v4530_v8 = vpop.permute.xlu1 %4529  ;;  %v9503_v43 = vpop.f32.mrb[34].mxu1  ;;  %vm872_vm11 = vcmp.gt.f32.partialorder %v14418_v24, 0.0  ;;  %v8615_v1 = vadd.f32 -1.0, %v10287_v31  ;;  %v4736_v32 = vsel %vm348_vm0, %v3583_v37, %v14252_v13  ;;  %v17402_v20 = vld [vmem:[#allocation50_spill] sm:$0xff]  ;;  %vm873_vm12 = vcmp.gt.f32.partialorder %v14438_v9, 0.0  ;;  %v17403_v37 = vld [vmem:[#allocation49_spill] sm:$0xff] }
 0x42c   : > { %v14580_v5 = vpop.permute.xlu0 %4403  ;;  %9467 = vmatprep.mubr.f32.mxu0 %v1027_v45  ;;  %v5158_v61 = vpop.f32.mrb[35].mxu1  ;;  %v4831_v3 = vsel %vm2405_vm4, %v4799_v41, %v17402_v20  ;;  %v8616_v60 = vadd.f32 -1.0, %v10289_v29  ;;  %v4768_v45 = vsel %vm2339_vm2, %v4736_v32, %v14314_v52  ;;  %v5340_v49 = vmin.f32 %v14593_v25, 0.0 }
 0x42d   : > { %4547 = vrot.lane.b32.xlu1 %v3784_v27, %s10789_s21  ;;  %v14606_v33 = vadd.f32 %v14556_v54, %v5158_v61  ;;  %v10291_v62 = vpop.eup %10290  ;;  %v4863_v19 = vsel %vm2438_vm5, %v4831_v3, %v14467_v58  ;;  %v14625_v40 = vadd.f32 %v9503_v43, %v14556_v54  ;;  %v5371_v13 = vmul.f32 1.442695, %v5339_v36  ;;  %v3816_v27 = vld [vmem:[#allocation2 + $0x1ef] sm:$0xff] }
 0x42e   : > { %4167 = vrot.lane.b32.xlu0 %v14101_v38, %s10785_s14  ;;  %v10293_v15 = vpop.eup %10292  ;;  %v4800_v11 = vsel %vm2372_vm3, %v4768_v45, %v14389_v50  ;;  %v4895_v39 = vsel %vm2471_vm6, %v4863_v19, %v14533_v18  ;;  %10302 = vpow2.f32 %v975_v53  ;;  %v1032_v35 = vsel %vm872_vm11, %v14418_v24, %v8615_v1  ;;  %v3627_v36 = vld [vmem:[#allocation2 + $0x18c] sm:$0xff] }
 0x42f   : > { %9468 = vmatmul.mubr.f32.gmra.mrb[50].mxu0 %v1028_v17  ;;  %v4532_v48 = vpop.permute.xlu1 %4531  ;;  %v5341_v6 = vmin.f32 %v14606_v33, 0.0  ;;  %v4927_v52 = vsel %vm2504_vm7, %v4895_v39, %v4530_v8  ;;  %v8617_v31 = vadd.f32 -1.0, %v10291_v62  ;;  %v1033_v18 = vsel %vm873_vm12, %v14438_v9, %v8616_v60 }
 0x430   : > { %v14608_v38 = vpop.permute.xlu0 %4151  ;;  %9470 = vmatprep.mubr.f32.mxu0 %v1029_v30  ;;  %vm874_vm13 = vcmp.gt.f32.partialorder %v14457_v21, 0.0  ;;  %v8618_v8 = vadd.f32 -1.0, %v10293_v15  ;;  %v10295_v17 = vpop.eup %10294  ;;  %v5373_v29 = vmul.f32 1.442695, %v5340_v49  ;;  %v4832_v41 = vsel %vm2405_vm4, %v4800_v11, %v17403_v37  ;;  %v17404_v49 = vld [vmem:[#allocation24_spill] sm:$0xff] }
 0x431   : > { %3913 = vrot.lane.b32.xlu1 %v3626_v63, %s10783_s10  ;;  %v5342_v24 = vmin.f32 %v14625_v40, 0.0  ;;  %vm875_vm14 = vcmp.gt.f32.partialorder %v14473_v42, 0.0  ;;  %v10297_v43 = vpop.eup %10296  ;;  %10304 = vpow2.f32 %v5371_v13  ;;  %v4864_v9 = vsel %vm2438_vm5, %v4832_v41, %v14530_v57  ;;  %v3659_v11 = vld [vmem:[#allocation2 + $0x18f] sm:$0xff] }
 0x432   : > { %4673 = vrot.lane.b32.xlu0 %v3815_v7, %s10790_s23  ;;  %v5375_v30 = vmul.f32 1.442695, %v5341_v6  ;;  %v10299_v61 = vpop.eup %10298  ;;  %v4896_v53 = vsel %vm2471_vm6, %v4864_v9, %v14580_v5  ;;  %v1035_v1 = vsel %vm875_vm14, %v14473_v42, %v8618_v8  ;;  %vm876_vm15 = vcmp.gt.f32.partialorder %v14504_v23, 0.0  ;;  %v3753_v42 = vld [vmem:[#allocation2 + $0x1f9] sm:$0xff] }
 0x433   : > { %9471 = vmatmul.mubr.f32.gmra.mrb[52].mxu0 %v1030_v46  ;;  %v14639_v26 = vpop.permute.xlu1 %3897  ;;  %v1034_v46 = vsel %vm874_vm13, %v14457_v21, %v8617_v31  ;;  %v10301_v63 = vpop.eup %10300  ;;  %v8619_v5 = vadd.f32 -1.0, %v10295_v17  ;;  %10306 = vpow2.f32 %v5373_v29  ;;  %v5377_v62 = vmul.f32 1.442695, %v5342_v24  ;;  %v3584_v29 = vld [vmem:[#allocation2 + $0x109] sm:$0xff] }
 0x434   : > { %v4658_v58 = vpop.permute.xlu0 %4657  ;;  %9473 = vmatprep.mubr.f32.mxu0 %v1031_v55  ;;  %v4928_v55 = vsel %vm2504_vm7, %v4896_v53, %v4532_v48  ;;  %v8620_v3 = vadd.f32 -1.0, %v10297_v43  ;;  %10308 = vpow2.f32 %v5375_v30  ;;  %vm877_vm10 = vcmp.gt.f32.partialorder %v14513_v2, 0.0 }
 0x435   : > { %v4959_v50 = vsel %vm2537_vm8, %v4927_v52, %v4658_v58  ;;  %4675 = vrot.lane.b32.xlu1 %v3816_v27, %s10790_s23  ;;  %v1036_v60 = vsel %vm876_vm15, %v14504_v23, %v8619_v5  ;;  %v8621_v15 = vadd.f32 -1.0, %v10299_v61  ;;  %10310 = vpow2.f32 %v5377_v62  ;;  %v17405_v27 = vld [vmem:[#allocation164_spill] sm:$0xff] }
 0x436   : > { %4293 = vrot.lane.b32.xlu0 %v14155_v4, %s10787_s12  ;;  %9525 = vmatprep.mubr.msk.f32.mxu1 %vm2580_vm9, %v4959_v50  ;;  %v3658_v4 = vld [vmem:[#allocation2 + $0x187] sm:$0xff]  ;;  %v1037_v19 = vsel %vm877_vm10, %v14513_v2, %v8620_v3  ;;  %vm878_vm11 = vcmp.gt.f32.partialorder %v14523_v59, 0.0  ;;  %v8622_v13 = vadd.f32 -1.0, %v10301_v63  ;;  %vm879_vm12 = vcmp.gt.f32.partialorder %v14528_v22, 0.0 }
 0x437   : > { %9474 = vmatmul.mubr.f32.gmra.mrb[54].mxu0 %v1032_v35  ;;  %v4660_v57 = vpop.permute.xlu1 %4659  ;;  %v1038_v52 = vsel %vm878_vm11, %v14523_v59, %v8621_v15  ;;  %vm880_vm13 = vcmp.gt.f32.partialorder %v14547_v56, 0.0  ;;  %v3754_v35 = vld [vmem:[#allocation2 + $0x201] sm:$0xff]  ;;  %vm5307_vm14 = vcmp.gt.f32.partialorder %v14574_v34, 0.0  ;;  %v4737_v43 = vsel %vm348_vm0, %v3584_v29, %v14441_v47  ;;  %v17406_v47 = vld [vmem:[#allocation165_spill] sm:$0xff] }
 0x438   : > { %v14657_v7 = vpop.permute.xlu0 %4277  ;;  %9476 = vmatprep.mubr.f32.mxu0 %v1033_v18  ;;  %v4960_v32 = vsel %vm2537_vm8, %v4928_v55, %v4660_v57  ;;  %v10303_v45 = vpop.eup %10302  ;;  %v1039_v2 = vsel %vm879_vm12, %v14528_v22, %v8622_v13  ;;  %v3785_v18 = vld [vmem:[#allocation2 + $0x1fc] sm:$0xff]  ;;  %vm5308_vm15 = vcmp.gt.f32.partialorder %v14593_v25, 0.0  ;;  %vm5309_vm10 = vcmp.gt.f32.partialorder %v14606_v33, 0.0  ;;  %v14758_v29 = vld [vmem:[#allocation2 + $0x8] sm:$0xff] }
 0x439   : > { %4041 = vrot.lane.b32.xlu1 %v3658_v4, %s10784_s11  ;;  %9526 = vmatmul.mubr.msk.f32.gmra.mrb[50].mxu1 %vm2580_vm9, %v4960_v32  ;;  %v8623_v58 = vadd.f32 -1.0, %v10303_v45  ;;  %v3585_v4 = vld [vmem:[#allocation2 + $0x111] sm:$0xff]  ;;  %v3817_v57 = vld [vmem:[#allocation2 + $0x1ff] sm:$0xff]  ;;  %vm5310_vm11 = vcmp.gt.f32.partialorder %v14625_v40, 0.0 }
 0x43a   : > { %3915 = vrot.lane.b32.xlu0 %v3627_v36, %s10783_s10  ;;  %v3786_v36 = vld [vmem:[#allocation2 + $0x204] sm:$0xff] }
 0x43b   : > { %9477 = vmatmul.mubr.f32.gmra.mrb[56].mxu0 %v1034_v46  ;;  %v14674_v48 = vpop.permute.xlu1 %4025  ;;  %v10305_v23 = vpop.eup %10304  ;;  %v1040_v41 = vsel %vm880_vm13, %v14547_v56, %v8623_v58  ;;  %v4769_v56 = vsel %vm2339_vm2, %v4737_v43, %v14507_v12  ;;  %v17407_v32 = vld [vmem:[#allocation54_spill] sm:$0xff] }
 0x43c   : > { %v14672_v21 = vpop.permute.xlu0 %3899  ;;  %9479 = vmatprep.mubr.f32.mxu0 %v1035_v1  ;;  %v8724_v8 = vadd.f32 -1.0, %v10305_v23  ;;  %v4801_v46 = vsel %vm2372_vm3, %v4769_v56, %v14560_v44 }
 0x43d   : > { %4421 = vrot.lane.b32.xlu1 %v3753_v42, %s10788_s13  ;;  %v10307_v31 = vpop.eup %10306  ;;  %v4833_v3 = vsel %vm2405_vm4, %v4801_v46, %v17407_v32 }
 0x43e   : > { %4295 = vrot.lane.b32.xlu0 %v17404_v49, %s10787_s12  ;;  %v10309_v17 = vpop.eup %10308  ;;  %v8725_v22 = vadd.f32 -1.0, %v10307_v31  ;;  %v5467_v30 = vsel %vm5307_vm14, %v14574_v34, %v8724_v8  ;;  %v4865_v45 = vsel %vm2438_vm5, %v4833_v3, %v14657_v7 }
 0x43f   : > { %9480 = vmatmul.mubr.f32.gmra.mrb[58].mxu0 %v1036_v60  ;;  %v4406_v6 = vpop.permute.xlu1 %4405  ;;  %v10311_v24 = vpop.eup %10310  ;;  %v8726_v61 = vadd.f32 -1.0, %v10309_v17  ;;  %v5805_v17 = vld [vmem:[#allocation2 + $0xc] sm:$0xff] }
 0x440   : > { %v14685_v39 = vpop.permute.xlu0 %4279  ;;  %9482 = vmatprep.mubr.f32.mxu0 %v1037_v19  ;;  %v5468_v55 = vsel %vm5308_vm15, %v14593_v25, %v8725_v22  ;;  %v8727_v1 = vadd.f32 -1.0, %v10311_v24  ;;  %v4738_v25 = vsel %vm348_vm0, %v3585_v4, %v14497_v51  ;;  %v3756_v24 = vld [vmem:[#allocation2 + $0x219] sm:$0xff] }
 0x441   : > { %4169 = vrot.lane.b32.xlu1 %v17405_v27, %s10785_s14  ;;  %v5469_v44 = vsel %vm5309_vm10, %v14606_v33, %v8726_v61  ;;  %v4770_v15 = vsel %vm2339_vm2, %v4738_v25, %v14558_v28  ;;  %v4897_v33 = vsel %vm2471_vm6, %v4865_v45, %v4406_v6  ;;  %v3818_v28 = vld [vmem:[#allocation2 + $0x207] sm:$0xff] }
 0x442   : > { %4043 = vrot.lane.b32.xlu0 %v3659_v11, %s10784_s11  ;;  %v4802_v51 = vsel %vm2372_vm3, %v4770_v15, %v14608_v38  ;;  %v5470_v13 = vsel %vm5310_vm11, %v14625_v40, %v8727_v1  ;;  %v17408_v38 = vld [vmem:[#allocation53_spill] sm:$0xff] }
 0x443   : > { %9483 = vmatmul.mubr.f32.gmra.mrb[60].mxu0 %v1038_v52  ;;  %v14695_v59 = vpop.permute.xlu1 %4153  ;;  %v5804_v52 = vld [vmem:[#allocation2 + $0x4] sm:$0xff]  ;;  %v4834_v6 = vsel %vm2405_vm4, %v4802_v51, %v17408_v38 }
 0x444   : > { %v14693_v50 = vpop.permute.xlu0 %4027  ;;  %9485 = vmatprep.mubr.f32.mxu0 %v1039_v2 }
 0x445   : > { %4549 = vrot.lane.b32.xlu1 %v3785_v18, %s10789_s21 }
 0x446   : > { %4423 = vrot.lane.b32.xlu0 %v3754_v35, %s10788_s13  ;;  %v3755_v35 = vld [vmem:[#allocation2 + $0x211] sm:$0xff] }
 0x447   : > { %9486 = vmatmul.mubr.f32.gmra.mrb[62].mxu0 %v1040_v41  ;;  %v4534_v53 = vpop.permute.xlu1 %4533  ;;  %v9506_v63 = vpop.f32.mrb[36].mxu1 }
 0x448   : > { %v4408_v9 = vpop.permute.xlu0 %4407  ;;  %9578 = vmatprep.mubr.f32.mxu0 %v5467_v30  ;;  %v14713_v34 = vadd.f32 %v9506_v63, %v14556_v54  ;;  %v5168_v12 = vpop.f32.mrb[37].mxu1  ;;  %v4929_v11 = vsel %vm2504_vm7, %v4897_v33, %v4534_v53  ;;  %v5836_v53 = vld [vmem:[#allocation2 + $0x10] sm:$0xff]  ;;  %v5852_v63 = vld [vmem:[#allocation2 + $0x60] sm:$0xff] }
 0x449   : > { %4551 = vrot.lane.b32.xlu1 %v3786_v36, %s10789_s21  ;;  %v5169_v5 = vadd.f32 %v14556_v54, %v5168_v12  ;;  %v3788_v12 = vld [vmem:[#allocation2 + $0x21c] sm:$0xff] }
 0x44a   : > { %4171 = vrot.lane.b32.xlu0 %v17406_v47, %s10785_s14  ;;  %v5344_v42 = vmin.f32 %v14713_v34, 0.0  ;;  %vm5312_vm13 = vcmp.gt.f32.partialorder %v14713_v34, 0.0  ;;  %v3586_v47 = vld [vmem:[#allocation2 + $0x121] sm:$0xff] }
 0x44b   : > { %9579 = vmatmul.mubr.f32.vlgmr.msra.gmra.mrb[32].mxu0 %v5468_v55  ;;  %v4536_v60 = vpop.permute.xlu1 %4535  ;;  %v5343_v49 = vmin.f32 %v5169_v5, 0.0  ;;  %vm5311_vm12 = vcmp.gt.f32.partialorder %v5169_v5, 0.0 }
 0x44c   : > { %v14718_v62 = vpop.permute.xlu0 %4155  ;;  %9581 = vmatprep.mubr.f32.mxu0 %v5469_v44  ;;  %v5381_v19 = vmul.f32 1.442695, %v5344_v42 }
 0x44d   : > { %4297 = vrot.lane.b32.xlu1 %v14377_v16, %s10787_s12  ;;  %v5379_v7 = vmul.f32 1.442695, %v5343_v49  ;;  %v4866_v16 = vsel %vm2438_vm5, %v4834_v6, %v14685_v39 }
 0x44e   : > { %4677 = vrot.lane.b32.xlu0 %v3817_v57, %s10790_s23  ;;  %10312 = vpow2.f32 %v5381_v19  ;;  %v4898_v40 = vsel %vm2471_vm6, %v4866_v16, %v4408_v9  ;;  %v3787_v9 = vld [vmem:[#allocation2 + $0x214] sm:$0xff]  ;;  %v4739_v57 = vsel %vm348_vm0, %v3586_v47, %v14639_v26  ;;  %v14786_v26 = vld [vmem:[#allocation2 + $0x68] sm:$0xff] }
 0x44f   : > { %9582 = vmatmul.mubr.f32.gmra.mrb[34].mxu0 %v5470_v13  ;;  %v14740_v2 = vpop.permute.xlu1 %3901  ;;  %10314 = vpow2.f32 %v5379_v7  ;;  %v4930_v31 = vsel %vm2504_vm7, %v4898_v40, %v4536_v60  ;;  %v4771_v44 = vsel %vm2339_vm2, %v4739_v57, %v14674_v48  ;;  %v3820_v48 = vld [vmem:[#allocation2 + $0x21f] sm:$0xff] }
 0x450   : > { %v4662_v23 = vpop.permute.xlu0 %4661  ;;  %v4803_v3 = vsel %vm2372_vm3, %v4771_v44, %v14695_v59  ;;  %v17409_v59 = vld [vmem:[#allocation58_spill] sm:$0xff]  ;;  %v5854_v47 = vld [vmem:[#allocation2 + $0x78] sm:$0xff] }
 0x451   : > { %v4961_v58 = vsel %vm2537_vm8, %v4929_v11, %v4662_v23  ;;  %6013 = vrot.lane.b32.xlu1 %v5804_v52, %s10783_s10  ;;  %v4835_v33 = vsel %vm2405_vm4, %v4803_v3, %v17409_v59  ;;  %v7102_v44 = vld [vmem:[#allocation8 + $0x8] sm:$0xff] }
 0x452   : > { %4679 = vrot.lane.b32.xlu0 %v3818_v28, %s10790_s23  ;;  %9528 = vmatprep.mubr.msk.f32.mxu1 %vm2580_vm9, %v4961_v58  ;;  %v5806_v58 = vld [vmem:[#allocation2 + $0x1c] sm:$0xff] }
 0x453   : > { %v4664_v18 = vpop.permute.xlu1 %4663 }
 0x454   : > { %v4282_v27 = vpop.permute.xlu0 %4281  ;;  %v4962_v8 = vsel %vm2537_vm8, %v4930_v31, %v4664_v18  ;;  %v5807_v18 = vld [vmem:[#allocation2 + $0x24] sm:$0xff] }
 0x455   : > { %9529 = vmatmul.mubr.msk.f32.gmra.mrb[52].mxu1 %vm2580_vm9, %v4962_v8  ;;  %4425 = vrot.lane.b32.xlu1 %v3755_v35, %s10788_s13  ;;  %v4867_v11 = vsel %vm2438_vm5, %v4835_v33, %v4282_v27  ;;  %v17410_v35 = vld [vmem:[#allocation57_spill] sm:$0xff]  ;;  %v14849_v33 = vld [vmem:[#allocation2 + $0xc4] sm:$0xff] }
 0x456   : > { %4299 = vrot.lane.b32.xlu0 %v14433_v14, %s10787_s12 }
 0x457   : > { %v14760_v41 = vpop.permute.xlu1 %4029 }
 0x458   : > { %v14756_v39 = vpop.permute.xlu0 %3903  ;;  %v10313_v22 = vpop.eup %10312 }
 0x459   : > { %6141 = vrot.lane.b32.xlu1 %v14758_v29, %s10784_s11  ;;  %v10315_v43 = vpop.eup %10314  ;;  %v8729_v30 = vadd.f32 -1.0, %v10313_v22  ;;  %v14819_v22 = vld [vmem:[#allocation2 + $0x20] sm:$0xff] }
 0x45a   : > { %6015 = vrot.lane.b32.xlu0 %v5805_v17, %s10783_s10  ;;  %v8728_v61 = vadd.f32 -1.0, %v10315_v43 }
 0x45b   : > { %v4410_v36 = vpop.permute.xlu1 %4409  ;;  %v5472_v46 = vsel %vm5312_vm13, %v14713_v34, %v8729_v30  ;;  %v3587_v34 = vld [vmem:[#allocation2 + $0x129] sm:$0xff] }
 0x45c   : > { %v4284_v14 = vpop.permute.xlu0 %4283  ;;  %v5471_v56 = vsel %vm5311_vm12, %v5169_v5, %v8728_v61  ;;  %v3819_v5 = vld [vmem:[#allocation2 + $0x217] sm:$0xff]  ;;  %v4740_v51 = vsel %vm348_vm0, %v3587_v34, %v14672_v21  ;;  %v4899_v21 = vsel %vm2471_vm6, %v4867_v11, %v4410_v36  ;;  %v14831_v36 = vld [vmem:[#allocation2 + $0xc0] sm:$0xff]  ;;  %v14844_v34 = vld [vmem:[#allocation2 + $0xc8] sm:$0xff] }
 0x45d   : > { %4553 = vrot.lane.b32.xlu1 %v3787_v9, %s10789_s21  ;;  %9584 = vmatprep.mubr.f32.mxu0 %v5471_v56  ;;  %v4772_v28 = vsel %vm2339_vm2, %v4740_v51, %v14693_v50 }
 0x45e   : > { %4427 = vrot.lane.b32.xlu0 %v3756_v24, %s10788_s13  ;;  %9585 = vmatmul.mubr.f32.gmra.mrb[36].mxu0 %v5472_v46  ;;  %v4804_v23 = vsel %vm2372_vm3, %v4772_v28, %v14718_v62 }
 0x45f   : > { %v14771_v55 = vpop.permute.xlu1 %4157  ;;  %v4836_v31 = vsel %vm2405_vm4, %v4804_v23, %v17410_v35  ;;  %v7105_v23 = vld [vmem:[#allocation8 + $0x20] sm:$0xf] }
 0x460   : > { %v14768_v4 = vpop.permute.xlu0 %4031  ;;  %v4868_v62 = vsel %vm2438_vm5, %v4836_v31, %v4284_v14  ;;  %v14827_v14 = vld [vmem:[#allocation2 + $0x70] sm:$0xff] }
 0x461   : > { %6269 = vrot.lane.b32.xlu1 %v5852_v63, %s10785_s14  ;;  %v5808_v31 = vld [vmem:[#allocation2 + $0x34] sm:$0xff] }
 0x462   : > { %6143 = vrot.lane.b32.xlu0 %v5836_v53, %s10784_s11  ;;  %v5837_v53 = vld [vmem:[#allocation2 + $0x28] sm:$0xff] }
 0x463   : > { %v4538_v25 = vpop.permute.xlu1 %4537  ;;  %v9509_v42 = vpop.f32.mrb[38].mxu1 }
 0x464   : > { %v4412_v1 = vpop.permute.xlu0 %4411  ;;  %v14783_v60 = vadd.f32 %v9509_v42, %v14556_v54  ;;  %v5178_v15 = vpop.f32.mrb[39].mxu1  ;;  %v4931_v6 = vsel %vm2504_vm7, %v4899_v21, %v4538_v25  ;;  %v7103_v42 = vld [vmem:[#allocation8 + $0x10] sm:$0xff] }
 0x465   : > { %4681 = vrot.lane.b32.xlu1 %v3819_v5, %s10790_s23  ;;  %v5179_v45 = vadd.f32 %v14556_v54, %v5178_v15  ;;  %v4900_v8 = vsel %vm2471_vm6, %v4868_v62, %v4412_v1  ;;  %v7101_v5 = vld [vmem:[#allocation8] sm:$0xff]  ;;  %v7104_v15 = vld [vmem:[#allocation8 + $0x18] sm:$0xff]  ;;  %v17411_v62 = vld [vmem:[#allocation62_spill] sm:$0xff] }
 0x466   : > { %4555 = vrot.lane.b32.xlu0 %v3788_v12, %s10789_s21  ;;  %v5346_v19 = vmin.f32 %v14783_v60, 0.0  ;;  %vm5314_vm15 = vcmp.gt.f32.partialorder %v14783_v60, 0.0  ;;  %v9916_v3 = vpack.c.bf16 %v7102_v44, %v7101_v5  ;;  %v17412_v44 = vld [vmem:[#allocation61_spill] sm:$0xff] }
 0x467   : > { %v4540_v13 = vpop.permute.xlu1 %4539  ;;  %v5345_v7 = vmin.f32 %v5179_v45, 0.0  ;;  %vm5313_vm14 = vcmp.gt.f32.partialorder %v5179_v45, 0.0 }
 0x468   : > { %v14789_v49 = vpop.permute.xlu0 %4159  ;;  %v5385_v52 = vmul.f32 1.442695, %v5346_v19  ;;  %v4932_v24 = vsel %vm2504_vm7, %v4900_v8, %v4540_v13  ;;  %v9920_v19 = vpack.c.bf16 %v7104_v15, %v7103_v42  ;;  %v3588_v13 = vld [vmem:[#allocation2 + $0x139] sm:$0xff]  ;;  %9917 = vmatprep.subr.bf16.mxu1 %v9916_v3 }
 0x469   : > { %4683 = vrot.lane.b32.xlu1 %v3820_v48, %s10790_s23  ;;  %v5383_v16 = vmul.f32 1.442695, %v5345_v7  ;;  %9919 = vmatpush3.bf16.msra.mxu1 %v9916_v3  ;;  %v14861_v7 = vld [vmem:[#allocation2 + $0xcc] sm:$0xff]  ;;  %v14910_v15 = vld [vmem:[#allocation2 + $0x38] sm:$0xff] }
 0x46a   : > { %6271 = vrot.lane.b32.xlu0 %v14786_v26, %s10785_s14  ;;  %10316 = vpow2.f32 %v5385_v52  ;;  %9921 = vmatprep.subr.bf16.mxu1 %v9920_v19 }
 0x46b   : > { %v14807_v27 = vpop.permute.xlu1 %3905  ;;  %10318 = vpow2.f32 %v5383_v16 }
 0x46c   : > { %v4666_v40 = vpop.permute.xlu0 %4665 }
 0x46d   : > { %v4963_v50 = vsel %vm2537_vm8, %v4931_v6, %v4666_v40  ;;  %6381 = vrot.lane.b32.xlu1 %v14786_v26, %s10787_s12  ;;  %9923 = vmatpush3.bf16.msra.mxu1 %v9920_v19 }
 0x46e   : > { %9531 = vmatprep.mubr.msk.f32.mxu1 %vm2580_vm9, %v4963_v50  ;;  %6017 = vrot.lane.b32.xlu0 %v5806_v58, %s10783_s10  ;;  %v3589_v58 = vld [vmem:[#allocation2 + $0x141] sm:$0xff] }
 0x46f   : > { %v4668_v43 = vpop.permute.xlu1 %4667  ;;  %9634 = vmatprep.subr.msk.mxu1 %vm620_vm1, %v7105_v23 }
 0x470   : > { %v14817_v17 = vpop.permute.xlu0 %4285  ;;  %v4964_v9 = vsel %vm2537_vm8, %v4932_v24, %v4668_v43 }
 0x471   : > { %9532 = vmatmul.mubr.msk.f32.gmra.mrb[54].mxu1 %vm2580_vm9, %v4964_v9  ;;  %6145 = vrot.lane.b32.xlu1 %v14819_v22, %s10784_s11 }
 0x472   : > { %6019 = vrot.lane.b32.xlu0 %v5807_v18, %s10783_s10  ;;  %9635 = vmatpush3.msk.msra.mxu1 %vm620_vm1, %v7105_v23 }
 0x473   : > { %v14833_v61 = vpop.permute.xlu1 %4033 }
 0x474   : > { %v14829_v30 = vpop.permute.xlu0 %3907  ;;  %v10317_v56 = vpop.eup %10316 }
 0x475   : > { %6509 = vrot.lane.b32.xlu1 %v14831_v36, %s10788_s13  ;;  %v10319_v46 = vpop.eup %10318  ;;  %v8731_v12 = vadd.f32 -1.0, %v10317_v56 }
 0x476   : > { %6383 = vrot.lane.b32.xlu0 %v14827_v14, %s10787_s12  ;;  %v8730_v1 = vadd.f32 -1.0, %v10319_v46 }
 0x477   : > { %v4414_v57 = vpop.permute.xlu1 %4413  ;;  %v5474_v51 = vsel %vm5314_vm15, %v14783_v60, %v8731_v12  ;;  %v4741_v60 = vsel %vm348_vm0, %v3588_v13, %v14740_v2 }
 0x478   : > { %v14839_v63 = vpop.permute.xlu0 %4287  ;;  %v5473_v25 = vsel %vm5313_vm14, %v5179_v45, %v8730_v1  ;;  %v14857_v45 = vld [vmem:[#allocation2 + $0x80] sm:$0xff]  ;;  %v4773_v21 = vsel %vm2339_vm2, %v4741_v60, %v14760_v41  ;;  %v14895_v1 = vld [vmem:[#allocation2 + $0xd0] sm:$0xff] }
 0x479   : > { %6273 = vrot.lane.b32.xlu1 %v5854_v47, %s10785_s14  ;;  %9587 = vmatprep.mubr.f32.mxu0 %v5473_v25  ;;  %v4805_v6 = vsel %vm2372_vm3, %v4773_v21, %v14771_v55  ;;  %v4742_v55 = vsel %vm348_vm0, %v3589_v58, %v14756_v39 }
 0x47a   : > { %6147 = vrot.lane.b32.xlu0 %v5837_v53, %s10784_s11  ;;  %9588 = vmatmul.mubr.f32.gmra.mrb[38].mxu0 %v5474_v51  ;;  %v4837_v18 = vsel %vm2405_vm4, %v4805_v6, %v17411_v62  ;;  %v4774_v43 = vsel %vm2339_vm2, %v4742_v55, %v14768_v4 }
 0x47b   : > { %v14851_v28 = vpop.permute.xlu1 %4161  ;;  %v4869_v9 = vsel %vm2438_vm5, %v4837_v18, %v14817_v17  ;;  %v4806_v39 = vsel %vm2372_vm3, %v4774_v43, %v14789_v49 }
 0x47c   : > { %v14846_v48 = vpop.permute.xlu0 %4035  ;;  %v4901_v53 = vsel %vm2471_vm6, %v4869_v9, %v4414_v57  ;;  %v4838_v25 = vsel %vm2405_vm4, %v4806_v39, %v17412_v44  ;;  %v5809_v57 = vld [vmem:[#allocation2 + $0x3c] sm:$0xff] }
 0x47d   : > { %6637 = vrot.lane.b32.xlu1 %v14849_v33, %s10789_s21  ;;  %v4870_v49 = vsel %vm2438_vm5, %v4838_v25, %v14839_v63  ;;  %v14918_v63 = vld [vmem:[#allocation2 + $0x88] sm:$0xff]  ;;  %v14938_v9 = vld [vmem:[#allocation2 + $0xdc] sm:$0xff] }
 0x47e   : > { %6511 = vrot.lane.b32.xlu0 %v14844_v34, %s10788_s13 }
 0x47f   : > { %v4542_v52 = vpop.permute.xlu1 %4541  ;;  %v9512_v16 = vpop.f32.mrb[40].mxu1 }
 0x480   : > { %v4416_v11 = vpop.permute.xlu0 %4415  ;;  %v14870_v40 = vadd.f32 %v9512_v16, %v14556_v54  ;;  %v5188_v2 = vpop.f32.mrb[41].mxu1  ;;  %v4933_v47 = vsel %vm2504_vm7, %v4901_v53, %v4542_v52  ;;  %v5838_v52 = vld [vmem:[#allocation2 + $0x40] sm:$0xff]  ;;  %v5856_v16 = vld [vmem:[#allocation2 + $0x90] sm:$0xff] }
 0x481   : > { %6639 = vrot.lane.b32.xlu1 %v14861_v7, %s10789_s21  ;;  %v5189_v41 = vadd.f32 %v14556_v54, %v5188_v2  ;;  %v4902_v3 = vsel %vm2471_vm6, %v4870_v49, %v4416_v11  ;;  %v14922_v11 = vld [vmem:[#allocation2 + $0xd8] sm:$0xff] }
 0x482   : > { %6275 = vrot.lane.b32.xlu0 %v14857_v45, %s10785_s14  ;;  %v5348_v8 = vmin.f32 %v14870_v40, 0.0  ;;  %vm5316_vm11 = vcmp.gt.f32.partialorder %v14870_v40, 0.0 }
 0x483   : > { %v4544_v24 = vpop.permute.xlu1 %4543  ;;  %v5347_v56 = vmin.f32 %v5189_v41, 0.0  ;;  %vm5315_vm10 = vcmp.gt.f32.partialorder %v5189_v41, 0.0 }
 0x484   : > { %v14876_v50 = vpop.permute.xlu0 %4163  ;;  %v5389_v46 = vmul.f32 1.442695, %v5348_v8  ;;  %v4934_v51 = vsel %vm2504_vm7, %v4902_v3, %v4544_v24  ;;  %v14933_v8 = vld [vmem:[#allocation2 + $0xe0] sm:$0xff] }
 0x485   : > { %6021 = vrot.lane.b32.xlu1 %v5808_v31, %s10783_s10  ;;  %v5387_v4 = vmul.f32 1.442695, %v5347_v56  ;;  %v3590_v56 = vld [vmem:[#allocation2 + $0x151] sm:$0xff] }
 0x486   : > { %6749 = vrot.lane.b32.xlu0 %v14844_v34, %s10790_s23  ;;  %10320 = vpow2.f32 %v5389_v46  ;;  %v4743_v53 = vsel %vm348_vm0, %v3590_v56, %v14807_v27  ;;  %v14981_v56 = vld [vmem:[#allocation2 + $0xe8] sm:$0xff] }
 0x487   : > { %v14898_v5 = vpop.permute.xlu1 %3909  ;;  %10322 = vpow2.f32 %v5387_v4 }
 0x488   : > { %v4670_v12 = vpop.permute.xlu0 %4669 }
 0x489   : > { %v4965_v17 = vsel %vm2537_vm8, %v4933_v47, %v4670_v12  ;;  %6751 = vrot.lane.b32.xlu1 %v14895_v1, %s10790_s23  ;;  %v14950_v47 = vld [vmem:[#allocation2 + $0xe4] sm:$0xff]  ;;  %v3591_v12 = vld [vmem:[#allocation2 + $0x159] sm:$0xff] }
 0x48a   : > { %9534 = vmatprep.mubr.msk.f32.mxu1 %vm2580_vm9, %v4965_v17  ;;  %6385 = vrot.lane.b32.xlu0 %v14857_v45, %s10787_s12 }
 0x48b   : > { %v4672_v19 = vpop.permute.xlu1 %4671 }
 0x48c   : > { %v4290_v42 = vpop.permute.xlu0 %4289  ;;  %v4966_v13 = vsel %vm2537_vm8, %v4934_v51, %v4672_v19  ;;  %v4744_v51 = vsel %vm348_vm0, %v3591_v12, %v14829_v30 }
 0x48d   : > { %9535 = vmatmul.mubr.msk.f32.gmra.mrb[56].mxu1 %vm2580_vm9, %v4966_v13  ;;  %6149 = vrot.lane.b32.xlu1 %v14910_v15, %s10784_s11 }
 0x48e   : > { %6023 = vrot.lane.b32.xlu0 %v5809_v57, %s10783_s10 }
 0x48f   : > { %v14924_v23 = vpop.permute.xlu1 %4037 }
 0x490   : > { %v14920_v60 = vpop.permute.xlu0 %3911  ;;  %v10321_v21 = vpop.eup %10320 }
 0x491   : > { %6513 = vrot.lane.b32.xlu1 %v14922_v11, %s10788_s13  ;;  %v10323_v58 = vpop.eup %10322  ;;  %v8733_v2 = vadd.f32 -1.0, %v10321_v21 }
 0x492   : > { %6387 = vrot.lane.b32.xlu0 %v14918_v63, %s10787_s12  ;;  %v8732_v55 = vadd.f32 -1.0, %v10323_v58 }
 0x493   : > { %v4418_v31 = vpop.permute.xlu1 %4417  ;;  %v5476_v43 = vsel %vm5316_vm11, %v14870_v40, %v8733_v2  ;;  %v4775_v40 = vsel %vm2339_vm2, %v4743_v53, %v14833_v61  ;;  %v5810_v61 = vld [vmem:[#allocation2 + $0x4c] sm:$0xff]  ;;  %v17414_v53 = vld [vmem:[#allocation65_spill] sm:$0xff] }
 0x494   : > { %v4292_v6 = vpop.permute.xlu0 %4291  ;;  %v5475_v18 = vsel %vm5315_vm10, %v5189_v41, %v8732_v55  ;;  %v14946_v41 = vld [vmem:[#allocation2 + $0x98] sm:$0xff]  ;;  %v4807_v17 = vsel %vm2372_vm3, %v4775_v40, %v14851_v28  ;;  %v17413_v28 = vld [vmem:[#allocation66_spill] sm:$0xff] }
 0x495   : > { %6277 = vrot.lane.b32.xlu1 %v5856_v16, %s10785_s14  ;;  %9590 = vmatprep.mubr.f32.mxu0 %v5475_v18  ;;  %v4839_v19 = vsel %vm2405_vm4, %v4807_v17, %v17413_v28  ;;  %v14995_v17 = vld [vmem:[#allocation2 + $0x50] sm:$0xff] }
 0x496   : > { %6151 = vrot.lane.b32.xlu0 %v5838_v52, %s10784_s11  ;;  %9591 = vmatmul.mubr.f32.gmra.mrb[40].mxu0 %v5476_v43  ;;  %v4776_v52 = vsel %vm2339_vm2, %v4744_v51, %v14846_v48  ;;  %v4871_v58 = vsel %vm2438_vm5, %v4839_v19, %v4290_v42 }
 0x497   : > { %v14940_v39 = vpop.permute.xlu1 %4165  ;;  %v4903_v30 = vsel %vm2471_vm6, %v4871_v58, %v4418_v31  ;;  %v5811_v31 = vld [vmem:[#allocation2 + $0x54] sm:$0xff] }
 0x498   : > { %v14935_v24 = vpop.permute.xlu0 %4039 }
 0x499   : > { %6641 = vrot.lane.b32.xlu1 %v14938_v9, %s10789_s21 }
 0x49a   : > { %6515 = vrot.lane.b32.xlu0 %v14933_v8, %s10788_s13 }
 0x49b   : > { %v4546_v4 = vpop.permute.xlu1 %4545 }
 0x49c   : > { %v4420_v46 = vpop.permute.xlu0 %4419  ;;  %v9515_v25 = vpop.f32.mrb[42].mxu1  ;;  %v4935_v55 = vsel %vm2504_vm7, %v4903_v30, %v4546_v4 }
 0x49d   : > { %v14959_v49 = vadd.f32 %v9515_v25, %v14556_v54  ;;  %v5198_v57 = vpop.f32.mrb[43].mxu1  ;;  %6643 = vrot.lane.b32.xlu1 %v14950_v47, %s10789_s21 }
 0x49e   : > { %6279 = vrot.lane.b32.xlu0 %v14946_v41, %s10785_s14  ;;  %v5199_v27 = vadd.f32 %v14556_v54, %v5198_v57  ;;  %v4808_v54 = vsel %vm2372_vm3, %v4776_v52, %v14876_v50 }
 0x49f   : > { %v5350_v13 = vmin.f32 %v14959_v49, 0.0  ;;  %v4548_v21 = vpop.permute.xlu1 %4547  ;;  %v4840_v40 = vsel %vm2405_vm4, %v4808_v54, %v17414_v53  ;;  %vm5318_vm13 = vcmp.gt.f32.partialorder %v14959_v49, 0.0 }
 0x4a0   : > { %v14964_v3 = vpop.permute.xlu0 %4167  ;;  %v5349_v16 = vmin.f32 %v5199_v27, 0.0  ;;  %v4872_v50 = vsel %vm2438_vm5, %v4840_v40, %v4292_v6  ;;  %v15003_v6 = vld [vmem:[#allocation2 + $0xa0] sm:$0xff]  ;;  %vm5317_vm12 = vcmp.gt.f32.partialorder %v5199_v27, 0.0  ;;  %v5937_v40 = vld [vmem:[#allocation2 + $0xf4] sm:$0xff] }
 0x4a1   : > { %v5393_v2 = vmul.f32 1.442695, %v5350_v13  ;;  %6025 = vrot.lane.b32.xlu1 %v5810_v61, %s10783_s10  ;;  %v4904_v4 = vsel %vm2471_vm6, %v4872_v50, %v4420_v46  ;;  %v15007_v46 = vld [vmem:[#allocation2 + $0xf0] sm:$0xff] }
 0x4a2   : > { %6753 = vrot.lane.b32.xlu0 %v14933_v8, %s10790_s23  ;;  %v5391_v18 = vmul.f32 1.442695, %v5349_v16  ;;  %v4936_v25 = vsel %vm2504_vm7, %v4904_v4, %v4548_v21  ;;  %v5839_v21 = vld [vmem:[#allocation2 + $0x58] sm:$0xff]  ;;  %v5858_v16 = vld [vmem:[#allocation2 + $0xa8] sm:$0xff] }
 0x4a3   : > { %10324 = vpow2.f32 %v5393_v2  ;;  %v14984_v42 = vpop.permute.xlu1 %3913  ;;  %v3592_v50 = vld [vmem:[#allocation2 + $0x169] sm:$0xff] }
 0x4a4   : > { %v4674_v43 = vpop.permute.xlu0 %4673  ;;  %10326 = vpow2.f32 %v5391_v18  ;;  %v15018_v18 = vld [vmem:[#allocation2 + $0xf8] sm:$0xff]  ;;  %v4745_v4 = vsel %vm348_vm0, %v3592_v50, %v14898_v5 }
 0x4a5   : > { %v4967_v48 = vsel %vm2537_vm8, %v4935_v55, %v4674_v43  ;;  %6755 = vrot.lane.b32.xlu1 %v14981_v56, %s10790_s23 }
 0x4a6   : > { %9537 = vmatprep.mubr.msk.f32.mxu1 %vm2580_vm9, %v4967_v48  ;;  %6389 = vrot.lane.b32.xlu0 %v14946_v41, %s10787_s12 }
 0x4a7   : > { %v4676_v57 = vpop.permute.xlu1 %4675 }
 0x4a8   : > { %v4294_v12 = vpop.permute.xlu0 %4293  ;;  %v4968_v61 = vsel %vm2537_vm8, %v4936_v25, %v4676_v57  ;;  %v5938_v57 = vld [vmem:[#allocation2 + $0xfc] sm:$0xff] }
 0x4a9   : > { %9538 = vmatmul.mubr.msk.f32.gmra.mrb[58].mxu1 %vm2580_vm9, %v4968_v61  ;;  %6153 = vrot.lane.b32.xlu1 %v14995_v17, %s10784_s11  ;;  %v3593_v61 = vld [vmem:[#allocation2 + $0x171] sm:$0xff] }
 0x4aa   : > { %6027 = vrot.lane.b32.xlu0 %v5811_v31, %s10783_s10 }
 0x4ab   : > { %v15009_v19 = vpop.permute.xlu1 %4041 }
 0x4ac   : > { %v15005_v51 = vpop.permute.xlu0 %3915 }
 0x4ad   : > { %v10325_v13 = vpop.eup %10324  ;;  %6517 = vrot.lane.b32.xlu1 %v15007_v46, %s10788_s13 }
 0x4ae   : > { %6391 = vrot.lane.b32.xlu0 %v15003_v6, %s10787_s12  ;;  %v10327_v52 = vpop.eup %10326  ;;  %v8735_v54 = vadd.f32 -1.0, %v10325_v13 }
 0x4af   : > { %v4422_v30 = vpop.permute.xlu1 %4421  ;;  %v8734_v2 = vadd.f32 -1.0, %v10327_v52 }
 0x4b0   : > { %v4296_v58 = vpop.permute.xlu0 %4295  ;;  %v5478_v48 = vsel %vm5318_vm13, %v14959_v49, %v8735_v54  ;;  %v4777_v49 = vsel %vm2339_vm2, %v4745_v4, %v14924_v23  ;;  %v4746_v23 = vsel %vm348_vm0, %v3593_v61, %v14920_v60 }
 0x4b1   : > { %6281 = vrot.lane.b32.xlu1 %v5858_v16, %s10785_s14  ;;  %v5477_v55 = vsel %vm5317_vm12, %v5199_v27, %v8734_v2  ;;  %v15028_v27 = vld [vmem:[#allocation2 + $0xb0] sm:$0xff]  ;;  %v15041_v16 = vld [vmem:[%s16753_s7 + $0x2] ss:$0 sm:$0xff] }
 0x4b2   : > { %6155 = vrot.lane.b32.xlu0 %v5839_v21, %s10784_s11  ;;  %9593 = vmatprep.mubr.f32.mxu0 %v5477_v55  ;;  %v4809_v21 = vsel %vm2372_vm3, %v4777_v49, %v14940_v39  ;;  %v5812_v55 = vld [vmem:[#allocation2 + $0x64] sm:$0xff] }
 0x4b3   : > { %v15023_v31 = vpop.permute.xlu1 %4169  ;;  %9594 = vmatmul.mubr.f32.gmra.mrb[42].mxu0 %v5478_v48  ;;  %v4778_v48 = vsel %vm2339_vm2, %v4746_v23, %v14935_v24  ;;  %v15062_v23 = vld [vmem:[#allocation2 + $0x100] sm:$0xff] }
 0x4b4   : > { %v15020_v43 = vpop.permute.xlu0 %4043 }
 0x4b5   : > { %6645 = vrot.lane.b32.xlu1 %v5937_v40, %s10789_s21  ;;  %v17415_v40 = vld [vmem:[#allocation70_spill] sm:$0xff] }
 0x4b6   : > { %6519 = vrot.lane.b32.xlu0 %v15018_v18, %s10788_s13  ;;  %v4841_v50 = vsel %vm2405_vm4, %v4809_v21, %v17415_v40  ;;  %v17416_v40 = vld [vmem:[#allocation69_spill] sm:$0xff] }
 0x4b7   : > { %v4550_v13 = vpop.permute.xlu1 %4549 }
 0x4b8   : > { %v4424_v25 = vpop.permute.xlu0 %4423  ;;  %v9518_v52 = vpop.f32.mrb[44].mxu1 }
 0x4b9   : > { %v5214_v5 = vadd.f32 %v15041_v16, %v9518_v52  ;;  %v5208_v54 = vpop.f32.mrb[45].mxu1  ;;  %6647 = vrot.lane.b32.xlu1 %v5938_v57, %s10789_s21  ;;  %v4810_v52 = vsel %vm2372_vm3, %v4778_v48, %v14964_v3  ;;  %v4873_v57 = vsel %vm2438_vm5, %v4841_v50, %v4294_v12 }
 0x4ba   : > { %6283 = vrot.lane.b32.xlu0 %v15028_v27, %s10785_s14  ;;  %v5209_v2 = vadd.f32 %v15041_v16, %v5208_v54  ;;  %v4905_v60 = vsel %vm2471_vm6, %v4873_v57, %v4422_v30  ;;  %v4842_v3 = vsel %vm2405_vm4, %v4810_v52, %v17416_v40  ;;  %v5813_v30 = vld [vmem:[#allocation2 + $0x6c] sm:$0xff] }
 0x4bb   : > { %v5352_v4 = vmin.f32 %v5214_v5, 0.0  ;;  %v4552_v49 = vpop.permute.xlu1 %4551  ;;  %v4937_v24 = vsel %vm2504_vm7, %v4905_v60, %v4550_v13  ;;  %v4874_v50 = vsel %vm2438_vm5, %v4842_v3, %v4296_v58  ;;  %v15082_v58 = vld [vmem:[#allocation2 + $0xb8] sm:$0xff]  ;;  %v15084_v57 = vld [vmem:[#allocation2 + $0x108] sm:$0xff]  ;;  %vm5320_vm15 = vcmp.gt.f32.partialorder %v5214_v5, 0.0  ;;  %v15205_v40 = vld [vmem:[#allocation2 + $0x130] sm:$0xff] }
 0x4bc   : > { %v15048_v39 = vpop.permute.xlu0 %4171  ;;  %v5351_v53 = vmin.f32 %v5209_v2, 0.0  ;;  %v3594_v3 = vld [vmem:[#allocation2 + $0x181] sm:$0xff]  ;;  %vm5319_vm14 = vcmp.gt.f32.partialorder %v5209_v2, 0.0 }
 0x4bd   : > { %v5397_v61 = vmul.f32 1.442695, %v5352_v4  ;;  %6029 = vrot.lane.b32.xlu1 %v5812_v55, %s10783_s10 }
 0x4be   : > { %6757 = vrot.lane.b32.xlu0 %v15018_v18, %s10790_s23  ;;  %v5395_v54 = vmul.f32 1.442695, %v5351_v53  ;;  %v4906_v53 = vsel %vm2471_vm6, %v4874_v50, %v4424_v25  ;;  %v15098_v50 = vld [vmem:[#allocation2 + $0x110] sm:$0xff] }
 0x4bf   : > { %10328 = vpow2.f32 %v5397_v61  ;;  %v4298_v48 = vpop.permute.xlu1 %4297  ;;  %v4938_v13 = vsel %vm2504_vm7, %v4906_v53, %v4552_v49 }
 0x4c0   : > { %v4678_v21 = vpop.permute.xlu0 %4677  ;;  %10330 = vpow2.f32 %v5395_v54 }
 0x4c1   : > { %v4969_v12 = vsel %vm2537_vm8, %v4937_v24, %v4678_v21  ;;  %6759 = vrot.lane.b32.xlu1 %v15062_v23, %s10790_s23 }
 0x4c2   : > { %9540 = vmatprep.mubr.msk.f32.mxu1 %vm2580_vm9, %v4969_v12  ;;  %6393 = vrot.lane.b32.xlu0 %v15028_v27, %s10787_s12 }
 0x4c3   : > { %v15076_v52 = vpop.permute.xlu1 %6013 }
 0x4c4   : > { %v4680_v55 = vpop.permute.xlu0 %4679 }
 0x4c5   : > { %v4970_v4 = vsel %vm2537_vm8, %v4938_v13, %v4680_v55  ;;  %6157 = vrot.lane.b32.xlu1 %v14786_v26, %s10784_s11  ;;  %v5939_v13 = vld [vmem:[#allocation2 + $0x10c] sm:$0xff]  ;;  %v4747_v55 = vsel %vm348_vm0, %v3594_v3, %v14984_v42 }
 0x4c6   : > { %9541 = vmatmul.mubr.msk.f32.gmra.mrb[60].mxu1 %vm2580_vm9, %v4970_v4  ;;  %6031 = vrot.lane.b32.xlu0 %v5813_v30, %s10783_s10 }
 0x4c7   : > { %v4426_v60 = vpop.permute.xlu1 %4425 }
 0x4c8   : > { %v4300_v25 = vpop.permute.xlu0 %4299 }
 0x4c9   : > { %v10329_v49 = vpop.eup %10328  ;;  %6521 = vrot.lane.b32.xlu1 %v15084_v57, %s10788_s13 }
 0x4ca   : > { %6395 = vrot.lane.b32.xlu0 %v15082_v58, %s10787_s12  ;;  %v10331_v61 = vpop.eup %10330  ;;  %v8737_v54 = vadd.f32 -1.0, %v10329_v49  ;;  %v3595_v49 = vld [vmem:[#allocation2 + $0x189] sm:$0xff] }
 0x4cb   : > { %v15092_v21 = vpop.permute.xlu1 %6141  ;;  %v8736_v26 = vadd.f32 -1.0, %v10331_v61  ;;  %v4748_v42 = vsel %vm348_vm0, %v3595_v49, %v15005_v51  ;;  %v5814_v49 = vld [vmem:[#allocation2 + $0x7c] sm:$0xff] }
 0x4cc   : > { %v15090_v24 = vpop.permute.xlu0 %6015  ;;  %v5480_v53 = vsel %vm5320_vm15, %v5214_v5, %v8737_v54  ;;  %v4780_v54 = vsel %vm2339_vm2, %v4748_v42, %v15020_v43 }
 0x4cd   : > { %6285 = vrot.lane.b32.xlu1 %v14831_v36, %s10785_s14  ;;  %v5479_v12 = vsel %vm5319_vm14, %v5209_v2, %v8736_v26  ;;  %v5940_v2 = vld [vmem:[#allocation2 + $0x114] sm:$0xff] }
 0x4ce   : > { %6159 = vrot.lane.b32.xlu0 %v14827_v14, %s10784_s11  ;;  %9596 = vmatprep.mubr.f32.mxu0 %v5479_v12  ;;  %v4779_v14 = vsel %vm2339_vm2, %v4747_v55, %v15009_v19  ;;  %v17417_v19 = vld [vmem:[#allocation74_spill] sm:$0xff] }
 0x4cf   : > { %9597 = vmatmul.mubr.f32.gmra.mrb[44].mxu0 %v5480_v53  ;;  %v4554_v4 = vpop.permute.xlu1 %4553  ;;  %v4811_v36 = vsel %vm2372_vm3, %v4779_v14, %v15023_v31  ;;  %v4812_v31 = vsel %vm2372_vm3, %v4780_v54, %v15048_v39 }
 0x4d0   : > { %v4428_v30 = vpop.permute.xlu0 %4427  ;;  %v4843_v26 = vsel %vm2405_vm4, %v4811_v36, %v17417_v19  ;;  %v17418_v19 = vld [vmem:[#allocation73_spill] sm:$0xff] }
 0x4d1   : > { %6649 = vrot.lane.b32.xlu1 %v5939_v13, %s10789_s21  ;;  %v4875_v12 = vsel %vm2438_vm5, %v4843_v26, %v4298_v48  ;;  %v4844_v39 = vsel %vm2405_vm4, %v4812_v31, %v17418_v19 }
 0x4d2   : > { %6523 = vrot.lane.b32.xlu0 %v15098_v50, %s10788_s13  ;;  %v4907_v13 = vsel %vm2471_vm6, %v4875_v12, %v4426_v60  ;;  %v15140_v12 = vld [vmem:[#allocation2 + $0x118] sm:$0xff] }
 0x4d3   : > { %v15113_v61 = vpop.permute.xlu1 %6269  ;;  %v4939_v14 = vsel %vm2504_vm7, %v4907_v13, %v4554_v4 }
 0x4d4   : > { %v15109_v5 = vpop.permute.xlu0 %6143  ;;  %v9521_v3 = vpop.f32.mrb[46].mxu1 }
 0x4d5   : > { %v5224_v53 = vadd.f32 %v15041_v16, %v9521_v3  ;;  %v5218_v51 = vpop.f32.mrb[47].mxu1  ;;  %6651 = vrot.lane.b32.xlu1 %v5940_v2, %s10789_s21  ;;  %v4876_v2 = vsel %vm2438_vm5, %v4844_v39, %v4300_v25  ;;  %v5815_v25 = vld [vmem:[#allocation2 + $0x84] sm:$0xff] }
 0x4d6   : > { %6287 = vrot.lane.b32.xlu0 %v14844_v34, %s10785_s14  ;;  %v5219_v43 = vadd.f32 %v15041_v16, %v5218_v51  ;;  %v4908_v4 = vsel %vm2471_vm6, %v4876_v2, %v4428_v30 }
 0x4d7   : > { %v5354_v36 = vmin.f32 %v5224_v53, 0.0  ;;  %v4682_v42 = vpop.permute.xlu1 %4681  ;;  %vm5322_vm11 = vcmp.gt.f32.partialorder %v5224_v53, 0.0 }
 0x4d8   : > { %v4556_v55 = vpop.permute.xlu0 %4555  ;;  %v5353_v54 = vmin.f32 %v5219_v43, 0.0  ;;  %v4971_v48 = vsel %vm2537_vm8, %v4939_v14, %v4682_v42  ;;  %v15156_v14 = vld [vmem:[#allocation2 + $0x120] sm:$0xff]  ;;  %vm5321_vm10 = vcmp.gt.f32.partialorder %v5219_v43, 0.0 }
 0x4d9   : > { %v5401_v60 = vmul.f32 1.442695, %v5354_v36  ;;  %6033 = vrot.lane.b32.xlu1 %v5814_v49, %s10783_s10  ;;  %9543 = vmatprep.mubr.msk.f32.mxu1 %vm2580_vm9, %v4971_v48  ;;  %v4940_v31 = vsel %vm2504_vm7, %v4908_v4, %v4556_v55 }
 0x4da   : > { %6761 = vrot.lane.b32.xlu0 %v15098_v50, %s10790_s23  ;;  %v5399_v26 = vmul.f32 1.442695, %v5353_v54 }
 0x4db   : > { %10332 = vpow2.f32 %v5401_v60  ;;  %v4684_v51 = vpop.permute.xlu1 %4683  ;;  %v15168_v60 = vld [vmem:[#allocation2 + $0x128] sm:$0xff] }
 0x4dc   : > { %v15138_v3 = vpop.permute.xlu0 %6271  ;;  %10334 = vpow2.f32 %v5399_v26  ;;  %v4972_v13 = vsel %vm2537_vm8, %v4940_v31, %v4684_v51  ;;  %v5941_v31 = vld [vmem:[#allocation2 + $0x124] sm:$0xff] }
 0x4dd   : > { %6763 = vrot.lane.b32.xlu1 %v15140_v12, %s10790_s23  ;;  %9544 = vmatmul.mubr.msk.f32.gmra.mrb[62].mxu1 %vm2580_vm9, %v4972_v13  ;;  %v5772_v51 = vld [vmem:[#allocation2] sm:$0xff] }
 0x4de   : > { %6397 = vrot.lane.b32.xlu0 %v14844_v34, %s10787_s12 }
 0x4df   : > { %v6382_v49 = vpop.permute.xlu1 %6381 }
 0x4e0   : > { %v15149_v30 = vpop.permute.xlu0 %6017 }
 0x4e1   : > { %6161 = vrot.lane.b32.xlu1 %v14857_v45, %s10784_s11 }
 0x4e2   : > { %6035 = vrot.lane.b32.xlu0 %v5815_v25, %s10783_s10 }
 0x4e3   : > { %v15158_v36 = vpop.permute.xlu1 %6145 }
 0x4e4   : > { %v15154_v55 = vpop.permute.xlu0 %6019 }
 0x4e5   : > { %v10333_v34 = vpop.eup %10332  ;;  %6525 = vrot.lane.b32.xlu1 %v15156_v14, %s10788_s13 }
 0x4e6   : > { %6399 = vrot.lane.b32.xlu0 %v14895_v1, %s10787_s12  ;;  %v10335_v42 = vpop.eup %10334  ;;  %v8739_v54 = vadd.f32 -1.0, %v10333_v34 }
 0x4e7   : > { %v6510_v48 = vpop.permute.xlu1 %6509  ;;  %v8738_v2 = vadd.f32 -1.0, %v10335_v42 }
 0x4e8   : > { %v6384_v39 = vpop.permute.xlu0 %6383  ;;  %v5482_v4 = vsel %vm5322_vm11, %v5224_v53, %v8739_v54 }
 0x4e9   : > { %6289 = vrot.lane.b32.xlu1 %v14922_v11, %s10785_s14  ;;  %v5481_v45 = vsel %vm5321_vm10, %v5219_v43, %v8738_v2  ;;  %v5942_v43 = vld [vmem:[#allocation2 + $0x12c] sm:$0xff] }
 0x4ea   : > { %6163 = vrot.lane.b32.xlu0 %v14918_v63, %s10784_s11  ;;  %9599 = vmatprep.mubr.f32.mxu0 %v5481_v45  ;;  %v6845_v63 = vsel %vm348_vm0, %v5772_v51, %v15076_v52 }
 0x4eb   : > { %9600 = vmatmul.mubr.f32.gmra.mrb[46].mxu0 %v5482_v4  ;;  %v15172_v13 = vpop.permute.xlu1 %6273  ;;  %v6877_v53 = vsel %vm2339_vm2, %v6845_v63, %v15092_v21  ;;  %v5816_v4 = vld [vmem:[#allocation2 + $0x94] sm:$0xff]  ;;  %v6846_v21 = vsel %vm348_vm0, %v14758_v29, %v15090_v24 }
 0x4ec   : > { %v15170_v26 = vpop.permute.xlu0 %6147  ;;  %v6909_v34 = vsel %vm2372_vm3, %v6877_v53, %v15113_v61  ;;  %v6878_v53 = vsel %vm2339_vm2, %v6846_v21, %v15109_v5  ;;  %v17420_v21 = vld [vmem:[#allocation127_spill] sm:$0xff] }
 0x4ed   : > { %6653 = vrot.lane.b32.xlu1 %v5941_v31, %s10789_s21  ;;  %v17419_v31 = vld [vmem:[#allocation128_spill] sm:$0xff] }
 0x4ee   : > { %6527 = vrot.lane.b32.xlu0 %v15168_v60, %s10788_s13  ;;  %v6941_v61 = vsel %vm2405_vm4, %v6909_v34, %v17419_v31 }
 0x4ef   : > { %v6638_v25 = vpop.permute.xlu1 %6637 }
 0x4f0   : > { %v6512_v11 = vpop.permute.xlu0 %6511 }
 0x4f1   : > { %v9524_v42 = vpop.f32.mrb[48].mxu1  ;;  %6655 = vrot.lane.b32.xlu1 %v5942_v43, %s10789_s21 }
 0x4f2   : > { %6291 = vrot.lane.b32.xlu0 %v14933_v8, %s10785_s14  ;;  %v5234_v54 = vadd.f32 %v15041_v16, %v9524_v42  ;;  %v5228_v2 = vpop.f32.mrb[49].mxu1  ;;  %v6973_v42 = vsel %vm2438_vm5, %v6941_v61, %v6382_v49 }
 0x4f3   : > { %v5229_v52 = vadd.f32 %v15041_v16, %v5228_v2  ;;  %v6640_v63 = vpop.permute.xlu1 %6639  ;;  %v6910_v2 = vsel %vm2372_vm3, %v6878_v53, %v15138_v3  ;;  %v7005_v19 = vsel %vm2471_vm6, %v6973_v42, %v6510_v48  ;;  %v5817_v3 = vld [vmem:[#allocation2 + $0x9c] sm:$0xff] }
 0x4f4   : > { %v15188_v45 = vpop.permute.xlu0 %6275  ;;  %v5356_v51 = vmin.f32 %v5234_v54, 0.0  ;;  %v7037_v24 = vsel %vm2504_vm7, %v7005_v19, %v6638_v25  ;;  %v6942_v61 = vsel %vm2405_vm4, %v6910_v2, %v17420_v21  ;;  %vm5324_vm13 = vcmp.gt.f32.partialorder %v5234_v54, 0.0  ;;  %v5943_v21 = vld [vmem:[#allocation2 + $0x13c] sm:$0xff] }
 0x4f5   : > { %v5355_v43 = vmin.f32 %v5229_v52, 0.0  ;;  %6037 = vrot.lane.b32.xlu1 %v5816_v4, %s10783_s10  ;;  %v6974_v19 = vsel %vm2438_vm5, %v6942_v61, %v6384_v39  ;;  %v15227_v39 = vld [vmem:[#allocation2 + $0x138] sm:$0xff]  ;;  %vm5323_vm12 = vcmp.gt.f32.partialorder %v5229_v52, 0.0 }
 0x4f6   : > { %6765 = vrot.lane.b32.xlu0 %v15168_v60, %s10790_s23  ;;  %v5405_v29 = vmul.f32 1.442695, %v5356_v51  ;;  %v7006_v48 = vsel %vm2471_vm6, %v6974_v19, %v6512_v11  ;;  %v5774_v61 = vld [vmem:[#allocation2 + $0x18] sm:$0xff] }
 0x4f7   : > { %v5403_v34 = vmul.f32 1.442695, %v5355_v43  ;;  %v15208_v49 = vpop.permute.xlu1 %6021  ;;  %v7038_v4 = vsel %vm2504_vm7, %v7006_v48, %v6640_v63 }
 0x4f8   : > { %v6750_v31 = vpop.permute.xlu0 %6749  ;;  %10336 = vpow2.f32 %v5405_v29 }
 0x4f9   : > { %v7069_v5 = vsel %vm2537_vm8, %v7037_v24, %v6750_v31  ;;  %10338 = vpow2.f32 %v5403_v34  ;;  %6767 = vrot.lane.b32.xlu1 %v15205_v40, %s10790_s23  ;;  %v15239_v34 = vld [vmem:[#allocation2 + $0x140] sm:$0xff] }
 0x4fa   : > { %6401 = vrot.lane.b32.xlu0 %v14933_v8, %s10787_s12  ;;  %9636 = vmatprep.mubr.msk.f32.mxu1 %vm2580_vm9, %v7069_v5 }
 0x4fb   : > { %v6752_v51 = vpop.permute.xlu1 %6751 }
 0x4fc   : > { %v6386_v25 = vpop.permute.xlu0 %6385  ;;  %v7070_v53 = vsel %vm2537_vm8, %v7038_v4, %v6752_v51 }
 0x4fd   : > { %6165 = vrot.lane.b32.xlu1 %v14946_v41, %s10784_s11  ;;  %9637 = vmatmul.mubr.msk.f32.vlgmr.msra.gmra.mrb[64].mxu1 %vm2580_vm9, %v7070_v53 }
 0x4fe   : > { %6039 = vrot.lane.b32.xlu0 %v5817_v3, %s10783_s10 }
 0x4ff   : > { %v15229_v42 = vpop.permute.xlu1 %6149 }
 0x500   : > { %v15225_v8 = vpop.permute.xlu0 %6023 }
 0x501   : > { %6529 = vrot.lane.b32.xlu1 %v15227_v39, %s10788_s13 }
 0x502   : > { %6403 = vrot.lane.b32.xlu0 %v14981_v56, %s10787_s12  ;;  %v10337_v11 = vpop.eup %10336 }
 0x503   : > { %v10339_v63 = vpop.eup %10338  ;;  %v8741_v2 = vadd.f32 -1.0, %v10337_v11  ;;  %v6514_v29 = vpop.permute.xlu1 %6513 }
 0x504   : > { %v6388_v43 = vpop.permute.xlu0 %6387  ;;  %v8740_v41 = vadd.f32 -1.0, %v10339_v63  ;;  %v5818_v63 = vld [vmem:[#allocation2 + $0xac] sm:$0xff] }
 0x505   : > { %6293 = vrot.lane.b32.xlu1 %v15007_v46, %s10785_s14  ;;  %v5484_v31 = vsel %vm5324_vm13, %v5234_v54, %v8741_v2  ;;  %v17421_v2 = vld [vmem:[#allocation22_spill] sm:$0xff] }
 0x506   : > { %6167 = vrot.lane.b32.xlu0 %v15003_v6, %s10784_s11  ;;  %v5483_v24 = vsel %vm5323_vm12, %v5229_v52, %v8740_v41  ;;  %v6847_v6 = vsel %vm348_vm0, %v5774_v61, %v15149_v30  ;;  %v5944_v52 = vld [vmem:[#allocation2 + $0x144] sm:$0xff] }
 0x507   : > { %9602 = vmatprep.mubr.f32.mxu0 %v5483_v24  ;;  %v15243_v19 = vpop.permute.xlu1 %6277  ;;  %v6879_v54 = vsel %vm2339_vm2, %v6847_v6, %v15158_v36  ;;  %v6848_v36 = vsel %vm348_vm0, %v14819_v22, %v15154_v55 }
 0x508   : > { %v15241_v5 = vpop.permute.xlu0 %6151  ;;  %9603 = vmatmul.mubr.f32.gmra.mrb[48].mxu0 %v5484_v31  ;;  %v6911_v48 = vsel %vm2372_vm3, %v6879_v54, %v15172_v13  ;;  %v6880_v31 = vsel %vm2339_vm2, %v6848_v36, %v15170_v26 }
 0x509   : > { %6657 = vrot.lane.b32.xlu1 %v5943_v21, %s10789_s21  ;;  %v6943_v13 = vsel %vm2405_vm4, %v6911_v48, %v17421_v2  ;;  %v6912_v6 = vsel %vm2372_vm3, %v6880_v31, %v15188_v45 }
 0x50a   : > { %6531 = vrot.lane.b32.xlu0 %v15239_v34, %s10788_s13  ;;  %v6975_v21 = vsel %vm2438_vm5, %v6943_v13, %v6386_v25 }
 0x50b   : > { %v6642_v3 = vpop.permute.xlu1 %6641 }
 0x50c   : > { %v6516_v46 = vpop.permute.xlu0 %6515  ;;  %v9527_v4 = vpop.f32.mrb[50].mxu1 }
 0x50d   : > { %v5244_v51 = vadd.f32 %v15041_v16, %v9527_v4  ;;  %v5238_v53 = vpop.f32.mrb[51].mxu1  ;;  %6659 = vrot.lane.b32.xlu1 %v5944_v52, %s10789_s21  ;;  %v7007_v52 = vsel %vm2471_vm6, %v6975_v21, %v6514_v29  ;;  %v15276_v4 = vld [vmem:[#allocation2 + $0x148] sm:$0xff]  ;;  %v5819_v29 = vld [vmem:[#allocation2 + $0xb4] sm:$0xff] }
 0x50e   : > { %6295 = vrot.lane.b32.xlu0 %v15018_v18, %s10785_s14  ;;  %v5239_v30 = vadd.f32 %v15041_v16, %v5238_v53  ;;  %v7039_v55 = vsel %vm2504_vm7, %v7007_v52, %v6642_v3  ;;  %v17422_v53 = vld [vmem:[#allocation21_spill] sm:$0xff] }
 0x50f   : > { %v5358_v41 = vmin.f32 %v5244_v51, 0.0  ;;  %v6644_v24 = vpop.permute.xlu1 %6643  ;;  %v6944_v36 = vsel %vm2405_vm4, %v6912_v6, %v17422_v53  ;;  %vm5326_vm15 = vcmp.gt.f32.partialorder %v5244_v51, 0.0 }
 0x510   : > { %v15259_v11 = vpop.permute.xlu0 %6279  ;;  %v5357_v61 = vmin.f32 %v5239_v30, 0.0  ;;  %v6976_v45 = vsel %vm2438_vm5, %v6944_v36, %v6388_v43  ;;  %v15298_v43 = vld [vmem:[#allocation2 + $0x150] sm:$0xff]  ;;  %vm5325_vm14 = vcmp.gt.f32.partialorder %v5239_v30, 0.0 }
 0x511   : > { %v5409_v22 = vmul.f32 1.442695, %v5358_v41  ;;  %6041 = vrot.lane.b32.xlu1 %v5818_v63, %s10783_s10  ;;  %v7008_v3 = vsel %vm2471_vm6, %v6976_v45, %v6516_v46 }
 0x512   : > { %6769 = vrot.lane.b32.xlu0 %v15239_v34, %s10790_s23  ;;  %v5407_v54 = vmul.f32 1.442695, %v5357_v61  ;;  %v7040_v2 = vsel %vm2504_vm7, %v7008_v3, %v6644_v24 }
 0x513   : > { %10340 = vpow2.f32 %v5409_v22  ;;  %v15279_v25 = vpop.permute.xlu1 %6025  ;;  %v15310_v22 = vld [vmem:[#allocation2 + $0x158] sm:$0xff] }
 0x514   : > { %v6754_v48 = vpop.permute.xlu0 %6753  ;;  %10342 = vpow2.f32 %v5407_v54  ;;  %v5945_v54 = vld [vmem:[#allocation2 + $0x154] sm:$0xff] }
 0x515   : > { %v7071_v26 = vsel %vm2537_vm8, %v7039_v55, %v6754_v48  ;;  %6771 = vrot.lane.b32.xlu1 %v15276_v4, %s10790_s23  ;;  %v5776_v48 = vld [vmem:[#allocation2 + $0x30] sm:$0xff] }
 0x516   : > { %6405 = vrot.lane.b32.xlu0 %v15018_v18, %s10787_s12  ;;  %9639 = vmatprep.mubr.msk.f32.mxu1 %vm2580_vm9, %v7071_v26 }
 0x517   : > { %v6756_v13 = vpop.permute.xlu1 %6755 }
 0x518   : > { %v6390_v63 = vpop.permute.xlu0 %6389  ;;  %v7072_v41 = vsel %vm2537_vm8, %v7040_v2, %v6756_v13  ;;  %v17423_v13 = vld [vmem:[#allocation130_spill] sm:$0xff] }
 0x519   : > { %6169 = vrot.lane.b32.xlu1 %v15028_v27, %s10784_s11  ;;  %9640 = vmatmul.mubr.msk.f32.gmra.mrb[66].mxu1 %vm2580_vm9, %v7072_v41 }
 0x51a   : > { %6043 = vrot.lane.b32.xlu0 %v5819_v29, %s10783_s10 }
 0x51b   : > { %v15300_v31 = vpop.permute.xlu1 %6153 }
 0x51c   : > { %v15296_v18 = vpop.permute.xlu0 %6027 }
 0x51d   : > { %v10341_v46 = vpop.eup %10340  ;;  %6533 = vrot.lane.b32.xlu1 %v15298_v43, %s10788_s13 }
 0x51e   : > { %6407 = vrot.lane.b32.xlu0 %v15062_v23, %s10787_s12  ;;  %v10343_v24 = vpop.eup %10342  ;;  %v8743_v61 = vadd.f32 -1.0, %v10341_v46 }
 0x51f   : > { %v6518_v6 = vpop.permute.xlu1 %6517  ;;  %v8742_v27 = vadd.f32 -1.0, %v10343_v24 }
 0x520   : > { %v6392_v21 = vpop.permute.xlu0 %6391  ;;  %v5486_v23 = vsel %vm5326_vm15, %v5244_v51, %v8743_v61 }
 0x521   : > { %6297 = vrot.lane.b32.xlu1 %v15084_v57, %s10785_s14  ;;  %v5485_v52 = vsel %vm5325_vm14, %v5239_v30, %v8742_v27  ;;  %v5946_v30 = vld [vmem:[#allocation2 + $0x15c] sm:$0xff] }
 0x522   : > { %6171 = vrot.lane.b32.xlu0 %v15082_v58, %s10784_s11  ;;  %9605 = vmatprep.mubr.f32.mxu0 %v5485_v52  ;;  %v6849_v58 = vsel %vm348_vm0, %v5776_v48, %v15208_v49 }
 0x523   : > { %9606 = vmatmul.mubr.f32.gmra.mrb[50].mxu0 %v5486_v23  ;;  %v15314_v26 = vpop.permute.xlu1 %6281  ;;  %v6881_v51 = vsel %vm2339_vm2, %v6849_v58, %v15229_v42  ;;  %v6850_v42 = vsel %vm348_vm0, %v14910_v15, %v15225_v8 }
 0x524   : > { %v15312_v55 = vpop.permute.xlu0 %6155  ;;  %v6913_v36 = vsel %vm2372_vm3, %v6881_v51, %v15243_v19  ;;  %v6882_v24 = vsel %vm2339_vm2, %v6850_v42, %v15241_v5  ;;  %v15348_v5 = vld [vmem:[#allocation2 + $0x160] sm:$0xff] }
 0x525   : > { %6661 = vrot.lane.b32.xlu1 %v5945_v54, %s10789_s21  ;;  %v6945_v19 = vsel %vm2405_vm4, %v6913_v36, %v17423_v13  ;;  %v6914_v52 = vsel %vm2372_vm3, %v6882_v24, %v15259_v11 }
 0x526   : > { %6535 = vrot.lane.b32.xlu0 %v15310_v22, %s10788_s13  ;;  %v6977_v61 = vsel %vm2438_vm5, %v6945_v19, %v6390_v63 }
 0x527   : > { %v6646_v53 = vpop.permute.xlu1 %6645  ;;  %v7009_v23 = vsel %vm2471_vm6, %v6977_v61, %v6518_v6 }
 0x528   : > { %v6520_v57 = vpop.permute.xlu0 %6519  ;;  %v9530_v45 = vpop.f32.mrb[52].mxu1  ;;  %v7041_v8 = vsel %vm2504_vm7, %v7009_v23, %v6646_v53  ;;  %v15362_v53 = vld [vmem:[#allocation2 + $0xc8] sm:$0xff] }
 0x529   : > { %v5254_v29 = vadd.f32 %v15041_v16, %v9530_v45  ;;  %v5248_v3 = vpop.f32.mrb[53].mxu1  ;;  %6663 = vrot.lane.b32.xlu1 %v5946_v30, %s10789_s21  ;;  %v17424_v30 = vld [vmem:[#allocation129_spill] sm:$0xff]  ;;  %v5778_v23 = vld [vmem:[#allocation2 + $0x48] sm:$0xff] }
 0x52a   : > { %6299 = vrot.lane.b32.xlu0 %v15098_v50, %s10785_s14  ;;  %v5249_v49 = vadd.f32 %v15041_v16, %v5248_v3  ;;  %v6946_v11 = vsel %vm2405_vm4, %v6914_v52, %v17424_v30  ;;  %v5947_v52 = vld [vmem:[#allocation2 + $0x16c] sm:$0xff] }
 0x52b   : > { %v5360_v41 = vmin.f32 %v5254_v29, 0.0  ;;  %v6648_v46 = vpop.permute.xlu1 %6647  ;;  %vm5328_vm11 = vcmp.gt.f32.partialorder %v5254_v29, 0.0 }
 0x52c   : > { %v15330_v2 = vpop.permute.xlu0 %6283  ;;  %v5359_v27 = vmin.f32 %v5249_v49, 0.0  ;;  %vm5327_vm10 = vcmp.gt.f32.partialorder %v5249_v49, 0.0 }
 0x52d   : > { %v5413_v15 = vmul.f32 1.442695, %v5360_v41  ;;  %6045 = vrot.lane.b32.xlu1 %v14849_v33, %s10783_s10  ;;  %v6978_v33 = vsel %vm2438_vm5, %v6946_v11, %v6392_v21  ;;  %v15373_v21 = vld [vmem:[#allocation2 + $0x168] sm:$0xff] }
 0x52e   : > { %6773 = vrot.lane.b32.xlu0 %v15310_v22, %s10790_s23  ;;  %v5411_v54 = vmul.f32 1.442695, %v5359_v27  ;;  %v7010_v6 = vsel %vm2471_vm6, %v6978_v33, %v6520_v57  ;;  %v6852_v33 = vsel %vm348_vm0, %v14995_v17, %v15296_v18 }
 0x52f   : > { %10344 = vpow2.f32 %v5413_v15  ;;  %v15351_v58 = vpop.permute.xlu1 %6029  ;;  %v7042_v36 = vsel %vm2504_vm7, %v7010_v6, %v6648_v46  ;;  %v17425_v6 = vld [vmem:[#allocation132_spill] sm:$0xff] }
 0x530   : > { %v6758_v48 = vpop.permute.xlu0 %6757  ;;  %10346 = vpow2.f32 %v5411_v54 }
 0x531   : > { %v7073_v63 = vsel %vm2537_vm8, %v7041_v8, %v6758_v48  ;;  %6775 = vrot.lane.b32.xlu1 %v15348_v5, %s10790_s23 }
 0x532   : > { %6409 = vrot.lane.b32.xlu0 %v15098_v50, %s10787_s12  ;;  %9642 = vmatprep.mubr.msk.f32.mxu1 %vm2580_vm9, %v7073_v63 }
 0x533   : > { %v6760_v45 = vpop.permute.xlu1 %6759 }
 0x534   : > { %v6394_v51 = vpop.permute.xlu0 %6393  ;;  %v7074_v3 = vsel %vm2537_vm8, %v7042_v36, %v6760_v45 }
 0x535   : > { %6173 = vrot.lane.b32.xlu1 %v15362_v53, %s10784_s11  ;;  %9643 = vmatmul.mubr.msk.f32.gmra.mrb[68].mxu1 %vm2580_vm9, %v7074_v3 }
 0x536   : > { %6047 = vrot.lane.b32.xlu0 %v14861_v7, %s10783_s10 }
 0x537   : > { %v15375_v57 = vpop.permute.xlu1 %6157 }
 0x538   : > { %v15371_v50 = vpop.permute.xlu0 %6031 }
 0x539   : > { %v10345_v42 = vpop.eup %10344  ;;  %6537 = vrot.lane.b32.xlu1 %v15373_v21, %s10788_s13 }
 0x53a   : > { %6411 = vrot.lane.b32.xlu0 %v15140_v12, %s10787_s12  ;;  %v10347_v13 = vpop.eup %10346  ;;  %v8745_v19 = vadd.f32 -1.0, %v10345_v42  ;;  %v15387_v12 = vld [vmem:[#allocation2 + $0x170] sm:$0xff] }
 0x53b   : > { %v6522_v41 = vpop.permute.xlu1 %6521  ;;  %v8744_v46 = vadd.f32 -1.0, %v10347_v13  ;;  %v6884_v13 = vsel %vm2339_vm2, %v6852_v33, %v15312_v55  ;;  %v7629_v55 = vld [vmem:[%s16752_s6 + $0x190] sm:$0xff] }
 0x53c   : > { %v15381_v7 = vpop.permute.xlu0 %6395  ;;  %v5488_v61 = vsel %vm5328_vm11, %v5254_v29, %v8745_v19  ;;  %v6916_v17 = vsel %vm2372_vm3, %v6884_v13, %v15330_v2  ;;  %v15443_v2 = vld [vmem:[#allocation2 + $0x178] sm:$0xff] }
 0x53d   : > { %6301 = vrot.lane.b32.xlu1 %v15156_v14, %s10785_s14  ;;  %v5487_v24 = vsel %vm5327_vm10, %v5249_v49, %v8744_v46  ;;  %v5948_v49 = vld [vmem:[#allocation2 + $0x174] sm:$0xff] }
 0x53e   : > { %6175 = vrot.lane.b32.xlu0 %v14895_v1, %s10784_s11  ;;  %9608 = vmatprep.mubr.f32.mxu0 %v5487_v24  ;;  %v6851_v1 = vsel %vm348_vm0, %v5778_v23, %v15279_v25 }
 0x53f   : > { %9609 = vmatmul.mubr.f32.gmra.mrb[52].mxu0 %v5488_v61  ;;  %v15391_v15 = vpop.permute.xlu1 %6285  ;;  %v6883_v29 = vsel %vm2339_vm2, %v6851_v1, %v15300_v31  ;;  %v7627_v31 = vld [vmem:[%s16752_s6 + $0x180] sm:$0xff] }
 0x540   : > { %v15389_v27 = vpop.permute.xlu0 %6159  ;;  %v6915_v54 = vsel %vm2372_vm3, %v6883_v29, %v15314_v26  ;;  %v7628_v26 = vld [vmem:[%s16752_s6 + $0x188] sm:$0xff] }
 0x541   : > { %6665 = vrot.lane.b32.xlu1 %v5947_v52, %s10789_s21  ;;  %v6947_v36 = vsel %vm2405_vm4, %v6915_v54, %v17425_v6  ;;  %v9924_v42 = vpack.c.bf16 %v7628_v26, %v7627_v31  ;;  %v7631_v54 = vld [vmem:[%s16752_s6 + $0x1a0] sm:$0xff] }
 0x542   : > { %6539 = vrot.lane.b32.xlu0 %v15387_v12, %s10788_s13  ;;  %v6979_v19 = vsel %vm2438_vm5, %v6947_v36, %v6394_v51  ;;  %v7630_v51 = vld [vmem:[%s16752_s6 + $0x198] sm:$0xff]  ;;  %v15466_v31 = vld [vmem:[#allocation2 + $0xe0] sm:$0xff] }
 0x543   : > { %v6650_v8 = vpop.permute.xlu1 %6649  ;;  %v7011_v18 = vsel %vm2471_vm6, %v6979_v19, %v6522_v41  ;;  %9925 = vmatprep.subr.bf16.mxu0 %v9924_v42  ;;  %v9928_v41 = vpack.c.bf16 %v7630_v51, %v7629_v55  ;;  %9980 = vmatprep.subr.bf16.mxu1 %v9924_v42  ;;  %v15477_v36 = vld [vmem:[#allocation2 + $0x180] sm:$0xff] }
 0x544   : > { %v6524_v14 = vpop.permute.xlu0 %6523  ;;  %v9533_v48 = vpop.f32.mrb[54].mxu1  ;;  %v7043_v61 = vsel %vm2504_vm7, %v7011_v18, %v6650_v8  ;;  %9927 = vmatpush3.bf16.msra.mxu0 %v9924_v42  ;;  %9988 = vmatpush3.bf16.msra.mxu1 %v9924_v42  ;;  %v7633_v18 = vld [vmem:[%s16752_s6 + $0x1b0] sm:$0xff] }
 0x545   : > { %v15405_v63 = vadd.f32 %v15041_v16, %v9533_v48  ;;  %v5258_v30 = vpop.f32.mrb[55].mxu1  ;;  %6667 = vrot.lane.b32.xlu1 %v5948_v49, %s10789_s21  ;;  %v17426_v49 = vld [vmem:[#allocation131_spill] sm:$0xff]  ;;  %9929 = vmatprep.subr.bf16.mxu0 %v9928_v41 }
 0x546   : > { %6303 = vrot.lane.b32.xlu0 %v15168_v60, %s10785_s14  ;;  %v15409_v25 = vadd.f32 %v15041_v16, %v5258_v30  ;;  %v6948_v29 = vsel %vm2405_vm4, %v6916_v17, %v17426_v49  ;;  %v7632_v48 = vld [vmem:[%s16752_s6 + $0x1a8] sm:$0xff]  ;;  %9981 = vmatprep.subr.bf16.mxu1 %v9928_v41 }
 0x547   : > { %v5362_v45 = vmin.f32 %v15405_v63, 0.0  ;;  %v6652_v3 = vpop.permute.xlu1 %6651  ;;  %v6980_v8 = vsel %vm2438_vm5, %v6948_v29, %v15381_v7  ;;  %v9932_v7 = vpack.c.bf16 %v7632_v48, %v7631_v54  ;;  %vm5330_vm13 = vcmp.gt.f32.partialorder %v15405_v63, 0.0  ;;  %v15494_v17 = vld [vmem:[#allocation2 + $0x188] sm:$0xff] }
 0x548   : > { %v15411_v11 = vpop.permute.xlu0 %6287  ;;  %v5361_v46 = vmin.f32 %v15409_v25, 0.0  ;;  %v7012_v30 = vsel %vm2471_vm6, %v6980_v8, %v6524_v14  ;;  %9931 = vmatpush3.bf16.msra.mxu0 %v9928_v41  ;;  %9989 = vmatpush3.bf16.msra.mxu1 %v9928_v41  ;;  %vm5329_vm12 = vcmp.gt.f32.partialorder %v15409_v25, 0.0 }
 0x549   : > { %v5417_v24 = vmul.f32 1.442695, %v5362_v45  ;;  %6049 = vrot.lane.b32.xlu1 %v14938_v9, %s10783_s10  ;;  %v7044_v26 = vsel %vm2504_vm7, %v7012_v30, %v6652_v3  ;;  %9933 = vmatprep.subr.bf16.mxu0 %v9932_v7 }
 0x54a   : > { %6777 = vrot.lane.b32.xlu0 %v15387_v12, %s10790_s23  ;;  %v5415_v52 = vmul.f32 1.442695, %v5361_v46  ;;  %9982 = vmatprep.subr.bf16.mxu1 %v9932_v7 }
 0x54b   : > { %10348 = vpow2.f32 %v5417_v24  ;;  %v15446_v1 = vpop.permute.xlu1 %6033  ;;  %v7634_v24 = vld [vmem:[%s16752_s6 + $0x1b8] sm:$0xff] }
 0x54c   : > { %v6762_v23 = vpop.permute.xlu0 %6761  ;;  %10350 = vpow2.f32 %v5415_v52  ;;  %9935 = vmatpush3.bf16.msra.mxu0 %v9932_v7  ;;  %9990 = vmatpush3.bf16.msra.mxu1 %v9932_v7  ;;  %v9936_v51 = vpack.c.bf16 %v7634_v24, %v7633_v18  ;;  %v7635_v52 = vld [vmem:[%s16752_s6 + $0x1c0] sm:$0xff] }
 0x54d   : > { %v7075_v9 = vsel %vm2537_vm8, %v7043_v61, %v6762_v23  ;;  %6779 = vrot.lane.b32.xlu1 %v15443_v2, %s10790_s23 }
 0x54e   : > { %6413 = vrot.lane.b32.xlu0 %v15168_v60, %s10787_s12  ;;  %9645 = vmatprep.mubr.msk.f32.mxu1 %vm2580_vm9, %v7075_v9  ;;  %v5950_v9 = vld [vmem:[#allocation2 + $0x18c] sm:$0xff] }
 0x54f   : > { %v6764_v33 = vpop.permute.xlu1 %6763  ;;  %9937 = vmatprep.subr.bf16.mxu0 %v9936_v51  ;;  %9983 = vmatprep.subr.bf16.mxu1 %v9936_v51 }
 0x550   : > { %v15464_v60 = vpop.permute.xlu0 %6397  ;;  %v7076_v6 = vsel %vm2537_vm8, %v7044_v26, %v6764_v33  ;;  %9939 = vmatpush3.bf16.msra.mxu0 %v9936_v51  ;;  %9991 = vmatpush3.bf16.msra.mxu1 %v9936_v51  ;;  %v7638_v26 = vld [vmem:[%s16752_s6 + $0x1d8] sm:$0xff]  ;;  %v10570_v33 = vld [vmem:[#allocation2 + $0x68] sm:$0xff] }
 0x551   : > { %6177 = vrot.lane.b32.xlu1 %v15466_v31, %s10784_s11  ;;  %9646 = vmatmul.mubr.msk.f32.gmra.mrb[70].mxu1 %vm2580_vm9, %v7076_v6  ;;  %v6854_v6 = vsel %vm348_vm0, %v10570_v33, %v15371_v50  ;;  %v7639_v50 = vld [vmem:[%s16752_s6 + $0x1e0] sm:$0xff]  ;;  %v15585_v33 = vld [vmem:[#allocation2 + $0xf8] sm:$0xff] }
 0x552   : > { %6051 = vrot.lane.b32.xlu0 %v14950_v47, %s10783_s10 }
 0x553   : > { %v15479_v45 = vpop.permute.xlu1 %6161 }
 0x554   : > { %v15475_v14 = vpop.permute.xlu0 %6035 }
 0x555   : > { %v10349_v3 = vpop.eup %10348  ;;  %6541 = vrot.lane.b32.xlu1 %v15477_v36, %s10788_s13 }
 0x556   : > { %6415 = vrot.lane.b32.xlu0 %v15205_v40, %s10787_s12  ;;  %v10351_v47 = vpop.eup %10350  ;;  %v8747_v13 = vadd.f32 -1.0, %v10349_v3  ;;  %v17427_v3 = vld [vmem:[#allocation134_spill] sm:$0xff] }
 0x557   : > { %v6526_v19 = vpop.permute.xlu1 %6525  ;;  %v8746_v46 = vadd.f32 -1.0, %v10351_v47 }
 0x558   : > { %v15485_v42 = vpop.permute.xlu0 %6399 }
 0x559   : > { %6305 = vrot.lane.b32.xlu1 %v15227_v39, %s10785_s14  ;;  %v5489_v40 = vsel %vm5329_vm12, %v15409_v25, %v8746_v46  ;;  %v5949_v39 = vld [vmem:[#allocation2 + $0x184] sm:$0xff] }
 0x55a   : > { %6179 = vrot.lane.b32.xlu0 %v14981_v56, %s10784_s11  ;;  %9611 = vmatprep.mubr.f32.mxu0 %v5489_v40  ;;  %v5490_v56 = vsel %vm5330_vm13, %v15405_v63, %v8747_v13  ;;  %v5780_v25 = vld [vmem:[#allocation2 + $0x60] sm:$0xff]  ;;  %v7636_v63 = vld [vmem:[%s16752_s6 + $0x1c8] sm:$0xff] }
 0x55b   : > { %9612 = vmatmul.mubr.f32.gmra.mrb[54].mxu0 %v5490_v56  ;;  %v15505_v61 = vpop.permute.xlu1 %6289  ;;  %v6853_v23 = vsel %vm348_vm0, %v5780_v25, %v15351_v58  ;;  %v9940_v49 = vpack.c.bf16 %v7636_v63, %v7635_v52  ;;  %v10571_v25 = vld [vmem:[#allocation2 + $0xf4] sm:$0xff] }
 0x55c   : > { %v15503_v55 = vpop.permute.xlu0 %6163  ;;  %v6885_v29 = vsel %vm2339_vm2, %v6853_v23, %v15375_v57  ;;  %v7637_v57 = vld [vmem:[%s16752_s6 + $0x1d0] sm:$0xff] }
 0x55d   : > { %6669 = vrot.lane.b32.xlu1 %v5949_v39, %s10789_s21  ;;  %v6917_v54 = vsel %vm2372_vm3, %v6885_v29, %v15391_v15  ;;  %9941 = vmatprep.subr.bf16.mxu0 %v9940_v49  ;;  %v9944_v40 = vpack.c.bf16 %v7638_v26, %v7637_v57 }
 0x55e   : > { %6543 = vrot.lane.b32.xlu0 %v15494_v17, %s10788_s13  ;;  %9943 = vmatpush3.bf16.msra.mxu0 %v9940_v49  ;;  %v6949_v47 = vsel %vm2405_vm4, %v6917_v54, %v17427_v3 }
 0x55f   : > { %v6654_v8 = vpop.permute.xlu1 %6653  ;;  %9984 = vmatprep.subr.bf16.mxu1 %v9940_v49  ;;  %v6981_v18 = vsel %vm2438_vm5, %v6949_v47, %v15464_v60  ;;  %9945 = vmatprep.subr.bf16.mxu0 %v9944_v40  ;;  %v7641_v60 = vld [vmem:[%s16752_s6 + $0x1f0] sm:$0xff]  ;;  %v15595_v47 = vld [vmem:[#allocation2 + $0x198] sm:$0xff] }
 0x560   : > { %v6528_v41 = vpop.permute.xlu0 %6527  ;;  %v9536_v48 = vpop.f32.mrb[56].mxu1  ;;  %9992 = vmatpush3.bf16.msra.mxu1 %v9940_v49  ;;  %v7013_v39 = vsel %vm2471_vm6, %v6981_v18, %v6526_v19 }
 0x561   : > { %v15525_v30 = vadd.f32 %v15041_v16, %v9536_v48  ;;  %v5268_v58 = vpop.f32.mrb[57].mxu1  ;;  %6671 = vrot.lane.b32.xlu1 %v5950_v9, %s10789_s21  ;;  %v7045_v52 = vsel %vm2504_vm7, %v7013_v39, %v6654_v8  ;;  %v7642_v9 = vld [vmem:[%s16752_s6 + $0x1f8] sm:$0xff]  ;;  %9985 = vmatprep.subr.bf16.mxu1 %v9944_v40  ;;  %v10573_v39 = vld [vmem:[#allocation2 + $0x100] sm:$0xff] }
 0x562   : > { %6307 = vrot.lane.b32.xlu0 %v15239_v34, %s10785_s14  ;;  %v15532_v7 = vadd.f32 %v15041_v16, %v5268_v58  ;;  %v6886_v16 = vsel %vm2339_vm2, %v6854_v6, %v15389_v27  ;;  %v7640_v27 = vld [vmem:[%s16752_s6 + $0x1e8] sm:$0xff]  ;;  %9947 = vmatpush3.bf16.msra.mxu0 %v9944_v40  ;;  %v9952_v54 = vpack.c.bf16 %v7642_v9, %v7641_v60  ;;  %v17428_v48 = vld [vmem:[#allocation133_spill] sm:$0xff] }
 0x563   : > { %v5364_v13 = vmin.f32 %v15525_v30, 0.0  ;;  %v6656_v46 = vpop.permute.xlu1 %6655  ;;  %v6918_v56 = vsel %vm2372_vm3, %v6886_v16, %v15411_v11  ;;  %v15565_v11 = vld [vmem:[#allocation2 + $0x190] sm:$0xff]  ;;  %v9948_v19 = vpack.c.bf16 %v7640_v27, %v7639_v50  ;;  %vm5332_vm15 = vcmp.gt.f32.partialorder %v15525_v30, 0.0  ;;  %v5951_v60 = vld [vmem:[#allocation2 + $0x19c] sm:$0xff] }
 0x564   : > { %v15534_v15 = vpop.permute.xlu0 %6291  ;;  %v5363_v24 = vmin.f32 %v15532_v7, 0.0  ;;  %9993 = vmatpush3.bf16.msra.mxu1 %v9944_v40  ;;  %v6950_v8 = vsel %vm2405_vm4, %v6918_v56, %v17428_v48  ;;  %vm5331_vm14 = vcmp.gt.f32.partialorder %v15532_v7, 0.0 }
 0x565   : > { %v5421_v51 = vmul.f32 1.442695, %v5364_v13  ;;  %6053 = vrot.lane.b32.xlu1 %v10571_v25, %s10783_s10  ;;  %v6982_v58 = vsel %vm2438_vm5, %v6950_v8, %v15485_v42  ;;  %9949 = vmatprep.subr.bf16.mxu0 %v9948_v19  ;;  %v10572_v42 = vld [vmem:[#allocation2 + $0xfc] sm:$0xff] }
 0x566   : > { %6781 = vrot.lane.b32.xlu0 %v15494_v17, %s10790_s23  ;;  %v5419_v63 = vmul.f32 1.442695, %v5363_v24  ;;  %v7014_v57 = vsel %vm2471_vm6, %v6982_v58, %v6528_v41  ;;  %9951 = vmatpush3.bf16.msra.mxu0 %v9948_v19  ;;  %v10575_v58 = vld [vmem:[#allocation2 + $0x80] sm:$0xff] }
 0x567   : > { %10352 = vpow2.f32 %v5421_v51  ;;  %v15571_v29 = vpop.permute.xlu1 %6037  ;;  %9986 = vmatprep.subr.bf16.mxu1 %v9948_v19  ;;  %v7046_v6 = vsel %vm2504_vm7, %v7014_v57, %v6656_v46  ;;  %9953 = vmatprep.subr.bf16.mxu0 %v9952_v54  ;;  %v17429_v46 = vmov 0.0   ;;  %v15610_v51 = vld [vmem:[#allocation2 + $0x1a0] sm:$0xff] }
 0x568   : > { %v6766_v23 = vpop.permute.xlu0 %6765  ;;  %10354 = vpow2.f32 %v5419_v63  ;;  %9994 = vmatpush3.bf16.msra.mxu1 %v9948_v19  ;;  %v17430_v57 = vld [vmem:[#allocation34_spill] sm:$0xff] }
 0x569   : > { %v7077_v49 = vsel %vm2537_vm8, %v7045_v52, %v6766_v23  ;;  %6783 = vrot.lane.b32.xlu1 %v15565_v11, %s10790_s23  ;;  %9987 = vmatprep.subr.bf16.mxu1 %v9952_v54  ;;  %v5782_v52 = vld [vmem:[#allocation2 + $0x78] sm:$0xff]  ;;  %v5952_v23 = vld [vmem:[#allocation2 + $0x1a4] sm:$0xff] }
 0x56a   : > { %6417 = vrot.lane.b32.xlu0 %v15239_v34, %s10787_s12  ;;  %9648 = vmatprep.mubr.msk.f32.mxu1 %vm2580_vm9, %v7077_v49 }
 0x56b   : > { %v6768_v34 = vpop.permute.xlu1 %6767  ;;  %9955 = vmatpush3.bf16.msra.mxu0 %v9952_v54 }
 0x56c   : > { %v15583_v26 = vpop.permute.xlu0 %6401  ;;  %v7078_v3 = vsel %vm2537_vm8, %v7046_v6, %v6768_v34  ;;  %9995 = vmatpush3.bf16.msra.mxu1 %v9952_v54  ;;  %v15631_v54 = vld [vmem:[%s16753_s7 + $0x2] ss:$0 sm:$0xff] }
 0x56d   : > { %6181 = vrot.lane.b32.xlu1 %v15585_v33, %s10784_s11  ;;  %9649 = vmatmul.mubr.msk.f32.gmra.mrb[72].mxu1 %vm2580_vm9, %v7078_v3 }
 0x56e   : > { %6055 = vrot.lane.b32.xlu0 %v10572_v42, %s10783_s10  ;;  %9764 = vmatprep.subr.mxu1 %v17429_v46 }
 0x56f   : > { %v15597_v13 = vpop.permute.xlu1 %6165 }
 0x570   : > { %v15593_v41 = vpop.permute.xlu0 %6039 }
 0x571   : > { %v10353_v40 = vpop.eup %10352  ;;  %6545 = vrot.lane.b32.xlu1 %v15595_v47, %s10788_s13 }
 0x572   : > { %6419 = vrot.lane.b32.xlu0 %v15276_v4, %s10787_s12  ;;  %v10355_v16 = vpop.eup %10354  ;;  %v8749_v24 = vadd.f32 -1.0, %v10353_v40 }
 0x573   : > { %v6530_v50 = vpop.permute.xlu1 %6529  ;;  %v8748_v56 = vadd.f32 -1.0, %v10355_v16 }
 0x574   : > { %v6404_v18 = vpop.permute.xlu0 %6403  ;;  %v5492_v25 = vsel %vm5332_vm15, %v15525_v30, %v8749_v24 }
 0x575   : > { %6309 = vrot.lane.b32.xlu1 %v15298_v43, %s10785_s14  ;;  %v5491_v4 = vsel %vm5331_vm14, %v15532_v7, %v8748_v56  ;;  %v6855_v43 = vsel %vm348_vm0, %v5782_v52, %v15446_v1 }
 0x576   : > { %6183 = vrot.lane.b32.xlu0 %v10573_v39, %s10784_s11  ;;  %9614 = vmatprep.mubr.f32.mxu0 %v5491_v4  ;;  %v6887_v30 = vsel %vm2339_vm2, %v6855_v43, %v15479_v45  ;;  %v10576_v39 = vld [vmem:[#allocation2 + $0x10c] sm:$0xff]  ;;  %v17431_v43 = vld [vmem:[#allocation33_spill] sm:$0xff] }
 0x577   : > { %9615 = vmatmul.mubr.f32.gmra.mrb[56].mxu0 %v5492_v25  ;;  %v15615_v63 = vpop.permute.xlu1 %6293  ;;  %v6919_v9 = vsel %vm2372_vm3, %v6887_v30, %v15505_v61  ;;  %v6856_v61 = vsel %vm348_vm0, %v10575_v58, %v15475_v14  ;;  %v10577_v58 = vld [vmem:[#allocation2 + $0x114] sm:$0xff] }
 0x578   : > { %v15613_v27 = vpop.permute.xlu0 %6167  ;;  %v6951_v6 = vsel %vm2405_vm4, %v6919_v9, %v17430_v57  ;;  %v6888_v42 = vsel %vm2339_vm2, %v6856_v61, %v15503_v55 }
 0x579   : > { %6673 = vrot.lane.b32.xlu1 %v5951_v60, %s10789_s21  ;;  %v6983_v40 = vsel %vm2438_vm5, %v6951_v6, %v15583_v26  ;;  %v6920_v24 = vsel %vm2372_vm3, %v6888_v42, %v15534_v15  ;;  %v15653_v60 = vld [vmem:[#allocation2 + $0x1a8] sm:$0xff] }
 0x57a   : > { %6547 = vrot.lane.b32.xlu0 %v15610_v51, %s10788_s13  ;;  %v7015_v14 = vsel %vm2471_vm6, %v6983_v40, %v6530_v50  ;;  %v6952_v15 = vsel %vm2405_vm4, %v6920_v24, %v17431_v43  ;;  %v10578_v40 = vld [vmem:[#allocation2 + $0x118] sm:$0xff] }
 0x57b   : > { %v6658_v19 = vpop.permute.xlu1 %6657  ;;  %v6984_v50 = vsel %vm2438_vm5, %v6952_v15, %v6404_v18  ;;  %v15677_v18 = vld [vmem:[#allocation2 + $0x1b0] sm:$0xff]  ;;  %v15688_v24 = vld [vmem:[#allocation2 + $0x1b8] sm:$0xff] }
 0x57c   : > { %v6532_v7 = vpop.permute.xlu0 %6531  ;;  %v9539_v49 = vpop.f32.mrb[58].mxu1  ;;  %v7047_v4 = vsel %vm2504_vm7, %v7015_v14, %v6658_v19  ;;  %v15667_v19 = vld [vmem:[#allocation2 + $0x110] sm:$0xff] }
 0x57d   : > { %v5284_v1 = vadd.f32 %v15631_v54, %v9539_v49  ;;  %v5278_v48 = vpop.f32.mrb[59].mxu1  ;;  %6675 = vrot.lane.b32.xlu1 %v5952_v23, %s10789_s21  ;;  %v7016_v23 = vsel %vm2471_vm6, %v6984_v50, %v6532_v7 }
 0x57e   : > { %6311 = vrot.lane.b32.xlu0 %v15310_v22, %s10785_s14  ;;  %v5279_v45 = vadd.f32 %v15631_v54, %v5278_v48 }
 0x57f   : > { %v5366_v34 = vmin.f32 %v5284_v1, 0.0  ;;  %v6660_v3 = vpop.permute.xlu1 %6659  ;;  %vm5334_vm11 = vcmp.gt.f32.partialorder %v5284_v1, 0.0 }
 0x580   : > { %v15636_v8 = vpop.permute.xlu0 %6295  ;;  %v5365_v16 = vmin.f32 %v5279_v45, 0.0  ;;  %v7048_v9 = vsel %vm2504_vm7, %v7016_v23, %v6660_v3  ;;  %vm5333_vm10 = vcmp.gt.f32.partialorder %v5279_v45, 0.0 }
 0x581   : > { %v5425_v56 = vmul.f32 1.442695, %v5366_v34  ;;  %6057 = vrot.lane.b32.xlu1 %v10576_v39, %s10783_s10  ;;  %v5784_v39 = vld [vmem:[#allocation2 + $0x90] sm:$0xff] }
 0x582   : > { %6785 = vrot.lane.b32.xlu0 %v15610_v51, %s10790_s23  ;;  %v5423_v25 = vmul.f32 1.442695, %v5365_v16 }
 0x583   : > { %10356 = vpow2.f32 %v5425_v56  ;;  %v15656_v52 = vpop.permute.xlu1 %6041  ;;  %v5953_v56 = vld [vmem:[#allocation2 + $0x1b4] sm:$0xff] }
 0x584   : > { %v6770_v55 = vpop.permute.xlu0 %6769  ;;  %10358 = vpow2.f32 %v5423_v25  ;;  %v5954_v25 = vld [vmem:[#allocation2 + $0x1bc] sm:$0xff] }
 0x585   : > { %v7079_v26 = vsel %vm2537_vm8, %v7047_v4, %v6770_v55  ;;  %6787 = vrot.lane.b32.xlu1 %v15653_v60, %s10790_s23 }
 0x586   : > { %6421 = vrot.lane.b32.xlu0 %v15310_v22, %s10787_s12  ;;  %9651 = vmatprep.mubr.msk.f32.mxu1 %vm2580_vm9, %v7079_v26 }
 0x587   : > { %v6772_v49 = vpop.permute.xlu1 %6771 }
 0x588   : > { %v6406_v30 = vpop.permute.xlu0 %6405  ;;  %v7080_v48 = vsel %vm2537_vm8, %v7048_v9, %v6772_v49 }
 0x589   : > { %6185 = vrot.lane.b32.xlu1 %v15667_v19, %s10784_s11  ;;  %9652 = vmatmul.mubr.msk.f32.gmra.mrb[74].mxu1 %vm2580_vm9, %v7080_v48 }
 0x58a   : > { %6059 = vrot.lane.b32.xlu0 %v10577_v58, %s10783_s10 }
 0x58b   : > { %v15679_v7 = vpop.permute.xlu1 %6169 }
 0x58c   : > { %v15675_v22 = vpop.permute.xlu0 %6043 }
 0x58d   : > { %v10357_v61 = vpop.eup %10356  ;;  %6549 = vrot.lane.b32.xlu1 %v15677_v18, %s10788_s13 }
 0x58e   : > { %6423 = vrot.lane.b32.xlu0 %v15348_v5, %s10787_s12  ;;  %v10359_v57 = vpop.eup %10358  ;;  %v8751_v34 = vadd.f32 -1.0, %v10357_v61 }
 0x58f   : > { %v6534_v3 = vpop.permute.xlu1 %6533  ;;  %v8750_v42 = vadd.f32 -1.0, %v10359_v57 }
 0x590   : > { %v6408_v6 = vpop.permute.xlu0 %6407  ;;  %v5494_v5 = vsel %vm5334_vm11, %v5284_v1, %v8751_v34 }
 0x591   : > { %6313 = vrot.lane.b32.xlu1 %v15373_v21, %s10785_s14  ;;  %v5493_v16 = vsel %vm5333_vm10, %v5279_v45, %v8750_v42  ;;  %v6857_v21 = vsel %vm348_vm0, %v5784_v39, %v15571_v29 }
 0x592   : > { %6187 = vrot.lane.b32.xlu0 %v10578_v40, %s10784_s11  ;;  %9617 = vmatprep.mubr.f32.mxu0 %v5493_v16  ;;  %v6889_v1 = vsel %vm2339_vm2, %v6857_v21, %v15597_v13  ;;  %v10579_v13 = vld [vmem:[#allocation2 + $0x98] sm:$0xff] }
 0x593   : > { %9618 = vmatmul.mubr.f32.gmra.mrb[58].mxu0 %v5494_v5  ;;  %v15692_v4 = vpop.permute.xlu1 %6297  ;;  %v6921_v43 = vsel %vm2372_vm3, %v6889_v1, %v15615_v63  ;;  %v6858_v49 = vsel %vm348_vm0, %v10579_v13, %v15593_v41  ;;  %v17432_v63 = vld [vmem:[#allocation38_spill] sm:$0xff] }
 0x594   : > { %v15690_v14 = vpop.permute.xlu0 %6171  ;;  %v6953_v48 = vsel %vm2405_vm4, %v6921_v43, %v17432_v63  ;;  %v6890_v57 = vsel %vm2339_vm2, %v6858_v49, %v15613_v27  ;;  %v10580_v5 = vld [vmem:[#allocation2 + $0x124] sm:$0xff]  ;;  %v10581_v49 = vld [vmem:[#allocation2 + $0x12c] sm:$0xff] }
 0x595   : > { %6677 = vrot.lane.b32.xlu1 %v5953_v56, %s10789_s21  ;;  %v6985_v34 = vsel %vm2438_vm5, %v6953_v48, %v6406_v30  ;;  %v6922_v40 = vsel %vm2372_vm3, %v6890_v57, %v15636_v8  ;;  %v15727_v27 = vld [vmem:[#allocation2 + $0x1c0] sm:$0xff]  ;;  %v15743_v43 = vld [vmem:[#allocation2 + $0x128] sm:$0xff] }
 0x596   : > { %6551 = vrot.lane.b32.xlu0 %v15688_v24, %s10788_s13  ;;  %v7017_v16 = vsel %vm2471_vm6, %v6985_v34, %v6534_v3 }
 0x597   : > { %v6662_v55 = vpop.permute.xlu1 %6661 }
 0x598   : > { %v6536_v45 = vpop.permute.xlu0 %6535  ;;  %v7049_v56 = vsel %vm2504_vm7, %v7017_v16, %v6662_v55 }
 0x599   : > { %v9542_v26 = vpop.f32.mrb[60].mxu1  ;;  %6679 = vrot.lane.b32.xlu1 %v5954_v25, %s10789_s21  ;;  %v17433_v25 = vld [vmem:[#allocation37_spill] sm:$0xff] }
 0x59a   : > { %v15704_v15 = vadd.f32 %v15631_v54, %v9542_v26  ;;  %v5288_v50 = vpop.f32.mrb[61].mxu1  ;;  %6315 = vrot.lane.b32.xlu0 %v15387_v12, %s10785_s14  ;;  %v6954_v8 = vsel %vm2405_vm4, %v6922_v40, %v17433_v25  ;;  %v10582_v40 = vld [vmem:[#allocation2 + $0x130] sm:$0xff] }
 0x59b   : > { %v5289_v23 = vadd.f32 %v15631_v54, %v5288_v50  ;;  %v6664_v61 = vpop.permute.xlu1 %6663  ;;  %v6986_v3 = vsel %vm2438_vm5, %v6954_v8, %v6408_v6 }
 0x59c   : > { %v5368_v29 = vmin.f32 %v15704_v15, 0.0  ;;  %v15711_v9 = vpop.permute.xlu0 %6299  ;;  %v7018_v1 = vsel %vm2471_vm6, %v6986_v3, %v6536_v45  ;;  %v15755_v45 = vld [vmem:[#allocation2 + $0x1c8] sm:$0xff]  ;;  %vm5336_vm13 = vcmp.gt.f32.partialorder %v15704_v15, 0.0 }
 0x59d   : > { %v5367_v58 = vmin.f32 %v5289_v23, 0.0  ;;  %6061 = vrot.lane.b32.xlu1 %v10580_v5, %s10783_s10  ;;  %v7050_v50 = vsel %vm2504_vm7, %v7018_v1, %v6664_v61  ;;  %vm5335_vm12 = vcmp.gt.f32.partialorder %v5289_v23, 0.0  ;;  %v5956_v1 = vld [vmem:[#allocation2 + $0x1d4] sm:$0xff] }
 0x59e   : > { %v5429_v42 = vmul.f32 1.442695, %v5368_v29  ;;  %6789 = vrot.lane.b32.xlu0 %v15688_v24, %s10790_s23 }
 0x59f   : > { %v5427_v41 = vmul.f32 1.442695, %v5367_v58  ;;  %v15730_v21 = vpop.permute.xlu1 %6045 }
 0x5a0   : > { %10360 = vpow2.f32 %v5429_v42  ;;  %v6774_v39 = vpop.permute.xlu0 %6773 }
 0x5a1   : > { %10362 = vpow2.f32 %v5427_v41  ;;  %v7081_v30 = vsel %vm2537_vm8, %v7049_v56, %v6774_v39  ;;  %6791 = vrot.lane.b32.xlu1 %v15727_v27, %s10790_s23  ;;  %v15768_v41 = vld [vmem:[#allocation2 + $0x1d0] sm:$0xff]  ;;  %v5786_v39 = vld [vmem:[#allocation2 + $0xa8] sm:$0xff] }
 0x5a2   : > { %6425 = vrot.lane.b32.xlu0 %v15387_v12, %s10787_s12  ;;  %9654 = vmatprep.mubr.msk.f32.mxu1 %vm2580_vm9, %v7081_v30  ;;  %v15741_v55 = vpop.f32.mrb[44].mxu0  ;;  %v5955_v56 = vld [vmem:[#allocation2 + $0x1cc] sm:$0xff] }
 0x5a3   : > { %v15746_v29 = vpop.f32.mrb[45].mxu0  ;;  %v6776_v13 = vpop.permute.xlu1 %6775 }
 0x5a4   : > { %v6410_v26 = vpop.permute.xlu0 %6409  ;;  %v7082_v12 = vsel %vm2537_vm8, %v7050_v50, %v6776_v13 }
 0x5a5   : > { %6189 = vrot.lane.b32.xlu1 %v15743_v43, %s10784_s11  ;;  %9655 = vmatmul.mubr.msk.f32.gmra.mrb[76].mxu1 %vm2580_vm9, %v7082_v12 }
 0x5a6   : > { %6063 = vrot.lane.b32.xlu0 %v10581_v49, %s10783_s10 }
 0x5a7   : > { %v15757_v63 = vpop.permute.xlu1 %6173 }
 0x5a8   : > { %v15753_v6 = vpop.permute.xlu0 %6047 }
 0x5a9   : > { %6553 = vrot.lane.b32.xlu1 %v15755_v45, %s10788_s13 }
 0x5aa   : > { %v10361_v48 = vpop.eup %10360  ;;  %6427 = vrot.lane.b32.xlu0 %v15443_v2, %s10787_s12 }
 0x5ab   : > { %v10363_v58 = vpop.eup %10362  ;;  %v8753_v61 = vadd.f32 -1.0, %v10361_v48  ;;  %v6538_v42 = vpop.permute.xlu1 %6537 }
 0x5ac   : > { %v6412_v57 = vpop.permute.xlu0 %6411  ;;  %v8752_v34 = vadd.f32 -1.0, %v10363_v58 }
 0x5ad   : > { %6317 = vrot.lane.b32.xlu1 %v15477_v36, %s10785_s14  ;;  %v5496_v2 = vsel %vm5336_vm13, %v15704_v15, %v8753_v61  ;;  %v6859_v15 = vsel %vm348_vm0, %v5786_v39, %v15656_v52  ;;  %v10583_v61 = vld [vmem:[#allocation2 + $0xb0] sm:$0xff] }
 0x5ae   : > { %6191 = vrot.lane.b32.xlu0 %v10582_v40, %s10784_s11  ;;  %v5495_v16 = vsel %vm5335_vm12, %v5289_v23, %v8752_v34  ;;  %v6891_v50 = vsel %vm2339_vm2, %v6859_v15, %v15679_v7  ;;  %v6860_v7 = vsel %vm348_vm0, %v10583_v61, %v15675_v22  ;;  %v17434_v34 = vld [vmem:[#allocation42_spill] sm:$0xff]  ;;  %v15807_v15 = vld [vmem:[#allocation2 + $0x1d8] sm:$0xff] }
 0x5af   : > { %9620 = vmatprep.mubr.f32.mxu0 %v5495_v16  ;;  %v15772_v30 = vpop.permute.xlu1 %6301  ;;  %v6923_v49 = vsel %vm2372_vm3, %v6891_v50, %v15692_v4  ;;  %v6892_v4 = vsel %vm2339_vm2, %v6860_v7, %v15690_v14  ;;  %v10584_v22 = vld [vmem:[#allocation2 + $0x13c] sm:$0xff] }
 0x5b0   : > { %9621 = vmatmul.mubr.f32.gmra.mrb[60].mxu0 %v5496_v2  ;;  %v15770_v5 = vpop.permute.xlu0 %6175  ;;  %v9545_v25 = vpop.f32.mrb[62].mxu1  ;;  %v6955_v40 = vsel %vm2405_vm4, %v6923_v49, %v17434_v34  ;;  %v5925_v34 = vld [vmem:[#allocation2 + $0x1e0] sm:$0xff] }
 0x5b1   : > { %v15777_v23 = vadd.f32 %v15631_v54, %v9545_v25  ;;  %v5298_v36 = vpop.f32.mrb[63].mxu1  ;;  %6681 = vrot.lane.b32.xlu1 %v5955_v56, %s10789_s21  ;;  %v6987_v2 = vsel %vm2438_vm5, %v6955_v40, %v6410_v26  ;;  %v6924_v56 = vsel %vm2372_vm3, %v6892_v4, %v15711_v9 }
 0x5b2   : > { %6555 = vrot.lane.b32.xlu0 %v15768_v41, %s10788_s13  ;;  %v5299_v8 = vadd.f32 %v15631_v54, %v5298_v36  ;;  %v7019_v39 = vsel %vm2471_vm6, %v6987_v2, %v6538_v42 }
 0x5b3   : > { %v5370_v13 = vmin.f32 %v15777_v23, 0.0  ;;  %v6666_v12 = vpop.permute.xlu1 %6665  ;;  %vm5338_vm15 = vcmp.gt.f32.partialorder %v15777_v23, 0.0 }
 0x5b4   : > { %v6540_v3 = vpop.permute.xlu0 %6539  ;;  %v5369_v48 = vmin.f32 %v5299_v8, 0.0  ;;  %v7051_v25 = vsel %vm2504_vm7, %v7019_v39, %v6666_v12  ;;  %vm5337_vm14 = vcmp.gt.f32.partialorder %v5299_v8, 0.0 }
 0x5b5   : > { %v5433_v58 = vmul.f32 1.442695, %v5370_v13  ;;  %6683 = vrot.lane.b32.xlu1 %v5956_v1, %s10789_s21  ;;  %v17435_v1 = vld [vmem:[#allocation41_spill] sm:$0xff] }
 0x5b6   : > { %6319 = vrot.lane.b32.xlu0 %v15494_v17, %s10785_s14  ;;  %v5431_v52 = vmul.f32 1.442695, %v5369_v48  ;;  %v6956_v50 = vsel %vm2405_vm4, %v6924_v56, %v17435_v1  ;;  %v5788_v1 = vld [vmem:[#allocation2 + $0xc0] sm:$0xff] }
 0x5b7   : > { %10364 = vpow2.f32 %v5433_v58  ;;  %v6668_v16 = vpop.permute.xlu1 %6667  ;;  %v6988_v9 = vsel %vm2438_vm5, %v6956_v50, %v6412_v57  ;;  %v15828_v57 = vld [vmem:[#allocation2 + $0x140] sm:$0xff] }
 0x5b8   : > { %v15791_v54 = vpop.permute.xlu0 %6303  ;;  %10366 = vpow2.f32 %v5431_v52  ;;  %v7020_v42 = vsel %vm2471_vm6, %v6988_v9, %v6540_v3  ;;  %v15856_v9 = vld [vmem:[%s16753_s7 + $0x3] ss:$0 sm:$0xff] }
 0x5b9   : > { %6065 = vrot.lane.b32.xlu1 %v10584_v22, %s10783_s10  ;;  %v7052_v49 = vsel %vm2504_vm7, %v7020_v42, %v6668_v16 }
 0x5ba   : > { %6793 = vrot.lane.b32.xlu0 %v15768_v41, %s10790_s23 }
 0x5bb   : > { %v15810_v26 = vpop.permute.xlu1 %6049 }
 0x5bc   : > { %v6778_v36 = vpop.permute.xlu0 %6777 }
 0x5bd   : > { %v7083_v14 = vsel %vm2537_vm8, %v7051_v25, %v6778_v36  ;;  %6795 = vrot.lane.b32.xlu1 %v15807_v15, %s10790_s23  ;;  %v10587_v25 = vld [vmem:[#allocation2 + $0x148] sm:$0xff] }
 0x5be   : > { %6429 = vrot.lane.b32.xlu0 %v15494_v17, %s10787_s12  ;;  %9657 = vmatprep.mubr.msk.f32.mxu1 %vm2580_vm9, %v7083_v14  ;;  %v15821_v13 = vpop.f32.mrb[46].mxu0  ;;  %v10585_v17 = vld [vmem:[#allocation2 + $0x144] sm:$0xff] }
 0x5bf   : > { %v15824_v48 = vpop.f32.mrb[47].mxu0  ;;  %v6780_v58 = vpop.permute.xlu1 %6779  ;;  %v5926_v36 = vld [vmem:[#allocation2 + $0x1e8] sm:$0xff] }
 0x5c0   : > { %v6414_v12 = vpop.permute.xlu0 %6413  ;;  %v7084_v52 = vsel %vm2537_vm8, %v7052_v49, %v6780_v58  ;;  %v5957_v14 = vld [vmem:[#allocation2 + $0x1e4] sm:$0xff] }
 0x5c1   : > { %v10365_v61 = vpop.eup %10364  ;;  %6193 = vrot.lane.b32.xlu1 %v15828_v57, %s10784_s11  ;;  %9658 = vmatmul.mubr.msk.f32.gmra.mrb[78].mxu1 %vm2580_vm9, %v7084_v52 }
 0x5c2   : > { %6067 = vrot.lane.b32.xlu0 %v10585_v17, %s10783_s10  ;;  %v10367_v3 = vpop.eup %10366  ;;  %v8755_v40 = vadd.f32 -1.0, %v10365_v61 }
 0x5c3   : > { %v15835_v16 = vpop.permute.xlu1 %6177  ;;  %v8754_v4 = vadd.f32 -1.0, %v10367_v3 }
 0x5c4   : > { %v15833_v7 = vpop.permute.xlu0 %6051  ;;  %v5498_v39 = vsel %vm5338_vm15, %v15777_v23, %v8755_v40  ;;  %v6861_v23 = vsel %vm348_vm0, %v5788_v1, %v15730_v21 }
 0x5c5   : > { %6557 = vrot.lane.b32.xlu1 %v5925_v34, %s10788_s13  ;;  %v5497_v2 = vsel %vm5337_vm14, %v5299_v8, %v8754_v4  ;;  %v6893_v42 = vsel %vm2339_vm2, %v6861_v23, %v15757_v63  ;;  %v5832_v34 = vld [vmem:[#allocation2 + $0x154] sm:$0xff]  ;;  %v6862_v63 = vsel %vm348_vm0, %v15362_v53, %v15753_v6 }
 0x5c6   : > { %6431 = vrot.lane.b32.xlu0 %v15565_v11, %s10787_s12  ;;  %9623 = vmatprep.mubr.f32.mxu0 %v5497_v2  ;;  %v6925_v58 = vsel %vm2372_vm3, %v6893_v42, %v15772_v30  ;;  %v6894_v2 = vsel %vm2339_vm2, %v6862_v63, %v15770_v5 }
 0x5c7   : > { %9624 = vmatmul.mubr.f32.gmra.mrb[62].mxu0 %v5498_v39  ;;  %v6542_v22 = vpop.permute.xlu1 %6541  ;;  %v6957_v30 = vsel %vm2405_vm4, %v6925_v58, %v17391_v0 }
 0x5c8   : > { %v6416_v56 = vpop.permute.xlu0 %6415  ;;  %v6989_v39 = vsel %vm2438_vm5, %v6957_v30, %v6414_v12 }
 0x5c9   : > { %6321 = vrot.lane.b32.xlu1 %v15595_v47, %s10785_s14  ;;  %v5958_v47 = vld [vmem:[#allocation2 + $0x1ec] sm:$0xff]  ;;  %v7021_v1 = vsel %vm2471_vm6, %v6989_v39, %v6542_v22  ;;  %v5833_v22 = vld [vmem:[#allocation2 + $0x15c] sm:$0xff] }
 0x5ca   : > { %6195 = vrot.lane.b32.xlu0 %v10587_v25, %s10784_s11 }
 0x5cb   : > { %v15847_v8 = vpop.permute.xlu1 %6305 }
 0x5cc   : > { %v15845_v11 = vpop.permute.xlu0 %6179 }
 0x5cd   : > { %6685 = vrot.lane.b32.xlu1 %v5957_v14, %s10789_s21  ;;  %v6926_v14 = vsel %vm2372_vm3, %v6894_v2, %v15791_v54 }
 0x5ce   : > { %6559 = vrot.lane.b32.xlu0 %v5926_v36, %s10788_s13 }
 0x5cf   : > { %v6670_v49 = vpop.permute.xlu1 %6669 }
 0x5d0   : > { %v6544_v50 = vpop.permute.xlu0 %6543  ;;  %v9638_v52 = vpop.f32.mrb[64].mxu1  ;;  %v7053_v0 = vsel %vm2504_vm7, %v7021_v1, %v6670_v49 }
 0x5d1   : > { %v7282_v21 = vadd.f32 %v9638_v52, %v15856_v9  ;;  %6687 = vrot.lane.b32.xlu1 %v5958_v47, %s10789_s21  ;;  %v7276_v17 = vpop.f32.mrb[65].mxu1  ;;  %v5977_v47 = vld [vmem:[#allocation2 + $0x1f0] sm:$0xff]  ;;  %v15896_v52 = vld [vmem:[#allocation2 + $0x158] sm:$0xff] }
 0x5d2   : > { %6323 = vrot.lane.b32.xlu0 %v15610_v51, %s10785_s14  ;;  %v7277_v61 = vadd.f32 %v15856_v9, %v7276_v17 }
 0x5d3   : > { %v7468_v40 = vmin.f32 %v7282_v21, 0.0  ;;  %v6672_v4 = vpop.permute.xlu1 %6671  ;;  %vm7436_vm11 = vcmp.gt.f32.partialorder %v7282_v21, 0.0 }
 0x5d4   : > { %v15867_v3 = vpop.permute.xlu0 %6307  ;;  %v7467_v25 = vmin.f32 %v7277_v61, 0.0  ;;  %vm7435_vm10 = vcmp.gt.f32.partialorder %v7277_v61, 0.0 }
 0x5d5   : > { %v7501_v23 = vmul.f32 1.442695, %v7468_v40  ;;  %6069 = vrot.lane.b32.xlu1 %v5832_v34, %s10783_s10  ;;  %v5850_v40 = vld [vmem:[#allocation2 + $0x160] sm:$0xff] }
 0x5d6   : > { %6797 = vrot.lane.b32.xlu0 %v5926_v36, %s10790_s23  ;;  %v7499_v53 = vmul.f32 1.442695, %v7467_v25  ;;  %v6958_v36 = vsel %vm2405_vm4, %v6926_v14, %v17394_v10 }
 0x5d7   : > { %10368 = vpow2.f32 %v7501_v23  ;;  %v15884_v12 = vpop.permute.xlu1 %6053  ;;  %v6990_v54 = vsel %vm2438_vm5, %v6958_v36, %v6416_v56  ;;  %v5928_v23 = vld [vmem:[#allocation2 + $0x200] sm:$0xff] }
 0x5d8   : > { %v6782_v6 = vpop.permute.xlu0 %6781  ;;  %10370 = vpow2.f32 %v7499_v53  ;;  %v7022_v42 = vsel %vm2471_vm6, %v6990_v54, %v6544_v50  ;;  %v5927_v50 = vld [vmem:[#allocation2 + $0x1f8] sm:$0xff] }
 0x5d9   : > { %v7085_v5 = vsel %vm2537_vm8, %v7053_v0, %v6782_v6  ;;  %6799 = vrot.lane.b32.xlu1 %v5977_v47, %s10790_s23  ;;  %v7054_v10 = vsel %vm2504_vm7, %v7022_v42, %v6672_v4  ;;  %v5959_v53 = vld [vmem:[#allocation2 + $0x1fc] sm:$0xff] }
 0x5da   : > { %6433 = vrot.lane.b32.xlu0 %v15610_v51, %s10787_s12  ;;  %9660 = vmatprep.mubr.msk.f32.mxu1 %vm2580_vm9, %v7085_v5  ;;  %v5790_v6 = vld [vmem:[#allocation2 + $0xd8] sm:$0xff] }
 0x5db   : > { %v15894_v49 = vpop.f32.mrb[48].mxu0  ;;  %v6784_v34 = vpop.permute.xlu1 %6783  ;;  %v6863_v5 = vsel %vm348_vm0, %v5790_v6, %v15810_v26 }
 0x5dc   : > { %v6418_v58 = vpop.permute.xlu0 %6417  ;;  %v15899_v17 = vpop.f32.mrb[49].mxu0  ;;  %v7086_v51 = vsel %vm2537_vm8, %v7054_v10, %v6784_v34 }
 0x5dd   : > { %6197 = vrot.lane.b32.xlu1 %v15896_v52, %s10784_s11  ;;  %9661 = vmatmul.mubr.msk.f32.gmra.mrb[80].mxu1 %vm2580_vm9, %v7086_v51  ;;  %v5834_v51 = vld [vmem:[#allocation2 + $0x16c] sm:$0xff] }
 0x5de   : > { %6071 = vrot.lane.b32.xlu0 %v5833_v22, %s10783_s10 }
 0x5df   : > { %v15908_v63 = vpop.permute.xlu1 %6181 }
 0x5e0   : > { %v15906_v56 = vpop.permute.xlu0 %6055 }
 0x5e1   : > { %v10369_v30 = vpop.eup %10368  ;;  %6561 = vrot.lane.b32.xlu1 %v5927_v50, %s10788_s13 }
 0x5e2   : > { %6435 = vrot.lane.b32.xlu0 %v15653_v60, %s10787_s12  ;;  %v10371_v4 = vpop.eup %10370  ;;  %v8791_v2 = vadd.f32 -1.0, %v10369_v30 }
 0x5e3   : > { %v6546_v25 = vpop.permute.xlu1 %6545  ;;  %v8790_v14 = vadd.f32 -1.0, %v10371_v4 }
 0x5e4   : > { %v6420_v39 = vpop.permute.xlu0 %6419  ;;  %v7596_v0 = vsel %vm7436_vm11, %v7282_v21, %v8791_v2  ;;  %v6895_v21 = vsel %vm2339_vm2, %v6863_v5, %v15835_v16  ;;  %v6864_v16 = vsel %vm348_vm0, %v15466_v31, %v15833_v7 }
 0x5e5   : > { %6325 = vrot.lane.b32.xlu1 %v15677_v18, %s10785_s14  ;;  %v7595_v1 = vsel %vm7435_vm10, %v7277_v61, %v8790_v14  ;;  %v5960_v18 = vld [vmem:[#allocation2 + $0x204] sm:$0xff]  ;;  %v6927_v54 = vsel %vm2372_vm3, %v6895_v21, %v15847_v8  ;;  %v15965_v21 = vld [vmem:[#allocation2 + $0x170] sm:$0xff] }
 0x5e6   : > { %6199 = vrot.lane.b32.xlu0 %v5850_v40, %s10784_s11  ;;  %9716 = vmatprep.mubr.f32.mxu0 %v7595_v1  ;;  %v6959_v8 = vsel %vm2405_vm4, %v6927_v54, %v17402_v20  ;;  %v6896_v40 = vsel %vm2339_vm2, %v6864_v16, %v15845_v11 }
 0x5e7   : > { %v15918_v47 = vpop.permute.xlu1 %6309  ;;  %9717 = vmatmul.mubr.f32.vlgmr.msra.gmra.mrb[32].mxu0 %v7596_v0  ;;  %v6991_v4 = vsel %vm2438_vm5, %v6959_v8, %v6418_v58  ;;  %v6928_v14 = vsel %vm2372_vm3, %v6896_v40, %v15867_v3 }
 0x5e8   : > { %v15916_v60 = vpop.permute.xlu0 %6183  ;;  %v7023_v1 = vsel %vm2471_vm6, %v6991_v4, %v6546_v25  ;;  %v5835_v25 = vld [vmem:[#allocation2 + $0x174] sm:$0xff] }
 0x5e9   : > { %6689 = vrot.lane.b32.xlu1 %v5959_v53, %s10789_s21  ;;  %v5978_v53 = vld [vmem:[#allocation2 + $0x208] sm:$0xff] }
 0x5ea   : > { %6563 = vrot.lane.b32.xlu0 %v5928_v23, %s10788_s13 }
 0x5eb   : > { %v6674_v61 = vpop.permute.xlu1 %6673 }
 0x5ec   : > { %v6548_v36 = vpop.permute.xlu0 %6547  ;;  %v9641_v22 = vpop.f32.mrb[66].mxu1  ;;  %v7055_v20 = vsel %vm2504_vm7, %v7023_v1, %v6674_v61  ;;  %v5961_v1 = vld [vmem:[#allocation2 + $0x214] sm:$0xff] }
 0x5ed   : > { %v15931_v42 = vadd.f32 %v9641_v22, %v15856_v9  ;;  %6691 = vrot.lane.b32.xlu1 %v5960_v18, %s10789_s21  ;;  %v7286_v10 = vpop.f32.mrb[67].mxu1 }
 0x5ee   : > { %6327 = vrot.lane.b32.xlu0 %v15688_v24, %s10785_s14  ;;  %v7287_v26 = vadd.f32 %v15856_v9, %v7286_v10 }
 0x5ef   : > { %v7470_v50 = vmin.f32 %v15931_v42, 0.0  ;;  %v6676_v30 = vpop.permute.xlu1 %6675  ;;  %vm7438_vm13 = vcmp.gt.f32.partialorder %v15931_v42, 0.0 }
 0x5f0   : > { %v15935_v34 = vpop.permute.xlu0 %6311  ;;  %v7469_v2 = vmin.f32 %v7287_v26, 0.0  ;;  %vm7437_vm12 = vcmp.gt.f32.partialorder %v7287_v26, 0.0 }
 0x5f1   : > { %v7505_v31 = vmul.f32 1.442695, %v7470_v50  ;;  %6073 = vrot.lane.b32.xlu1 %v5834_v51, %s10783_s10  ;;  %v5851_v51 = vld [vmem:[#allocation2 + $0x178] sm:$0xff] }
 0x5f2   : > { %6801 = vrot.lane.b32.xlu0 %v5928_v23, %s10790_s23  ;;  %v7503_v7 = vmul.f32 1.442695, %v7469_v2  ;;  %v6960_v23 = vsel %vm2405_vm4, %v6928_v14, %v17403_v37  ;;  %v5930_v2 = vld [vmem:[#allocation2 + $0x218] sm:$0xff] }
 0x5f3   : > { %10372 = vpow2.f32 %v7505_v31  ;;  %v15953_v58 = vpop.permute.xlu1 %6057  ;;  %v6992_v3 = vsel %vm2438_vm5, %v6960_v23, %v6420_v39  ;;  %v5792_v31 = vld [vmem:[#allocation2 + $0xf0] sm:$0xff] }
 0x5f4   : > { %v6786_v0 = vpop.permute.xlu0 %6785  ;;  %10374 = vpow2.f32 %v7503_v7  ;;  %v7024_v6 = vsel %vm2471_vm6, %v6992_v3, %v6548_v36  ;;  %v5929_v36 = vld [vmem:[#allocation2 + $0x210] sm:$0xff]  ;;  %v5962_v7 = vld [vmem:[#allocation2 + $0x21c] sm:$0xff] }
 0x5f5   : > { %v7087_v11 = vsel %vm2537_vm8, %v7055_v20, %v6786_v0  ;;  %6803 = vrot.lane.b32.xlu1 %v5978_v53, %s10790_s23  ;;  %v7056_v37 = vsel %vm2504_vm7, %v7024_v6, %v6676_v30 }
 0x5f6   : > { %6437 = vrot.lane.b32.xlu0 %v15688_v24, %s10787_s12  ;;  %9663 = vmatprep.mubr.msk.f32.mxu1 %vm2580_vm9, %v7087_v11  ;;  %v15963_v5 = vpop.f32.mrb[50].mxu0 }
 0x5f7   : > { %v15968_v61 = vpop.f32.mrb[51].mxu0  ;;  %v6788_v54 = vpop.permute.xlu1 %6787 }
 0x5f8   : > { %v6422_v18 = vpop.permute.xlu0 %6421  ;;  %v7088_v24 = vsel %vm2537_vm8, %v7056_v37, %v6788_v54 }
 0x5f9   : > { %6201 = vrot.lane.b32.xlu1 %v15965_v21, %s10784_s11  ;;  %9664 = vmatmul.mubr.msk.f32.gmra.mrb[82].mxu1 %vm2580_vm9, %v7088_v24 }
 0x5fa   : > { %6075 = vrot.lane.b32.xlu0 %v5835_v25, %s10783_s10  ;;  %s10705_s10 = scalar_lea.vmem %s16697_s25, 4096 }
 0x5fb   : > { %v15977_v22 = vpop.permute.xlu1 %6185  ;;  %p10706_p12 = scmp.ne.s32.totalorder %s16697_s25, %s10705_s10 }
 0x5fc   : > { %v15975_v39 = vpop.permute.xlu0 %6059 }
 0x5fd   : > { %v10373_v10 = vpop.eup %10372  ;;  %6565 = vrot.lane.b32.xlu1 %v5929_v36, %s10788_s13  ;;  %p10707_p8 = pnand %p10706_p12, %p17441_p7 }
 0x5fe   : > { %6439 = vrot.lane.b32.xlu0 %v15727_v27, %s10787_s12  ;;  %v10375_v16 = vpop.eup %10374  ;;  %v8793_v50 = vadd.f32 -1.0, %v10373_v10 }
 0x5ff   : > { %v6550_v30 = vpop.permute.xlu1 %6549  ;;  %v8792_v40 = vadd.f32 -1.0, %v10375_v16  ;;  %p10708_p11 = pneg %p10707_p8 }
 0x600   : > { %v6424_v8 = vpop.permute.xlu0 %6423  ;;  %v7598_v14 = vsel %vm7438_vm13, %v15931_v42, %v8793_v50 }
 0x601   : > { %6329 = vrot.lane.b32.xlu1 %v15755_v45, %s10785_s14  ;;  %v7597_v4 = vsel %vm7437_vm12, %v7287_v26, %v8792_v40  ;;  %v6865_v45 = vsel %vm348_vm0, %v5792_v31, %v15884_v12 }
 0x602   : > { %6203 = vrot.lane.b32.xlu0 %v5851_v51, %s10784_s11  ;;  %9719 = vmatprep.mubr.f32.mxu0 %v7597_v4  ;;  %v6897_v0 = vsel %vm2339_vm2, %v6865_v45, %v15908_v63  ;;  %v6866_v63 = vsel %vm348_vm0, %v15585_v33, %v15906_v56 }
 0x603   : > { %v15989_v20 = vpop.permute.xlu1 %6313  ;;  %9720 = vmatmul.mubr.f32.gmra.mrb[34].mxu0 %v7598_v14  ;;  %v6929_v42 = vsel %vm2372_vm3, %v6897_v0, %v15918_v47  ;;  %v6898_v54 = vsel %vm2339_vm2, %v6866_v63, %v15916_v60  ;;  %v5932_v14 = vld [vmem:[#allocation2 + $0x230] sm:$0xff] }
 0x604   : > { %v15986_v27 = vpop.permute.xlu0 %6187  ;;  %v6961_v47 = vsel %vm2405_vm4, %v6929_v42, %v17407_v32  ;;  %v6930_v10 = vsel %vm2372_vm3, %v6898_v54, %v15935_v34  ;;  %v5979_v32 = vld [vmem:[#allocation2 + $0x220] sm:$0xff]  ;;  %v5931_v34 = vld [vmem:[#allocation2 + $0x228] sm:$0xff] }
 0x605   : > { %6693 = vrot.lane.b32.xlu1 %v5961_v1, %s10789_s21  ;;  %v6993_v24 = vsel %vm2438_vm5, %v6961_v47, %v6422_v18  ;;  %v6962_v40 = vsel %vm2405_vm4, %v6930_v10, %v17408_v38 }
 0x606   : > { %6567 = vrot.lane.b32.xlu0 %v5930_v2, %s10788_s13  ;;  %v7025_v51 = vsel %vm2471_vm6, %v6993_v24, %v6550_v30  ;;  %v5794_v24 = vld [vmem:[#allocation2 + $0x108] sm:$0xff] }
 0x607   : > { %v6678_v53 = vpop.permute.xlu1 %6677  ;;  %v6867_v10 = vsel %vm348_vm0, %v5794_v24, %v15953_v58  ;;  %v6868_v58 = vsel %vm348_vm0, %v15667_v19, %v15975_v39 }
 0x608   : > { %v6552_v26 = vpop.permute.xlu0 %6551  ;;  %v9644_v11 = vpop.f32.mrb[68].mxu1  ;;  %v7057_v56 = vsel %vm2504_vm7, %v7025_v51, %v6678_v53 }
 0x609   : > { %v16002_v23 = vadd.f32 %v9644_v11, %v15856_v9  ;;  %6695 = vrot.lane.b32.xlu1 %v5962_v7, %s10789_s21  ;;  %v7296_v3 = vpop.f32.mrb[69].mxu1  ;;  %v5980_v11 = vld [vmem:[#allocation2 + $0x238] sm:$0xff] }
 0x60a   : > { %6331 = vrot.lane.b32.xlu0 %v15768_v41, %s10785_s14  ;;  %v7297_v12 = vadd.f32 %v15856_v9, %v7296_v3  ;;  %s10793_s14 = smov [#allocation9]  }
 0x60b   : > { %v7472_v6 = vmin.f32 %v16002_v23, 0.0  ;;  %v6680_v37 = vpop.permute.xlu1 %6679  ;;  %vm7440_vm15 = vcmp.gt.f32.partialorder %v16002_v23, 0.0 }
 0x60c   : > { %v16006_v25 = vpop.permute.xlu0 %6315  ;;  %v7471_v36 = vmin.f32 %v7297_v12, 0.0  ;;  %vm7439_vm14 = vcmp.gt.f32.partialorder %v7297_v12, 0.0 }
 0x60d   : > { %v7509_v33 = vmul.f32 1.442695, %v7472_v6  ;;  %6441 = vrot.lane.b32.xlu1 %v15768_v41, %s10787_s12  ;;  %v6994_v41 = vsel %vm2438_vm5, %v6962_v40, %v6424_v8 }
 0x60e   : > { %6805 = vrot.lane.b32.xlu0 %v5930_v2, %s10790_s23  ;;  %v7507_v16 = vmul.f32 1.442695, %v7471_v36  ;;  %v7026_v30 = vsel %vm2471_vm6, %v6994_v41, %v6552_v26  ;;  %v5964_v26 = vld [vmem:[#allocation2 + $0x234] sm:$0xff] }
 0x60f   : > { %10376 = vpow2.f32 %v7509_v33  ;;  %v16025_v18 = vpop.permute.xlu1 %6061  ;;  %v7058_v1 = vsel %vm2504_vm7, %v7026_v30, %v6680_v37  ;;  %v6899_v33 = vsel %vm2339_vm2, %v6867_v10, %v15977_v22 }
 0x610   : > { %v6790_v50 = vpop.permute.xlu0 %6789  ;;  %10378 = vpow2.f32 %v7507_v16 }
 0x611   : > { %v7089_v60 = vsel %vm2537_vm8, %v7057_v56, %v6790_v50  ;;  %6443 = vrot.lane.b32.xlu1 %v15807_v15, %s10787_s12  ;;  %v5963_v15 = vld [vmem:[#allocation2 + $0x22c] sm:$0xff]  ;;  %s10709_s12 = sshll.u32 %s10793_s14, 4  ;;  %s10710_s12 = int_to_ptr.vmem [resolvable:$false] %s10709_s12 }
 0x612   : > { %6807 = vrot.lane.b32.xlu0 %v5979_v32, %s10790_s23  ;;  %9666 = vmatprep.mubr.msk.f32.mxu1 %vm2580_vm9, %v7089_v60  ;;  %v16035_v4 = vpop.f32.mrb[52].mxu0  ;;  %p10712_p13 = scmp.lt.s32.totalorder %s16697_s25, %s10710_s12 }
 0x613   : > { %v16038_v38 = vpop.f32.mrb[53].mxu0  ;;  %v6792_v31 = vpop.permute.xlu1 %6791 }
 0x614   : > { %v6426_v2 = vpop.permute.xlu0 %6425  ;;  %v7090_v45 = vsel %vm2537_vm8, %v7058_v1, %v6792_v31 }
 0x615   : > { %6571 = vrot.lane.b32.xlu1 %v5932_v14, %s10788_s13  ;;  %9667 = vmatmul.mubr.msk.f32.gmra.mrb[84].mxu1 %vm2580_vm9, %v7090_v45 }
 0x616   : > { %6569 = vrot.lane.b32.xlu0 %v5931_v34, %s10788_s13  ;;  %s10711_s13 = scalar_lea.vmem %s10710_s12, 8192 }
 0x617   : > { %v16046_v7 = vpop.permute.xlu1 %6189  ;;  %p10713_p1 = scmp.lt.s32.totalorder %s10711_s13, %s10705_s10 }
 0x618   : > { %v16044_v8 = vpop.permute.xlu0 %6063 }
 0x619   : > { %v10377_v0 = vpop.eup %10376  ;;  %6699 = vrot.lane.b32.xlu1 %v5964_v26, %s10789_s21  ;;  %p10714_p6 = por %p10713_p1, %p10712_p13 }
 0x61a   : > { %6697 = vrot.lane.b32.xlu0 %v5963_v15, %s10789_s21  ;;  %v10379_v53 = vpop.eup %10378  ;;  %v8795_v3 = vadd.f32 -1.0, %v10377_v0 }
 0x61b   : > { %v6554_v63 = vpop.permute.xlu1 %6553  ;;  %v8794_v47 = vadd.f32 -1.0, %v10379_v53  ;;  %p10715_p9 = pnand %p10714_p6, %p10708_p11 }
 0x61c   : > { %v6428_v42 = vpop.permute.xlu0 %6427  ;;  %v7600_v54 = vsel %vm7440_vm15, %v16002_v23, %v8795_v3 }
 0x61d   : > { %6811 = vrot.lane.b32.xlu1 %v5980_v11, %s10790_s23  ;;  %v7599_v6 = vsel %vm7439_vm14, %v7297_v12, %v8794_v47  ;;  %v6931_v12 = vsel %vm2372_vm3, %v6899_v33, %v15989_v20  ;;  %v6900_v20 = vsel %vm2339_vm2, %v6868_v58, %v15986_v27 }
 0x61e   : > { %6809 = vrot.lane.b32.xlu0 %v5932_v14, %s10790_s23  ;;  %9722 = vmatprep.mubr.f32.mxu0 %v7599_v6  ;;  %v6963_v40 = vsel %vm2405_vm4, %v6931_v12, %v17409_v59  ;;  %v6932_v14 = vsel %vm2372_vm3, %v6900_v20, %v16006_v25 }
 0x61f   : > { %v6318_v36 = vpop.permute.xlu1 %6317  ;;  %9723 = vmatmul.mubr.f32.gmra.mrb[36].mxu0 %v7600_v54  ;;  %v6995_v34 = vsel %vm2438_vm5, %v6963_v40, %v6426_v2  ;;  %v6964_v27 = vsel %vm2405_vm4, %v6932_v14, %v17410_v35 }
 0x620   : > { %v16053_v37 = vpop.permute.xlu0 %6191  ;;  %v7027_v1 = vsel %vm2471_vm6, %v6995_v34, %v6554_v63  ;;  %v6996_v25 = vsel %vm2438_vm5, %v6964_v27, %v6428_v42 }
 0x623   : > { %v6682_v32 = vpop.permute.xlu1 %6681 }
 0x624   : > { %v6556_v51 = vpop.permute.xlu0 %6555  ;;  %v9647_v56 = vpop.f32.mrb[70].mxu1  ;;  %v7059_v45 = vsel %vm2504_vm7, %v7027_v1, %v6682_v32  ;;  %v6870_v1 = vsel %vm348_vm0, %v15743_v43, %v16044_v8 }
 0x625   : > { %v7312_v16 = vadd.f32 %v9647_v56, %v15856_v9  ;;  %v7306_v50 = vpop.f32.mrb[71].mxu1  ;;  %v7028_v2 = vsel %vm2471_vm6, %v6996_v25, %v6556_v51  ;;  %v5796_v56 = vld [vmem:[#allocation2 + $0x120] sm:$0xff] }
 0x626   : > { %v7307_v23 = vadd.f32 %v15856_v9, %v7306_v50  ;;  %v6869_v58 = vsel %vm348_vm0, %v5796_v56, %v16025_v18 }
 0x627   : > { %v7474_v22 = vmin.f32 %v7312_v16, 0.0  ;;  %v6684_v41 = vpop.permute.xlu1 %6683  ;;  %vm7442_vm11 = vcmp.gt.f32.partialorder %v7312_v16, 0.0 }
 0x628   : > { %v16064_v60 = vpop.permute.xlu0 %6319  ;;  %v7473_v30 = vmin.f32 %v7307_v23, 0.0  ;;  %v7060_v53 = vsel %vm2504_vm7, %v7028_v2, %v6684_v41  ;;  %vm7441_vm10 = vcmp.gt.f32.partialorder %v7307_v23, 0.0 }
 0x629   : > { %v7513_v31 = vmul.f32 1.442695, %v7474_v22  ;;  %v6901_v22 = vsel %vm2339_vm2, %v6869_v58, %v16046_v7 }
 0x62a   : > { %v7511_v19 = vmul.f32 1.442695, %v7473_v30  ;;  %v6933_v20 = vsel %vm2372_vm3, %v6901_v22, %v6318_v36  ;;  %v6902_v36 = vsel %vm2339_vm2, %v6870_v1, %v16053_v37 }
 0x62b   : > { %10380 = vpow2.f32 %v7513_v31  ;;  %v16079_v15 = vpop.permute.xlu1 %6065  ;;  %v6965_v18 = vsel %vm2405_vm4, %v6933_v20, %v17411_v62  ;;  %v5798_v20 = vld [vmem:[#allocation2 + $0x138] sm:$0xff] }
 0x62c   : > { %v6794_v39 = vpop.permute.xlu0 %6793  ;;  %10382 = vpow2.f32 %v7511_v19 }
 0x62d   : > { %v7091_v59 = vsel %vm2537_vm8, %v7059_v45, %v6794_v39  ;;  %v6934_v39 = vsel %vm2372_vm3, %v6902_v36, %v16064_v60 }
 0x62e   : > { %9669 = vmatprep.mubr.msk.f32.mxu1 %vm2580_vm9, %v7091_v59  ;;  %v16086_v26 = vpop.f32.mrb[54].mxu0  ;;  %v6966_v37 = vsel %vm2405_vm4, %v6934_v39, %v17412_v44 }
 0x62f   : > { %v16089_v11 = vpop.f32.mrb[55].mxu0  ;;  %v6796_v3 = vpop.permute.xlu1 %6795 }
 0x630   : > { %v6430_v0 = vpop.permute.xlu0 %6429  ;;  %v7092_v63 = vsel %vm2537_vm8, %v7060_v53, %v6796_v3 }
 0x631   : > { %9670 = vmatmul.mubr.msk.f32.gmra.mrb[86].mxu1 %vm2580_vm9, %v7092_v63  ;;  %v6997_v45 = vsel %vm2438_vm5, %v6965_v18, %v6430_v0 }
 0x633   : > { %v16095_v47 = vpop.permute.xlu1 %6193 }
 0x634   : > { %v16093_v35 = vpop.permute.xlu0 %6067 }
 0x635   : > { %v10381_v6 = vpop.eup %10380  ;;  %v6872_v39 = vsel %vm348_vm0, %v15828_v57, %v16093_v35 }
 0x636   : > { %v10383_v42 = vpop.eup %10382  ;;  %v8797_v24 = vadd.f32 -1.0, %v10381_v6 }
 0x637   : > { %v6558_v10 = vpop.permute.xlu1 %6557  ;;  %v8796_v51 = vadd.f32 -1.0, %v10383_v42 }
 0x638   : > { %v6432_v54 = vpop.permute.xlu0 %6431  ;;  %v7602_v12 = vsel %vm7442_vm11, %v7312_v16, %v8797_v24  ;;  %v7029_v59 = vsel %vm2471_vm6, %v6997_v45, %v6558_v10 }
 0x639   : > { %v7601_v33 = vsel %vm7441_vm10, %v7307_v23, %v8796_v51  ;;  %v6998_v60 = vsel %vm2438_vm5, %v6966_v37, %v6432_v54 }
 0x63a   : > { %9725 = vmatprep.mubr.f32.mxu0 %v7601_v33 }
 0x63b   : > { %v6322_v50 = vpop.permute.xlu1 %6321  ;;  %9726 = vmatmul.mubr.f32.gmra.mrb[38].mxu0 %v7602_v12 }
 0x63c   : > { %v16097_v32 = vpop.permute.xlu0 %6195 }
 0x63f   : > { %v6686_v41 = vpop.permute.xlu1 %6685 }
 0x640   : > { %v6560_v40 = vpop.permute.xlu0 %6559  ;;  %v9650_v34 = vpop.f32.mrb[72].mxu1  ;;  %v7061_v25 = vsel %vm2504_vm7, %v7029_v59, %v6686_v41 }
 0x641   : > { %v7322_v23 = vadd.f32 %v9650_v34, %v15856_v9  ;;  %v7316_v30 = vpop.f32.mrb[73].mxu1  ;;  %v7030_v0 = vsel %vm2471_vm6, %v6998_v60, %v6560_v40 }
 0x642   : > { %v7317_v14 = vadd.f32 %v15856_v9, %v7316_v30  ;;  %v6871_v30 = vsel %vm348_vm0, %v5798_v20, %v16079_v15 }
 0x643   : > { %v7476_v31 = vmin.f32 %v7322_v23, 0.0  ;;  %v6688_v7 = vpop.permute.xlu1 %6687  ;;  %vm7444_vm13 = vcmp.gt.f32.partialorder %v7322_v23, 0.0  ;;  %v6903_v18 = vsel %vm2339_vm2, %v6871_v30, %v16095_v47  ;;  %v6904_v47 = vsel %vm2339_vm2, %v6872_v39, %v16097_v32 }
 0x644   : > { %v16106_v16 = vpop.permute.xlu0 %6323  ;;  %v7475_v19 = vmin.f32 %v7317_v14, 0.0  ;;  %v7062_v63 = vsel %vm2504_vm7, %v7030_v0, %v6688_v7  ;;  %vm7443_vm12 = vcmp.gt.f32.partialorder %v7317_v14, 0.0  ;;  %v6935_v7 = vsel %vm2372_vm3, %v6903_v18, %v6322_v50  ;;  %v17436_v0 = vld [vmem:[#allocation65_spill] sm:$0xff] }
 0x645   : > { %v7517_v27 = vmul.f32 1.442695, %v7476_v31  ;;  %v6967_v15 = vsel %vm2405_vm4, %v6935_v7, %v17413_v28 }
 0x646   : > { %v7515_v43 = vmul.f32 1.442695, %v7475_v19 }
 0x647   : > { %10384 = vpow2.f32 %v7517_v27  ;;  %v16121_v2 = vpop.permute.xlu1 %6069 }
 0x648   : > { %v6798_v8 = vpop.permute.xlu0 %6797  ;;  %10386 = vpow2.f32 %v7515_v43  ;;  %v6936_v43 = vsel %vm2372_vm3, %v6904_v47, %v16106_v16 }
 0x649   : > { %v7093_v62 = vsel %vm2537_vm8, %v7061_v25, %v6798_v8  ;;  %v6968_v32 = vsel %vm2405_vm4, %v6936_v43, %v17436_v0 }
 0x64a   : > { %9672 = vmatprep.mubr.msk.f32.mxu1 %vm2580_vm9, %v7093_v62  ;;  %v16128_v53 = vpop.f32.mrb[56].mxu0 }
 0x64b   : > { %v16131_v6 = vpop.f32.mrb[57].mxu0  ;;  %v6800_v42 = vpop.permute.xlu1 %6799 }
 0x64c   : > { %v6434_v3 = vpop.permute.xlu0 %6433  ;;  %v7094_v24 = vsel %vm2537_vm8, %v7062_v63, %v6800_v42 }
 0x64d   : > { %9673 = vmatmul.mubr.msk.f32.gmra.mrb[88].mxu1 %vm2580_vm9, %v7094_v24  ;;  %v6999_v50 = vsel %vm2438_vm5, %v6967_v15, %v6434_v3 }
 0x64f   : > { %v16137_v10 = vpop.permute.xlu1 %6197 }
 0x650   : > { %v16135_v44 = vpop.permute.xlu0 %6071 }
 0x651   : > { %v10385_v51 = vpop.eup %10384 }
 0x652   : > { %v10387_v54 = vpop.eup %10386  ;;  %v8799_v12 = vadd.f32 -1.0, %v10385_v51 }
 0x653   : > { %v6562_v56 = vpop.permute.xlu1 %6561  ;;  %v8798_v58 = vadd.f32 -1.0, %v10387_v54 }
 0x654   : > { %v6436_v33 = vpop.permute.xlu0 %6435  ;;  %v7604_v41 = vsel %vm7444_vm13, %v7322_v23, %v8799_v12  ;;  %v7031_v8 = vsel %vm2471_vm6, %v6999_v50, %v6562_v56 }
 0x655   : > { %v7603_v40 = vsel %vm7443_vm12, %v7317_v14, %v8798_v58  ;;  %v7000_v16 = vsel %vm2438_vm5, %v6968_v32, %v6436_v33 }
 0x656   : > { %9728 = vmatprep.mubr.f32.mxu0 %v7603_v40 }
 0x657   : > { %v6326_v34 = vpop.permute.xlu1 %6325  ;;  %9729 = vmatmul.mubr.f32.gmra.mrb[40].mxu0 %v7604_v41 }
 0x658   : > { %v16139_v22 = vpop.permute.xlu0 %6199 }
 0x65b   : > { %v6690_v31 = vpop.permute.xlu1 %6689 }
 0x65c   : > { %v6564_v1 = vpop.permute.xlu0 %6563  ;;  %v9653_v36 = vpop.f32.mrb[74].mxu1  ;;  %v7063_v37 = vsel %vm2504_vm7, %v7031_v8, %v6690_v31 }
 0x65d   : > { %v7332_v14 = vadd.f32 %v9653_v36, %v15856_v9  ;;  %v7326_v45 = vpop.f32.mrb[75].mxu1  ;;  %v7032_v3 = vsel %vm2471_vm6, %v7000_v16, %v6564_v1  ;;  %v5800_v36 = vld [vmem:[#allocation2 + $0x150] sm:$0xff]  ;;  %v17438_v16 = vld [vmem:[#allocation69_spill] sm:$0xff] }
 0x65e   : > { %v7327_v19 = vadd.f32 %v15856_v9, %v7326_v45  ;;  %v6873_v39 = vsel %vm348_vm0, %v5800_v36, %v16121_v2 }
 0x65f   : > { %v7478_v59 = vmin.f32 %v7332_v14, 0.0  ;;  %v6692_v27 = vpop.permute.xlu1 %6691  ;;  %vm7446_vm15 = vcmp.gt.f32.partialorder %v7332_v14, 0.0 }
 0x660   : > { %v6328_v23 = vpop.permute.xlu0 %6327  ;;  %v7477_v25 = vmin.f32 %v7327_v19, 0.0  ;;  %v7064_v24 = vsel %vm2504_vm7, %v7032_v3, %v6692_v27  ;;  %vm7445_vm14 = vcmp.gt.f32.partialorder %v7327_v19, 0.0 }
 0x661   : > { %v7521_v62 = vmul.f32 1.442695, %v7478_v59  ;;  %v6905_v59 = vsel %vm2339_vm2, %v6873_v39, %v16137_v10 }
 0x662   : > { %v7519_v57 = vmul.f32 1.442695, %v7477_v25  ;;  %v6937_v47 = vsel %vm2372_vm3, %v6905_v59, %v6326_v34 }
 0x663   : > { %10388 = vpow2.f32 %v7521_v62  ;;  %v16161_v60 = vpop.permute.xlu1 %6073  ;;  %v17437_v62 = vld [vmem:[#allocation70_spill] sm:$0xff] }
 0x664   : > { %v6802_v35 = vpop.permute.xlu0 %6801  ;;  %10390 = vpow2.f32 %v7519_v57  ;;  %v6969_v10 = vsel %vm2405_vm4, %v6937_v47, %v17437_v62 }
 0x665   : > { %v7095_v28 = vsel %vm2537_vm8, %v7063_v37, %v6802_v35 }
 0x666   : > { %9675 = vmatprep.mubr.msk.f32.mxu1 %vm2580_vm9, %v7095_v28  ;;  %v16168_v63 = vpop.f32.mrb[58].mxu0 }
 0x667   : > { %v16171_v51 = vpop.f32.mrb[59].mxu0  ;;  %v6804_v54 = vpop.permute.xlu1 %6803 }
 0x668   : > { %v6438_v42 = vpop.permute.xlu0 %6437  ;;  %v7096_v12 = vsel %vm2537_vm8, %v7064_v24, %v6804_v54 }
 0x669   : > { %9676 = vmatmul.mubr.msk.f32.gmra.mrb[90].mxu1 %vm2580_vm9, %v7096_v12  ;;  %v7001_v35 = vsel %vm2438_vm5, %v6969_v10, %v6438_v42  ;;  %v17440_v10 = vld [vmem:[#allocation73_spill] sm:$0xff] }
 0x66b   : > { %v6202_v58 = vpop.permute.xlu1 %6201 }
 0x66c   : > { %v6076_v56 = vpop.permute.xlu0 %6075 }
 0x66d   : > { %v10389_v40 = vpop.eup %10388  ;;  %v6876_v36 = vsel %vm348_vm0, %v15965_v21, %v6076_v56 }
 0x66e   : > { %v10391_v41 = vpop.eup %10390  ;;  %v8801_v33 = vadd.f32 -1.0, %v10389_v40 }
 0x66f   : > { %v6566_v30 = vpop.permute.xlu1 %6565  ;;  %v8800_v1 = vadd.f32 -1.0, %v10391_v41 }
 0x670   : > { %v6440_v20 = vpop.permute.xlu0 %6439  ;;  %v7606_v7 = vsel %vm7446_vm15, %v7332_v14, %v8801_v33  ;;  %v6874_v14 = vsel %vm348_vm0, %v15896_v52, %v16135_v44  ;;  %v7033_v0 = vsel %vm2471_vm6, %v7001_v35, %v6566_v30  ;;  %v5802_v30 = vld [vmem:[#allocation2 + $0x168] sm:$0xff] }
 0x671   : > { %v7605_v18 = vsel %vm7445_vm14, %v7327_v19, %v8800_v1  ;;  %v6906_v2 = vsel %vm2339_vm2, %v6874_v14, %v16139_v22  ;;  %v17439_v14 = vld [vmem:[#allocation74_spill] sm:$0xff] }
 0x672   : > { %9731 = vmatprep.mubr.f32.mxu0 %v7605_v18  ;;  %v6938_v57 = vsel %vm2372_vm3, %v6906_v2, %v6328_v23 }
 0x673   : > { %v6330_v45 = vpop.permute.xlu1 %6329  ;;  %9732 = vmatmul.mubr.f32.gmra.mrb[42].mxu0 %v7606_v7  ;;  %v6970_v22 = vsel %vm2405_vm4, %v6938_v57, %v17438_v16 }
 0x674   : > { %v6204_v31 = vpop.permute.xlu0 %6203  ;;  %v7002_v12 = vsel %vm2438_vm5, %v6970_v22, %v6440_v20  ;;  %v6875_v20 = vsel %vm348_vm0, %v5802_v30, %v16161_v60 }
 0x675   : > { %v6907_v39 = vsel %vm2339_vm2, %v6875_v20, %v6202_v58  ;;  %v6908_v59 = vsel %vm2339_vm2, %v6876_v36, %v6204_v31 }
 0x677   : > { %v6694_v27 = vpop.permute.xlu1 %6693 }
 0x678   : > { %v6568_v15 = vpop.permute.xlu0 %6567  ;;  %v9656_v50 = vpop.f32.mrb[76].mxu1  ;;  %v7065_v52 = vsel %vm2504_vm7, %v7033_v0, %v6694_v27  ;;  %v6939_v27 = vsel %vm2372_vm3, %v6907_v39, %v6330_v45 }
 0x679   : > { %v16181_v19 = vadd.f32 %v9656_v50, %v15856_v9  ;;  %v7336_v25 = vpop.f32.mrb[77].mxu1  ;;  %v7034_v23 = vsel %vm2471_vm6, %v7002_v12, %v6568_v15  ;;  %v6971_v2 = vsel %vm2405_vm4, %v6939_v27, %v17439_v14 }
 0x67a   : > { %v7337_v43 = vadd.f32 %v15856_v9, %v7336_v25 }
 0x67b   : > { %v7480_v34 = vmin.f32 %v16181_v19, 0.0  ;;  %v6696_v37 = vpop.permute.xlu1 %6695 }
 0x67c   : > { %v6332_v8 = vpop.permute.xlu0 %6331  ;;  %v7479_v28 = vmin.f32 %v7337_v43, 0.0  ;;  %v7066_v40 = vsel %vm2504_vm7, %v7034_v23, %v6696_v37  ;;  %vm7447_vm2 = vcmp.gt.f32.partialorder %v7337_v43, 0.0 }
 0x67d   : > { %v7525_v3 = vmul.f32 1.442695, %v7480_v34  ;;  %v6940_v47 = vsel %vm2372_vm3, %v6908_v59, %v6332_v8  ;;  %vm7448_vm3 = vcmp.gt.f32.partialorder %v16181_v19, 0.0 }
 0x67e   : > { %v7523_v44 = vmul.f32 1.442695, %v7479_v28  ;;  %v6972_v21 = vsel %vm2405_vm4, %v6940_v47, %v17440_v10 }
 0x67f   : > { %v6442_v54 = vpop.permute.xlu1 %6441 }
 0x680   : > { %v6806_v32 = vpop.permute.xlu0 %6805  ;;  %10392 = vpow2.f32 %v7523_v44  ;;  %v7003_v60 = vsel %vm2438_vm5, %v6971_v2, %v6442_v54 }
 0x681   : > { %v7097_v24 = vsel %vm2537_vm8, %v7065_v52, %v6806_v32  ;;  %10394 = vpow2.f32 %v7525_v3 }
 0x682   : > { %9678 = vmatprep.mubr.msk.f32.mxu1 %vm2580_vm9, %v7097_v24 }
 0x683   : > { %v16202_v42 = vpop.f32.mrb[60].mxu0  ;;  %v6444_v18 = vpop.permute.xlu1 %6443 }
 0x684   : > { %v16205_v41 = vpop.f32.mrb[61].mxu0  ;;  %v6808_v33 = vpop.permute.xlu0 %6807  ;;  %v7004_v58 = vsel %vm2438_vm5, %v6972_v21, %v6444_v18 }
 0x685   : > { %v7098_v1 = vsel %vm2537_vm8, %v7066_v40, %v6808_v33 }
 0x686   : > { %9679 = vmatmul.mubr.msk.f32.gmra.mrb[92].mxu1 %vm2580_vm9, %v7098_v1 }
 0x687   : > { %v6572_v15 = vpop.permute.xlu1 %6571 }
 0x688   : > { %v6570_v7 = vpop.permute.xlu0 %6569  ;;  %v7036_v45 = vsel %vm2471_vm6, %v7004_v58, %v6572_v15 }
 0x689   : > { %v7035_v31 = vsel %vm2471_vm6, %v7003_v60, %v6570_v7 }
 0x68a   : > { %v10393_v50 = vpop.eup %10392 }
 0x68b   : > { %v6700_v62 = vpop.permute.xlu1 %6699  ;;  %v10395_v56 = vpop.eup %10394  ;;  %v8802_v34 = vadd.f32 -1.0, %v10393_v50 }
 0x68c   : > { %v6698_v25 = vpop.permute.xlu0 %6697  ;;  %v7068_v57 = vsel %vm2504_vm7, %v7036_v45, %v6700_v62  ;;  %v8803_v0 = vadd.f32 -1.0, %v10395_v56 }
 0x68d   : > { %v7067_v8 = vsel %vm2504_vm7, %v7035_v31, %v6698_v25  ;;  %v7607_v44 = vsel %vm7447_vm2, %v7337_v43, %v8802_v34  ;;  %v16248_v31 = vld [vmem:[%s16753_s7 + $0x3] ss:$0 sm:$0xff] }
 0x68e   : > { %v7608_v32 = vsel %vm7448_vm3, %v16181_v19, %v8803_v0 }
 0x68f   : > { %v6812_v28 = vpop.permute.xlu1 %6811 }
 0x690   : > { %v6810_v37 = vpop.permute.xlu0 %6809  ;;  %v7100_v52 = vsel %vm2537_vm8, %v7068_v57, %v6812_v28 }
 0x691   : > { %v7099_v35 = vsel %vm2537_vm8, %v7067_v8, %v6810_v37 }
 0x692   : > { %9681 = vmatprep.mubr.msk.f32.mxu1 %vm2580_vm9, %v7099_v35 }
 0x693   : > { %9682 = vmatmul.mubr.msk.f32.gmra.mrb[94].mxu1 %vm2580_vm9, %v7100_v52 }
 0x694   : > { %9734 = vmatprep.mubr.f32.mxu1 %v7607_v44  ;;  %v9659_v16 = vpop.f32.mrb[78].mxu1 }
 0x695   : > { %v7352_v22 = vadd.f32 %v9659_v16, %v15856_v9  ;;  %v7346_v3 = vpop.f32.mrb[79].mxu1 }
 0x696   : > { %v7347_v24 = vadd.f32 %v15856_v9, %v7346_v3 }
 0x697   : > { %9735 = vmatmul.mubr.f32.vlgmr.msra.gmra.mrb[96].mxu1 %v7608_v32  ;;  %v7482_v54 = vmin.f32 %v7352_v22, 0.0  ;;  %vm7450_vm5 = vcmp.gt.f32.partialorder %v7352_v22, 0.0 }
 0x698   : > { %v7481_v12 = vmin.f32 %v7347_v24, 0.0  ;;  %vm7449_vm4 = vcmp.gt.f32.partialorder %v7347_v24, 0.0 }
 0x699   : > { %v7529_v23 = vmul.f32 1.442695, %v7482_v54 }
 0x69a   : > { %v7527_v40 = vmul.f32 1.442695, %v7481_v12  ;;  %v16235_v33 = vpop.f32.mrb[62].mxu0  ;;  %v10589_v12 = vld [vmem:[#allocation2 + $0x6c] sm:$0xff] }
 0x69b   : > { %10396 = vpow2.f32 %v7529_v23  ;;  %v16237_v43 = vpop.f32.mrb[63].mxu0  ;;  %v7901_v23 = vsel %vm348_vm0, %v10589_v12, 0.0 }
 0x69c   : > { %10398 = vpow2.f32 %v7527_v40  ;;  %v10590_v40 = vld [vmem:[#allocation2 + $0x64] sm:$0xff] }
 0x6a5   : > { %v10397_v30 = vpop.eup %10396 }
 0x6a6   : > { %v10399_v1 = vpop.eup %10398  ;;  %v8805_v19 = vadd.f32 -1.0, %v10397_v30  ;;  %v7900_v30 = vsel %vm348_vm0, %v10590_v40, 0.0 }
 0x6a7   : > { %v8804_v18 = vadd.f32 -1.0, %v10399_v1  ;;  %v7902_v1 = vadd.f32 %v7901_v23, %v7900_v30  ;;  %v10597_v23 = vld [vmem:[#allocation2 + $0xc4] sm:$0xff] }
 0x6a8   : > { %v7610_v7 = vsel %vm7450_vm5, %v7352_v22, %v8805_v19  ;;  %v7971_v22 = vld [vmem:[%s16751_s5] sm:$0xf]  ;;  %v7915_v40 = vsel %vm348_vm0, %v10597_v23, 0.0 }
 0x6a9   : > { %v7609_v20 = vsel %vm7449_vm4, %v7347_v24, %v8804_v18  ;;  %9765 = vmatpush3.msk.msra.mxu1 %vm620_vm1, %v7971_v22  ;;  %v10591_v19 = vld [vmem:[#allocation2 + $0x7c] sm:$0xff]  ;;  %v10596_v22 = vld [vmem:[#allocation2 + $0xb4] sm:$0xff] }
 0x6aa   : > { %9737 = vmatprep.mubr.f32.mxu1 %v7609_v20  ;;  %v7903_v18 = vsel %vm348_vm0, %v10591_v19, 0.0 }
 0x6ab   : > { %9738 = vmatmul.mubr.f32.gmra.mrb[98].mxu1 %v7610_v7 }
 0x6b0   : > { %v9662_v36 = vpop.f32.mrb[80].mxu1 }
 0x6b1   : > { %v7362_v39 = vadd.f32 %v9662_v36, %v15856_v9  ;;  %v7356_v15 = vpop.f32.mrb[81].mxu1 }
 0x6b2   : > { %v7357_v59 = vadd.f32 %v15856_v9, %v7356_v15  ;;  %v7904_v15 = vadd.f32 %v7903_v18, %v7902_v1  ;;  %v10598_v1 = vld [vmem:[#allocation2 + $0xcc] sm:$0xff] }
 0x6b3   : > { %v7484_v27 = vmin.f32 %v7362_v39, 0.0  ;;  %vm7452_vm7 = vcmp.gt.f32.partialorder %v7362_v39, 0.0  ;;  %v7917_v19 = vsel %vm348_vm0, %v10598_v1, 0.0 }
 0x6b4   : > { %v7483_v47 = vmin.f32 %v7357_v59, 0.0  ;;  %vm7451_vm6 = vcmp.gt.f32.partialorder %v7357_v59, 0.0 }
 0x6b5   : > { %v7533_v50 = vmul.f32 1.442695, %v7484_v27  ;;  %v10592_v27 = vld [vmem:[#allocation2 + $0x84] sm:$0xff] }
 0x6b6   : > { %v7531_v25 = vmul.f32 1.442695, %v7483_v47  ;;  %v7905_v47 = vsel %vm348_vm0, %v10592_v27, 0.0  ;;  %v10599_v27 = vld [vmem:[#allocation2 + $0xdc] sm:$0xff] }
 0x6b7   : > { %10400 = vpow2.f32 %v7533_v50 }
 0x6b8   : > { %10402 = vpow2.f32 %v7531_v25 }
 0x6ba   : > { %v16241_v14 = vpop.f32.mrb[32].mxu0 }
 0x6bb   : > { %v16243_v2 = vpop.f32.mrb[33].mxu0 }
 0x6c1   : > { %v10401_v62 = vpop.eup %10400 }
 0x6c2   : > { %v10403_v60 = vpop.eup %10402  ;;  %v8807_v10 = vadd.f32 -1.0, %v10401_v62 }
 0x6c3   : > { %v8806_v21 = vadd.f32 -1.0, %v10403_v60  ;;  %v7906_v60 = vadd.f32 %v7905_v47, %v7904_v15 }
 0x6c4   : > { %v7612_v58 = vsel %vm7452_vm7, %v7362_v39, %v8807_v10  ;;  %v10593_v10 = vld [vmem:[#allocation2 + $0x94] sm:$0xff]  ;;  %vm10791_vm7 = vmmov 0  }
 0x6c5   : > { %v7611_v56 = vsel %vm7451_vm6, %v7357_v59, %v8806_v21  ;;  %v7907_v21 = vsel %vm348_vm0, %v10593_v10, 0.0 }
 0x6c6   : > { %9740 = vmatprep.mubr.f32.mxu1 %v7611_v56 }
 0x6c7   : > { %9741 = vmatmul.mubr.f32.gmra.mrb[100].mxu1 %v7612_v58  ;;  %v7908_v58 = vadd.f32 %v7907_v21, %v7906_v60  ;;  %v10600_v60 = vld [vmem:[#allocation2 + $0xe4] sm:$0xff] }
 0x6c8   : > { %v7921_v10 = vsel %vm348_vm0, %v10600_v60, 0.0 }
 0x6cc   : > { %v9665_v9 = vpop.f32.mrb[82].mxu1 }
 0x6cd   : > { %v7372_v34 = vadd.f32 %v16248_v31, %v9665_v9  ;;  %v7366_v45 = vpop.f32.mrb[83].mxu1 }
 0x6ce   : > { %v7367_v8 = vadd.f32 %v16248_v31, %v7366_v45 }
 0x6cf   : > { %v7486_v37 = vmin.f32 %v7372_v34, 0.0  ;;  %vm7454_vm9 = vcmp.gt.f32.partialorder %v7372_v34, 0.0 }
 0x6d0   : > { %v7485_v57 = vmin.f32 %v7367_v8, 0.0  ;;  %vm7453_vm8 = vcmp.gt.f32.partialorder %v7367_v8, 0.0 }
 0x6d1   : > { %v7537_v35 = vmul.f32 1.442695, %v7486_v37  ;;  %v10595_v37 = vld [vmem:[#allocation2 + $0xac] sm:$0xff] }
 0x6d2   : > { %v7535_v28 = vmul.f32 1.442695, %v7485_v57  ;;  %v7911_v57 = vsel %vm348_vm0, %v10595_v37, 0.0 }
 0x6d3   : > { %10404 = vpow2.f32 %v7537_v35 }
 0x6d4   : > { %10406 = vpow2.f32 %v7535_v28 }
 0x6d6   : > { %v16252_v0 = vpop.f32.mrb[34].mxu0 }
 0x6d7   : > { %v16254_v52 = vpop.f32.mrb[35].mxu0 }
 0x6dd   : > { %v10405_v44 = vpop.eup %10404 }
 0x6de   : > { %v10407_v32 = vpop.eup %10406  ;;  %v8809_v16 = vadd.f32 -1.0, %v10405_v44 }
 0x6df   : > { %v8808_v3 = vadd.f32 -1.0, %v10407_v32 }
 0x6e0   : > { %v7614_v54 = vsel %vm7454_vm9, %v7372_v34, %v8809_v16  ;;  %v10594_v34 = vld [vmem:[#allocation2 + $0x9c] sm:$0xff] }
 0x6e1   : > { %v7613_v24 = vsel %vm7453_vm8, %v7367_v8, %v8808_v3  ;;  %v7909_v45 = vsel %vm348_vm0, %v10594_v34, 0.0  ;;  %v7913_v3 = vsel %vm348_vm0, %v10596_v22, 0.0 }
 0x6e2   : > { %9743 = vmatprep.mubr.f32.mxu1 %v7613_v24  ;;  %v7910_v8 = vadd.f32 %v7909_v45, %v7908_v58  ;;  %v10601_v45 = vld [vmem:[#allocation2 + $0xf4] sm:$0xff] }
 0x6e3   : > { %9744 = vmatmul.mubr.f32.gmra.mrb[102].mxu1 %v7614_v54 }
 0x6e4   : > { %v7912_v32 = vadd.f32 %v7911_v57, %v7910_v8  ;;  %v7923_v8 = vsel %vm348_vm0, %v10601_v45, 0.0  ;;  %v10602_v57 = vld [vmem:[#allocation2 + $0xfc] sm:$0xff] }
 0x6e6   : > { %v7914_v12 = vadd.f32 %v7913_v3, %v7912_v32  ;;  %v10603_v3 = vld [vmem:[#allocation2 + $0x10c] sm:$0xff] }
 0x6e8   : > { %v9668_v20 = vpop.f32.mrb[84].mxu1  ;;  %v7916_v30 = vadd.f32 %v7915_v40, %v7914_v12  ;;  %v10604_v40 = vld [vmem:[#allocation2 + $0x114] sm:$0xff] }
 0x6e9   : > { %v7382_v7 = vadd.f32 %v16248_v31, %v9668_v20  ;;  %v7376_v36 = vpop.f32.mrb[85].mxu1 }
 0x6ea   : > { %v7377_v39 = vadd.f32 %v16248_v31, %v7376_v36 }
 0x6eb   : > { %v7488_v59 = vmin.f32 %v7382_v7, 0.0  ;;  %vm7456_vm10 = vcmp.gt.f32.partialorder %v7382_v7, 0.0 }
 0x6ec   : > { %v7487_v50 = vmin.f32 %v7377_v39, 0.0  ;;  %vm7455_vm1 = vcmp.gt.f32.partialorder %v7377_v39, 0.0 }
 0x6ed   : > { %v7541_v25 = vmul.f32 1.442695, %v7488_v59  ;;  %v7918_v59 = vadd.f32 %v7917_v19, %v7916_v30  ;;  %v7929_v30 = vsel %vm348_vm0, %v10604_v40, 0.0  ;;  %v10605_v19 = vld [vmem:[#allocation2 + $0x124] sm:$0xff] }
 0x6ee   : > { %v7539_v62 = vmul.f32 1.442695, %v7487_v50 }
 0x6ef   : > { %10408 = vpow2.f32 %v7541_v25 }
 0x6f0   : > { %10410 = vpow2.f32 %v7539_v62 }
 0x6f2   : > { %v16267_v56 = vpop.f32.mrb[36].mxu0 }
 0x6f3   : > { %v16269_v9 = vpop.f32.mrb[37].mxu0 }
 0x6f9   : > { %v10409_v35 = vpop.eup %10408 }
 0x6fa   : > { %v10411_v28 = vpop.eup %10410  ;;  %v8811_v44 = vadd.f32 -1.0, %v10409_v35  ;;  %v7925_v35 = vsel %vm348_vm0, %v10602_v57, 0.0  ;;  %v10608_v57 = vld [vmem:[#allocation2 + $0x144] sm:$0xff] }
 0x6fb   : > { %v8810_v16 = vadd.f32 -1.0, %v10411_v28 }
 0x6fc   : > { %v7616_v54 = vsel %vm7456_vm10, %v7382_v7, %v8811_v44  ;;  %v7919_v7 = vsel %vm348_vm0, %v10599_v27, 0.0 }
 0x6fd   : > { %v7615_v24 = vsel %vm7455_vm1, %v7377_v39, %v8810_v16  ;;  %v7920_v62 = vadd.f32 %v7919_v7, %v7918_v59 }
 0x6fe   : > { %9746 = vmatprep.mubr.f32.mxu1 %v7615_v24  ;;  %v7927_v24 = vsel %vm348_vm0, %v10603_v3, 0.0 }
 0x6ff   : > { %9747 = vmatmul.mubr.f32.gmra.mrb[104].mxu1 %v7616_v54  ;;  %v7922_v58 = vadd.f32 %v7921_v10, %v7920_v62  ;;  %v10607_v10 = vld [vmem:[#allocation2 + $0x13c] sm:$0xff] }
 0x701   : > { %v7924_v37 = vadd.f32 %v7923_v8, %v7922_v58  ;;  %v7935_v58 = vsel %vm348_vm0, %v10607_v10, 0.0 }
 0x703   : > { %v7926_v16 = vadd.f32 %v7925_v35, %v7924_v37  ;;  %v7937_v35 = vsel %vm348_vm0, %v10608_v57, 0.0  ;;  %v10614_v57 = vld [vmem:[#allocation2 + $0x18c] sm:$0xff] }
 0x704   : > { %v9671_v18 = vpop.f32.mrb[86].mxu1 }
 0x705   : > { %v7392_v20 = vadd.f32 %v16248_v31, %v9671_v18  ;;  %v7386_v36 = vpop.f32.mrb[87].mxu1  ;;  %v7928_v23 = vadd.f32 %v7927_v24, %v7926_v16  ;;  %v7931_v18 = vsel %vm348_vm0, %v10605_v19, 0.0  ;;  %v10611_v19 = vld [vmem:[#allocation2 + $0x16c] sm:$0xff] }
 0x706   : > { %v7387_v15 = vadd.f32 %v16248_v31, %v7386_v36 }
 0x707   : > { %v7490_v39 = vmin.f32 %v7392_v20, 0.0  ;;  %vm7458_vm12 = vcmp.gt.f32.partialorder %v7392_v20, 0.0  ;;  %v7930_v1 = vadd.f32 %v7929_v30, %v7928_v23 }
 0x708   : > { %v7489_v47 = vmin.f32 %v7387_v15, 0.0  ;;  %vm7457_vm11 = vcmp.gt.f32.partialorder %v7387_v15, 0.0 }
 0x709   : > { %v7545_v50 = vmul.f32 1.442695, %v7490_v39  ;;  %v7932_v7 = vadd.f32 %v7931_v18, %v7930_v1  ;;  %v7943_v18 = vsel %vm348_vm0, %v10611_v19, 0.0  ;;  %v10617_v19 = vld [vmem:[#allocation2 + $0x1b4] sm:$0xff] }
 0x70a   : > { %v7543_v25 = vmul.f32 1.442695, %v7489_v47  ;;  %v10606_v47 = vld [vmem:[#allocation2 + $0x12c] sm:$0xff] }
 0x70b   : > { %10412 = vpow2.f32 %v7545_v50 }
 0x70c   : > { %10414 = vpow2.f32 %v7543_v25 }
 0x70e   : > { %v16280_v21 = vpop.f32.mrb[38].mxu0 }
 0x70f   : > { %v16282_v34 = vpop.f32.mrb[39].mxu0 }
 0x715   : > { %v10413_v28 = vpop.eup %10412 }
 0x716   : > { %v10415_v44 = vpop.eup %10414  ;;  %v8813_v32 = vadd.f32 -1.0, %v10413_v28 }
 0x717   : > { %v8812_v22 = vadd.f32 -1.0, %v10415_v44  ;;  %v10609_v44 = vld [vmem:[#allocation2 + $0x154] sm:$0xff] }
 0x718   : > { %v7618_v12 = vsel %vm7458_vm12, %v7392_v20, %v8813_v32  ;;  %v7933_v20 = vsel %vm348_vm0, %v10606_v47, 0.0  ;;  %v7939_v32 = vsel %vm348_vm0, %v10609_v44, 0.0 }
 0x719   : > { %v7617_v54 = vsel %vm7457_vm11, %v7387_v15, %v8812_v22  ;;  %v7934_v60 = vadd.f32 %v7933_v20, %v7932_v7 }
 0x71a   : > { %9749 = vmatprep.mubr.f32.mxu1 %v7617_v54 }
 0x71b   : > { %9750 = vmatmul.mubr.f32.gmra.mrb[106].mxu1 %v7618_v12  ;;  %v7936_v8 = vadd.f32 %v7935_v58, %v7934_v60  ;;  %v10610_v12 = vld [vmem:[#allocation2 + $0x15c] sm:$0xff] }
 0x71c   : > { %v7941_v23 = vsel %vm348_vm0, %v10610_v12, 0.0 }
 0x71d   : > { %v7938_v28 = vadd.f32 %v7937_v35, %v7936_v8  ;;  %v7949_v35 = vsel %vm348_vm0, %v10614_v57, 0.0 }
 0x71f   : > { %v7940_v24 = vadd.f32 %v7939_v32, %v7938_v28 }
 0x720   : > { %v9674_v36 = vpop.f32.mrb[88].mxu1 }
 0x721   : > { %v7402_v59 = vadd.f32 %v16248_v31, %v9674_v36  ;;  %v7396_v39 = vpop.f32.mrb[89].mxu1  ;;  %v7942_v1 = vadd.f32 %v7941_v23, %v7940_v24  ;;  %v10616_v24 = vld [vmem:[#allocation2 + $0x1a4] sm:$0xff] }
 0x722   : > { %v7397_v27 = vadd.f32 %v16248_v31, %v7396_v39  ;;  %v10612_v39 = vld [vmem:[#allocation2 + $0x174] sm:$0xff] }
 0x723   : > { %v7492_v15 = vmin.f32 %v7402_v59, 0.0  ;;  %vm7460_vm14 = vcmp.gt.f32.partialorder %v7402_v59, 0.0  ;;  %v7944_v36 = vadd.f32 %v7943_v18, %v7942_v1  ;;  %v7945_v7 = vsel %vm348_vm0, %v10612_v39, 0.0 }
 0x724   : > { %v7491_v50 = vmin.f32 %v7397_v27, 0.0  ;;  %vm7459_vm13 = vcmp.gt.f32.partialorder %v7397_v27, 0.0  ;;  %v7955_v18 = vsel %vm348_vm0, %v10617_v19, 0.0 }
 0x725   : > { %v7549_v25 = vmul.f32 1.442695, %v7492_v15 }
 0x726   : > { %v7547_v62 = vmul.f32 1.442695, %v7491_v50 }
 0x727   : > { %10416 = vpow2.f32 %v7549_v25  ;;  %v7946_v25 = vadd.f32 %v7945_v7, %v7944_v36 }
 0x728   : > { %10418 = vpow2.f32 %v7547_v62  ;;  %v10613_v62 = vld [vmem:[#allocation2 + $0x184] sm:$0xff] }
 0x72a   : > { %v16293_v45 = vpop.f32.mrb[40].mxu0 }
 0x72b   : > { %v16295_v37 = vpop.f32.mrb[41].mxu0 }
 0x731   : > { %v10417_v16 = vpop.eup %10416 }
 0x732   : > { %v10419_v22 = vpop.eup %10418  ;;  %v8815_v3 = vadd.f32 -1.0, %v10417_v16  ;;  %v10615_v16 = vld [vmem:[#allocation2 + $0x19c] sm:$0xff] }
 0x733   : > { %v8814_v54 = vadd.f32 -1.0, %v10419_v22  ;;  %v7951_v22 = vsel %vm348_vm0, %v10615_v16, 0.0 }
 0x734   : > { %v7620_v30 = vsel %vm7460_vm14, %v7402_v59, %v8815_v3  ;;  %v7947_v59 = vsel %vm348_vm0, %v10613_v62, 0.0  ;;  %v10619_v62 = vld [vmem:[#allocation2 + $0x1cc] sm:$0xff] }
 0x735   : > { %v7619_v40 = vsel %vm7459_vm13, %v7397_v27, %v8814_v54  ;;  %v7948_v8 = vadd.f32 %v7947_v59, %v7946_v25  ;;  %v7953_v54 = vsel %vm348_vm0, %v10616_v24, 0.0  ;;  %v7959_v59 = vsel %vm348_vm0, %v10619_v62, 0.0 }
 0x736   : > { %9752 = vmatprep.mubr.f32.mxu1 %v7619_v40 }
 0x737   : > { %9753 = vmatmul.mubr.f32.gmra.mrb[108].mxu1 %v7620_v30  ;;  %v7950_v44 = vadd.f32 %v7949_v35, %v7948_v8  ;;  %v10620_v35 = vld [vmem:[#allocation2 + $0x1d4] sm:$0xff] }
 0x739   : > { %v7952_v3 = vadd.f32 %v7951_v22, %v7950_v44 }
 0x73b   : > { %v7954_v30 = vadd.f32 %v7953_v54, %v7952_v3 }
 0x73c   : > { %v9677_v15 = vpop.f32.mrb[90].mxu1 }
 0x73d   : > { %v7412_v47 = vadd.f32 %v16248_v31, %v9677_v15  ;;  %v7406_v20 = vpop.f32.mrb[91].mxu1  ;;  %v7956_v7 = vadd.f32 %v7955_v18, %v7954_v30  ;;  %v10618_v15 = vld [vmem:[#allocation2 + $0x1bc] sm:$0xff] }
 0x73e   : > { %v7407_v50 = vadd.f32 %v16248_v31, %v7406_v20  ;;  %v7957_v20 = vsel %vm348_vm0, %v10618_v15, 0.0 }
 0x73f   : > { %v7494_v27 = vmin.f32 %v7412_v47, 0.0  ;;  %vm7462_vm2 = vcmp.gt.f32.partialorder %v7412_v47, 0.0  ;;  %v7958_v25 = vadd.f32 %v7957_v20, %v7956_v7 }
 0x740   : > { %v7493_v60 = vmin.f32 %v7407_v50, 0.0  ;;  %vm7461_vm15 = vcmp.gt.f32.partialorder %v7407_v50, 0.0 }
 0x741   : > { %v7553_v10 = vmul.f32 1.442695, %v7494_v27 }
 0x742   : > { %v7551_v58 = vmul.f32 1.442695, %v7493_v60 }
 0x743   : > { %10420 = vpow2.f32 %v7553_v10 }
 0x744   : > { %10422 = vpow2.f32 %v7551_v58 }
 0x746   : > { %v16306_v28 = vpop.f32.mrb[42].mxu0 }
 0x747   : > { %v16308_v32 = vpop.f32.mrb[43].mxu0 }
 0x74d   : > { %v10421_v12 = vpop.eup %10420 }
 0x74e   : > { %v10423_v23 = vpop.eup %10422  ;;  %v8817_v40 = vadd.f32 -1.0, %v10421_v12 }
 0x74f   : > { %v8816_v1 = vadd.f32 -1.0, %v10423_v23 }
 0x750   : > { %v7622_v39 = vsel %vm7462_vm2, %v7412_v47, %v8817_v40  ;;  %v7961_v47 = vsel %vm348_vm0, %v10620_v35, 0.0 }
 0x751   : > { %v7621_v36 = vsel %vm7461_vm15, %v7407_v50, %v8816_v1  ;;  %v7960_v50 = vadd.f32 %v7959_v59, %v7958_v25 }
 0x752   : > { %9755 = vmatprep.mubr.f32.mxu1 %v7621_v36 }
 0x753   : > { %9756 = vmatmul.mubr.f32.gmra.mrb[110].mxu1 %v7622_v39  ;;  %v7962_v22 = vadd.f32 %v7961_v47, %v7960_v50 }
 0x755   : > { %v7963_v3 = vrot.slane %v7962_v22, 4 }
 0x757   : > { %v7964_v40 = vadd.f32 %v7963_v3, %v7962_v22 }
 0x759   : > { %v9680_v27 = vpop.f32.mrb[92].mxu1  ;;  %v7965_v59 = vrot.slane %v7964_v40, 2 }
 0x75a   : > { %v7422_v60 = vadd.f32 %v16248_v31, %v9680_v27  ;;  %v7416_v10 = vpop.f32.mrb[93].mxu1 }
 0x75b   : > { %v7417_v58 = vadd.f32 %v16248_v31, %v7416_v10 }
 0x75c   : > { %v7496_v8 = vmin.f32 %v7422_v60, 0.0  ;;  %vm7464_vm4 = vcmp.gt.f32.partialorder %v7422_v60, 0.0 }
 0x75d   : > { %v7495_v57 = vmin.f32 %v7417_v58, 0.0  ;;  %vm7463_vm3 = vcmp.gt.f32.partialorder %v7417_v58, 0.0 }
 0x75e   : > { %v7557_v44 = vmul.f32 1.442695, %v7496_v8  ;;  %v7966_v8 = vadd.f32 %v7965_v59, %v7964_v40 }
 0x75f   : > { %v7555_v16 = vmul.f32 1.442695, %v7495_v57 }
 0x760   : > { %10424 = vpow2.f32 %v7557_v44  ;;  %v7967_v50 = vrot.slane %v7966_v8, 1 }
 0x761   : > { %10426 = vpow2.f32 %v7555_v16 }
 0x762   : > { %v7968_v47 = vadd.f32 %v7967_v50, %v7966_v8  ;;  %v8063_v8 = vld [vmem:[%s16752_s6 + $0x240] sm:$0xff]  ;;  %v8064_v50 = vld [vmem:[%s16752_s6 + $0x248] sm:$0xff] }
 0x764   : > { %v7970_v22 = vmul.f32 0.00390625, %v7968_v47  ;;  %v8067_v47 = vld [vmem:[%s16752_s6 + $0x260] sm:$0xff] }
 0x766   : > { %v9683_v24 = vpop.f32.mrb[94].mxu1 }
 0x767   : > { %v7432_v54 = vadd.f32 %v16248_v31, %v9683_v24  ;;  %v7426_v12 = vpop.f32.mrb[95].mxu1 }
 0x768   : > { %v7427_v23 = vadd.f32 %v16248_v31, %v7426_v12 }
 0x769   : > { %v7498_v30 = vmin.f32 %v7432_v54, 0.0  ;;  %vm7466_vm6 = vcmp.gt.f32.partialorder %v7432_v54, 0.0 }
 0x76a   : > { %v10425_v1 = vpop.eup %10424  ;;  %v7497_v19 = vmin.f32 %v7427_v23, 0.0  ;;  %v9736_v18 = vpop.f32.mrb[96].mxu1  ;;  %vm7465_vm5 = vcmp.gt.f32.partialorder %v7427_v23, 0.0 }
 0x76b   : > { %v10427_v36 = vpop.eup %10426  ;;  %v7561_v39 = vmul.f32 1.442695, %v7498_v30  ;;  %v16321_v7 = vadd.f32 %v9736_v18, %v15741_v55  ;;  %v7769_v15 = vpop.f32.mrb[97].mxu1  ;;  %v8819_v20 = vadd.f32 -1.0, %v10425_v1 }
 0x76c   : > { %v7559_v25 = vmul.f32 1.442695, %v7497_v19  ;;  %v16324_v27 = vadd.f32 %v7769_v15, %v15746_v29  ;;  %v8818_v62 = vadd.f32 -1.0, %v10427_v36  ;;  %v8059_v36 = vld [vmem:[%s16752_s6 + $0x220] sm:$0xff] }
 0x76d   : > { %10428 = vpow2.f32 %v7561_v39  ;;  %v7624_v10 = vsel %vm7464_vm4, %v7422_v60, %v8819_v20  ;;  %v8060_v39 = vld [vmem:[%s16752_s6 + $0x228] sm:$0xff] }
 0x76e   : > { %10430 = vpow2.f32 %v7559_v25  ;;  %v7623_v31 = vsel %vm7463_vm3, %v7417_v58, %v8818_v62  ;;  %v9963_v15 = vpack.c.bf16 %v8060_v39, %v8059_v36 }
 0x76f   : > { %9758 = vmatprep.mubr.f32.mxu1 %v7623_v31  ;;  %v8061_v31 = vld [vmem:[%s16752_s6 + $0x230] sm:$0xff] }
 0x770   : > { %9759 = vmatmul.mubr.f32.gmra.mrb[112].mxu1 %v7624_v10  ;;  %v8062_v10 = vld [vmem:[%s16752_s6 + $0x238] sm:$0xff] }
 0x777   : > { %v10429_v55 = vpop.eup %10428 }
 0x778   : > { %v10431_v57 = vpop.eup %10430  ;;  %v8821_v35 = vadd.f32 -1.0, %v10429_v55  ;;  %v8065_v55 = vld [vmem:[%s16752_s6 + $0x250] sm:$0xff] }
 0x779   : > { %v8820_v44 = vadd.f32 -1.0, %v10431_v57  ;;  %v8066_v57 = vld [vmem:[%s16752_s6 + $0x258] sm:$0xff] }
 0x77a   : > { %v7626_v16 = vsel %vm7466_vm6, %v7432_v54, %v8821_v35  ;;  %v9972_v35 = vpack.c.bf16 %v8066_v57, %v8065_v55 }
 0x77b   : > { %v7625_v29 = vsel %vm7465_vm5, %v7427_v23, %v8820_v44  ;;  %v8068_v44 = vld [vmem:[%s16752_s6 + $0x268] sm:$0xff] }
 0x77c   : > { %9761 = vmatprep.mubr.f32.mxu1 %v7625_v29  ;;  %v9975_v29 = vpack.c.bf16 %v8068_v44, %v8067_v47 }
 0x77d   : > { %9762 = vmatmul.mubr.f32.gmra.mrb[114].mxu1 %v7626_v16  ;;  %v8069_v16 = vld [vmem:[%s16752_s6 + $0x270] sm:$0xff] }
 0x77e   : > { %9766 = vmatprep.mubr.msk.f32.mxu1 %vm10791_vm7, %v17429_v46  ;;  %v9739_v58 = vpop.f32.mrb[98].mxu1 }
 0x77f   : > { %v16328_v60 = vadd.f32 %v9739_v58, %v15821_v13  ;;  %v7779_v3 = vpop.f32.mrb[99].mxu1 }
 0x780   : > { %v16332_v24 = vadd.f32 %v7779_v3, %v15824_v48  ;;  %v8056_v48 = vld [vmem:[%s16752_s6 + $0x208] sm:$0xff] }
 0x781   : > { %9767 = vmatmul.mubr.msk.f32.vlgmr.msra.gmra.mrb[116].mxu1 %vm348_vm0, %v7970_v22  ;;  %v8070_v22 = vld [vmem:[%s16752_s6 + $0x278] sm:$0xff] }
 0x782   : > { %9801 = vmatprep.mubr.msk.f32.mxu1 %vm10791_vm7, %v17429_v46  ;;  %v8055_v46 = vld [vmem:[%s16752_s6 + $0x200] sm:$0xff]  ;;  %v9978_v58 = vpack.c.bf16 %v8070_v22, %v8069_v16 }
 0x79a   : > { %v9742_v12 = vpop.f32.mrb[100].mxu1 }
 0x79b   : > { %v16336_v54 = vadd.f32 %v9742_v12, %v15894_v49  ;;  %v7789_v23 = vpop.f32.mrb[101].mxu1  ;;  %v8057_v49 = vld [vmem:[%s16752_s6 + $0x210] sm:$0xff] }
 0x79c   : > { %v16339_v40 = vadd.f32 %v7789_v23, %v15899_v17  ;;  %v10792_v17 = vmov 0.0|0.0  }
 0x79d   : > { %9956 = vmatprep.subr.bf16.mxu1 %v10792_v17 }
 0x7b6   : > { %v9745_v30 = vpop.f32.mrb[102].mxu1 }
 0x7b7   : > { %v16342_v13 = vadd.f32 %v9745_v30, %v15963_v5  ;;  %v7799_v1 = vpop.f32.mrb[103].mxu1  ;;  %v9957_v5 = vpack.c.bf16 %v8056_v48, %v8055_v46 }
 0x7b8   : > { %v16345_v19 = vadd.f32 %v7799_v1, %v15968_v61  ;;  %v8058_v61 = vld [vmem:[%s16752_s6 + $0x218] sm:$0xff] }
 0x7b9   : > { %9958 = vmatpush3.bf16.msra.mxu1 %v9957_v5  ;;  %v9960_v18 = vpack.c.bf16 %v8058_v61, %v8057_v49 }
 0x7ba   : > { %9959 = vmatprep.subr.bf16.mxu1 %v10792_v17 }
 0x7bd   : > { %9961 = vmatpush3.bf16.msra.mxu1 %v9960_v18 }
 0x7be   : > { %9962 = vmatprep.subr.bf16.mxu1 %v10792_v17 }
 0x7c1   : > { %9964 = vmatpush3.bf16.msra.mxu1 %v9963_v15 }
 0x7c2   : > { %9965 = vmatprep.subr.bf16.mxu1 %v10792_v17 }
 0x7d2   : > { %v9748_v20 = vpop.f32.mrb[104].mxu1 }
 0x7d3   : > { %v16366_v25 = vadd.f32 %v9748_v20, %v16035_v4  ;;  %v7809_v62 = vpop.f32.mrb[105].mxu1  ;;  %v9966_v4 = vpack.c.bf16 %v8062_v10, %v8061_v31 }
 0x7d4   : > { %v16369_v59 = vadd.f32 %v7809_v62, %v16038_v38  ;;  %v9969_v38 = vpack.c.bf16 %v8064_v50, %v8063_v8  ;;  %v8141_v50 = vlaneseq }
 0x7d5   : > { %9967 = vmatpush3.bf16.msra.mxu1 %v9966_v4 }
 0x7d6   : > { %9968 = vmatprep.subr.bf16.mxu1 %v10792_v17 }
 0x7d9   : > { %9970 = vmatpush3.bf16.msra.mxu1 %v9969_v38 }
 0x7da   : > { %9971 = vmatprep.subr.bf16.mxu1 %v10792_v17 }
 0x7dd   : > { %9973 = vmatpush3.bf16.msra.mxu1 %v9972_v35 }
 0x7de   : > { %9974 = vmatprep.subr.bf16.mxu1 %v10792_v17 }
 0x7e1   : > { %9976 = vmatpush3.bf16.msra.mxu1 %v9975_v29 }
 0x7e2   : > { %9977 = vmatprep.subr.bf16.mxu1 %v10792_v17 }
 0x7e5   : > { %9979 = vmatpush3.bf16.msra.mxu1 %v9978_v58 }
 0x7ee   : > { %v9751_v3 = vpop.f32.mrb[106].mxu1 }
 0x7ef   : > { %v10006_v12 = vadd.f32 %v9751_v3, %v16086_v26  ;;  %v7819_v23 = vpop.f32.mrb[107].mxu1 }
 0x7f0   : > { %v10007_v30 = vadd.f32 %v7819_v23, %v16089_v11 }
 0x80a   : > { %v9754_v1 = vpop.f32.mrb[108].mxu1 }
 0x80b   : > { %v10008_v46 = vadd.f32 %v9754_v1, %v16128_v53  ;;  %v7829_v48 = vpop.f32.mrb[109].mxu1 }
 0x80c   : > { %v10009_v49 = vadd.f32 %v7829_v48, %v16131_v6  ;;  %v7972_v6 = vld [vmem:[%s16753_s7 + $0x4] sm:$0x1] }
 0x826   : > { %v9757_v5 = vpop.f32.mrb[110].mxu1 }
 0x827   : > { %v10010_v61 = vadd.f32 %v9757_v5, %v16168_v63  ;;  %v7839_v18 = vpop.f32.mrb[111].mxu1 }
 0x828   : > { %v10011_v36 = vadd.f32 %v7839_v18, %v16171_v51 }
 0x843   : > { %v9760_v17 = vpop.f32.mrb[112].mxu1 }
 0x844   : > { %v10012_v39 = vadd.f32 %v9760_v17, %v16202_v42  ;;  %v7849_v15 = vpop.f32.mrb[113].mxu1 }
 0x845   : > { %v10013_v26 = vadd.f32 %v7849_v15, %v16205_v41 }
 0x850   : > { %v9763_v20 = vpop.f32.mrb[114].mxu1 }
 0x851   : > { %v10014_v11 = vadd.f32 %v9763_v20, %v16235_v33  ;;  %v7859_v62 = vpop.f32.mrb[115].mxu1  ;;  %v8142_v33 = vshrl.u32 %v8141_v50, 7 }
 0x852   : > { %v10015_v53 = vadd.f32 %v7859_v62, %v16237_v43 }
 0x853   : > { %v8143_v38 = vsub.s32 0, %v8142_v33 }
 0x854   : > { %v8045_v63 = vpop.f32.mrb[116].mxu1 }
 0x855   : > { %v8046_v31 = vadd.f32 %v8045_v63, %v7972_v6  ;;  %v9768_v10 = vpop.f32.mrb[117].mxu1 }
 0x857   : > { %v8050_v51 = vmin.f32 %v8046_v31, 0.0  ;;  %vm8049_vm0 = vcmp.gt.f32.partialorder %v8046_v31, 0.0 }
 0x859   : > { %v8051_v8 = vmul.f32 1.442695, %v8050_v51 }
 0x85b   : > { %10432 = vpow2.f32 %v8051_v8 }
 0x865   : > { %v10433_v42 = vpop.eup %10432 }
 0x866   : > { %v8824_v4 = vadd.f32 -1.0, %v10433_v42 }
 0x868   : > { %v8054_v41 = vsel %vm8049_vm0, %v8046_v31, %v8824_v4 }
 0x869   : > { %9802 = vmatmul.mubr.f32.vlgmr.msra.gmra.mrb[118].mxu1 %v8054_v41 }
 0x93c   : > { %v8137_v55 = vpop.f32.mrb[118].mxu1 }
 0x93d   : > { %v8144_v43 = vrot.slane %v8137_v55, %v8143_v38  ;;  %v9803_v57 = vpop.f32.mrb[119].mxu1 }
 0x93f   : > { %v8145_v35 = vadd.f32 %v8144_v43, %v16243_v2  ;;  %v8146_v47 = vadd.f32 %v16241_v14, %v8144_v43  ;;  %v8147_v44 = vadd.f32 %v8144_v43, %v16254_v52  ;;  %v8148_v29 = vadd.f32 %v16252_v0, %v8144_v43 }
 0x940   : > { %v8149_v16 = vadd.f32 %v8144_v43, %v16269_v9  ;;  %v8150_v22 = vadd.f32 %v16267_v56, %v8144_v43  ;;  %v8151_v58 = vadd.f32 %v8144_v43, %v16282_v34  ;;  %v8152_v3 = vadd.f32 %v16280_v21, %v8144_v43 }
 0x941   : > { %v8153_v23 = vadd.f32 %v8144_v43, %v16295_v37  ;;  %v8154_v1 = vadd.f32 %v16293_v45, %v8144_v43  ;;  %v8155_v2 = vadd.f32 %v8144_v43, %v16308_v32  ;;  %v8156_v14 = vadd.f32 %v16306_v28, %v8144_v43 }
 0x942   : > { %v8157_v52 = vadd.f32 %v16324_v27, %v8144_v43  ;;  %v8158_v0 = vadd.f32 %v16321_v7, %v8144_v43  ;;  %v8159_v9 = vadd.f32 %v16332_v24, %v8144_v43  ;;  %v8160_v56 = vadd.f32 %v16328_v60, %v8144_v43 }
 0x943   : > { %v8161_v34 = vadd.f32 %v16339_v40, %v8144_v43  ;;  %v8162_v21 = vadd.f32 %v16336_v54, %v8144_v43  ;;  %v8163_v37 = vadd.f32 %v16345_v19, %v8144_v43  ;;  %v8164_v45 = vadd.f32 %v16342_v13, %v8144_v43  ;;  %v8825_v54 = vld [vmem:[%s16753_s7 + $0x5] ss:$0 sm:$0xff] }
 0x944   : > { %v8165_v32 = vadd.f32 %v16369_v59, %v8144_v43  ;;  %v8166_v28 = vadd.f32 %v16366_v25, %v8144_v43  ;;  %v8167_v48 = vadd.f32 %v10007_v30, %v8144_v43  ;;  %v8168_v27 = vadd.f32 %v10006_v12, %v8144_v43 }
 0x945   : > { %v8169_v5 = vadd.f32 %v10009_v49, %v8144_v43  ;;  %v8170_v7 = vadd.f32 %v10008_v46, %v8144_v43  ;;  %v8171_v18 = vadd.f32 %v10011_v36, %v8144_v43  ;;  %v8172_v24 = vadd.f32 %v10010_v61, %v8144_v43 }
 0x946   : > { %v8173_v17 = vadd.f32 %v10013_v26, %v8144_v43  ;;  %v8174_v60 = vadd.f32 %v10012_v39, %v8144_v43  ;;  %v8175_v15 = vadd.f32 %v10015_v53, %v8144_v43  ;;  %v8176_v40 = vadd.f32 %v10014_v11, %v8144_v43 }
 0x947   : > { %v16439_v19 = vadd.f32 %v8825_v54, %v8145_v35  ;;  %v16441_v13 = vadd.f32 %v8825_v54, %v8146_v47  ;;  %v16443_v59 = vadd.f32 %v8825_v54, %v8147_v44  ;;  %v16445_v25 = vadd.f32 %v8825_v54, %v8148_v29 }
 0x948   : > { %v16447_v12 = vadd.f32 %v8825_v54, %v8149_v16  ;;  %v16449_v30 = vadd.f32 %v8825_v54, %v8150_v22  ;;  %v16451_v46 = vadd.f32 %v8825_v54, %v8151_v58  ;;  %v16453_v49 = vadd.f32 %v8825_v54, %v8152_v3 }
 0x949   : > { %v16455_v61 = vadd.f32 %v8825_v54, %v8153_v23  ;;  %v16457_v36 = vadd.f32 %v8825_v54, %v8154_v1  ;;  %v16459_v39 = vadd.f32 %v8825_v54, %v8155_v2  ;;  %v16461_v26 = vadd.f32 %v8825_v54, %v8156_v14 }
 0x94a   : > { %v16463_v20 = vadd.f32 %v8825_v54, %v8157_v52  ;;  %v16465_v11 = vadd.f32 %v8825_v54, %v8158_v0  ;;  %v16467_v62 = vadd.f32 %v8825_v54, %v8159_v9  ;;  %v16469_v53 = vadd.f32 %v8825_v54, %v8160_v56 }
 0x94b   : > { %v16471_v6 = vadd.f32 %v8825_v54, %v8161_v34  ;;  %v16473_v63 = vadd.f32 %v8825_v54, %v8162_v21  ;;  %v16475_v31 = vadd.f32 %v8825_v54, %v8163_v37  ;;  %v16477_v10 = vadd.f32 %v8825_v54, %v8164_v45 }
 0x94c   : > { %v16479_v51 = vadd.f32 %v8825_v54, %v8165_v32  ;;  %v8246_v8 = vmin.f32 %v16439_v19, 0.0  ;;  %v8247_v42 = vmin.f32 %v16441_v13, 0.0  ;;  %v8248_v4 = vmin.f32 %v16443_v59, 0.0 }
 0x94d   : > { %v16484_v41 = vadd.f32 %v8825_v54, %v8166_v28  ;;  %v16486_v50 = vadd.f32 %v8825_v54, %v8167_v48  ;;  %v16488_v33 = vadd.f32 %v8825_v54, %v8168_v27  ;;  %v8249_v38 = vmin.f32 %v16445_v25, 0.0 }
 0x94e   : > { %v16491_v55 = vadd.f32 %v8825_v54, %v8169_v5  ;;  %v16493_v43 = vadd.f32 %v8825_v54, %v8170_v7  ;;  %v16495_v57 = vadd.f32 %v8825_v54, %v8171_v18  ;;  %v8250_v35 = vmin.f32 %v16447_v12, 0.0 }
 0x94f   : > { %v16498_v47 = vadd.f32 %v8825_v54, %v8172_v24  ;;  %v16500_v44 = vadd.f32 %v8825_v54, %v8173_v17  ;;  %v8251_v29 = vmin.f32 %v16449_v30, 0.0  ;;  %v8252_v16 = vmin.f32 %v16451_v46, 0.0 }
 0x950   : > { %v16504_v22 = vadd.f32 %v8825_v54, %v8174_v60  ;;  %v8278_v58 = vmul.f32 1.442695, %v8246_v8  ;;  %v8280_v3 = vmul.f32 1.442695, %v8247_v42  ;;  %v8282_v23 = vmul.f32 1.442695, %v8248_v4 }
 0x951   : > { %v16506_v1 = vadd.f32 %v8825_v54, %v8175_v15  ;;  %v16508_v2 = vadd.f32 %v8825_v54, %v8176_v40  ;;  %v8253_v14 = vmin.f32 %v16453_v49, 0.0  ;;  %v8284_v52 = vmul.f32 1.442695, %v8249_v38 }
 0x952   : > { %v8254_v0 = vmin.f32 %v16455_v61, 0.0  ;;  %v8255_v9 = vmin.f32 %v16457_v36, 0.0  ;;  %10434 = vpow2.f32 %v8278_v58  ;;  %v8286_v56 = vmul.f32 1.442695, %v8250_v35 }
 0x953   : > { %v8256_v34 = vmin.f32 %v16459_v39, 0.0  ;;  %v8257_v21 = vmin.f32 %v16461_v26, 0.0  ;;  %10436 = vpow2.f32 %v8280_v3  ;;  %v8288_v37 = vmul.f32 1.442695, %v8251_v29 }
 0x954   : > { %v8258_v45 = vmin.f32 %v16463_v20, 0.0  ;;  %v8259_v32 = vmin.f32 %v16465_v11, 0.0  ;;  %10438 = vpow2.f32 %v8282_v23  ;;  %v8290_v28 = vmul.f32 1.442695, %v8252_v16 }
 0x955   : > { %v8260_v48 = vmin.f32 %v16467_v62, 0.0  ;;  %v8261_v27 = vmin.f32 %v16469_v53, 0.0  ;;  %10440 = vpow2.f32 %v8284_v52  ;;  %v8292_v5 = vmul.f32 1.442695, %v8253_v14 }
 0x956   : > { %vm8214_vm8 = vcmp.gt.f32.partialorder %v16439_v19, 0.0  ;;  %v8262_v7 = vmin.f32 %v16471_v6, 0.0  ;;  %v8263_v18 = vmin.f32 %v16473_v63, 0.0  ;;  %10442 = vpow2.f32 %v8286_v56 }
 0x957   : > { %v8294_v24 = vmul.f32 1.442695, %v8254_v0  ;;  %vm8215_vm9 = vcmp.gt.f32.partialorder %v16441_v13, 0.0  ;;  %v8264_v17 = vmin.f32 %v16475_v31, 0.0  ;;  %v8265_v60 = vmin.f32 %v16477_v10, 0.0 }
 0x958   : > { %10444 = vpow2.f32 %v8288_v37  ;;  %v8296_v15 = vmul.f32 1.442695, %v8255_v9  ;;  %vm8216_vm1 = vcmp.gt.f32.partialorder %v16443_v59, 0.0  ;;  %v8266_v40 = vmin.f32 %v16479_v51, 0.0 }
 0x959   : > { %v8267_v54 = vmin.f32 %v16484_v41, 0.0  ;;  %10446 = vpow2.f32 %v8290_v28  ;;  %v8298_v8 = vmul.f32 1.442695, %v8256_v34  ;;  %vm8217_vm10 = vcmp.gt.f32.partialorder %v16445_v25, 0.0 }
 0x95a   : > { %v8268_v42 = vmin.f32 %v16486_v50, 0.0  ;;  %v8269_v4 = vmin.f32 %v16488_v33, 0.0  ;;  %10448 = vpow2.f32 %v8292_v5  ;;  %v8300_v38 = vmul.f32 1.442695, %v8257_v21 }
 0x95b   : > { %vm8218_vm11 = vcmp.gt.f32.partialorder %v16447_v12, 0.0  ;;  %v8270_v35 = vmin.f32 %v16491_v55, 0.0  ;;  %v8271_v29 = vmin.f32 %v16493_v43, 0.0  ;;  %10450 = vpow2.f32 %v8294_v24 }
 0x95c   : > { %v8302_v16 = vmul.f32 1.442695, %v8258_v45  ;;  %vm8219_vm12 = vcmp.gt.f32.partialorder %v16449_v30, 0.0  ;;  %v8272_v58 = vmin.f32 %v16495_v57, 0.0  ;;  %v8273_v3 = vmin.f32 %v16498_v47, 0.0  ;;  %v10435_v14 = vpop.eup %10434 }
 0x95d   : > { %10452 = vpow2.f32 %v8296_v15  ;;  %v8304_v23 = vmul.f32 1.442695, %v8259_v32  ;;  %vm8220_vm13 = vcmp.gt.f32.partialorder %v16451_v46, 0.0  ;;  %v8274_v52 = vmin.f32 %v16500_v44, 0.0  ;;  %v10437_v56 = vpop.eup %10436 }
 0x95e   : > { %v8275_v0 = vmin.f32 %v16504_v22, 0.0  ;;  %10454 = vpow2.f32 %v8298_v8  ;;  %v8306_v9 = vmul.f32 1.442695, %v8260_v48  ;;  %vm8221_vm14 = vcmp.gt.f32.partialorder %v16453_v49, 0.0  ;;  %v10439_v45 = vpop.eup %10438 }
 0x95f   : > { %v8276_v34 = vmin.f32 %v16506_v1, 0.0  ;;  %10456 = vpow2.f32 %v8300_v38  ;;  %v8308_v21 = vmul.f32 1.442695, %v8261_v27  ;;  %v8826_v37 = vadd.f32 -1.0, %v10435_v14  ;;  %v10441_v24 = vpop.eup %10440 }
 0x960   : > { %vm8222_vm15 = vcmp.gt.f32.partialorder %v16455_v61, 0.0  ;;  %v8277_v32 = vmin.f32 %v16508_v2, 0.0  ;;  %10458 = vpow2.f32 %v8302_v16  ;;  %v8310_v28 = vmul.f32 1.442695, %v8262_v7  ;;  %v10443_v8 = vpop.eup %10442 }
 0x961   : > { %v8827_v5 = vadd.f32 -1.0, %v10437_v56  ;;  %vm8223_vm2 = vcmp.gt.f32.partialorder %v16457_v36, 0.0  ;;  %10460 = vpow2.f32 %v8304_v23  ;;  %v8312_v48 = vmul.f32 1.442695, %v8263_v18 }
 0x962   : > { %v8828_v15 = vadd.f32 -1.0, %v10439_v45  ;;  %v8374_v27 = vsel %vm8214_vm8, %v16439_v19, %v8826_v37  ;;  %vm8224_vm3 = vcmp.gt.f32.partialorder %v16459_v39, 0.0  ;;  %10462 = vpow2.f32 %v8306_v9  ;;  %v10445_v18 = vpop.eup %10444 }
 0x963   : > { %v8314_v38 = vmul.f32 1.442695, %v8264_v17  ;;  %v8829_v14 = vadd.f32 -1.0, %v10441_v24  ;;  %v8375_v7 = vsel %vm8215_vm9, %v16441_v13, %v8827_v5  ;;  %8406 = vst [vmem:[%s16558_s26] sm:$0xff] %v8374_v27  ;;  %vm8225_vm4 = vcmp.gt.f32.partialorder %v16461_v26, 0.0  ;;  %v10447_v23 = vpop.eup %10446 }
 0x964   : > { %10464 = vpow2.f32 %v8308_v21  ;;  %v8316_v19 = vmul.f32 1.442695, %v8265_v60  ;;  %v8830_v16 = vadd.f32 -1.0, %v10443_v8  ;;  %v8376_v17 = vsel %vm8216_vm1, %v16443_v59, %v8828_v15  ;;  %8407 = vst [vmem:[%s16558_s26 + $0x8] sm:$0xff] %v8375_v7  ;;  %v10449_v60 = vpop.eup %10448 }
 0x965   : > { %vm8226_vm5 = vcmp.gt.f32.partialorder %v16463_v20, 0.0  ;;  %10466 = vpow2.f32 %v8310_v28  ;;  %v8318_v13 = vmul.f32 1.442695, %v8266_v40  ;;  %v8831_v9 = vadd.f32 -1.0, %v10445_v18  ;;  %8408 = vst [vmem:[%s16558_s26 + $0x10] sm:$0xff] %v8376_v17  ;;  %v10451_v37 = vpop.eup %10450 }
 0x966   : > { %v8377_v56 = vsel %vm8217_vm10, %v16445_v25, %v8829_v14  ;;  %vm8227_vm6 = vcmp.gt.f32.partialorder %v16465_v11, 0.0  ;;  %10468 = vpow2.f32 %v8312_v48  ;;  %v8320_v59 = vmul.f32 1.442695, %v8267_v54 }
 0x967   : > { %v8832_v21 = vadd.f32 -1.0, %v10447_v23  ;;  %v8378_v40 = vsel %vm8218_vm11, %v16447_v12, %v8830_v16  ;;  %8409 = vst [vmem:[%s16558_s26 + $0x18] sm:$0xff] %v8377_v56  ;;  %vm8228_vm7 = vcmp.gt.f32.partialorder %v16467_v62, 0.0  ;;  %10470 = vpow2.f32 %v8314_v38  ;;  %v10453_v28 = vpop.eup %10452 }
 0x968   : > { %v8322_v25 = vmul.f32 1.442695, %v8268_v42  ;;  %v8833_v45 = vadd.f32 -1.0, %v10449_v60  ;;  %v8379_v54 = vsel %vm8219_vm12, %v16449_v30, %v8831_v9  ;;  %8410 = vst [vmem:[%s16558_s26 + $0x20] sm:$0xff] %v8378_v40  ;;  %vm8229_vm0 = vcmp.gt.f32.partialorder %v16469_v53, 0.0  ;;  %v10455_v24 = vpop.eup %10454 }
 0x969   : > { %10472 = vpow2.f32 %v8316_v19  ;;  %v8324_v12 = vmul.f32 1.442695, %v8269_v4  ;;  %v8834_v5 = vadd.f32 -1.0, %v10451_v37  ;;  %v8380_v42 = vsel %vm8220_vm13, %v16451_v46, %v8832_v21  ;;  %8411 = vst [vmem:[%s16558_s26 + $0x28] sm:$0xff] %v8379_v54  ;;  %v10457_v27 = vpop.eup %10456 }
 0x96a   : > { %10474 = vpow2.f32 %v8318_v13  ;;  %v8326_v30 = vmul.f32 1.442695, %v8270_v35  ;;  %v8835_v48 = vadd.f32 -1.0, %v10453_v28  ;;  %v8381_v15 = vsel %vm8221_vm14, %v16453_v49, %v8833_v45  ;;  %8412 = vst [vmem:[%s16558_s26 + $0x30] sm:$0xff] %v8380_v42  ;;  %v10459_v38 = vpop.eup %10458 }
 0x96b   : > { %10476 = vpow2.f32 %v8320_v59  ;;  %v8328_v4 = vmul.f32 1.442695, %v8271_v29  ;;  %v8836_v46 = vadd.f32 -1.0, %v10455_v24  ;;  %v8382_v8 = vsel %vm8222_vm15, %v16455_v61, %v8834_v5  ;;  %8413 = vst [vmem:[%s16558_s26 + $0x38] sm:$0xff] %v8381_v15  ;;  %v10461_v7 = vpop.eup %10460 }
 0x96c   : > { %10478 = vpow2.f32 %v8322_v25  ;;  %v8330_v35 = vmul.f32 1.442695, %v8272_v58  ;;  %v8837_v49 = vadd.f32 -1.0, %v10457_v27  ;;  %v8383_v14 = vsel %vm8223_vm2, %v16457_v36, %v8835_v48  ;;  %8414 = vst [vmem:[%s16558_s26 + $0x40] sm:$0xff] %v8382_v8  ;;  %v10463_v19 = vpop.eup %10462 }
 0x96d   : > { %10480 = vpow2.f32 %v8324_v12  ;;  %v8332_v29 = vmul.f32 1.442695, %v8273_v3  ;;  %v8838_v61 = vadd.f32 -1.0, %v10459_v38  ;;  %v8384_v18 = vsel %vm8224_vm3, %v16459_v39, %v8836_v46  ;;  %8415 = vst [vmem:[%s16558_s26 + $0x48] sm:$0xff] %v8383_v14 }
 0x96e   : > { %10482 = vpow2.f32 %v8326_v30  ;;  %v8334_v58 = vmul.f32 1.442695, %v8274_v52  ;;  %v8839_v36 = vadd.f32 -1.0, %v10461_v7  ;;  %v8385_v16 = vsel %vm8225_vm4, %v16461_v26, %v8837_v49  ;;  %8416 = vst [vmem:[%s16558_s26 + $0x50] sm:$0xff] %v8384_v18  ;;  %v10465_v17 = vpop.eup %10464 }
 0x96f   : > { %10484 = vpow2.f32 %v8328_v4  ;;  %v8336_v3 = vmul.f32 1.442695, %v8275_v0  ;;  %v8840_v39 = vadd.f32 -1.0, %v10463_v19  ;;  %v8386_v23 = vsel %vm8226_vm5, %v16463_v20, %v8838_v61  ;;  %8417 = vst [vmem:[%s16558_s26 + $0x58] sm:$0xff] %v8385_v16  ;;  %v10467_v13 = vpop.eup %10466 }
 0x970   : > { %10486 = vpow2.f32 %v8330_v35  ;;  %v8338_v52 = vmul.f32 1.442695, %v8276_v34  ;;  %v8841_v26 = vadd.f32 -1.0, %v10465_v17  ;;  %v8387_v9 = vsel %vm8227_vm6, %v16465_v11, %v8839_v36  ;;  %8418 = vst [vmem:[%s16558_s26 + $0x60] sm:$0xff] %v8386_v23  ;;  %v10469_v56 = vpop.eup %10468 }
 0x971   : > { %10488 = vpow2.f32 %v8332_v29  ;;  %v8340_v0 = vmul.f32 1.442695, %v8277_v32  ;;  %v8842_v20 = vadd.f32 -1.0, %v10467_v13  ;;  %v8388_v60 = vsel %vm8228_vm7, %v16467_v62, %v8840_v39  ;;  %8419 = vst [vmem:[%s16558_s26 + $0x68] sm:$0xff] %v8387_v9  ;;  %v10471_v59 = vpop.eup %10470 }
 0x972   : > { %vm8230_vm8 = vcmp.gt.f32.partialorder %v16471_v6, 0.0  ;;  %10490 = vpow2.f32 %v8334_v58  ;;  %v8843_v34 = vadd.f32 -1.0, %v10469_v56  ;;  %v8389_v11 = vsel %vm8229_vm0, %v16469_v53, %v8841_v26  ;;  %8420 = vst [vmem:[%s16558_s26 + $0x70] sm:$0xff] %v8388_v60 }
 0x973   : > { %v10473_v21 = vpop.eup %10472  ;;  %vm8231_vm9 = vcmp.gt.f32.partialorder %v16473_v63, 0.0  ;;  %10492 = vpow2.f32 %v8336_v3  ;;  %v8844_v32 = vadd.f32 -1.0, %v10471_v59  ;;  %v8390_v62 = vsel %vm8230_vm8, %v16471_v6, %v8842_v20  ;;  %8421 = vst [vmem:[%s16558_s26 + $0x78] sm:$0xff] %v8389_v11 }
 0x974   : > { %v10475_v40 = vpop.eup %10474  ;;  %vm8232_vm1 = vcmp.gt.f32.partialorder %v16475_v31, 0.0  ;;  %10494 = vpow2.f32 %v8338_v52  ;;  %v8845_v37 = vadd.f32 -1.0, %v10473_v21  ;;  %v8391_v25 = vsel %vm8231_vm9, %v16473_v63, %v8843_v34  ;;  %8422 = vst [vmem:[%s16558_s26 + $0x80] sm:$0xff] %v8390_v62 }
 0x975   : > { %v10477_v53 = vpop.eup %10476  ;;  %vm8233_vm10 = vcmp.gt.f32.partialorder %v16477_v10, 0.0  ;;  %10496 = vpow2.f32 %v8340_v0  ;;  %v8846_v45 = vadd.f32 -1.0, %v10475_v40  ;;  %v8392_v54 = vsel %vm8232_vm1, %v16475_v31, %v8844_v32  ;;  %8423 = vst [vmem:[%s16558_s26 + $0x88] sm:$0xff] %v8391_v25 }
 0x976   : > { %v10479_v6 = vpop.eup %10478  ;;  %vm8234_vm11 = vcmp.gt.f32.partialorder %v16479_v51, 0.0  ;;  %v8847_v28 = vadd.f32 -1.0, %v10477_v53  ;;  %v8393_v12 = vsel %vm8233_vm10, %v16477_v10, %v8845_v37  ;;  %8424 = vst [vmem:[%s16558_s26 + $0x90] sm:$0xff] %v8392_v54  ;;  %vm8235_vm12 = vcmp.gt.f32.partialorder %v16484_v41, 0.0 }
 0x977   : > { %v10481_v63 = vpop.eup %10480  ;;  %v8848_v5 = vadd.f32 -1.0, %v10479_v6  ;;  %v8394_v42 = vsel %vm8234_vm11, %v16479_v51, %v8846_v45  ;;  %8425 = vst [vmem:[%s16558_s26 + $0x98] sm:$0xff] %v8393_v12  ;;  %vm8236_vm13 = vcmp.gt.f32.partialorder %v16486_v50, 0.0  ;;  %vm8237_vm14 = vcmp.gt.f32.partialorder %v16488_v33, 0.0 }
 0x978   : > { %v10483_v24 = vpop.eup %10482  ;;  %v8849_v31 = vadd.f32 -1.0, %v10481_v63  ;;  %v8395_v30 = vsel %vm8235_vm12, %v16484_v41, %v8847_v28  ;;  %8426 = vst [vmem:[%s16558_s26 + $0xa0] sm:$0xff] %v8394_v42  ;;  %vm8238_vm15 = vcmp.gt.f32.partialorder %v16491_v55, 0.0  ;;  %vm8239_vm2 = vcmp.gt.f32.partialorder %v16493_v43, 0.0 }
 0x979   : > { %v10485_v48 = vpop.eup %10484  ;;  %v8850_v10 = vadd.f32 -1.0, %v10483_v24  ;;  %v8396_v15 = vsel %vm8236_vm13, %v16486_v50, %v8848_v5  ;;  %8427 = vst [vmem:[%s16558_s26 + $0xa8] sm:$0xff] %v8395_v30  ;;  %vm8240_vm3 = vcmp.gt.f32.partialorder %v16495_v57, 0.0  ;;  %vm8241_vm4 = vcmp.gt.f32.partialorder %v16498_v47, 0.0 }
 0x97a   : > { %v10487_v27 = vpop.eup %10486  ;;  %v8851_v51 = vadd.f32 -1.0, %v10485_v48  ;;  %v8397_v4 = vsel %vm8237_vm14, %v16488_v33, %v8849_v31  ;;  %8428 = vst [vmem:[%s16558_s26 + $0xb0] sm:$0xff] %v8396_v15  ;;  %vm8242_vm5 = vcmp.gt.f32.partialorder %v16500_v44, 0.0  ;;  %vm8243_vm6 = vcmp.gt.f32.partialorder %v16504_v22, 0.0 }
 0x97b   : > { %v10489_v41 = vpop.eup %10488  ;;  %v8852_v46 = vadd.f32 -1.0, %v10487_v27  ;;  %v8398_v8 = vsel %vm8238_vm15, %v16491_v55, %v8850_v10  ;;  %8429 = vst [vmem:[%s16558_s26 + $0xb8] sm:$0xff] %v8397_v4  ;;  %vm8244_vm7 = vcmp.gt.f32.partialorder %v16506_v1, 0.0  ;;  %vm8245_vm0 = vcmp.gt.f32.partialorder %v16508_v2, 0.0 }
 0x97c   : > { %v10491_v50 = vpop.eup %10490  ;;  %v8853_v38 = vadd.f32 -1.0, %v10489_v41  ;;  %v8399_v35 = vsel %vm8239_vm2, %v16493_v43, %v8851_v51  ;;  %8430 = vst [vmem:[%s16558_s26 + $0xc0] sm:$0xff] %v8398_v8 }
 0x97d   : > { %v10493_v33 = vpop.eup %10492  ;;  %v8854_v49 = vadd.f32 -1.0, %v10491_v50  ;;  %v8400_v14 = vsel %vm8240_vm3, %v16495_v57, %v8852_v46  ;;  %8431 = vst [vmem:[%s16558_s26 + $0xc8] sm:$0xff] %v8399_v35 }
 0x97e   : > { %v10495_v55 = vpop.eup %10494  ;;  %v8855_v7 = vadd.f32 -1.0, %v10493_v33  ;;  %v8401_v29 = vsel %vm8241_vm4, %v16498_v47, %v8853_v38  ;;  %8432 = vst [vmem:[%s16558_s26 + $0xd0] sm:$0xff] %v8400_v14 }
 0x97f   : > { %v10497_v43 = vpop.eup %10496  ;;  %v8856_v61 = vadd.f32 -1.0, %v10495_v55  ;;  %v8402_v57 = vsel %vm8242_vm5, %v16500_v44, %v8854_v49  ;;  %8433 = vst [vmem:[%s16558_s26 + $0xd8] sm:$0xff] %v8401_v29 }
 0x980   : > { %v8857_v18 = vadd.f32 -1.0, %v10497_v43  ;;  %v8403_v19 = vsel %vm8243_vm6, %v16504_v22, %v8855_v7  ;;  %8434 = vst [vmem:[%s16558_s26 + $0xe0] sm:$0xff] %v8402_v57 }
 0x981   : > { %v8404_v47 = vsel %vm8244_vm7, %v16506_v1, %v8856_v61  ;;  %8435 = vst [vmem:[%s16558_s26 + $0xe8] sm:$0xff] %v8403_v19 }
 0x982   : > { %v8405_v44 = vsel %vm8245_vm0, %v16508_v2, %v8857_v18  ;;  %8436 = vst [vmem:[%s16558_s26 + $0xf0] sm:$0xff] %v8404_v47 }
 0x983   : > { %8437 = vst [vmem:[%s16558_s26 + $0xf8] sm:$0xff] %v8405_v44 }
 0x984   : > { %10718 = shalt.err (!%p10715_p9)
}
 0x985   : > { %s10719_s21 = scalar_lea.hbm %s16692_s22, 4096  ;;  %s10723_s20 = scalar_lea.hbm %s16754_s8, 8192 }
 0x986   : > { %p10720_p2 = scmp.ne.s32.totalorder %s16692_s22, %s10719_s21  ;;  %p10724_p5 = scmp.lt.u32.totalorder %s16692_s22, %s16754_s8 }
 0x987   : > { %p10725_p10 = scmp.lt.u32.totalorder %s10723_s20, %s10719_s21  ;;  %p10727_p12 = scmp.lt.u32.totalorder %s10719_s21, %s16692_s22 }
 0x988   : > { %p10721_p0 = pnand %p10720_p2, %p17441_p7 }
 0x989   : > { %p10726_p4 = por %p10725_p10, %p10724_p5 }
 0x98a   : > { %p10722_p3 = pneg %p10721_p0 }
 0x98b   : > { %p10728_p8 = por %p10727_p12, %p10726_p4 }
 0x98d   : > { %p10729_p11 = pnand %p10728_p8, %p10722_p3 }
 0x98f   : > { %10732 = shalt.err (!%p10729_p11)
}
 0x990   : > { %s10794_s26 = smov 128  }
 0x991   : > { %10104 = dma.vmem_to_hbm [thread:$0]  (%p17441_p7), %s16697_s25, 4096, %s16692_s22, %s16704_s29, %s10794_s26, %s10794_s26, %s10784_s11  }
 0x992 PF: > { %s17442_s16 = sld [smem:[#allocation16_spill]]  ;;  %p10126_p13 = scmp.ge.s32.totalorder %s10775_s30, 2 }
 0x993   : > { %s8467_s9 = sand.u32 1, %s10763_s27  }
 0x994   : > { %s8468_s19 = scalar_lea.sflag [#allocation5], %s8467_s9 }
 0x998   : > { %p17443_p1 = scmp.ne.s32.totalorder %s17442_s16, 0 }
 0x99a   : > { %p10117_p6 = pnand %p10126_p13, %p17443_p1 }
 0x99c   : > { %10758 = dma.done.wait (!%p10117_p6), %s8468_s19, 4096  }
 0x99d   : > { %10760 = vsyncadd (!%p10117_p6), %s8468_s19, 4294963200  ;;  %s17444_s30 = sld [smem:[#allocation14_spill]]  ;;  %s17445_s10 = sld [smem:[#allocation13_spill]] }
 0x99e   : > { %s17446_s29 = sld [smem:[#allocation15_spill]]  ;;  %s17447_s27 = smov %s10767_s28 }
 0x9a3   : > { %p20_p9 = scmp.ge.s32.totalorder %s17444_s30, 4   ;;  %s17448_s28 = smov %s17445_s10 }
 0x9a5   :  { %22 = sbr.rel (!%p20_p9) target bundleno = 5 (0x5), region = 106 }
 0x9ac   :  { %8473 = vsyncpa [#allocation4], 1 }
 0x9ad   :  { %8475 = vsyncpa [#allocation4 + $0x1], 1 }
 0x9ae   :  { %8476 = vsyncpa [#allocation7], 1 }
 0x9af   :  { %8477 = vsyncpa [#allocation5], 1 }
 0x9b0   :  { %8479 = vsyncpa [#allocation5 + $0x1], 1 }

</bundles_post_ra>
